<compile_context>
chip_gen: v7x
topology: tpu7x:2x2x1
jax: 0.10.0
libtpu: 0.0.40
codegen_flags: <defaults>
</compile_context>

<pallas_src>
import functools

import jax
import jax.numpy as jnp
from jax.experimental import pallas as pl
from jax.experimental.pallas import tpu as pltpu


ROW_ALIGN = 16  # bf16 packs rows in sublane pairs -> keep row tiles %16 == 0


def _round_up(x, m):
    return ((x + m - 1) // m) * m


def _cdiv(a, b):
    return (a + b - 1) // b


def _tpu_budget():
    """(physical VMEM bytes per core, tensor-cores per chip) with safe fallbacks."""
    vmem_cap = 128 * 2**20
    try:
        info = pltpu.get_tpu_info()
        vmem_cap = int(getattr(info, "vmem_capacity_bytes", vmem_cap))
    except Exception:
        pass
    # Heuristic: 64 MiB-per-core VMEM => v7x-class chip with 2 TensorCores/chip.
    num_cores = 2 if vmem_cap <= 64 * 2**20 else 1
    return vmem_cap, num_cores


def _choose_tiling(B, F, num_layers, half, single_buffer_weights):
    """Balanced batch tiling + a per-generation VMEM limit."""
    vmem_cap, num_cores = _tpu_budget()

    # Per-row VMEM bytes for one grid step:
    #   double-buffered bf16 input + output tiles            -> 2*(2*F*2) = 8F
    #   f32 intermediates (x1,x2,y1/f,y2/g + bf16 cast temps) -> ~8*half*4 = 16F
    per_row = 2 * (2 * F * 2) + 8 * half * 4
    w_mult = 1 if single_buffer_weights else 2
    w_bytes = w_mult * 2 * num_layers * half * half * 2          # bf16 F & G weights

    budget = int(0.72 * vmem_cap)                                # headroom for compiler scratch
    tb_cap = max(ROW_ALIGN, ((budget - w_bytes) // per_row) // ROW_ALIGN * ROW_ALIGN)

    Bp0 = _round_up(max(B, 1), ROW_ALIGN)
    nt = _cdiv(Bp0, tb_cap)
    if num_cores >= 2 and Bp0 >= 2 * ROW_ALIGN:
        # v7x: >=2 grid steps, and an even count so neither TC idles on the tail.
        nt = max(nt, num_cores)
        nt = _round_up(nt, num_cores)
    tb = _round_up(_cdiv(Bp0, nt), ROW_ALIGN)
    Bp = nt * tb

    vmem_limit = min(int(0.90 * vmem_cap), tb * per_row + w_bytes + (4 << 20))
    vmem_limit = max(vmem_limit, 16 << 20)
    return tb, Bp, nt, int(vmem_limit)


# ---- Pallas kernel -----------------------------------------------------------
def revmlp_kernel(x_ref, wf_ref, wg_ref, o_ref, *, split_chains):
    # x_ref/o_ref: (TB, F) bf16; wf_ref/wg_ref: (L, half, half) bf16, (in, out) layout.
    tb = x_ref.shape[0]
    half = x_ref.shape[1] // 2
    num_layers = wf_ref.shape[0]

    # Optionally split the tile into two independent row sub-chains so one chain's
    # MXU matmul overlaps the other's f32 epilogue (helps v5e/v6e MXU bubbles).
    if split_chains:
        rows = (slice(0, tb // 2), slice(tb // 2, tb))
    else:
        rows = (slice(0, tb),)

    # Residual stream stays f32; bf16 only at HBM IO and at the MXU boundary.
    x1s = [x_ref[r, :half].astype(jnp.float32) for r in rows]
    x2s = [x_ref[r, half:].astype(jnp.float32) for r in rows]

    # num_layers is small & static -> unrolled Python loop.
    # TODO(synk): for large num_layers switch to lax.fori_loop(..., unroll=True)
    #             with dynamic wf_ref[n]/wg_ref[n] indexing to bound live ranges.
    for n in range(num_layers):
        wf_n = wf_ref[n]
        wg_n = wg_ref[n]

        fs = [jnp.dot(x2.astype(jnp.bfloat16), wf_n,
                      preferred_element_type=jnp.float32) for x2 in x2s]
        if n > 0:                       # layer 0: Identity; layers >= 1: ReLU
            fs = [jnp.maximum(f, 0.0) for f in fs]
        y1s = [x1 + f for x1, f in zip(x1s, fs)]

        gs = [jnp.dot(y1.astype(jnp.bfloat16), wg_n,
                      preferred_element_type=jnp.float32) for y1 in y1s]
        if n > 0:
            gs = [jnp.maximum(g, 0.0) for g in gs]
        y2s = [x2 + g for x2, g in zip(x2s, gs)]

        x1s, x2s = y1s, y2s

    # Lane-aligned, unmasked 128-lane-multiple stores; no concat needed.
    for r, x1, x2 in zip(rows, x1s, x2s):
        o_ref[r, :half] = x1.astype(o_ref.dtype)
        o_ref[r, half:] = x2.astype(o_ref.dtype)


# ---- wrapper -----------------------------------------------------------------
def revmlp_forward(x, wf, wg):
    """x: (B, ...) with trailing dims flattening to feature_dim.
    wf, wg: (num_layers, half, half) weights already transposed to (in, out),
    i.e. y = x @ W  (== x @ W_pt.T for PyTorch weights of shape (out, in)).
    NOTE: (in, out) vs (out, in) cannot be distinguished by shape here (square);
    passing untransposed PyTorch weights gives silently wrong results."""
    B = x.shape[0]
    x_flat = x.reshape(B, -1)
    F = x_flat.shape[1]
    half = F // 2
    assert F % 256 == 0, "feature_dim/2 must be a multiple of 128 lanes"
    num_layers = wf.shape[0]
    assert wf.shape == (num_layers, half, half)
    assert wg.shape == (num_layers, half, half)

    # bf16 activation IO + bf16 weights: halves HBM traffic (bandwidth-bound on
    # v6e/v7x at this arithmetic intensity). Accumulation stays f32 in-kernel.
    x_bf = x_flat.astype(jnp.bfloat16)
    wf_bf = wf.astype(jnp.bfloat16)
    wg_bf = wg.astype(jnp.bfloat16)

    def build_and_run(single_buffer_weights):
        tb, Bp, nt, vmem_limit = _choose_tiling(B, F, num_layers, half,
                                                single_buffer_weights)
        xin = x_bf if Bp == B else jnp.pad(x_bf, ((0, Bp - B), (0, 0)))

        kernel = functools.partial(revmlp_kernel, split_chains=(tb >= 32))

        w_spec_kwargs = ({"pipeline_mode": pl.Buffered(1)}
                         if single_buffer_weights else {})
        in_specs = [
            pl.BlockSpec((tb, F), lambda i: (i, 0)),
            # Constant index_map -> weights fetched once, VMEM-resident.
            pl.BlockSpec((num_layers, half, half), lambda i: (0, 0, 0),
                         **w_spec_kwargs),
            pl.BlockSpec((num_layers, half, half), lambda i: (0, 0, 0),
                         **w_spec_kwargs),
        ]

        call = pl.pallas_call(
            kernel,
            out_shape=jax.ShapeDtypeStruct((Bp, F), jnp.bfloat16),
            grid_spec=pltpu.PrefetchScalarGridSpec(
                num_scalar_prefetch=0,
                grid=(nt,),
                in_specs=in_specs,
                out_specs=pl.BlockSpec((tb, F), lambda i: (i, 0)),
            ),
            compiler_params=pltpu.CompilerParams(
                dimension_semantics=("parallel",),   # megacore-shardable batch axis
                vmem_limit_bytes=vmem_limit,
            ),
        )
        return call(xin, wf_bf, wg_bf)

    try:
        out = build_and_run(True)          # single-buffered weights (preferred)
    except Exception:
        out = build_and_run(False)         # fallback: default double-buffering
    return out[:B]


# ---- pure-JAX references (for correctness check) ------------------------------
def revmlp_ref_f32(x, wf, wg):
    """Full-f32 reference matching the PyTorch module semantics."""
    B = x.shape[0]
    h = x.reshape(B, -1).astype(jnp.float32)
    half = h.shape[1] // 2
    x1, x2 = h[:, :half], h[:, half:]
    for n in range(wf.shape[0]):
        f = jnp.dot(x2, wf[n], precision=jax.lax.Precision.HIGHEST)
        if n > 0:
            f = jnp.maximum(f, 0.0)
        y1 = x1 + f
        g = jnp.dot(y1, wg[n], precision=jax.lax.Precision.HIGHEST)
        if n > 0:
            g = jnp.maximum(g, 0.0)
        y2 = x2 + g
        x1, x2 = y1, y2
    return jnp.concatenate([x1, x2], axis=-1)


def revmlp_ref_bf16(x, wf, wg):
    """Reference that emulates the kernel's numerics exactly:
    bf16 input/weight/output IO, bf16 MXU operands, f32 accumulation & residuals."""
    B = x.shape[0]
    h = x.reshape(B, -1).astype(jnp.bfloat16).astype(jnp.float32)
    wf = wf.astype(jnp.bfloat16)
    wg = wg.astype(jnp.bfloat16)
    half = h.shape[1] // 2
    x1, x2 = h[:, :half], h[:, half:]
    for n in range(wf.shape[0]):
        f = jnp.dot(x2.astype(jnp.bfloat16), wf[n],
                    preferred_element_type=jnp.float32)
        if n > 0:
            f = jnp.maximum(f, 0.0)
        y1 = x1 + f
        g = jnp.dot(y1.astype(jnp.bfloat16), wg[n],
                    preferred_element_type=jnp.float32)
        if n > 0:
            g = jnp.maximum(g, 0.0)
        y2 = x2 + g
        x1, x2 = y1, y2
    return jnp.concatenate([x1, x2], axis=-1).astype(jnp.bfloat16)


# ---- driver ------------------------------------------------------------------
if __name__ == "__main__":
    key = jax.random.PRNGKey(0)
    k_x, k_wf, k_wg = jax.random.split(key, 3)

    NUM_LAYERS = 3
    GAIN = 1.0
    B, C, H, W = 2, 4, 16, 16                  # feature_dim = 1024, half = 512
    F = C * H * W
    HALF = F // 2

    x = jax.random.normal(k_x, (B, C, H, W), dtype=jnp.float32)

    # Deterministic synthetic weights (already transposed to (in, out)),
    # scaled like a gain-initialized linear layer.
    scale = GAIN / jnp.sqrt(jnp.float32(HALF))
    wf = jax.random.normal(k_wf, (NUM_LAYERS, HALF, HALF), dtype=jnp.float32) * scale
    wg = jax.random.normal(k_wg, (NUM_LAYERS, HALF, HALF), dtype=jnp.float32) * scale

    out = revmlp_forward(x, wf, wg)
    out = jax.block_until_ready(out)
    assert out.shape == (B, F)
    out_f32 = out.astype(jnp.float32)

    # (1) Tight check against a reference emulating the kernel's exact numerics
    #     (bf16 IO / MXU operands, f32 accumulation) -> validates structure.
    ref_bf16 = revmlp_ref_bf16(x, wf, wg).astype(jnp.float32)
    assert jnp.allclose(out_f32, ref_bf16, atol=1e-2, rtol=1e-2), \
        "mismatch vs bf16-emulating reference"

    # (2) Loose check against the full-f32 module semantics (bf16 drift only).
    #     NOTE: bf16 weights/activations compound error through the residual
    #     stream; for deep stacks or high gain keep weights f32 if fidelity matters.
    ref_f32 = revmlp_ref_f32(x, wf, wg)
    rel_err = jnp.linalg.norm(out_f32 - ref_f32) / jnp.linalg.norm(ref_f32)
    assert float(rel_err) < 3e-2, f"bf16 drift too large: {float(rel_err)}"

    print("KERNEL_OK")
</pallas_src>

<mosaic_0001>
module attributes {stable_mosaic.version = 11 : i64} {
  func.func @revmlp_kernel(%arg0: i32, %arg1: memref<16x1024xbf16, #tpu.memory_space<vmem>>, %arg2: memref<3x512x512xbf16, #tpu.memory_space<vmem>>, %arg3: memref<3x512x512xbf16, #tpu.memory_space<vmem>>, %arg4: memref<16x1024xbf16, #tpu.memory_space<vmem>>) attributes {dimension_semantics = [#tpu.dimension_semantics<parallel>], iteration_bounds = array<i64: 1>, scalar_prefetch = 0 : i64, scratch_operands = 0 : i64, tpu.core_type = #tpu.core_type<tc>, window_params = [{transform_indices = @transform_0, window_bounds = array<i64: 16, 1024>}, {pipeline_mode = #tpu.pipeline_mode<synchronous>, transform_indices = @transform_1, window_bounds = array<i64: 3, 512, 512>}, {pipeline_mode = #tpu.pipeline_mode<synchronous>, transform_indices = @transform_2, window_bounds = array<i64: 3, 512, 512>}, {transform_indices = @transform_3, window_bounds = array<i64: 16, 1024>}]} {
    %c0 = arith.constant 0 : index
    %c0_0 = arith.constant 0 : index
    %0 = vector.load %arg1[%c0, %c0_0] : memref<16x1024xbf16, #tpu.memory_space<vmem>>, vector<16x512xbf16>
    %1 = arith.extf %0 : vector<16x512xbf16> to vector<16x512xf32>
    %c0_1 = arith.constant 0 : index
    %c512 = arith.constant 512 : index
    %2 = vector.load %arg1[%c0_1, %c512] : memref<16x1024xbf16, #tpu.memory_space<vmem>>, vector<16x512xbf16>
    %3 = arith.extf %2 : vector<16x512xbf16> to vector<16x512xf32>
    %c0_2 = arith.constant 0 : index
    %c0_3 = arith.constant 0 : index
    %c0_4 = arith.constant 0 : index
    %4 = vector.load %arg2[%c0_2, %c0_3, %c0_4] : memref<3x512x512xbf16, #tpu.memory_space<vmem>>, vector<1x512x512xbf16>
    %5 = vector.shape_cast %4 : vector<1x512x512xbf16> to vector<512x512xbf16>
    %c0_5 = arith.constant 0 : index
    %c0_6 = arith.constant 0 : index
    %c0_7 = arith.constant 0 : index
    %6 = vector.load %arg3[%c0_5, %c0_6, %c0_7] : memref<3x512x512xbf16, #tpu.memory_space<vmem>>, vector<1x512x512xbf16>
    %7 = vector.shape_cast %6 : vector<1x512x512xbf16> to vector<512x512xbf16>
    %8 = arith.truncf %3 : vector<16x512xf32> to vector<16x512xbf16>
    %cst = arith.constant dense<0.000000e+00> : vector<16x512xf32>
    %9 = tpu.matmul %8, %5, %cst {dimension_numbers = #tpu.dot_dimension_numbers<[1], [0], [0], [1], [0, 0, 1, 1], [], []>} : vector<16x512xbf16>, vector<512x512xbf16>, vector<16x512xf32> -> vector<16x512xf32>
    %10 = arith.addf %1, %9 : vector<16x512xf32>
    %11 = arith.truncf %10 : vector<16x512xf32> to vector<16x512xbf16>
    %cst_8 = arith.constant dense<0.000000e+00> : vector<16x512xf32>
    %12 = tpu.matmul %11, %7, %cst_8 {dimension_numbers = #tpu.dot_dimension_numbers<[1], [0], [0], [1], [0, 0, 1, 1], [], []>} : vector<16x512xbf16>, vector<512x512xbf16>, vector<16x512xf32> -> vector<16x512xf32>
    %13 = arith.addf %3, %12 : vector<16x512xf32>
    %c1 = arith.constant 1 : index
    %c0_9 = arith.constant 0 : index
    %c0_10 = arith.constant 0 : index
    %14 = vector.load %arg2[%c1, %c0_9, %c0_10] : memref<3x512x512xbf16, #tpu.memory_space<vmem>>, vector<1x512x512xbf16>
    %15 = vector.shape_cast %14 : vector<1x512x512xbf16> to vector<512x512xbf16>
    %c1_11 = arith.constant 1 : index
    %c0_12 = arith.constant 0 : index
    %c0_13 = arith.constant 0 : index
    %16 = vector.load %arg3[%c1_11, %c0_12, %c0_13] : memref<3x512x512xbf16, #tpu.memory_space<vmem>>, vector<1x512x512xbf16>
    %17 = vector.shape_cast %16 : vector<1x512x512xbf16> to vector<512x512xbf16>
    %18 = arith.truncf %13 : vector<16x512xf32> to vector<16x512xbf16>
    %cst_14 = arith.constant dense<0.000000e+00> : vector<16x512xf32>
    %19 = tpu.matmul %18, %15, %cst_14 {dimension_numbers = #tpu.dot_dimension_numbers<[1], [0], [0], [1], [0, 0, 1, 1], [], []>} : vector<16x512xbf16>, vector<512x512xbf16>, vector<16x512xf32> -> vector<16x512xf32>
    %cst_15 = arith.constant 0.000000e+00 : f32
    %20 = vector.broadcast %cst_15 : f32 to vector<16x512xf32>
    %21 = arith.maximumf %19, %20 : vector<16x512xf32>
    %22 = arith.addf %10, %21 : vector<16x512xf32>
    %23 = arith.truncf %22 : vector<16x512xf32> to vector<16x512xbf16>
    %cst_16 = arith.constant dense<0.000000e+00> : vector<16x512xf32>
    %24 = tpu.matmul %23, %17, %cst_16 {dimension_numbers = #tpu.dot_dimension_numbers<[1], [0], [0], [1], [0, 0, 1, 1], [], []>} : vector<16x512xbf16>, vector<512x512xbf16>, vector<16x512xf32> -> vector<16x512xf32>
    %cst_17 = arith.constant 0.000000e+00 : f32
    %25 = vector.broadcast %cst_17 : f32 to vector<16x512xf32>
    %26 = arith.maximumf %24, %25 : vector<16x512xf32>
    %27 = arith.addf %13, %26 : vector<16x512xf32>
    %c2 = arith.constant 2 : index
    %c0_18 = arith.constant 0 : index
    %c0_19 = arith.constant 0 : index
    %28 = vector.load %arg2[%c2, %c0_18, %c0_19] : memref<3x512x512xbf16, #tpu.memory_space<vmem>>, vector<1x512x512xbf16>
    %29 = vector.shape_cast %28 : vector<1x512x512xbf16> to vector<512x512xbf16>
    %c2_20 = arith.constant 2 : index
    %c0_21 = arith.constant 0 : index
    %c0_22 = arith.constant 0 : index
    %30 = vector.load %arg3[%c2_20, %c0_21, %c0_22] : memref<3x512x512xbf16, #tpu.memory_space<vmem>>, vector<1x512x512xbf16>
    %31 = vector.shape_cast %30 : vector<1x512x512xbf16> to vector<512x512xbf16>
    %32 = arith.truncf %27 : vector<16x512xf32> to vector<16x512xbf16>
    %cst_23 = arith.constant dense<0.000000e+00> : vector<16x512xf32>
    %33 = tpu.matmul %32, %29, %cst_23 {dimension_numbers = #tpu.dot_dimension_numbers<[1], [0], [0], [1], [0, 0, 1, 1], [], []>} : vector<16x512xbf16>, vector<512x512xbf16>, vector<16x512xf32> -> vector<16x512xf32>
    %cst_24 = arith.constant 0.000000e+00 : f32
    %34 = vector.broadcast %cst_24 : f32 to vector<16x512xf32>
    %35 = arith.maximumf %33, %34 : vector<16x512xf32>
    %36 = arith.addf %22, %35 : vector<16x512xf32>
    %37 = arith.truncf %36 : vector<16x512xf32> to vector<16x512xbf16>
    %cst_25 = arith.constant dense<0.000000e+00> : vector<16x512xf32>
    %38 = tpu.matmul %37, %31, %cst_25 {dimension_numbers = #tpu.dot_dimension_numbers<[1], [0], [0], [1], [0, 0, 1, 1], [], []>} : vector<16x512xbf16>, vector<512x512xbf16>, vector<16x512xf32> -> vector<16x512xf32>
    %cst_26 = arith.constant 0.000000e+00 : f32
    %39 = vector.broadcast %cst_26 : f32 to vector<16x512xf32>
    %40 = arith.maximumf %38, %39 : vector<16x512xf32>
    %41 = arith.addf %27, %40 : vector<16x512xf32>
    %42 = arith.truncf %36 : vector<16x512xf32> to vector<16x512xbf16>
    %c0_27 = arith.constant 0 : index
    %c0_28 = arith.constant 0 : index
    %43 = vector.load %arg4[%c0_27, %c0_28] : memref<16x1024xbf16, #tpu.memory_space<vmem>>, vector<16x512xbf16>
    tpu.vector_store %arg4[%c0_27, %c0_28], %42 {strides = array<i32>} : memref<16x1024xbf16, #tpu.memory_space<vmem>>, vector<16x512xbf16>,
    %44 = arith.truncf %41 : vector<16x512xf32> to vector<16x512xbf16>
    %c0_29 = arith.constant 0 : index
    %c512_30 = arith.constant 512 : index
    %45 = vector.load %arg4[%c0_29, %c512_30] : memref<16x1024xbf16, #tpu.memory_space<vmem>>, vector<16x512xbf16>
    tpu.vector_store %arg4[%c0_29, %c512_30], %44 {strides = array<i32>} : memref<16x1024xbf16, #tpu.memory_space<vmem>>, vector<16x512xbf16>,
    return
  }
  func.func @transform_0(%arg0: i32) -> (i32, i32) {
    %c0_i32 = arith.constant 0 : i32
    %c0_i32_0 = arith.constant 0 : i32
    return %arg0, %c0_i32 : i32, i32
  }
  func.func @transform_1(%arg0: i32) -> (i32, i32, i32) {
    %c0_i32 = arith.constant 0 : i32
    %c0_i32_0 = arith.constant 0 : i32
    %c0_i32_1 = arith.constant 0 : i32
    %c0_i32_2 = arith.constant 0 : i32
    return %c0_i32, %c0_i32_0, %c0_i32_1 : i32, i32, i32
  }
  func.func @transform_2(%arg0: i32) -> (i32, i32, i32) {
    %c0_i32 = arith.constant 0 : i32
    %c0_i32_0 = arith.constant 0 : i32
    %c0_i32_1 = arith.constant 0 : i32
    %c0_i32_2 = arith.constant 0 : i32
    return %c0_i32, %c0_i32_0, %c0_i32_1 : i32, i32, i32
  }
  func.func @transform_3(%arg0: i32) -> (i32, i32) {
    %c0_i32 = arith.constant 0 : i32
    %c0_i32_0 = arith.constant 0 : i32
    return %arg0, %c0_i32 : i32, i32
  }
}

module attributes {stable_mosaic.version = 11 : i64} {
  func.func @revmlp_kernel(%arg0: i32, %arg1: memref<16x1024xbf16, #tpu.memory_space<vmem>>, %arg2: memref<3x512x512xbf16, #tpu.memory_space<vmem>>, %arg3: memref<3x512x512xbf16, #tpu.memory_space<vmem>>, %arg4: memref<16x1024xbf16, #tpu.memory_space<vmem>>) attributes {dimension_semantics = [#tpu.dimension_semantics<parallel>], iteration_bounds = array<i64: 1>, scalar_prefetch = 0 : i64, scratch_operands = 0 : i64, tpu.core_type = #tpu.core_type<tc>, window_params = [{transform_indices = @transform_0, window_bounds = array<i64: 16, 1024>}, {pipeline_mode = #tpu.pipeline_mode<synchronous>, transform_indices = @transform_1, window_bounds = array<i64: 3, 512, 512>}, {pipeline_mode = #tpu.pipeline_mode<synchronous>, transform_indices = @transform_2, window_bounds = array<i64: 3, 512, 512>}, {transform_indices = @transform_3, window_bounds = array<i64: 16, 1024>}]} {
    %c0 = arith.constant 0 : index
    %c0_0 = arith.constant 0 : index
    %0 = vector.load %arg1[%c0, %c0_0] : memref<16x1024xbf16, #tpu.memory_space<vmem>>, vector<16x512xbf16>
    %1 = arith.extf %0 : vector<16x512xbf16> to vector<16x512xf32>
    %c0_1 = arith.constant 0 : index
    %c512 = arith.constant 512 : index
    %2 = vector.load %arg1[%c0_1, %c512] : memref<16x1024xbf16, #tpu.memory_space<vmem>>, vector<16x512xbf16>
    %3 = arith.extf %2 : vector<16x512xbf16> to vector<16x512xf32>
    %c0_2 = arith.constant 0 : index
    %c0_3 = arith.constant 0 : index
    %c0_4 = arith.constant 0 : index
    %4 = vector.load %arg2[%c0_2, %c0_3, %c0_4] : memref<3x512x512xbf16, #tpu.memory_space<vmem>>, vector<1x512x512xbf16>
    %5 = vector.shape_cast %4 : vector<1x512x512xbf16> to vector<512x512xbf16>
    %c0_5 = arith.constant 0 : index
    %c0_6 = arith.constant 0 : index
    %c0_7 = arith.constant 0 : index
    %6 = vector.load %arg3[%c0_5, %c0_6, %c0_7] : memref<3x512x512xbf16, #tpu.memory_space<vmem>>, vector<1x512x512xbf16>
    %7 = vector.shape_cast %6 : vector<1x512x512xbf16> to vector<512x512xbf16>
    %8 = arith.truncf %3 : vector<16x512xf32> to vector<16x512xbf16>
    %cst = arith.constant dense<0.000000e+00> : vector<16x512xf32>
    %9 = tpu.matmul %8, %5, %cst {dimension_numbers = #tpu.dot_dimension_numbers<[1], [0], [0], [1], [0, 0, 1, 1], [], []>} : vector<16x512xbf16>, vector<512x512xbf16>, vector<16x512xf32> -> vector<16x512xf32>
    %10 = arith.addf %1, %9 : vector<16x512xf32>
    %11 = arith.truncf %10 : vector<16x512xf32> to vector<16x512xbf16>
    %cst_8 = arith.constant dense<0.000000e+00> : vector<16x512xf32>
    %12 = tpu.matmul %11, %7, %cst_8 {dimension_numbers = #tpu.dot_dimension_numbers<[1], [0], [0], [1], [0, 0, 1, 1], [], []>} : vector<16x512xbf16>, vector<512x512xbf16>, vector<16x512xf32> -> vector<16x512xf32>
    %13 = arith.addf %3, %12 : vector<16x512xf32>
    %c1 = arith.constant 1 : index
    %c0_9 = arith.constant 0 : index
    %c0_10 = arith.constant 0 : index
    %14 = vector.load %arg2[%c1, %c0_9, %c0_10] : memref<3x512x512xbf16, #tpu.memory_space<vmem>>, vector<1x512x512xbf16>
    %15 = vector.shape_cast %14 : vector<1x512x512xbf16> to vector<512x512xbf16>
    %c1_11 = arith.constant 1 : index
    %c0_12 = arith.constant 0 : index
    %c0_13 = arith.constant 0 : index
    %16 = vector.load %arg3[%c1_11, %c0_12, %c0_13] : memref<3x512x512xbf16, #tpu.memory_space<vmem>>, vector<1x512x512xbf16>
    %17 = vector.shape_cast %16 : vector<1x512x512xbf16> to vector<512x512xbf16>
    %18 = arith.truncf %13 : vector<16x512xf32> to vector<16x512xbf16>
    %cst_14 = arith.constant dense<0.000000e+00> : vector<16x512xf32>
    %19 = tpu.matmul %18, %15, %cst_14 {dimension_numbers = #tpu.dot_dimension_numbers<[1], [0], [0], [1], [0, 0, 1, 1], [], []>} : vector<16x512xbf16>, vector<512x512xbf16>, vector<16x512xf32> -> vector<16x512xf32>
    %cst_15 = arith.constant 0.000000e+00 : f32
    %20 = vector.broadcast %cst_15 : f32 to vector<16x512xf32>
    %21 = arith.maximumf %19, %20 : vector<16x512xf32>
    %22 = arith.addf %10, %21 : vector<16x512xf32>
    %23 = arith.truncf %22 : vector<16x512xf32> to vector<16x512xbf16>
    %cst_16 = arith.constant dense<0.000000e+00> : vector<16x512xf32>
    %24 = tpu.matmul %23, %17, %cst_16 {dimension_numbers = #tpu.dot_dimension_numbers<[1], [0], [0], [1], [0, 0, 1, 1], [], []>} : vector<16x512xbf16>, vector<512x512xbf16>, vector<16x512xf32> -> vector<16x512xf32>
    %cst_17 = arith.constant 0.000000e+00 : f32
    %25 = vector.broadcast %cst_17 : f32 to vector<16x512xf32>
    %26 = arith.maximumf %24, %25 : vector<16x512xf32>
    %27 = arith.addf %13, %26 : vector<16x512xf32>
    %c2 = arith.constant 2 : index
    %c0_18 = arith.constant 0 : index
    %c0_19 = arith.constant 0 : index
    %28 = vector.load %arg2[%c2, %c0_18, %c0_19] : memref<3x512x512xbf16, #tpu.memory_space<vmem>>, vector<1x512x512xbf16>
    %29 = vector.shape_cast %28 : vector<1x512x512xbf16> to vector<512x512xbf16>
    %c2_20 = arith.constant 2 : index
    %c0_21 = arith.constant 0 : index
    %c0_22 = arith.constant 0 : index
    %30 = vector.load %arg3[%c2_20, %c0_21, %c0_22] : memref<3x512x512xbf16, #tpu.memory_space<vmem>>, vector<1x512x512xbf16>
    %31 = vector.shape_cast %30 : vector<1x512x512xbf16> to vector<512x512xbf16>
    %32 = arith.truncf %27 : vector<16x512xf32> to vector<16x512xbf16>
    %cst_23 = arith.constant dense<0.000000e+00> : vector<16x512xf32>
    %33 = tpu.matmul %32, %29, %cst_23 {dimension_numbers = #tpu.dot_dimension_numbers<[1], [0], [0], [1], [0, 0, 1, 1], [], []>} : vector<16x512xbf16>, vector<512x512xbf16>, vector<16x512xf32> -> vector<16x512xf32>
    %cst_24 = arith.constant 0.000000e+00 : f32
    %34 = vector.broadcast %cst_24 : f32 to vector<16x512xf32>
    %35 = arith.maximumf %33, %34 : vector<16x512xf32>
    %36 = arith.addf %22, %35 : vector<16x512xf32>
    %37 = arith.truncf %36 : vector<16x512xf32> to vector<16x512xbf16>
    %cst_25 = arith.constant dense<0.000000e+00> : vector<16x512xf32>
    %38 = tpu.matmul %37, %31, %cst_25 {dimension_numbers = #tpu.dot_dimension_numbers<[1], [0], [0], [1], [0, 0, 1, 1], [], []>} : vector<16x512xbf16>, vector<512x512xbf16>, vector<16x512xf32> -> vector<16x512xf32>
    %cst_26 = arith.constant 0.000000e+00 : f32
    %39 = vector.broadcast %cst_26 : f32 to vector<16x512xf32>
    %40 = arith.maximumf %38, %39 : vector<16x512xf32>
    %41 = arith.addf %27, %40 : vector<16x512xf32>
    %42 = arith.truncf %36 : vector<16x512xf32> to vector<16x512xbf16>
    %c0_27 = arith.constant 0 : index
    %c0_28 = arith.constant 0 : index
    %43 = vector.load %arg4[%c0_27, %c0_28] : memref<16x1024xbf16, #tpu.memory_space<vmem>>, vector<16x512xbf16>
    tpu.vector_store %arg4[%c0_27, %c0_28], %42 {strides = array<i32>} : memref<16x1024xbf16, #tpu.memory_space<vmem>>, vector<16x512xbf16>,
    %44 = arith.truncf %41 : vector<16x512xf32> to vector<16x512xbf16>
    %c0_29 = arith.constant 0 : index
    %c512_30 = arith.constant 512 : index
    %45 = vector.load %arg4[%c0_29, %c512_30] : memref<16x1024xbf16, #tpu.memory_space<vmem>>, vector<16x512xbf16>
    tpu.vector_store %arg4[%c0_29, %c512_30], %44 {strides = array<i32>} : memref<16x1024xbf16, #tpu.memory_space<vmem>>, vector<16x512xbf16>,
    return
  }
  func.func @transform_0(%arg0: i32) -> (i32, i32) {
    %c0_i32 = arith.constant 0 : i32
    %c0_i32_0 = arith.constant 0 : i32
    return %arg0, %c0_i32 : i32, i32
  }
  func.func @transform_1(%arg0: i32) -> (i32, i32, i32) {
    %c0_i32 = arith.constant 0 : i32
    %c0_i32_0 = arith.constant 0 : i32
    %c0_i32_1 = arith.constant 0 : i32
    %c0_i32_2 = arith.constant 0 : i32
    return %c0_i32, %c0_i32_0, %c0_i32_1 : i32, i32, i32
  }
  func.func @transform_2(%arg0: i32) -> (i32, i32, i32) {
    %c0_i32 = arith.constant 0 : i32
    %c0_i32_0 = arith.constant 0 : i32
    %c0_i32_1 = arith.constant 0 : i32
    %c0_i32_2 = arith.constant 0 : i32
    return %c0_i32, %c0_i32_0, %c0_i32_1 : i32, i32, i32
  }
  func.func @transform_3(%arg0: i32) -> (i32, i32) {
    %c0_i32 = arith.constant 0 : i32
    %c0_i32_0 = arith.constant 0 : i32
    return %arg0, %c0_i32 : i32, i32
  }
}

</mosaic_0001>

<bundles_post_ra>
// kernel: tpu_custom_call.1
= control target key start
LH: loop header
LB: loop body
LE: loop exit
PB: predicated region body
PF: predicated region fallthrough
CT: control target
= control target key end

     0   :  { %8 = vsyncpa [#allocation3], 0  ;;  %s8276_s0 = inlined_call_operand.hbm [shape: bf16[16,1024], index: 0, kind: input, shape index: {}]   ;;  %s8277_s1 = inlined_call_operand.hbm [shape: bf16[3,512,512], index: 1, kind: input, shape index: {}]   ;;  %s8278_s2 = inlined_call_operand.hbm [shape: bf16[3,512,512], index: 2, kind: input, shape index: {}]   ;;  %s8279_s3 = inlined_call_operand.hbm [shape: bf16[16,1024], index: 3, kind: output, shape index: {}]  }
   0x1   :  { %9 = vsyncpa [#allocation6], 0 }
   0x2   :  { %10 = vsyncpa [#allocation4], 0  ;;  %s8008_s12 = smov [#allocation5]   ;;  %s7914_s16 = scalar_lea.hbm %s8277_s1, 49152 }
   0x3   :  { %s28_s13 = sshll.u32 %s8008_s12, 4  ;;  %p7915_p0 = scmp.ne.s32.totalorder %s8277_s1, %s7914_s16  ;;  %s29_s13 = int_to_ptr.vmem [resolvable:$true] %s28_s13 }
   0x4   :  { %p7918_p1 = scmp.lt.u32.totalorder %s7914_s16, %s8277_s1 }
   0x6   :  { %p7920_p2 = pnand %p7918_p1, %p7915_p0 }
   0x8   :  { %7923 = shalt.err (!%p7920_p2)
}
   0x9   :  { %s7924_s21 = scalar_lea.vmem %s29_s13, 49152  ;;  %p7929_p4 = scmp.lt.s32.totalorder %s29_s13, %s29_s13 }
   0xa   :  { %p7925_p3 = scmp.ne.s32.totalorder %s29_s13, %s7924_s21  ;;  %p7930_p5 = scmp.lt.s32.totalorder %s7924_s21, %s7924_s21 }
   0xc   :  { %p7931_p6 = por %p7930_p5, %p7929_p4 }
   0xe   :  { %p7932_p7 = pnand %p7931_p6, %p7925_p3 }
  0x10   :  { %7935 = shalt.err (!%p7932_p7)
}
  0x11   :  { %s8009_s22 = smov 256   ;;  %s8010_s23 = smov 16  }
  0x12   :  { %34 = dma.hbm_to_vmem [thread:$0]  %s8277_s1, 49152, %s29_s13, [#allocation6], %s8009_s22, %s8009_s22, %s8010_s23  }
  0x13   :  { %s8011_s26 = smov [#allocation2]   ;;  %s7936_s30 = scalar_lea.hbm %s8276_s0, 1024 }
  0x14   :  { %s16_s27 = sshll.u32 %s8011_s26, 4  ;;  %p7937_p8 = scmp.ne.s32.totalorder %s8276_s0, %s7936_s30  ;;  %s17_s27 = int_to_ptr.vmem [resolvable:$true] %s16_s27 }
  0x15   :  { %p7940_p9 = scmp.lt.u32.totalorder %s7936_s30, %s8276_s0 }
  0x17   :  { %p7942_p10 = pnand %p7940_p9, %p7937_p8 }
  0x19   :  { %7945 = shalt.err (!%p7942_p10)
}
  0x1a   :  { %s7946_s8 = scalar_lea.vmem %s17_s27, 1024  ;;  %p7951_p12 = scmp.lt.s32.totalorder %s17_s27, %s17_s27 }
  0x1b   :  { %p7947_p11 = scmp.ne.s32.totalorder %s17_s27, %s7946_s8  ;;  %p7952_p13 = scmp.lt.s32.totalorder %s7946_s8, %s7946_s8 }
  0x1d   :  { %p7953_p0 = por %p7952_p13, %p7951_p12 }
  0x1f   :  { %p7954_p1 = pnand %p7953_p0, %p7947_p11 }
  0x21   :  { %7957 = shalt.err (!%p7954_p1)
}
  0x22   :  { %s8012_s1 = smov 512   ;;  %s8013_s9 = smov 32  }
  0x23   :  { %22 = dma.hbm_to_vmem [thread:$0]  %s8276_s0, 1024, %s17_s27, [#allocation3], %s8012_s1, %s8012_s1, %s8013_s9  }
  0x24   :  { %s8014_s12 = smov [#allocation7]   ;;  %s7958_s16 = scalar_lea.hbm %s8278_s2, 49152 }
  0x25   :  { %s40_s13 = sshll.u32 %s8014_s12, 4  ;;  %p7959_p2 = scmp.ne.s32.totalorder %s8278_s2, %s7958_s16  ;;  %s41_s13 = int_to_ptr.vmem [resolvable:$true] %s40_s13 }
  0x26   :  { %p7962_p3 = scmp.lt.u32.totalorder %s7958_s16, %s8278_s2 }
  0x28   :  { %p7964_p4 = pnand %p7962_p3, %p7959_p2 }
  0x2a   :  { %7967 = shalt.err (!%p7964_p4)
}
  0x2b   :  { %s7968_s21 = scalar_lea.vmem %s41_s13, 49152  ;;  %p7973_p6 = scmp.lt.s32.totalorder %s41_s13, %s41_s13 }
  0x2c   :  { %p7969_p5 = scmp.ne.s32.totalorder %s41_s13, %s7968_s21  ;;  %p7974_p7 = scmp.lt.s32.totalorder %s7968_s21, %s7968_s21 }
  0x2e   :  { %p7975_p8 = por %p7974_p7, %p7973_p6 }
  0x30   :  { %p7976_p9 = pnand %p7975_p8, %p7969_p5 }
  0x32   :  { %7979 = shalt.err (!%p7976_p9)
}
  0x33   :  { %46 = dma.hbm_to_vmem [thread:$0]  %s8278_s2, 49152, %s41_s13, [#allocation6], %s8009_s22, %s8009_s22, %s8010_s23  }
  0x34   :  { %8002 = dma.done.wait [#allocation3], 1024  }
  0x35   :  { %8003 = vsyncadd [#allocation3], 4294966272 }
  0x36   :  { %8004 = dma.done.wait [#allocation6], 98304  }
  0x37   :  { %8005 = vsyncadd [#allocation6], 4294868992  ;;  %v6758_v0 = vld [vmem:[#allocation5 + $0x4] ss:$16 sps:$4 sm:$0xff]   ;;  %v6760_v1 = vld [vmem:[#allocation5 + $0xc] ss:$16 sps:$4 sm:$0xff]  }
  0x38   :  { %996 = vmatprep.subr.bf16.mxu0 %v6758_v0  ;;  %v6762_v2 = vld [vmem:[#allocation5] ss:$16 sps:$4 sm:$0xff]   ;;  %v6763_v3 = vld [vmem:[#allocation5 + $0x8] ss:$16 sps:$4 sm:$0xff]   ;;  %1082 = vmatprep.subr.bf16.mxu1 %v6760_v1  ;;  %v6764_v4 = vld [vmem:[#allocation5 + $0x24] ss:$16 sps:$4 sm:$0xff]  }
  0x39   :  { %997 = vmatpush1.bf16.msra.mxu0 %v6762_v2  ;;  %1083 = vmatpush1.bf16.msra.mxu1 %v6763_v3  ;;  %v6766_v5 = vld [vmem:[#allocation5 + $0x2c] ss:$16 sps:$4 sm:$0xff]   ;;  %v6768_v6 = vld [vmem:[#allocation5 + $0x20] ss:$16 sps:$4 sm:$0xff]   ;;  %v6769_v7 = vld [vmem:[#allocation5 + $0x28] ss:$16 sps:$4 sm:$0xff]  }
  0x3a   :  { %998 = vmatprep.subr.bf16.mxu0 %v6764_v4  ;;  %1084 = vmatprep.subr.bf16.mxu1 %v6766_v5  ;;  %v6770_v8 = vld [vmem:[#allocation5 + $0x44] ss:$16 sps:$4 sm:$0xff]   ;;  %v6772_v9 = vld [vmem:[#allocation5 + $0x4c] ss:$16 sps:$4 sm:$0xff]   ;;  %v6774_v10 = vld [vmem:[#allocation5 + $0x40] ss:$16 sps:$4 sm:$0xff]  }
  0x3b   :  { %v6775_v11 = vld [vmem:[#allocation5 + $0x48] ss:$16 sps:$4 sm:$0xff]   ;;  %v6776_v12 = vld [vmem:[#allocation5 + $0x64] ss:$16 sps:$4 sm:$0xff]   ;;  %v6778_v13 = vld [vmem:[#allocation5 + $0x6c] ss:$16 sps:$4 sm:$0xff]  }
  0x3c   :  { %v6780_v14 = vld [vmem:[#allocation5 + $0x60] ss:$16 sps:$4 sm:$0xff]   ;;  %v6781_v15 = vld [vmem:[#allocation5 + $0x68] ss:$16 sps:$4 sm:$0xff]   ;;  %v6782_v16 = vld [vmem:[#allocation5 + $0x84] ss:$16 sps:$4 sm:$0xff]  }
  0x3d   :  { %999 = vmatpush1.bf16.msra.mxu0 %v6768_v6  ;;  %1085 = vmatpush1.bf16.msra.mxu1 %v6769_v7  ;;  %v6784_v17 = vld [vmem:[#allocation5 + $0x8c] ss:$16 sps:$4 sm:$0xff]   ;;  %v6786_v18 = vld [vmem:[#allocation5 + $0x80] ss:$16 sps:$4 sm:$0xff]   ;;  %v6787_v19 = vld [vmem:[#allocation5 + $0x88] ss:$16 sps:$4 sm:$0xff]  }
  0x3e   :  { %1000 = vmatprep.subr.bf16.mxu0 %v6770_v8  ;;  %1086 = vmatprep.subr.bf16.mxu1 %v6772_v9  ;;  %v6788_v20 = vld [vmem:[#allocation5 + $0xa4] ss:$16 sps:$4 sm:$0xff]   ;;  %v6790_v21 = vld [vmem:[#allocation5 + $0xac] ss:$16 sps:$4 sm:$0xff]   ;;  %v6792_v22 = vld [vmem:[#allocation5 + $0xa0] ss:$16 sps:$4 sm:$0xff]  }
  0x3f   :  { %v6793_v23 = vld [vmem:[#allocation5 + $0xa8] ss:$16 sps:$4 sm:$0xff]   ;;  %v6794_v24 = vld [vmem:[#allocation5 + $0xc4] ss:$16 sps:$4 sm:$0xff]   ;;  %v6796_v25 = vld [vmem:[#allocation5 + $0xcc] ss:$16 sps:$4 sm:$0xff]  }
  0x40   :  { %v6798_v26 = vld [vmem:[#allocation5 + $0xc0] ss:$16 sps:$4 sm:$0xff]   ;;  %v6799_v27 = vld [vmem:[#allocation5 + $0xc8] ss:$16 sps:$4 sm:$0xff]   ;;  %v6800_v28 = vld [vmem:[#allocation5 + $0xe4] ss:$16 sps:$4 sm:$0xff]  }
  0x41   :  { %1001 = vmatpush1.bf16.msra.mxu0 %v6774_v10  ;;  %1087 = vmatpush1.bf16.msra.mxu1 %v6775_v11  ;;  %v6802_v29 = vld [vmem:[#allocation5 + $0xec] ss:$16 sps:$4 sm:$0xff]   ;;  %v6804_v30 = vld [vmem:[#allocation5 + $0xe0] ss:$16 sps:$4 sm:$0xff]   ;;  %v6805_v31 = vld [vmem:[#allocation5 + $0xe8] ss:$16 sps:$4 sm:$0xff]  }
  0x42   :  { %1002 = vmatprep.subr.bf16.mxu0 %v6776_v12  ;;  %1088 = vmatprep.subr.bf16.mxu1 %v6778_v13  ;;  %v6806_v32 = vld [vmem:[#allocation5 + $0x104] ss:$16 sps:$4 sm:$0xff]   ;;  %v6808_v33 = vld [vmem:[#allocation5 + $0x10c] ss:$16 sps:$4 sm:$0xff]   ;;  %v6810_v34 = vld [vmem:[#allocation5 + $0x100] ss:$16 sps:$4 sm:$0xff]  }
  0x43   :  { %v6811_v35 = vld [vmem:[#allocation5 + $0x108] ss:$16 sps:$4 sm:$0xff]   ;;  %v6812_v36 = vld [vmem:[#allocation5 + $0x124] ss:$16 sps:$4 sm:$0xff]   ;;  %v6814_v37 = vld [vmem:[#allocation5 + $0x12c] ss:$16 sps:$4 sm:$0xff]  }
  0x44   :  { %v6816_v38 = vld [vmem:[#allocation5 + $0x120] ss:$16 sps:$4 sm:$0xff]   ;;  %v6817_v39 = vld [vmem:[#allocation5 + $0x128] ss:$16 sps:$4 sm:$0xff]   ;;  %v6818_v40 = vld [vmem:[#allocation5 + $0x144] ss:$16 sps:$4 sm:$0xff]  }
  0x45   :  { %1003 = vmatpush1.bf16.msra.mxu0 %v6780_v14  ;;  %1089 = vmatpush1.bf16.msra.mxu1 %v6781_v15  ;;  %v6820_v41 = vld [vmem:[#allocation5 + $0x14c] ss:$16 sps:$4 sm:$0xff]   ;;  %v6822_v42 = vld [vmem:[#allocation5 + $0x140] ss:$16 sps:$4 sm:$0xff]   ;;  %v6823_v43 = vld [vmem:[#allocation5 + $0x148] ss:$16 sps:$4 sm:$0xff]  }
  0x46   :  { %1004 = vmatprep.subr.bf16.mxu0 %v6782_v16  ;;  %1090 = vmatprep.subr.bf16.mxu1 %v6784_v17  ;;  %v6824_v44 = vld [vmem:[#allocation5 + $0x164] ss:$16 sps:$4 sm:$0xff]   ;;  %v6826_v45 = vld [vmem:[#allocation5 + $0x16c] ss:$16 sps:$4 sm:$0xff]   ;;  %v6828_v48 = vld [vmem:[#allocation5 + $0x160] ss:$16 sps:$4 sm:$0xff]  }
  0x47   :  { %v68_v46 = vld [vmem:[#allocation2 + $0x10] sm:$0xff]  ;;  %v6829_v49 = vld [vmem:[#allocation5 + $0x168] ss:$16 sps:$4 sm:$0xff]   ;;  %v6832_v52 = vld [vmem:[#allocation5 + $0x18c] ss:$16 sps:$4 sm:$0xff]   ;;  %s8015_s2 = smov [#allocation8]  }
  0x48   :  { %v70_v47 = vld [vmem:[#allocation2 + $0x30] sm:$0xff]  ;;  %v6835_v54 = vld [vmem:[#allocation5 + $0x188] ss:$16 sps:$4 sm:$0xff]   ;;  %v6838_v56 = vld [vmem:[#allocation5 + $0x1ac] ss:$16 sps:$4 sm:$0xff]   ;;  %s5901_s22 = sshll.u32 %s8015_s2, 4  ;;  %s5902_s22 = int_to_ptr.vmem [resolvable:$true] %s5901_s22 }
  0x49   :  { %1005 = vmatpush1.bf16.msra.mxu0 %v6786_v18  ;;  %1091 = vmatpush1.bf16.msra.mxu1 %v6787_v19  ;;  %v5915_v50 = vcombine.high %v68_v46, %v70_v47  ;;  %v6830_v51 = vld [vmem:[#allocation5 + $0x184] ss:$16 sps:$4 sm:$0xff]   ;;  %v6834_v53 = vld [vmem:[#allocation5 + $0x180] ss:$16 sps:$4 sm:$0xff]   ;;  %v6841_v58 = vld [vmem:[#allocation5 + $0x1a8] ss:$16 sps:$4 sm:$0xff]   ;;  %v5914_v5 = vcombine.low %v68_v46, %v70_v47  ;;  %p7985_p11 = scmp.lt.s32.totalorder %s5902_s22, %s5902_s22 }
  0x4a   :  { %1006 = vmatprep.subr.bf16.mxu0 %v6788_v20  ;;  %1092 = vmatprep.subr.bf16.mxu1 %v6790_v21  ;;  %v6836_v55 = vld [vmem:[#allocation5 + $0x1a4] ss:$16 sps:$4 sm:$0xff]   ;;  %v6840_v57 = vld [vmem:[#allocation5 + $0x1a0] ss:$16 sps:$4 sm:$0xff]   ;;  %v6844_v60 = vld [vmem:[#allocation5 + $0x1cc] ss:$16 sps:$4 sm:$0xff]  }
  0x4b   :  { %1028 = vmatprep.mubr.bf16.mxu0 %v5915_v50  ;;  %1114 = vmatprep.mubr.bf16.mxu1 %v5915_v50  ;;  %v6842_v59 = vld [vmem:[#allocation5 + $0x1c4] ss:$16 sps:$4 sm:$0xff]   ;;  %v6846_v61 = vld [vmem:[#allocation5 + $0x1c0] ss:$16 sps:$4 sm:$0xff]   ;;  %v6847_v62 = vld [vmem:[#allocation5 + $0x1c8] ss:$16 sps:$4 sm:$0xff]  }
  0x4c   :  { %v6848_v63 = vld [vmem:[#allocation5 + $0x1e4] ss:$16 sps:$4 sm:$0xff]   ;;  %v6850_v0 = vld [vmem:[#allocation5 + $0x1ec] ss:$16 sps:$4 sm:$0xff]   ;;  %v6852_v1 = vld [vmem:[#allocation5 + $0x1e0] ss:$16 sps:$4 sm:$0xff]  }
  0x4d   :  { %1007 = vmatpush1.bf16.msra.mxu0 %v6792_v22  ;;  %1093 = vmatpush1.bf16.msra.mxu1 %v6793_v23  ;;  %v6853_v2 = vld [vmem:[#allocation5 + $0x1e8] ss:$16 sps:$4 sm:$0xff]   ;;  %v6856_v3 = vld [vmem:[#allocation5 + $0x204] ss:$16 sps:$4 sm:$0xff]   ;;  %v6859_v4 = vld [vmem:[#allocation5 + $0x20c] ss:$16 sps:$4 sm:$0xff]  }
  0x4e   :  { %1008 = vmatprep.subr.bf16.mxu0 %v6794_v24  ;;  %1094 = vmatprep.subr.bf16.mxu1 %v6796_v25  ;;  %v6854_v6 = vld [vmem:[#allocation5 + $0x200] ss:$16 sps:$4 sm:$0xff]   ;;  %v6857_v7 = vld [vmem:[#allocation5 + $0x208] ss:$16 sps:$4 sm:$0xff]   ;;  %v6862_v8 = vld [vmem:[#allocation5 + $0x224] ss:$16 sps:$4 sm:$0xff]  }
  0x4f   :  { %v6865_v9 = vld [vmem:[#allocation5 + $0x22c] ss:$16 sps:$4 sm:$0xff]   ;;  %v6860_v10 = vld [vmem:[#allocation5 + $0x220] ss:$16 sps:$4 sm:$0xff]   ;;  %v6863_v11 = vld [vmem:[#allocation5 + $0x228] ss:$16 sps:$4 sm:$0xff]  }
  0x50   :  { %v6868_v12 = vld [vmem:[#allocation5 + $0x244] ss:$16 sps:$4 sm:$0xff]   ;;  %v6871_v13 = vld [vmem:[#allocation5 + $0x24c] ss:$16 sps:$4 sm:$0xff]   ;;  %v6866_v14 = vld [vmem:[#allocation5 + $0x240] ss:$16 sps:$4 sm:$0xff]  }
  0x51   :  { %1009 = vmatpush1.bf16.msra.mxu0 %v6798_v26  ;;  %1095 = vmatpush1.bf16.msra.mxu1 %v6799_v27  ;;  %v6869_v15 = vld [vmem:[#allocation5 + $0x248] ss:$16 sps:$4 sm:$0xff]   ;;  %v6874_v16 = vld [vmem:[#allocation5 + $0x264] ss:$16 sps:$4 sm:$0xff]   ;;  %v6877_v17 = vld [vmem:[#allocation5 + $0x26c] ss:$16 sps:$4 sm:$0xff]  }
  0x52   :  { %1010 = vmatprep.subr.bf16.mxu0 %v6800_v28  ;;  %1096 = vmatprep.subr.bf16.mxu1 %v6802_v29  ;;  %v6872_v18 = vld [vmem:[#allocation5 + $0x260] ss:$16 sps:$4 sm:$0xff]   ;;  %v6875_v19 = vld [vmem:[#allocation5 + $0x268] ss:$16 sps:$4 sm:$0xff]   ;;  %v6880_v20 = vld [vmem:[#allocation5 + $0x284] ss:$16 sps:$4 sm:$0xff]  }
  0x53   :  { %v6883_v21 = vld [vmem:[#allocation5 + $0x28c] ss:$16 sps:$4 sm:$0xff]   ;;  %v6878_v22 = vld [vmem:[#allocation5 + $0x280] ss:$16 sps:$4 sm:$0xff]   ;;  %v6881_v23 = vld [vmem:[#allocation5 + $0x288] ss:$16 sps:$4 sm:$0xff]  }
  0x54   :  { %v6886_v24 = vld [vmem:[#allocation5 + $0x2a4] ss:$16 sps:$4 sm:$0xff]   ;;  %v6889_v25 = vld [vmem:[#allocation5 + $0x2ac] ss:$16 sps:$4 sm:$0xff]   ;;  %v6884_v26 = vld [vmem:[#allocation5 + $0x2a0] ss:$16 sps:$4 sm:$0xff]  }
  0x55   :  { %1011 = vmatpush1.bf16.msra.mxu0 %v6804_v30  ;;  %1097 = vmatpush1.bf16.msra.mxu1 %v6805_v31  ;;  %v6887_v27 = vld [vmem:[#allocation5 + $0x2a8] ss:$16 sps:$4 sm:$0xff]   ;;  %v6892_v28 = vld [vmem:[#allocation5 + $0x2c4] ss:$16 sps:$4 sm:$0xff]   ;;  %v6895_v29 = vld [vmem:[#allocation5 + $0x2cc] ss:$16 sps:$4 sm:$0xff]  }
  0x56   :  { %1012 = vmatprep.subr.bf16.mxu0 %v6806_v32  ;;  %1098 = vmatprep.subr.bf16.mxu1 %v6808_v33  ;;  %v8081_v30 = vld [vmem:[#allocation2 + $0x18] sm:$0xff]  ;;  %v6890_v32 = vld [vmem:[#allocation5 + $0x2c0] ss:$16 sps:$4 sm:$0xff]   ;;  %v6916_v47 = vld [vmem:[#allocation5 + $0x344] ss:$16 sps:$4 sm:$0xff]   ;;  %s7980_s23 = scalar_lea.vmem %s5902_s22, 1024 }
  0x57   :  { %v8083_v31 = vld [vmem:[#allocation2 + $0x38] sm:$0xff]  ;;  %p7981_p10 = scmp.ne.s32.totalorder %s5902_s22, %s7980_s23  ;;  %p7986_p12 = scmp.lt.s32.totalorder %s7980_s23, %s7980_s23 }
  0x58   :  { %v6893_v33 = vld [vmem:[#allocation5 + $0x2c8] ss:$16 sps:$4 sm:$0xff]  }
  0x59   :  { %1013 = vmatpush1.bf16.msra.mxu0 %v6810_v34  ;;  %1099 = vmatpush1.bf16.msra.mxu1 %v6811_v35  ;;  %v5917_v34 = vcombine.high %v8081_v30, %v8083_v31  ;;  %v6898_v35 = vld [vmem:[#allocation5 + $0x2e4] ss:$16 sps:$4 sm:$0xff]   ;;  %v6911_v46 = vld [vmem:[#allocation5 + $0x328] ss:$16 sps:$4 sm:$0xff]   ;;  %p7987_p13 = por %p7986_p12, %p7985_p11 }
  0x5a   :  { %1014 = vmatprep.subr.bf16.mxu0 %v6812_v36  ;;  %1100 = vmatprep.subr.bf16.mxu1 %v6814_v37  ;;  %v6901_v36 = vld [vmem:[#allocation5 + $0x2ec] ss:$16 sps:$4 sm:$0xff]   ;;  %v6896_v37 = vld [vmem:[#allocation5 + $0x2e0] ss:$16 sps:$4 sm:$0xff]   ;;  %v6917_v50 = vld [vmem:[#allocation5 + $0x348] ss:$16 sps:$4 sm:$0xff]  }
  0x5b   :  { %p7988_p0 = pnand %p7987_p13, %p7981_p10 }
  0x5d   :  { %1015 = vmatpush1.bf16.msra.mxu0 %v6816_v38  ;;  %1101 = vmatpush1.bf16.msra.mxu1 %v6817_v39  ;;  %v6899_v38 = vld [vmem:[#allocation5 + $0x2e8] ss:$16 sps:$4 sm:$0xff]   ;;  %v6904_v39 = vld [vmem:[#allocation5 + $0x304] ss:$16 sps:$4 sm:$0xff]  }
  0x5e   :  { %1016 = vmatprep.subr.bf16.mxu0 %v6818_v40  ;;  %1102 = vmatprep.subr.bf16.mxu1 %v6820_v41  ;;  %v6907_v40 = vld [vmem:[#allocation5 + $0x30c] ss:$16 sps:$4 sm:$0xff]   ;;  %v6902_v41 = vld [vmem:[#allocation5 + $0x300] ss:$16 sps:$4 sm:$0xff]  }
  0x61   :  { %1017 = vmatpush1.bf16.msra.mxu0 %v6822_v42  ;;  %1103 = vmatpush1.bf16.msra.mxu1 %v6823_v43  ;;  %v6905_v42 = vld [vmem:[#allocation5 + $0x308] ss:$16 sps:$4 sm:$0xff]   ;;  %v6910_v43 = vld [vmem:[#allocation5 + $0x324] ss:$16 sps:$4 sm:$0xff]  }
  0x62   :  { %1018 = vmatprep.subr.bf16.mxu0 %v6824_v44  ;;  %1104 = vmatprep.subr.bf16.mxu1 %v6826_v45  ;;  %v6913_v44 = vld [vmem:[#allocation5 + $0x32c] ss:$16 sps:$4 sm:$0xff]   ;;  %v6908_v45 = vld [vmem:[#allocation5 + $0x320] ss:$16 sps:$4 sm:$0xff]  }
  0x65   :  { %1019 = vmatpush1.bf16.msra.mxu0 %v6828_v48  ;;  %1105 = vmatpush1.bf16.msra.mxu1 %v6829_v49  ;;  %v6919_v48 = vld [vmem:[#allocation5 + $0x34c] ss:$16 sps:$4 sm:$0xff]   ;;  %v6914_v49 = vld [vmem:[#allocation5 + $0x340] ss:$16 sps:$4 sm:$0xff]  }
  0x66   :  { %1020 = vmatprep.subr.bf16.mxu0 %v6830_v51  ;;  %1106 = vmatprep.subr.bf16.mxu1 %v6832_v52  ;;  %v6922_v51 = vld [vmem:[#allocation5 + $0x364] ss:$16 sps:$4 sm:$0xff]   ;;  %v6925_v52 = vld [vmem:[#allocation5 + $0x36c] ss:$16 sps:$4 sm:$0xff]  }
  0x69   :  { %1021 = vmatpush1.bf16.msra.mxu0 %v6834_v53  ;;  %1107 = vmatpush1.bf16.msra.mxu1 %v6835_v54  ;;  %v6920_v53 = vld [vmem:[#allocation5 + $0x360] ss:$16 sps:$4 sm:$0xff]   ;;  %v6923_v54 = vld [vmem:[#allocation5 + $0x368] ss:$16 sps:$4 sm:$0xff]  }
  0x6a   :  { %1022 = vmatprep.subr.bf16.mxu0 %v6836_v55  ;;  %1108 = vmatprep.subr.bf16.mxu1 %v6838_v56  ;;  %v6928_v55 = vld [vmem:[#allocation5 + $0x384] ss:$16 sps:$4 sm:$0xff]   ;;  %v6931_v56 = vld [vmem:[#allocation5 + $0x38c] ss:$16 sps:$4 sm:$0xff]  }
  0x6d   :  { %1023 = vmatpush1.bf16.msra.mxu0 %v6840_v57  ;;  %1109 = vmatpush1.bf16.msra.mxu1 %v6841_v58  ;;  %v6926_v57 = vld [vmem:[#allocation5 + $0x380] ss:$16 sps:$4 sm:$0xff]   ;;  %v6929_v58 = vld [vmem:[#allocation5 + $0x388] ss:$16 sps:$4 sm:$0xff]  }
  0x6e   :  { %1024 = vmatprep.subr.bf16.mxu0 %v6842_v59  ;;  %1110 = vmatprep.subr.bf16.mxu1 %v6844_v60  ;;  %v6934_v59 = vld [vmem:[#allocation5 + $0x3a4] ss:$16 sps:$4 sm:$0xff]   ;;  %v6937_v60 = vld [vmem:[#allocation5 + $0x3ac] ss:$16 sps:$4 sm:$0xff]  }
  0x71   :  { %1025 = vmatpush1.bf16.msra.mxu0 %v6846_v61  ;;  %1111 = vmatpush1.bf16.msra.mxu1 %v6847_v62  ;;  %v6932_v61 = vld [vmem:[#allocation5 + $0x3a0] ss:$16 sps:$4 sm:$0xff]   ;;  %v6935_v62 = vld [vmem:[#allocation5 + $0x3a8] ss:$16 sps:$4 sm:$0xff]  }
  0x72   :  { %1026 = vmatprep.subr.bf16.mxu0 %v6848_v63  ;;  %1112 = vmatprep.subr.bf16.mxu1 %v6850_v0  ;;  %v6940_v63 = vld [vmem:[#allocation5 + $0x3c4] ss:$16 sps:$4 sm:$0xff]   ;;  %v6943_v0 = vld [vmem:[#allocation5 + $0x3cc] ss:$16 sps:$4 sm:$0xff]  }
  0x75   :  { %1027 = vmatpush1.bf16.msra.mxu0 %v6852_v1  ;;  %1113 = vmatpush1.bf16.msra.mxu1 %v6853_v2  ;;  %v6938_v1 = vld [vmem:[#allocation5 + $0x3c0] ss:$16 sps:$4 sm:$0xff]   ;;  %v6941_v2 = vld [vmem:[#allocation5 + $0x3c8] ss:$16 sps:$4 sm:$0xff]  }
  0x76   :  { %1039 = vmatprep.subr.bf16.mxu0 %v6856_v3  ;;  %1125 = vmatprep.subr.bf16.mxu1 %v6859_v4  ;;  %v6946_v3 = vld [vmem:[#allocation5 + $0x3e4] ss:$16 sps:$4 sm:$0xff]   ;;  %v6949_v4 = vld [vmem:[#allocation5 + $0x3ec] ss:$16 sps:$4 sm:$0xff]  }
  0x78   :  { %1029 = vmatmul.mubr.bf16.vlgmr.msra.gmra.mrb[0].mxu0 %v5914_v5  ;;  %1115 = vmatmul.mubr.bf16.vlgmr.msra.gmra.mrb[0].mxu1 %v5914_v5  ;;  %v6944_v5 = vld [vmem:[#allocation5 + $0x3e0] ss:$16 sps:$4 sm:$0xff]  }
  0x79   :  { %1040 = vmatpush1.bf16.msra.mxu0 %v6854_v6  ;;  %1126 = vmatpush1.bf16.msra.mxu1 %v6857_v7  ;;  %v6947_v6 = vld [vmem:[#allocation5 + $0x3e8] ss:$16 sps:$4 sm:$0xff]   ;;  %v6952_v7 = vld [vmem:[#allocation7 + $0x4] ss:$16 sps:$4 sm:$0xff]  }
  0x7a   :  { %1041 = vmatprep.subr.bf16.mxu0 %v6862_v8  ;;  %1127 = vmatprep.subr.bf16.mxu1 %v6865_v9  ;;  %v6955_v8 = vld [vmem:[#allocation7 + $0xc] ss:$16 sps:$4 sm:$0xff]   ;;  %v6950_v9 = vld [vmem:[#allocation7] ss:$16 sps:$4 sm:$0xff]  }
  0x7b   :  { %1071 = vmatprep.mubr.bf16.mxu0 %v5917_v34  ;;  %1157 = vmatprep.mubr.bf16.mxu1 %v5917_v34  ;;  %v6986_v34 = vld [vmem:[#allocation7 + $0xc0] ss:$16 sps:$4 sm:$0xff]  }
  0x7d   :  { %1042 = vmatpush1.bf16.msra.mxu0 %v6860_v10  ;;  %1128 = vmatpush1.bf16.msra.mxu1 %v6863_v11  ;;  %v6953_v10 = vld [vmem:[#allocation7 + $0x8] ss:$16 sps:$4 sm:$0xff]   ;;  %v5916_v11 = vcombine.low %v8081_v30, %v8083_v31  ;;  %v6980_v30 = vld [vmem:[#allocation7 + $0xa0] ss:$16 sps:$4 sm:$0xff]  }
  0x7e   :  { %1043 = vmatprep.subr.bf16.mxu0 %v6868_v12  ;;  %1129 = vmatprep.subr.bf16.mxu1 %v6871_v13  ;;  %v6958_v12 = vld [vmem:[#allocation7 + $0x24] ss:$16 sps:$4 sm:$0xff]   ;;  %v6961_v13 = vld [vmem:[#allocation7 + $0x2c] ss:$16 sps:$4 sm:$0xff]   ;;  %v6983_v31 = vld [vmem:[#allocation7 + $0xa8] ss:$16 sps:$4 sm:$0xff]  }
  0x81   :  { %1044 = vmatpush1.bf16.msra.mxu0 %v6866_v14  ;;  %1130 = vmatpush1.bf16.msra.mxu1 %v6869_v15  ;;  %v6956_v14 = vld [vmem:[#allocation7 + $0x20] ss:$16 sps:$4 sm:$0xff]   ;;  %v6959_v15 = vld [vmem:[#allocation7 + $0x28] ss:$16 sps:$4 sm:$0xff]  }
  0x82   :  { %1045 = vmatprep.subr.bf16.mxu0 %v6874_v16  ;;  %1131 = vmatprep.subr.bf16.mxu1 %v6877_v17  ;;  %v6964_v16 = vld [vmem:[#allocation7 + $0x44] ss:$16 sps:$4 sm:$0xff]   ;;  %v6967_v17 = vld [vmem:[#allocation7 + $0x4c] ss:$16 sps:$4 sm:$0xff]  }
  0x85   :  { %1046 = vmatpush1.bf16.msra.mxu0 %v6872_v18  ;;  %1132 = vmatpush1.bf16.msra.mxu1 %v6875_v19  ;;  %v6962_v18 = vld [vmem:[#allocation7 + $0x40] ss:$16 sps:$4 sm:$0xff]   ;;  %v6965_v19 = vld [vmem:[#allocation7 + $0x48] ss:$16 sps:$4 sm:$0xff]  }
  0x86   :  { %1047 = vmatprep.subr.bf16.mxu0 %v6880_v20  ;;  %1133 = vmatprep.subr.bf16.mxu1 %v6883_v21  ;;  %v6970_v20 = vld [vmem:[#allocation7 + $0x64] ss:$16 sps:$4 sm:$0xff]   ;;  %v6973_v21 = vld [vmem:[#allocation7 + $0x6c] ss:$16 sps:$4 sm:$0xff]  }
  0x89   :  { %1048 = vmatpush1.bf16.msra.mxu0 %v6878_v22  ;;  %1134 = vmatpush1.bf16.msra.mxu1 %v6881_v23  ;;  %v6968_v22 = vld [vmem:[#allocation7 + $0x60] ss:$16 sps:$4 sm:$0xff]   ;;  %v6971_v23 = vld [vmem:[#allocation7 + $0x68] ss:$16 sps:$4 sm:$0xff]  }
  0x8a   :  { %1049 = vmatprep.subr.bf16.mxu0 %v6886_v24  ;;  %1135 = vmatprep.subr.bf16.mxu1 %v6889_v25  ;;  %v6976_v24 = vld [vmem:[#allocation7 + $0x84] ss:$16 sps:$4 sm:$0xff]   ;;  %v6979_v25 = vld [vmem:[#allocation7 + $0x8c] ss:$16 sps:$4 sm:$0xff]  }
  0x8d   :  { %1050 = vmatpush1.bf16.msra.mxu0 %v6884_v26  ;;  %1136 = vmatpush1.bf16.msra.mxu1 %v6887_v27  ;;  %v6974_v26 = vld [vmem:[#allocation7 + $0x80] ss:$16 sps:$4 sm:$0xff]   ;;  %v6977_v27 = vld [vmem:[#allocation7 + $0x88] ss:$16 sps:$4 sm:$0xff]  }
  0x8e   :  { %1051 = vmatprep.subr.bf16.mxu0 %v6892_v28  ;;  %1137 = vmatprep.subr.bf16.mxu1 %v6895_v29  ;;  %v6982_v28 = vld [vmem:[#allocation7 + $0xa4] ss:$16 sps:$4 sm:$0xff]   ;;  %v6985_v29 = vld [vmem:[#allocation7 + $0xac] ss:$16 sps:$4 sm:$0xff]  }
  0x91   :  { %1052 = vmatpush1.bf16.msra.mxu0 %v6890_v32  ;;  %1138 = vmatpush1.bf16.msra.mxu1 %v6893_v33  ;;  %v6988_v32 = vld [vmem:[#allocation7 + $0xc4] ss:$16 sps:$4 sm:$0xff]   ;;  %v6991_v33 = vld [vmem:[#allocation7 + $0xcc] ss:$16 sps:$4 sm:$0xff]  }
  0x92   :  { %1053 = vmatprep.subr.bf16.mxu0 %v6898_v35  ;;  %1139 = vmatprep.subr.bf16.mxu1 %v6901_v36  ;;  %v6989_v35 = vld [vmem:[#allocation7 + $0xc8] ss:$16 sps:$4 sm:$0xff]   ;;  %v6994_v36 = vld [vmem:[#allocation7 + $0xe4] ss:$16 sps:$4 sm:$0xff]  }
  0x95   :  { %1054 = vmatpush1.bf16.msra.mxu0 %v6896_v37  ;;  %1140 = vmatpush1.bf16.msra.mxu1 %v6899_v38  ;;  %v6997_v37 = vld [vmem:[#allocation7 + $0xec] ss:$16 sps:$4 sm:$0xff]   ;;  %v6992_v38 = vld [vmem:[#allocation7 + $0xe0] ss:$16 sps:$4 sm:$0xff]  }
  0x96   :  { %1055 = vmatprep.subr.bf16.mxu0 %v6904_v39  ;;  %1141 = vmatprep.subr.bf16.mxu1 %v6907_v40  ;;  %v6995_v39 = vld [vmem:[#allocation7 + $0xe8] ss:$16 sps:$4 sm:$0xff]   ;;  %v7000_v40 = vld [vmem:[#allocation7 + $0x104] ss:$16 sps:$4 sm:$0xff]  }
  0x99   :  { %1056 = vmatpush1.bf16.msra.mxu0 %v6902_v41  ;;  %1142 = vmatpush1.bf16.msra.mxu1 %v6905_v42  ;;  %v7003_v41 = vld [vmem:[#allocation7 + $0x10c] ss:$16 sps:$4 sm:$0xff]   ;;  %v6998_v42 = vld [vmem:[#allocation7 + $0x100] ss:$16 sps:$4 sm:$0xff]  }
  0x9a   :  { %1057 = vmatprep.subr.bf16.mxu0 %v6910_v43  ;;  %1143 = vmatprep.subr.bf16.mxu1 %v6913_v44  ;;  %v7001_v43 = vld [vmem:[#allocation7 + $0x108] ss:$16 sps:$4 sm:$0xff]   ;;  %v7006_v44 = vld [vmem:[#allocation7 + $0x124] ss:$16 sps:$4 sm:$0xff]  }
  0x9d   :  { %1058 = vmatpush1.bf16.msra.mxu0 %v6908_v45  ;;  %1144 = vmatpush1.bf16.msra.mxu1 %v6911_v46  ;;  %v7009_v45 = vld [vmem:[#allocation7 + $0x12c] ss:$16 sps:$4 sm:$0xff]   ;;  %v7004_v46 = vld [vmem:[#allocation7 + $0x120] ss:$16 sps:$4 sm:$0xff]  }
  0x9e   :  { %1059 = vmatprep.subr.bf16.mxu0 %v6916_v47  ;;  %1145 = vmatprep.subr.bf16.mxu1 %v6919_v48  ;;  %v7007_v47 = vld [vmem:[#allocation7 + $0x128] ss:$16 sps:$4 sm:$0xff]   ;;  %v7012_v48 = vld [vmem:[#allocation7 + $0x144] ss:$16 sps:$4 sm:$0xff]  }
  0xa1   :  { %1060 = vmatpush1.bf16.msra.mxu0 %v6914_v49  ;;  %1146 = vmatpush1.bf16.msra.mxu1 %v6917_v50  ;;  %v7015_v49 = vld [vmem:[#allocation7 + $0x14c] ss:$16 sps:$4 sm:$0xff]   ;;  %v7010_v50 = vld [vmem:[#allocation7 + $0x140] ss:$16 sps:$4 sm:$0xff]  }
  0xa2   :  { %1061 = vmatprep.subr.bf16.mxu0 %v6922_v51  ;;  %1147 = vmatprep.subr.bf16.mxu1 %v6925_v52  ;;  %v7013_v51 = vld [vmem:[#allocation7 + $0x148] ss:$16 sps:$4 sm:$0xff]   ;;  %v7018_v52 = vld [vmem:[#allocation7 + $0x164] ss:$16 sps:$4 sm:$0xff]  }
  0xa5   :  { %1062 = vmatpush1.bf16.msra.mxu0 %v6920_v53  ;;  %1148 = vmatpush1.bf16.msra.mxu1 %v6923_v54  ;;  %v7021_v53 = vld [vmem:[#allocation7 + $0x16c] ss:$16 sps:$4 sm:$0xff]   ;;  %v7016_v54 = vld [vmem:[#allocation7 + $0x160] ss:$16 sps:$4 sm:$0xff]  }
  0xa6   :  { %1063 = vmatprep.subr.bf16.mxu0 %v6928_v55  ;;  %1149 = vmatprep.subr.bf16.mxu1 %v6931_v56  ;;  %v7019_v55 = vld [vmem:[#allocation7 + $0x168] ss:$16 sps:$4 sm:$0xff]   ;;  %v7024_v56 = vld [vmem:[#allocation7 + $0x184] ss:$16 sps:$4 sm:$0xff]  }
  0xa9   :  { %1064 = vmatpush1.bf16.msra.mxu0 %v6926_v57  ;;  %1150 = vmatpush1.bf16.msra.mxu1 %v6929_v58  ;;  %v7027_v57 = vld [vmem:[#allocation7 + $0x18c] ss:$16 sps:$4 sm:$0xff]   ;;  %v7022_v58 = vld [vmem:[#allocation7 + $0x180] ss:$16 sps:$4 sm:$0xff]  }
  0xaa   :  { %1065 = vmatprep.subr.bf16.mxu0 %v6934_v59  ;;  %1151 = vmatprep.subr.bf16.mxu1 %v6937_v60  ;;  %v7025_v59 = vld [vmem:[#allocation7 + $0x188] ss:$16 sps:$4 sm:$0xff]   ;;  %v7030_v60 = vld [vmem:[#allocation7 + $0x1a4] ss:$16 sps:$4 sm:$0xff]  }
  0xad   :  { %1066 = vmatpush1.bf16.msra.mxu0 %v6932_v61  ;;  %1152 = vmatpush1.bf16.msra.mxu1 %v6935_v62  ;;  %v7033_v61 = vld [vmem:[#allocation7 + $0x1ac] ss:$16 sps:$4 sm:$0xff]   ;;  %v7028_v62 = vld [vmem:[#allocation7 + $0x1a0] ss:$16 sps:$4 sm:$0xff]  }
  0xae   :  { %1067 = vmatprep.subr.bf16.mxu0 %v6940_v63  ;;  %1153 = vmatprep.subr.bf16.mxu1 %v6943_v0  ;;  %v7031_v63 = vld [vmem:[#allocation7 + $0x1a8] ss:$16 sps:$4 sm:$0xff]   ;;  %v7036_v0 = vld [vmem:[#allocation7 + $0x1c4] ss:$16 sps:$4 sm:$0xff]  }
  0xb1   :  { %1068 = vmatpush1.bf16.msra.mxu0 %v6938_v1  ;;  %1154 = vmatpush1.bf16.msra.mxu1 %v6941_v2  ;;  %v7039_v1 = vld [vmem:[#allocation7 + $0x1cc] ss:$16 sps:$4 sm:$0xff]   ;;  %v7034_v2 = vld [vmem:[#allocation7 + $0x1c0] ss:$16 sps:$4 sm:$0xff]  }
  0xb2   :  { %1069 = vmatprep.subr.bf16.mxu0 %v6946_v3  ;;  %1155 = vmatprep.subr.bf16.mxu1 %v6949_v4  ;;  %v7037_v3 = vld [vmem:[#allocation7 + $0x1c8] ss:$16 sps:$4 sm:$0xff]   ;;  %v7042_v4 = vld [vmem:[#allocation7 + $0x1e4] ss:$16 sps:$4 sm:$0xff]  }
  0xb5   :  { %1070 = vmatpush1.bf16.msra.mxu0 %v6944_v5  ;;  %1156 = vmatpush1.bf16.msra.mxu1 %v6947_v6  ;;  %v7045_v5 = vld [vmem:[#allocation7 + $0x1ec] ss:$16 sps:$4 sm:$0xff]   ;;  %v7040_v6 = vld [vmem:[#allocation7 + $0x1e0] ss:$16 sps:$4 sm:$0xff]  }
  0xb6   :  { %1820 = vmatprep.subr.bf16.mxu0 %v6952_v7  ;;  %1906 = vmatprep.subr.bf16.mxu1 %v6955_v8  ;;  %v7043_v7 = vld [vmem:[#allocation7 + $0x1e8] ss:$16 sps:$4 sm:$0xff]   ;;  %v7048_v8 = vld [vmem:[#allocation7 + $0x204] ss:$16 sps:$4 sm:$0xff]  }
  0xb8   :  { %1072 = vmatmul.mubr.bf16.vlgmr.msra.gmra.mrb[0].mxu0 %v5916_v11  ;;  %1158 = vmatmul.mubr.bf16.vlgmr.msra.gmra.mrb[0].mxu1 %v5916_v11  ;;  %v58_v11 = vld [vmem:[#allocation2 + $0x20] sm:$0xff] }
  0xb9   :  { %1821 = vmatpush1.bf16.msra.mxu0 %v6950_v9  ;;  %1907 = vmatpush1.bf16.msra.mxu1 %v6953_v10  ;;  %v7051_v9 = vld [vmem:[#allocation7 + $0x20c] ss:$16 sps:$4 sm:$0xff]   ;;  %v56_v10 = vld [vmem:[#allocation2] sm:$0xff] }
  0xba   :  { %1822 = vmatprep.subr.bf16.mxu0 %v6958_v12  ;;  %1908 = vmatprep.subr.bf16.mxu1 %v6961_v13  ;;  %v8089_v12 = vld [vmem:[#allocation2 + $0x28] sm:$0xff] }
  0xbb   :  { %v8091_v13 = vld [vmem:[#allocation2 + $0x8] sm:$0xff] }
  0xbd   :  { %1823 = vmatpush1.bf16.msra.mxu0 %v6956_v14  ;;  %1909 = vmatpush1.bf16.msra.mxu1 %v6959_v15  ;;  %v64_v14 = vunpack.c.l.bf16 %v58_v11 }
  0xbe   :  { %1824 = vmatprep.subr.bf16.mxu0 %v6964_v16  ;;  %1910 = vmatprep.subr.bf16.mxu1 %v6967_v17  ;;  %v61_v17 = vunpack.c.h.bf16 %v56_v10 }
  0xc1   :  { %1825 = vmatpush1.bf16.msra.mxu0 %v6962_v18  ;;  %1911 = vmatpush1.bf16.msra.mxu1 %v6965_v19  ;;  %v65_v18 = vunpack.c.h.bf16 %v58_v11  ;;  %v60_v19 = vunpack.c.l.bf16 %v56_v10  ;;  %v7103_v10 = vld [vmem:[#allocation7 + $0x328] ss:$16 sps:$4 sm:$0xff]   ;;  %v7108_v11 = vld [vmem:[#allocation7 + $0x344] ss:$16 sps:$4 sm:$0xff]  }
  0xc2   :  { %1826 = vmatprep.subr.bf16.mxu0 %v6970_v20  ;;  %1912 = vmatprep.subr.bf16.mxu1 %v6973_v21 }
  0xc5   :  { %1827 = vmatpush1.bf16.msra.mxu0 %v6968_v22  ;;  %1913 = vmatpush1.bf16.msra.mxu1 %v6971_v23  ;;  %v67_v22 = vunpack.c.h.bf16 %v8089_v12 }
  0xc6   :  { %1828 = vmatprep.subr.bf16.mxu0 %v6976_v24  ;;  %1914 = vmatprep.subr.bf16.mxu1 %v6979_v25  ;;  %v63_v25 = vunpack.c.h.bf16 %v8091_v13 }
  0xc9   :  { %1829 = vmatpush1.bf16.msra.mxu0 %v6974_v26  ;;  %1915 = vmatpush1.bf16.msra.mxu1 %v6977_v27 }
  0xca   :  { %1830 = vmatprep.subr.bf16.mxu0 %v6982_v28  ;;  %1916 = vmatprep.subr.bf16.mxu1 %v6985_v29 }
  0xcd   :  { %1831 = vmatpush1.bf16.msra.mxu0 %v6980_v30  ;;  %1917 = vmatpush1.bf16.msra.mxu1 %v6983_v31  ;;  %v7046_v31 = vld [vmem:[#allocation7 + $0x200] ss:$16 sps:$4 sm:$0xff]  }
  0xce   :  { %1832 = vmatprep.subr.bf16.mxu0 %v6988_v32  ;;  %1918 = vmatprep.subr.bf16.mxu1 %v6991_v33  ;;  %v7049_v32 = vld [vmem:[#allocation7 + $0x208] ss:$16 sps:$4 sm:$0xff]  }
  0xd1   :  { %1833 = vmatpush1.bf16.msra.mxu0 %v6986_v34  ;;  %1919 = vmatpush1.bf16.msra.mxu1 %v6989_v35 }
  0xd2   :  { %1834 = vmatprep.subr.bf16.mxu0 %v6994_v36  ;;  %1920 = vmatprep.subr.bf16.mxu1 %v6997_v37  ;;  %v7054_v36 = vld [vmem:[#allocation7 + $0x224] ss:$16 sps:$4 sm:$0xff]   ;;  %v7057_v37 = vld [vmem:[#allocation7 + $0x22c] ss:$16 sps:$4 sm:$0xff]  }
  0xd5   :  { %1835 = vmatpush1.bf16.msra.mxu0 %v6992_v38  ;;  %1921 = vmatpush1.bf16.msra.mxu1 %v6995_v39 }
  0xd6   :  { %1836 = vmatprep.subr.bf16.mxu0 %v7000_v40  ;;  %1922 = vmatprep.subr.bf16.mxu1 %v7003_v41  ;;  %v7052_v40 = vld [vmem:[#allocation7 + $0x220] ss:$16 sps:$4 sm:$0xff]   ;;  %v7055_v41 = vld [vmem:[#allocation7 + $0x228] ss:$16 sps:$4 sm:$0xff]  }
  0xd9   :  { %1837 = vmatpush1.bf16.msra.mxu0 %v6998_v42  ;;  %1923 = vmatpush1.bf16.msra.mxu1 %v7001_v43  ;;  %v7060_v43 = vld [vmem:[#allocation7 + $0x244] ss:$16 sps:$4 sm:$0xff]  }
  0xda   :  { %1838 = vmatprep.subr.bf16.mxu0 %v7006_v44  ;;  %1924 = vmatprep.subr.bf16.mxu1 %v7009_v45  ;;  %v7063_v44 = vld [vmem:[#allocation7 + $0x24c] ss:$16 sps:$4 sm:$0xff]   ;;  %v7058_v45 = vld [vmem:[#allocation7 + $0x240] ss:$16 sps:$4 sm:$0xff]  }
  0xdd   :  { %1839 = vmatpush1.bf16.msra.mxu0 %v7004_v46  ;;  %1925 = vmatpush1.bf16.msra.mxu1 %v7007_v47  ;;  %v7061_v46 = vld [vmem:[#allocation7 + $0x248] ss:$16 sps:$4 sm:$0xff]   ;;  %v7066_v47 = vld [vmem:[#allocation7 + $0x264] ss:$16 sps:$4 sm:$0xff]  }
  0xde   :  { %1840 = vmatprep.subr.bf16.mxu0 %v7012_v48  ;;  %1926 = vmatprep.subr.bf16.mxu1 %v7015_v49  ;;  %v7069_v48 = vld [vmem:[#allocation7 + $0x26c] ss:$16 sps:$4 sm:$0xff]   ;;  %v7064_v49 = vld [vmem:[#allocation7 + $0x260] ss:$16 sps:$4 sm:$0xff]  }
  0xe1   :  { %1841 = vmatpush1.bf16.msra.mxu0 %v7010_v50  ;;  %1927 = vmatpush1.bf16.msra.mxu1 %v7013_v51  ;;  %v7067_v50 = vld [vmem:[#allocation7 + $0x268] ss:$16 sps:$4 sm:$0xff]   ;;  %v7072_v51 = vld [vmem:[#allocation7 + $0x284] ss:$16 sps:$4 sm:$0xff]  }
  0xe2   :  { %1842 = vmatprep.subr.bf16.mxu0 %v7018_v52  ;;  %1928 = vmatprep.subr.bf16.mxu1 %v7021_v53  ;;  %v7075_v52 = vld [vmem:[#allocation7 + $0x28c] ss:$16 sps:$4 sm:$0xff]   ;;  %v7070_v53 = vld [vmem:[#allocation7 + $0x280] ss:$16 sps:$4 sm:$0xff]  }
  0xe5   :  { %1843 = vmatpush1.bf16.msra.mxu0 %v7016_v54  ;;  %1929 = vmatpush1.bf16.msra.mxu1 %v7019_v55  ;;  %v7073_v54 = vld [vmem:[#allocation7 + $0x288] ss:$16 sps:$4 sm:$0xff]   ;;  %v7078_v55 = vld [vmem:[#allocation7 + $0x2a4] ss:$16 sps:$4 sm:$0xff]  }
  0xe6   :  { %1844 = vmatprep.subr.bf16.mxu0 %v7024_v56  ;;  %1930 = vmatprep.subr.bf16.mxu1 %v7027_v57  ;;  %v7081_v56 = vld [vmem:[#allocation7 + $0x2ac] ss:$16 sps:$4 sm:$0xff]   ;;  %v7076_v57 = vld [vmem:[#allocation7 + $0x2a0] ss:$16 sps:$4 sm:$0xff]  }
  0xe9   :  { %1845 = vmatpush1.bf16.msra.mxu0 %v7022_v58  ;;  %1931 = vmatpush1.bf16.msra.mxu1 %v7025_v59  ;;  %v7079_v58 = vld [vmem:[#allocation7 + $0x2a8] ss:$16 sps:$4 sm:$0xff]   ;;  %v7084_v59 = vld [vmem:[#allocation7 + $0x2c4] ss:$16 sps:$4 sm:$0xff]  }
  0xea   :  { %1846 = vmatprep.subr.bf16.mxu0 %v7030_v60  ;;  %1932 = vmatprep.subr.bf16.mxu1 %v7033_v61  ;;  %v7087_v60 = vld [vmem:[#allocation7 + $0x2cc] ss:$16 sps:$4 sm:$0xff]   ;;  %v7082_v61 = vld [vmem:[#allocation7 + $0x2c0] ss:$16 sps:$4 sm:$0xff]  }
  0xed   :  { %1847 = vmatpush1.bf16.msra.mxu0 %v7028_v62  ;;  %1933 = vmatpush1.bf16.msra.mxu1 %v7031_v63  ;;  %v7085_v62 = vld [vmem:[#allocation7 + $0x2c8] ss:$16 sps:$4 sm:$0xff]   ;;  %v7090_v63 = vld [vmem:[#allocation7 + $0x2e4] ss:$16 sps:$4 sm:$0xff]  }
  0xee   :  { %1848 = vmatprep.subr.bf16.mxu0 %v7036_v0  ;;  %1934 = vmatprep.subr.bf16.mxu1 %v7039_v1  ;;  %v7093_v0 = vld [vmem:[#allocation7 + $0x2ec] ss:$16 sps:$4 sm:$0xff]   ;;  %v7088_v1 = vld [vmem:[#allocation7 + $0x2e0] ss:$16 sps:$4 sm:$0xff]  }
  0xf1   :  { %1849 = vmatpush1.bf16.msra.mxu0 %v7034_v2  ;;  %1935 = vmatpush1.bf16.msra.mxu1 %v7037_v3  ;;  %v7091_v2 = vld [vmem:[#allocation7 + $0x2e8] ss:$16 sps:$4 sm:$0xff]   ;;  %v7096_v3 = vld [vmem:[#allocation7 + $0x304] ss:$16 sps:$4 sm:$0xff]  }
  0xf2   :  { %1850 = vmatprep.subr.bf16.mxu0 %v7042_v4  ;;  %1936 = vmatprep.subr.bf16.mxu1 %v7045_v5  ;;  %v7099_v4 = vld [vmem:[#allocation7 + $0x30c] ss:$16 sps:$4 sm:$0xff]   ;;  %v7094_v5 = vld [vmem:[#allocation7 + $0x300] ss:$16 sps:$4 sm:$0xff]  }
  0xf5   :  { %1851 = vmatpush1.bf16.msra.mxu0 %v7040_v6  ;;  %1937 = vmatpush1.bf16.msra.mxu1 %v7043_v7  ;;  %v7097_v6 = vld [vmem:[#allocation7 + $0x308] ss:$16 sps:$4 sm:$0xff]   ;;  %v7102_v7 = vld [vmem:[#allocation7 + $0x324] ss:$16 sps:$4 sm:$0xff]  }
  0xf6   :  { %1863 = vmatprep.subr.bf16.mxu0 %v7048_v8  ;;  %1949 = vmatprep.subr.bf16.mxu1 %v7051_v9  ;;  %v7105_v8 = vld [vmem:[#allocation7 + $0x32c] ss:$16 sps:$4 sm:$0xff]   ;;  %v7100_v9 = vld [vmem:[#allocation7 + $0x320] ss:$16 sps:$4 sm:$0xff]  }
 0x18b   :  { %v1073_v15 = vpop.f32.mrb[0].mxu0  ;;  %v8093_v16 = vpop.f32.mrb[0].mxu1 }
 0x18c   :  { %v1075_v20 = vpop.f32.mrb[1].mxu0  ;;  %v1161_v21 = vpop.f32.mrb[1].mxu1  ;;  %v8105_v33 = vadd.f32 %v1073_v15, %v60_v19  ;;  %v7106_v15 = vld [vmem:[#allocation7 + $0x340] ss:$16 sps:$4 sm:$0xff]   ;;  %v7117_v19 = vld [vmem:[#allocation7 + $0x36c] ss:$16 sps:$4 sm:$0xff]  }
 0x18d   :  { %v1077_v23 = vpop.f32.mrb[2].mxu0  ;;  %v8096_v24 = vpop.f32.mrb[2].mxu1  ;;  %v8101_v29 = vadd.f32 %v1075_v20, %v61_v17  ;;  %v8111_v38 = vadd.f32 %v1161_v21, %v63_v25  ;;  %v7109_v17 = vld [vmem:[#allocation7 + $0x348] ss:$16 sps:$4 sm:$0xff]   ;;  %v7112_v20 = vld [vmem:[#allocation7 + $0x360] ss:$16 sps:$4 sm:$0xff]  }
 0x18e   :  { %v8099_v26 = vadd.f32 %v1077_v23, %v64_v14  ;;  %v1079_v27 = vpop.f32.mrb[3].mxu0  ;;  %v1165_v28 = vpop.f32.mrb[3].mxu1  ;;  %v7111_v14 = vld [vmem:[#allocation7 + $0x34c] ss:$16 sps:$4 sm:$0xff]   ;;  %v7115_v21 = vld [vmem:[#allocation7 + $0x368] ss:$16 sps:$4 sm:$0xff]  }
 0x18f   :  { %v8103_v30 = vadd.f32 %v1079_v27, %v65_v18  ;;  %v8107_v34 = vadd.f32 %v1165_v28, %v67_v22  ;;  %v7114_v18 = vld [vmem:[#allocation7 + $0x364] ss:$16 sps:$4 sm:$0xff]   ;;  %v7123_v23 = vld [vmem:[#allocation7 + $0x38c] ss:$16 sps:$4 sm:$0xff]   ;;  %v7118_v25 = vld [vmem:[#allocation7 + $0x380] ss:$16 sps:$4 sm:$0xff]  }
 0x190   :  { %v1176_v39 = vpack.c.bf16 %v8099_v26, %v8105_v33  ;;  %v7120_v22 = vld [vmem:[#allocation7 + $0x384] ss:$16 sps:$4 sm:$0xff]   ;;  %v7121_v27 = vld [vmem:[#allocation7 + $0x388] ss:$16 sps:$4 sm:$0xff]  }
 0x191   :  { %v1177_v35 = vpack.c.bf16 %v8103_v30, %v8101_v29  ;;  %v1179_v42 = vpack.c.bf16 %v8107_v34, %v8111_v38  ;;  %v7126_v28 = vld [vmem:[#allocation7 + $0x3a4] ss:$16 sps:$4 sm:$0xff]  }
 0x193   :  { %1852 = vmatprep.mubr.bf16.mxu0 %v1177_v35  ;;  %1938 = vmatprep.mubr.bf16.mxu1 %v1177_v35  ;;  %v7127_v35 = vld [vmem:[#allocation7 + $0x3a8] ss:$16 sps:$4 sm:$0xff]  }
 0x194   :  { %1853 = vmatmul.mubr.bf16.vlgmr.msra.gmra.mrb[4].mxu0 %v1176_v39  ;;  %1939 = vmatmul.mubr.bf16.vlgmr.msra.gmra.mrb[4].mxu1 %v1176_v39  ;;  %v7130_v39 = vld [vmem:[#allocation7 + $0x3c0] ss:$16 sps:$4 sm:$0xff]  }
 0x195   :  { %1864 = vmatpush1.bf16.msra.mxu0 %v7046_v31  ;;  %1950 = vmatpush1.bf16.msra.mxu1 %v7049_v32  ;;  %v7129_v31 = vld [vmem:[#allocation7 + $0x3ac] ss:$16 sps:$4 sm:$0xff]   ;;  %v7124_v32 = vld [vmem:[#allocation7 + $0x3a0] ss:$16 sps:$4 sm:$0xff]  }
 0x196   :  { %1895 = vmatprep.mubr.bf16.mxu0 %v1179_v42  ;;  %1981 = vmatprep.mubr.bf16.mxu1 %v1179_v42  ;;  %v7138_v42 = vld [vmem:[#allocation7 + $0x3e4] ss:$16 sps:$4 sm:$0xff]  }
 0x197   :  { %1865 = vmatprep.subr.bf16.mxu0 %v7054_v36  ;;  %1951 = vmatprep.subr.bf16.mxu1 %v7057_v37  ;;  %v7132_v36 = vld [vmem:[#allocation7 + $0x3c4] ss:$16 sps:$4 sm:$0xff]   ;;  %v7135_v37 = vld [vmem:[#allocation7 + $0x3cc] ss:$16 sps:$4 sm:$0xff]  }
 0x199   :  { %1866 = vmatpush1.bf16.msra.mxu0 %v7052_v40  ;;  %1952 = vmatpush1.bf16.msra.mxu1 %v7055_v41  ;;  %v7133_v40 = vld [vmem:[#allocation7 + $0x3c8] ss:$16 sps:$4 sm:$0xff]   ;;  %v66_v41 = vunpack.c.l.bf16 %v8089_v12  ;;  %v7142_v12 = vld [vmem:[#allocation5 + $0x400] ss:$16 sps:$4 sm:$0xff]  }
 0x19a   :  { %1867 = vmatprep.subr.bf16.mxu0 %v7060_v43  ;;  %1953 = vmatprep.subr.bf16.mxu1 %v7063_v44  ;;  %v7141_v43 = vld [vmem:[#allocation7 + $0x3ec] ss:$16 sps:$4 sm:$0xff]   ;;  %v62_v44 = vunpack.c.l.bf16 %v8091_v13 }
 0x19d   :  { %1868 = vmatpush1.bf16.msra.mxu0 %v7058_v45  ;;  %1954 = vmatpush1.bf16.msra.mxu1 %v7061_v46  ;;  %v7136_v45 = vld [vmem:[#allocation7 + $0x3e0] ss:$16 sps:$4 sm:$0xff]   ;;  %v7139_v46 = vld [vmem:[#allocation7 + $0x3e8] ss:$16 sps:$4 sm:$0xff]  }
 0x19e   :  { %1869 = vmatprep.subr.bf16.mxu0 %v7066_v47  ;;  %1955 = vmatprep.subr.bf16.mxu1 %v7069_v48  ;;  %v8120_v47 = vadd.f32 %v8096_v24, %v66_v41  ;;  %v7144_v48 = vld [vmem:[#allocation5 + $0x404] ss:$16 sps:$4 sm:$0xff]   ;;  %v7148_v24 = vld [vmem:[#allocation5 + $0x420] ss:$16 sps:$4 sm:$0xff]   ;;  %v7219_v41 = vld [vmem:[#allocation5 + $0x58c] ss:$16 sps:$4 sm:$0xff]  }
 0x1a1   :  { %1870 = vmatpush1.bf16.msra.mxu0 %v7064_v49  ;;  %1956 = vmatpush1.bf16.msra.mxu1 %v7067_v50  ;;  %v7147_v49 = vld [vmem:[#allocation5 + $0x40c] ss:$16 sps:$4 sm:$0xff]   ;;  %v8123_v50 = vadd.f32 %v8093_v16, %v62_v44  ;;  %v7156_v16 = vld [vmem:[#allocation5 + $0x444] ss:$16 sps:$4 sm:$0xff]  }
 0x1a2   :  { %1871 = vmatprep.subr.bf16.mxu0 %v7072_v51  ;;  %1957 = vmatprep.subr.bf16.mxu1 %v7075_v52  ;;  %v7145_v51 = vld [vmem:[#allocation5 + $0x408] ss:$16 sps:$4 sm:$0xff]   ;;  %v7150_v52 = vld [vmem:[#allocation5 + $0x424] ss:$16 sps:$4 sm:$0xff]  }
 0x1a3   :  { %v1178_v13 = vpack.c.bf16 %v8120_v47, %v8123_v50  ;;  %v7222_v44 = vld [vmem:[#allocation5 + $0x5a4] ss:$16 sps:$4 sm:$0xff]  }
 0x1a5   :  { %1872 = vmatpush1.bf16.msra.mxu0 %v7070_v53  ;;  %1958 = vmatpush1.bf16.msra.mxu1 %v7073_v54  ;;  %v7153_v53 = vld [vmem:[#allocation5 + $0x42c] ss:$16 sps:$4 sm:$0xff]   ;;  %v7151_v54 = vld [vmem:[#allocation5 + $0x428] ss:$16 sps:$4 sm:$0xff]  }
 0x1a6   :  { %1873 = vmatprep.subr.bf16.mxu0 %v7078_v55  ;;  %1959 = vmatprep.subr.bf16.mxu1 %v7081_v56  ;;  %v7159_v55 = vld [vmem:[#allocation5 + $0x44c] ss:$16 sps:$4 sm:$0xff]   ;;  %v7154_v56 = vld [vmem:[#allocation5 + $0x440] ss:$16 sps:$4 sm:$0xff]  }
 0x1a9   :  { %1874 = vmatpush1.bf16.msra.mxu0 %v7076_v57  ;;  %1960 = vmatpush1.bf16.msra.mxu1 %v7079_v58  ;;  %v7157_v57 = vld [vmem:[#allocation5 + $0x448] ss:$16 sps:$4 sm:$0xff]   ;;  %v7162_v58 = vld [vmem:[#allocation5 + $0x464] ss:$16 sps:$4 sm:$0xff]  }
 0x1aa   :  { %1875 = vmatprep.subr.bf16.mxu0 %v7084_v59  ;;  %1961 = vmatprep.subr.bf16.mxu1 %v7087_v60  ;;  %v7165_v59 = vld [vmem:[#allocation5 + $0x46c] ss:$16 sps:$4 sm:$0xff]   ;;  %v7160_v60 = vld [vmem:[#allocation5 + $0x460] ss:$16 sps:$4 sm:$0xff]  }
 0x1ad   :  { %1876 = vmatpush1.bf16.msra.mxu0 %v7082_v61  ;;  %1962 = vmatpush1.bf16.msra.mxu1 %v7085_v62  ;;  %v7163_v61 = vld [vmem:[#allocation5 + $0x468] ss:$16 sps:$4 sm:$0xff]   ;;  %v7168_v62 = vld [vmem:[#allocation5 + $0x484] ss:$16 sps:$4 sm:$0xff]  }
 0x1ae   :  { %1877 = vmatprep.subr.bf16.mxu0 %v7090_v63  ;;  %1963 = vmatprep.subr.bf16.mxu1 %v7093_v0  ;;  %v7171_v63 = vld [vmem:[#allocation5 + $0x48c] ss:$16 sps:$4 sm:$0xff]   ;;  %v7166_v0 = vld [vmem:[#allocation5 + $0x480] ss:$16 sps:$4 sm:$0xff]  }
 0x1b1   :  { %1878 = vmatpush1.bf16.msra.mxu0 %v7088_v1  ;;  %1964 = vmatpush1.bf16.msra.mxu1 %v7091_v2  ;;  %v7169_v1 = vld [vmem:[#allocation5 + $0x488] ss:$16 sps:$4 sm:$0xff]   ;;  %v7174_v2 = vld [vmem:[#allocation5 + $0x4a4] ss:$16 sps:$4 sm:$0xff]  }
 0x1b2   :  { %1879 = vmatprep.subr.bf16.mxu0 %v7096_v3  ;;  %1965 = vmatprep.subr.bf16.mxu1 %v7099_v4  ;;  %v7177_v3 = vld [vmem:[#allocation5 + $0x4ac] ss:$16 sps:$4 sm:$0xff]   ;;  %v7172_v4 = vld [vmem:[#allocation5 + $0x4a0] ss:$16 sps:$4 sm:$0xff]  }
 0x1b5   :  { %1880 = vmatpush1.bf16.msra.mxu0 %v7094_v5  ;;  %1966 = vmatpush1.bf16.msra.mxu1 %v7097_v6  ;;  %v7175_v5 = vld [vmem:[#allocation5 + $0x4a8] ss:$16 sps:$4 sm:$0xff]   ;;  %v7180_v6 = vld [vmem:[#allocation5 + $0x4c4] ss:$16 sps:$4 sm:$0xff]  }
 0x1b6   :  { %1881 = vmatprep.subr.bf16.mxu0 %v7102_v7  ;;  %1967 = vmatprep.subr.bf16.mxu1 %v7105_v8  ;;  %v7183_v7 = vld [vmem:[#allocation5 + $0x4cc] ss:$16 sps:$4 sm:$0xff]   ;;  %v7178_v8 = vld [vmem:[#allocation5 + $0x4c0] ss:$16 sps:$4 sm:$0xff]  }
 0x1b9   :  { %1882 = vmatpush1.bf16.msra.mxu0 %v7100_v9  ;;  %1968 = vmatpush1.bf16.msra.mxu1 %v7103_v10  ;;  %v7181_v9 = vld [vmem:[#allocation5 + $0x4c8] ss:$16 sps:$4 sm:$0xff]   ;;  %v7186_v10 = vld [vmem:[#allocation5 + $0x4e4] ss:$16 sps:$4 sm:$0xff]  }
 0x1ba   :  { %1883 = vmatprep.subr.bf16.mxu0 %v7108_v11  ;;  %1969 = vmatprep.subr.bf16.mxu1 %v7111_v14  ;;  %v7189_v11 = vld [vmem:[#allocation5 + $0x4ec] ss:$16 sps:$4 sm:$0xff]   ;;  %v7184_v14 = vld [vmem:[#allocation5 + $0x4e0] ss:$16 sps:$4 sm:$0xff]  }
 0x1bd   :  { %1884 = vmatpush1.bf16.msra.mxu0 %v7106_v15  ;;  %1970 = vmatpush1.bf16.msra.mxu1 %v7109_v17  ;;  %v7187_v15 = vld [vmem:[#allocation5 + $0x4e8] ss:$16 sps:$4 sm:$0xff]   ;;  %v7192_v17 = vld [vmem:[#allocation5 + $0x504] ss:$16 sps:$4 sm:$0xff]  }
 0x1be   :  { %1885 = vmatprep.subr.bf16.mxu0 %v7114_v18  ;;  %1971 = vmatprep.subr.bf16.mxu1 %v7117_v19  ;;  %v7195_v18 = vld [vmem:[#allocation5 + $0x50c] ss:$16 sps:$4 sm:$0xff]   ;;  %v7190_v19 = vld [vmem:[#allocation5 + $0x500] ss:$16 sps:$4 sm:$0xff]  }
 0x1c1   :  { %1886 = vmatpush1.bf16.msra.mxu0 %v7112_v20  ;;  %1972 = vmatpush1.bf16.msra.mxu1 %v7115_v21  ;;  %v7193_v20 = vld [vmem:[#allocation5 + $0x508] ss:$16 sps:$4 sm:$0xff]   ;;  %v7198_v21 = vld [vmem:[#allocation5 + $0x524] ss:$16 sps:$4 sm:$0xff]  }
 0x1c2   :  { %1887 = vmatprep.subr.bf16.mxu0 %v7120_v22  ;;  %1973 = vmatprep.subr.bf16.mxu1 %v7123_v23  ;;  %v7201_v22 = vld [vmem:[#allocation5 + $0x52c] ss:$16 sps:$4 sm:$0xff]   ;;  %v7196_v23 = vld [vmem:[#allocation5 + $0x520] ss:$16 sps:$4 sm:$0xff]  }
 0x1c5   :  { %1888 = vmatpush1.bf16.msra.mxu0 %v7118_v25  ;;  %1974 = vmatpush1.bf16.msra.mxu1 %v7121_v27  ;;  %v7199_v25 = vld [vmem:[#allocation5 + $0x528] ss:$16 sps:$4 sm:$0xff]   ;;  %v7204_v27 = vld [vmem:[#allocation5 + $0x544] ss:$16 sps:$4 sm:$0xff]  }
 0x1c6   :  { %1889 = vmatprep.subr.bf16.mxu0 %v7126_v28  ;;  %1975 = vmatprep.subr.bf16.mxu1 %v7129_v31  ;;  %v7207_v28 = vld [vmem:[#allocation5 + $0x54c] ss:$16 sps:$4 sm:$0xff]   ;;  %v7202_v31 = vld [vmem:[#allocation5 + $0x540] ss:$16 sps:$4 sm:$0xff]  }
 0x1c9   :  { %1890 = vmatpush1.bf16.msra.mxu0 %v7124_v32  ;;  %1976 = vmatpush1.bf16.msra.mxu1 %v7127_v35  ;;  %v7205_v32 = vld [vmem:[#allocation5 + $0x548] ss:$16 sps:$4 sm:$0xff]   ;;  %v7210_v35 = vld [vmem:[#allocation5 + $0x564] ss:$16 sps:$4 sm:$0xff]  }
 0x1ca   :  { %1891 = vmatprep.subr.bf16.mxu0 %v7132_v36  ;;  %1977 = vmatprep.subr.bf16.mxu1 %v7135_v37  ;;  %v7213_v36 = vld [vmem:[#allocation5 + $0x56c] ss:$16 sps:$4 sm:$0xff]   ;;  %v7208_v37 = vld [vmem:[#allocation5 + $0x560] ss:$16 sps:$4 sm:$0xff]  }
 0x1cd   :  { %1892 = vmatpush1.bf16.msra.mxu0 %v7130_v39  ;;  %1978 = vmatpush1.bf16.msra.mxu1 %v7133_v40  ;;  %v7211_v39 = vld [vmem:[#allocation5 + $0x568] ss:$16 sps:$4 sm:$0xff]   ;;  %v7216_v40 = vld [vmem:[#allocation5 + $0x584] ss:$16 sps:$4 sm:$0xff]  }
 0x1ce   :  { %1893 = vmatprep.subr.bf16.mxu0 %v7138_v42  ;;  %1979 = vmatprep.subr.bf16.mxu1 %v7141_v43  ;;  %v7214_v42 = vld [vmem:[#allocation5 + $0x580] ss:$16 sps:$4 sm:$0xff]   ;;  %v7217_v43 = vld [vmem:[#allocation5 + $0x588] ss:$16 sps:$4 sm:$0xff]  }
 0x1d1   :  { %1894 = vmatpush1.bf16.msra.mxu0 %v7136_v45  ;;  %1980 = vmatpush1.bf16.msra.mxu1 %v7139_v46  ;;  %v7225_v45 = vld [vmem:[#allocation5 + $0x5ac] ss:$16 sps:$4 sm:$0xff]   ;;  %v7220_v46 = vld [vmem:[#allocation5 + $0x5a0] ss:$16 sps:$4 sm:$0xff]  }
 0x1d2   :  { %2902 = vmatprep.subr.bf16.mxu0 %v7144_v48  ;;  %2988 = vmatprep.subr.bf16.mxu1 %v7147_v49  ;;  %v7223_v48 = vld [vmem:[#allocation5 + $0x5a8] ss:$16 sps:$4 sm:$0xff]   ;;  %v7228_v49 = vld [vmem:[#allocation5 + $0x5c4] ss:$16 sps:$4 sm:$0xff]  }
 0x1d4   :  { %1896 = vmatmul.mubr.bf16.vlgmr.msra.gmra.mrb[4].mxu0 %v1178_v13  ;;  %1982 = vmatmul.mubr.bf16.vlgmr.msra.gmra.mrb[4].mxu1 %v1178_v13  ;;  %v7229_v13 = vld [vmem:[#allocation5 + $0x5c8] ss:$16 sps:$4 sm:$0xff]  }
 0x1d5   :  { %2903 = vmatpush1.bf16.msra.mxu0 %v7142_v12  ;;  %2989 = vmatpush1.bf16.msra.mxu1 %v7145_v51  ;;  %v7231_v12 = vld [vmem:[#allocation5 + $0x5cc] ss:$16 sps:$4 sm:$0xff]   ;;  %v7226_v51 = vld [vmem:[#allocation5 + $0x5c0] ss:$16 sps:$4 sm:$0xff]  }
 0x1d6   :  { %2904 = vmatprep.subr.bf16.mxu0 %v7150_v52  ;;  %2990 = vmatprep.subr.bf16.mxu1 %v7153_v53  ;;  %v7234_v52 = vld [vmem:[#allocation5 + $0x5e4] ss:$16 sps:$4 sm:$0xff]   ;;  %v7237_v53 = vld [vmem:[#allocation5 + $0x5ec] ss:$16 sps:$4 sm:$0xff]  }
 0x1d9   :  { %2905 = vmatpush1.bf16.msra.mxu0 %v7148_v24  ;;  %2991 = vmatpush1.bf16.msra.mxu1 %v7151_v54  ;;  %v7232_v24 = vld [vmem:[#allocation5 + $0x5e0] ss:$16 sps:$4 sm:$0xff]   ;;  %v7235_v54 = vld [vmem:[#allocation5 + $0x5e8] ss:$16 sps:$4 sm:$0xff]  }
 0x1da   :  { %2906 = vmatprep.subr.bf16.mxu0 %v7156_v16  ;;  %2992 = vmatprep.subr.bf16.mxu1 %v7159_v55  ;;  %v7240_v16 = vld [vmem:[#allocation5 + $0x604] ss:$16 sps:$4 sm:$0xff]   ;;  %v7243_v55 = vld [vmem:[#allocation5 + $0x60c] ss:$16 sps:$4 sm:$0xff]  }
 0x1dd   :  { %2907 = vmatpush1.bf16.msra.mxu0 %v7154_v56  ;;  %2993 = vmatpush1.bf16.msra.mxu1 %v7157_v57  ;;  %v7910_v56 = vld [vmem:[#allocation2 + $0x30] sm:$0xff] }
 0x1de   :  { %2908 = vmatprep.subr.bf16.mxu0 %v7162_v58  ;;  %2994 = vmatprep.subr.bf16.mxu1 %v7165_v59  ;;  %v76_v57 = vunpack.c.l.bf16 %v7910_v56 }
 0x1e1   :  { %2909 = vmatpush1.bf16.msra.mxu0 %v7160_v60  ;;  %2995 = vmatpush1.bf16.msra.mxu1 %v7163_v61  ;;  %v7911_v60 = vld [vmem:[#allocation2 + $0x10] sm:$0xff] }
 0x1e2   :  { %2910 = vmatprep.subr.bf16.mxu0 %v7168_v62  ;;  %2996 = vmatprep.subr.bf16.mxu1 %v7171_v63  ;;  %v73_v61 = vunpack.c.h.bf16 %v7911_v60  ;;  %v77_v62 = vunpack.c.h.bf16 %v7910_v56  ;;  %v72_v63 = vunpack.c.l.bf16 %v7911_v60  ;;  %v7283_v56 = vld [vmem:[#allocation5 + $0x6e8] ss:$16 sps:$4 sm:$0xff]   ;;  %v7286_v60 = vld [vmem:[#allocation5 + $0x700] ss:$16 sps:$4 sm:$0xff]  }
 0x1e5   :  { %2911 = vmatpush1.bf16.msra.mxu0 %v7166_v0  ;;  %2997 = vmatpush1.bf16.msra.mxu1 %v7169_v1 }
 0x1e6   :  { %2912 = vmatprep.subr.bf16.mxu0 %v7174_v2  ;;  %2998 = vmatprep.subr.bf16.mxu1 %v7177_v3  ;;  %v8129_v2 = vld [vmem:[#allocation2 + $0x38] sm:$0xff] }
 0x1e7   :  { %v79_v3 = vunpack.c.h.bf16 %v8129_v2 }
 0x1e9   :  { %2913 = vmatpush1.bf16.msra.mxu0 %v7172_v4  ;;  %2999 = vmatpush1.bf16.msra.mxu1 %v7175_v5 }
 0x1ea   :  { %2914 = vmatprep.subr.bf16.mxu0 %v7180_v6  ;;  %3000 = vmatprep.subr.bf16.mxu1 %v7183_v7  ;;  %v8134_v6 = vld [vmem:[#allocation2 + $0x18] sm:$0xff] }
 0x1eb   :  { %v75_v7 = vunpack.c.h.bf16 %v8134_v6 }
 0x1ed   :  { %2915 = vmatpush1.bf16.msra.mxu0 %v7178_v8  ;;  %3001 = vmatpush1.bf16.msra.mxu1 %v7181_v9 }
 0x1ee   :  { %2916 = vmatprep.subr.bf16.mxu0 %v7186_v10  ;;  %3002 = vmatprep.subr.bf16.mxu1 %v7189_v11 }
 0x1f1   :  { %2917 = vmatpush1.bf16.msra.mxu0 %v7184_v14  ;;  %3003 = vmatpush1.bf16.msra.mxu1 %v7187_v15 }
 0x1f2   :  { %2918 = vmatprep.subr.bf16.mxu0 %v7192_v17  ;;  %3004 = vmatprep.subr.bf16.mxu1 %v7195_v18 }
 0x1f5   :  { %2919 = vmatpush1.bf16.msra.mxu0 %v7190_v19  ;;  %3005 = vmatpush1.bf16.msra.mxu1 %v7193_v20  ;;  %v7238_v19 = vld [vmem:[#allocation5 + $0x600] ss:$16 sps:$4 sm:$0xff]   ;;  %v7241_v20 = vld [vmem:[#allocation5 + $0x608] ss:$16 sps:$4 sm:$0xff]  }
 0x1f6   :  { %2920 = vmatprep.subr.bf16.mxu0 %v7198_v21  ;;  %3006 = vmatprep.subr.bf16.mxu1 %v7201_v22 }
 0x1f9   :  { %2921 = vmatpush1.bf16.msra.mxu0 %v7196_v23  ;;  %3007 = vmatpush1.bf16.msra.mxu1 %v7199_v25  ;;  %v7246_v23 = vld [vmem:[#allocation5 + $0x624] ss:$16 sps:$4 sm:$0xff]   ;;  %v7249_v25 = vld [vmem:[#allocation5 + $0x62c] ss:$16 sps:$4 sm:$0xff]  }
 0x1fa   :  { %2922 = vmatprep.subr.bf16.mxu0 %v7204_v27  ;;  %3008 = vmatprep.subr.bf16.mxu1 %v7207_v28  ;;  %v7244_v28 = vld [vmem:[#allocation5 + $0x620] ss:$16 sps:$4 sm:$0xff]  }
 0x1fd   :  { %2923 = vmatpush1.bf16.msra.mxu0 %v7202_v31  ;;  %3009 = vmatpush1.bf16.msra.mxu1 %v7205_v32  ;;  %v7247_v31 = vld [vmem:[#allocation5 + $0x628] ss:$16 sps:$4 sm:$0xff]   ;;  %v7252_v32 = vld [vmem:[#allocation5 + $0x644] ss:$16 sps:$4 sm:$0xff]  }
 0x1fe   :  { %2924 = vmatprep.subr.bf16.mxu0 %v7210_v35  ;;  %3010 = vmatprep.subr.bf16.mxu1 %v7213_v36  ;;  %v7255_v35 = vld [vmem:[#allocation5 + $0x64c] ss:$16 sps:$4 sm:$0xff]   ;;  %v7250_v36 = vld [vmem:[#allocation5 + $0x640] ss:$16 sps:$4 sm:$0xff]  }
 0x201   :  { %2925 = vmatpush1.bf16.msra.mxu0 %v7208_v37  ;;  %3011 = vmatpush1.bf16.msra.mxu1 %v7211_v39  ;;  %v7253_v37 = vld [vmem:[#allocation5 + $0x648] ss:$16 sps:$4 sm:$0xff]   ;;  %v7258_v39 = vld [vmem:[#allocation5 + $0x664] ss:$16 sps:$4 sm:$0xff]  }
 0x202   :  { %2926 = vmatprep.subr.bf16.mxu0 %v7216_v40  ;;  %3012 = vmatprep.subr.bf16.mxu1 %v7219_v41  ;;  %v7261_v40 = vld [vmem:[#allocation5 + $0x66c] ss:$16 sps:$4 sm:$0xff]   ;;  %v7256_v41 = vld [vmem:[#allocation5 + $0x660] ss:$16 sps:$4 sm:$0xff]  }
 0x205   :  { %2927 = vmatpush1.bf16.msra.mxu0 %v7214_v42  ;;  %3013 = vmatpush1.bf16.msra.mxu1 %v7217_v43  ;;  %v7259_v42 = vld [vmem:[#allocation5 + $0x668] ss:$16 sps:$4 sm:$0xff]   ;;  %v7264_v43 = vld [vmem:[#allocation5 + $0x684] ss:$16 sps:$4 sm:$0xff]  }
 0x206   :  { %2928 = vmatprep.subr.bf16.mxu0 %v7222_v44  ;;  %3014 = vmatprep.subr.bf16.mxu1 %v7225_v45  ;;  %v7267_v44 = vld [vmem:[#allocation5 + $0x68c] ss:$16 sps:$4 sm:$0xff]   ;;  %v7262_v45 = vld [vmem:[#allocation5 + $0x680] ss:$16 sps:$4 sm:$0xff]  }
 0x209   :  { %2929 = vmatpush1.bf16.msra.mxu0 %v7220_v46  ;;  %3015 = vmatpush1.bf16.msra.mxu1 %v7223_v48  ;;  %v7265_v46 = vld [vmem:[#allocation5 + $0x688] ss:$16 sps:$4 sm:$0xff]   ;;  %v7270_v48 = vld [vmem:[#allocation5 + $0x6a4] ss:$16 sps:$4 sm:$0xff]  }
 0x20a   :  { %2930 = vmatprep.subr.bf16.mxu0 %v7228_v49  ;;  %3016 = vmatprep.subr.bf16.mxu1 %v7231_v12  ;;  %v7273_v49 = vld [vmem:[#allocation5 + $0x6ac] ss:$16 sps:$4 sm:$0xff]   ;;  %v7268_v12 = vld [vmem:[#allocation5 + $0x6a0] ss:$16 sps:$4 sm:$0xff]  }
 0x20d   :  { %2931 = vmatpush1.bf16.msra.mxu0 %v7226_v51  ;;  %3017 = vmatpush1.bf16.msra.mxu1 %v7229_v13  ;;  %v7271_v51 = vld [vmem:[#allocation5 + $0x6a8] ss:$16 sps:$4 sm:$0xff]   ;;  %v7276_v13 = vld [vmem:[#allocation5 + $0x6c4] ss:$16 sps:$4 sm:$0xff]  }
 0x20e   :  { %2932 = vmatprep.subr.bf16.mxu0 %v7234_v52  ;;  %3018 = vmatprep.subr.bf16.mxu1 %v7237_v53  ;;  %v7279_v52 = vld [vmem:[#allocation5 + $0x6cc] ss:$16 sps:$4 sm:$0xff]   ;;  %v7274_v53 = vld [vmem:[#allocation5 + $0x6c0] ss:$16 sps:$4 sm:$0xff]  }
 0x211   :  { %2933 = vmatpush1.bf16.msra.mxu0 %v7232_v24  ;;  %3019 = vmatpush1.bf16.msra.mxu1 %v7235_v54  ;;  %v7277_v24 = vld [vmem:[#allocation5 + $0x6c8] ss:$16 sps:$4 sm:$0xff]   ;;  %v7282_v54 = vld [vmem:[#allocation5 + $0x6e4] ss:$16 sps:$4 sm:$0xff]  }
 0x212   :  { %2945 = vmatprep.subr.bf16.mxu0 %v7240_v16  ;;  %3031 = vmatprep.subr.bf16.mxu1 %v7243_v55  ;;  %v7285_v16 = vld [vmem:[#allocation5 + $0x6ec] ss:$16 sps:$4 sm:$0xff]   ;;  %v7280_v55 = vld [vmem:[#allocation5 + $0x6e0] ss:$16 sps:$4 sm:$0xff]  }
 0x2a7   :  { %v1897_v58 = vpop.f32.mrb[4].mxu0  ;;  %v8127_v59 = vpop.f32.mrb[4].mxu1 }
 0x2a8   :  { %v1899_v0 = vpop.f32.mrb[5].mxu0  ;;  %v1985_v1 = vpop.f32.mrb[5].mxu1  ;;  %v8143_v15 = vadd.f32 %v1897_v58, %v72_v63  ;;  %v7291_v58 = vld [vmem:[#allocation5 + $0x70c] ss:$16 sps:$4 sm:$0xff]  }
 0x2a9   :  { %v1901_v4 = vpop.f32.mrb[6].mxu0  ;;  %v8132_v5 = vpop.f32.mrb[6].mxu1  ;;  %v8139_v11 = vadd.f32 %v1899_v0, %v73_v61  ;;  %v8149_v21 = vadd.f32 %v1985_v1, %v75_v7  ;;  %v7289_v61 = vld [vmem:[#allocation5 + $0x708] ss:$16 sps:$4 sm:$0xff]   ;;  %v7297_v63 = vld [vmem:[#allocation5 + $0x72c] ss:$16 sps:$4 sm:$0xff]  }
 0x2aa   :  { %v8137_v8 = vadd.f32 %v1901_v4, %v76_v57  ;;  %v1903_v9 = vpop.f32.mrb[7].mxu0  ;;  %v1989_v10 = vpop.f32.mrb[7].mxu1  ;;  %v7288_v57 = vld [vmem:[#allocation5 + $0x704] ss:$16 sps:$4 sm:$0xff]   ;;  %v7292_v0 = vld [vmem:[#allocation5 + $0x720] ss:$16 sps:$4 sm:$0xff]  }
 0x2ab   :  { %v8141_v14 = vadd.f32 %v1903_v9, %v77_v62  ;;  %v8145_v17 = vadd.f32 %v1989_v10, %v79_v3  ;;  %v7294_v62 = vld [vmem:[#allocation5 + $0x724] ss:$16 sps:$4 sm:$0xff]   ;;  %v7295_v1 = vld [vmem:[#allocation5 + $0x728] ss:$16 sps:$4 sm:$0xff]   ;;  %v7303_v4 = vld [vmem:[#allocation5 + $0x74c] ss:$16 sps:$4 sm:$0xff]  }
 0x2ac   :  { %v2258_v22 = vpack.c.bf16 %v8137_v8, %v8143_v15  ;;  %v7300_v3 = vld [vmem:[#allocation5 + $0x744] ss:$16 sps:$4 sm:$0xff]   ;;  %v7298_v7 = vld [vmem:[#allocation5 + $0x740] ss:$16 sps:$4 sm:$0xff]   ;;  %v7301_v9 = vld [vmem:[#allocation5 + $0x748] ss:$16 sps:$4 sm:$0xff]  }
 0x2ad   :  { %v2259_v18 = vpack.c.bf16 %v8141_v14, %v8139_v11  ;;  %v2261_v27 = vpack.c.bf16 %v8145_v17, %v8149_v21  ;;  %v7306_v10 = vld [vmem:[#allocation5 + $0x764] ss:$16 sps:$4 sm:$0xff]  }
 0x2af   :  { %2934 = vmatprep.mubr.bf16.mxu0 %v2259_v18  ;;  %3020 = vmatprep.mubr.bf16.mxu1 %v2259_v18  ;;  %v7309_v18 = vld [vmem:[#allocation5 + $0x76c] ss:$16 sps:$4 sm:$0xff]  }
 0x2b0   :  { %2935 = vmatmul.mubr.bf16.vlgmr.msra.gmra.mrb[8].mxu0 %v2258_v22  ;;  %3021 = vmatmul.mubr.bf16.vlgmr.msra.gmra.mrb[8].mxu1 %v2258_v22  ;;  %v7312_v22 = vld [vmem:[#allocation5 + $0x784] ss:$16 sps:$4 sm:$0xff]  }
 0x2b1   :  { %2946 = vmatpush1.bf16.msra.mxu0 %v7238_v19  ;;  %3032 = vmatpush1.bf16.msra.mxu1 %v7241_v20  ;;  %v7304_v19 = vld [vmem:[#allocation5 + $0x760] ss:$16 sps:$4 sm:$0xff]   ;;  %v7307_v20 = vld [vmem:[#allocation5 + $0x768] ss:$16 sps:$4 sm:$0xff]  }
 0x2b2   :  { %2977 = vmatprep.mubr.bf16.mxu0 %v2261_v27  ;;  %3063 = vmatprep.mubr.bf16.mxu1 %v2261_v27  ;;  %v7313_v27 = vld [vmem:[#allocation5 + $0x788] ss:$16 sps:$4 sm:$0xff]  }
 0x2b3   :  { %2947 = vmatprep.subr.bf16.mxu0 %v7246_v23  ;;  %3033 = vmatprep.subr.bf16.mxu1 %v7249_v25  ;;  %v7315_v23 = vld [vmem:[#allocation5 + $0x78c] ss:$16 sps:$4 sm:$0xff]   ;;  %v7310_v25 = vld [vmem:[#allocation5 + $0x780] ss:$16 sps:$4 sm:$0xff]  }
 0x2b5   :  { %2948 = vmatpush1.bf16.msra.mxu0 %v7244_v28  ;;  %3034 = vmatpush1.bf16.msra.mxu1 %v7247_v31  ;;  %v7318_v28 = vld [vmem:[#allocation5 + $0x7a4] ss:$16 sps:$4 sm:$0xff]   ;;  %v7321_v31 = vld [vmem:[#allocation5 + $0x7ac] ss:$16 sps:$4 sm:$0xff]  }
 0x2b6   :  { %2949 = vmatprep.subr.bf16.mxu0 %v7252_v32  ;;  %3035 = vmatprep.subr.bf16.mxu1 %v7255_v35  ;;  %v7316_v32 = vld [vmem:[#allocation5 + $0x7a0] ss:$16 sps:$4 sm:$0xff]   ;;  %v7319_v35 = vld [vmem:[#allocation5 + $0x7a8] ss:$16 sps:$4 sm:$0xff]  }
 0x2b9   :  { %2950 = vmatpush1.bf16.msra.mxu0 %v7250_v36  ;;  %3036 = vmatpush1.bf16.msra.mxu1 %v7253_v37  ;;  %v7324_v36 = vld [vmem:[#allocation5 + $0x7c4] ss:$16 sps:$4 sm:$0xff]   ;;  %v7327_v37 = vld [vmem:[#allocation5 + $0x7cc] ss:$16 sps:$4 sm:$0xff]  }
 0x2ba   :  { %2951 = vmatprep.subr.bf16.mxu0 %v7258_v39  ;;  %3037 = vmatprep.subr.bf16.mxu1 %v7261_v40  ;;  %v7322_v39 = vld [vmem:[#allocation5 + $0x7c0] ss:$16 sps:$4 sm:$0xff]   ;;  %v7325_v40 = vld [vmem:[#allocation5 + $0x7c8] ss:$16 sps:$4 sm:$0xff]  }
 0x2bd   :  { %2952 = vmatpush1.bf16.msra.mxu0 %v7256_v41  ;;  %3038 = vmatpush1.bf16.msra.mxu1 %v7259_v42  ;;  %v78_v41 = vunpack.c.l.bf16 %v8129_v2  ;;  %v7330_v42 = vld [vmem:[#allocation5 + $0x7e4] ss:$16 sps:$4 sm:$0xff]   ;;  %v7334_v2 = vld [vmem:[#allocation7 + $0x400] ss:$16 sps:$4 sm:$0xff]  }
 0x2be   :  { %2953 = vmatprep.subr.bf16.mxu0 %v7264_v43  ;;  %3039 = vmatprep.subr.bf16.mxu1 %v7267_v44  ;;  %v7333_v43 = vld [vmem:[#allocation5 + $0x7ec] ss:$16 sps:$4 sm:$0xff]   ;;  %v74_v44 = vunpack.c.l.bf16 %v8134_v6 }
 0x2c1   :  { %2954 = vmatpush1.bf16.msra.mxu0 %v7262_v45  ;;  %3040 = vmatpush1.bf16.msra.mxu1 %v7265_v46  ;;  %v7328_v45 = vld [vmem:[#allocation5 + $0x7e0] ss:$16 sps:$4 sm:$0xff]   ;;  %v7331_v46 = vld [vmem:[#allocation5 + $0x7e8] ss:$16 sps:$4 sm:$0xff]  }
 0x2c2   :  { %2955 = vmatprep.subr.bf16.mxu0 %v7270_v48  ;;  %3041 = vmatprep.subr.bf16.mxu1 %v7273_v49  ;;  %v8158_v48 = vadd.f32 %v8132_v5, %v78_v41  ;;  %v7336_v49 = vld [vmem:[#allocation7 + $0x404] ss:$16 sps:$4 sm:$0xff]   ;;  %v7340_v5 = vld [vmem:[#allocation7 + $0x420] ss:$16 sps:$4 sm:$0xff]   ;;  %v7399_v41 = vld [vmem:[#allocation7 + $0x54c] ss:$16 sps:$4 sm:$0xff]  }
 0x2c5   :  { %2956 = vmatpush1.bf16.msra.mxu0 %v7268_v12  ;;  %3042 = vmatpush1.bf16.msra.mxu1 %v7271_v51  ;;  %v7339_v12 = vld [vmem:[#allocation7 + $0x40c] ss:$16 sps:$4 sm:$0xff]   ;;  %v8161_v51 = vadd.f32 %v8127_v59, %v74_v44  ;;  %v7348_v59 = vld [vmem:[#allocation7 + $0x444] ss:$16 sps:$4 sm:$0xff]  }
 0x2c6   :  { %2957 = vmatprep.subr.bf16.mxu0 %v7276_v13  ;;  %3043 = vmatprep.subr.bf16.mxu1 %v7279_v52  ;;  %v7337_v13 = vld [vmem:[#allocation7 + $0x408] ss:$16 sps:$4 sm:$0xff]   ;;  %v7342_v52 = vld [vmem:[#allocation7 + $0x424] ss:$16 sps:$4 sm:$0xff]  }
 0x2c7   :  { %v2260_v6 = vpack.c.bf16 %v8158_v48, %v8161_v51  ;;  %v7402_v44 = vld [vmem:[#allocation7 + $0x564] ss:$16 sps:$4 sm:$0xff]  }
 0x2c9   :  { %2958 = vmatpush1.bf16.msra.mxu0 %v7274_v53  ;;  %3044 = vmatpush1.bf16.msra.mxu1 %v7277_v24  ;;  %v7345_v53 = vld [vmem:[#allocation7 + $0x42c] ss:$16 sps:$4 sm:$0xff]   ;;  %v7343_v24 = vld [vmem:[#allocation7 + $0x428] ss:$16 sps:$4 sm:$0xff]  }
 0x2ca   :  { %2959 = vmatprep.subr.bf16.mxu0 %v7282_v54  ;;  %3045 = vmatprep.subr.bf16.mxu1 %v7285_v16  ;;  %v7351_v54 = vld [vmem:[#allocation7 + $0x44c] ss:$16 sps:$4 sm:$0xff]   ;;  %v7346_v16 = vld [vmem:[#allocation7 + $0x440] ss:$16 sps:$4 sm:$0xff]  }
 0x2cd   :  { %2960 = vmatpush1.bf16.msra.mxu0 %v7280_v55  ;;  %3046 = vmatpush1.bf16.msra.mxu1 %v7283_v56  ;;  %v7349_v55 = vld [vmem:[#allocation7 + $0x448] ss:$16 sps:$4 sm:$0xff]   ;;  %v7354_v56 = vld [vmem:[#allocation7 + $0x464] ss:$16 sps:$4 sm:$0xff]  }
 0x2ce   :  { %2961 = vmatprep.subr.bf16.mxu0 %v7288_v57  ;;  %3047 = vmatprep.subr.bf16.mxu1 %v7291_v58  ;;  %v7357_v57 = vld [vmem:[#allocation7 + $0x46c] ss:$16 sps:$4 sm:$0xff]   ;;  %v7352_v58 = vld [vmem:[#allocation7 + $0x460] ss:$16 sps:$4 sm:$0xff]  }
 0x2d1   :  { %2962 = vmatpush1.bf16.msra.mxu0 %v7286_v60  ;;  %3048 = vmatpush1.bf16.msra.mxu1 %v7289_v61  ;;  %v7355_v60 = vld [vmem:[#allocation7 + $0x468] ss:$16 sps:$4 sm:$0xff]   ;;  %v7360_v61 = vld [vmem:[#allocation7 + $0x484] ss:$16 sps:$4 sm:$0xff]  }
 0x2d2   :  { %2963 = vmatprep.subr.bf16.mxu0 %v7294_v62  ;;  %3049 = vmatprep.subr.bf16.mxu1 %v7297_v63  ;;  %v7363_v62 = vld [vmem:[#allocation7 + $0x48c] ss:$16 sps:$4 sm:$0xff]   ;;  %v7358_v63 = vld [vmem:[#allocation7 + $0x480] ss:$16 sps:$4 sm:$0xff]  }
 0x2d5   :  { %2964 = vmatpush1.bf16.msra.mxu0 %v7292_v0  ;;  %3050 = vmatpush1.bf16.msra.mxu1 %v7295_v1  ;;  %v7361_v0 = vld [vmem:[#allocation7 + $0x488] ss:$16 sps:$4 sm:$0xff]   ;;  %v7366_v1 = vld [vmem:[#allocation7 + $0x4a4] ss:$16 sps:$4 sm:$0xff]  }
 0x2d6   :  { %2965 = vmatprep.subr.bf16.mxu0 %v7300_v3  ;;  %3051 = vmatprep.subr.bf16.mxu1 %v7303_v4  ;;  %v7369_v3 = vld [vmem:[#allocation7 + $0x4ac] ss:$16 sps:$4 sm:$0xff]   ;;  %v7364_v4 = vld [vmem:[#allocation7 + $0x4a0] ss:$16 sps:$4 sm:$0xff]  }
 0x2d9   :  { %2966 = vmatpush1.bf16.msra.mxu0 %v7298_v7  ;;  %3052 = vmatpush1.bf16.msra.mxu1 %v7301_v9  ;;  %v7367_v7 = vld [vmem:[#allocation7 + $0x4a8] ss:$16 sps:$4 sm:$0xff]   ;;  %v7372_v9 = vld [vmem:[#allocation7 + $0x4c4] ss:$16 sps:$4 sm:$0xff]  }
 0x2da   :  { %2967 = vmatprep.subr.bf16.mxu0 %v7306_v10  ;;  %3053 = vmatprep.subr.bf16.mxu1 %v7309_v18  ;;  %v7375_v10 = vld [vmem:[#allocation7 + $0x4cc] ss:$16 sps:$4 sm:$0xff]   ;;  %v7370_v18 = vld [vmem:[#allocation7 + $0x4c0] ss:$16 sps:$4 sm:$0xff]  }
 0x2dd   :  { %2968 = vmatpush1.bf16.msra.mxu0 %v7304_v19  ;;  %3054 = vmatpush1.bf16.msra.mxu1 %v7307_v20  ;;  %v7373_v19 = vld [vmem:[#allocation7 + $0x4c8] ss:$16 sps:$4 sm:$0xff]   ;;  %v7378_v20 = vld [vmem:[#allocation7 + $0x4e4] ss:$16 sps:$4 sm:$0xff]  }
 0x2de   :  { %2969 = vmatprep.subr.bf16.mxu0 %v7312_v22  ;;  %3055 = vmatprep.subr.bf16.mxu1 %v7315_v23  ;;  %v7381_v22 = vld [vmem:[#allocation7 + $0x4ec] ss:$16 sps:$4 sm:$0xff]   ;;  %v7376_v23 = vld [vmem:[#allocation7 + $0x4e0] ss:$16 sps:$4 sm:$0xff]  }
 0x2e1   :  { %2970 = vmatpush1.bf16.msra.mxu0 %v7310_v25  ;;  %3056 = vmatpush1.bf16.msra.mxu1 %v7313_v27  ;;  %v7379_v25 = vld [vmem:[#allocation7 + $0x4e8] ss:$16 sps:$4 sm:$0xff]   ;;  %v7384_v27 = vld [vmem:[#allocation7 + $0x504] ss:$16 sps:$4 sm:$0xff]  }
 0x2e2   :  { %2971 = vmatprep.subr.bf16.mxu0 %v7318_v28  ;;  %3057 = vmatprep.subr.bf16.mxu1 %v7321_v31  ;;  %v7387_v28 = vld [vmem:[#allocation7 + $0x50c] ss:$16 sps:$4 sm:$0xff]   ;;  %v7382_v31 = vld [vmem:[#allocation7 + $0x500] ss:$16 sps:$4 sm:$0xff]  }
 0x2e5   :  { %2972 = vmatpush1.bf16.msra.mxu0 %v7316_v32  ;;  %3058 = vmatpush1.bf16.msra.mxu1 %v7319_v35  ;;  %v7385_v32 = vld [vmem:[#allocation7 + $0x508] ss:$16 sps:$4 sm:$0xff]   ;;  %v7390_v35 = vld [vmem:[#allocation7 + $0x524] ss:$16 sps:$4 sm:$0xff]  }
 0x2e6   :  { %2973 = vmatprep.subr.bf16.mxu0 %v7324_v36  ;;  %3059 = vmatprep.subr.bf16.mxu1 %v7327_v37  ;;  %v7393_v36 = vld [vmem:[#allocation7 + $0x52c] ss:$16 sps:$4 sm:$0xff]   ;;  %v7388_v37 = vld [vmem:[#allocation7 + $0x520] ss:$16 sps:$4 sm:$0xff]  }
 0x2e9   :  { %2974 = vmatpush1.bf16.msra.mxu0 %v7322_v39  ;;  %3060 = vmatpush1.bf16.msra.mxu1 %v7325_v40  ;;  %v7391_v39 = vld [vmem:[#allocation7 + $0x528] ss:$16 sps:$4 sm:$0xff]   ;;  %v7396_v40 = vld [vmem:[#allocation7 + $0x544] ss:$16 sps:$4 sm:$0xff]  }
 0x2ea   :  { %2975 = vmatprep.subr.bf16.mxu0 %v7330_v42  ;;  %3061 = vmatprep.subr.bf16.mxu1 %v7333_v43  ;;  %v7394_v42 = vld [vmem:[#allocation7 + $0x540] ss:$16 sps:$4 sm:$0xff]   ;;  %v7397_v43 = vld [vmem:[#allocation7 + $0x548] ss:$16 sps:$4 sm:$0xff]  }
 0x2ed   :  { %2976 = vmatpush1.bf16.msra.mxu0 %v7328_v45  ;;  %3062 = vmatpush1.bf16.msra.mxu1 %v7331_v46  ;;  %v7405_v45 = vld [vmem:[#allocation7 + $0x56c] ss:$16 sps:$4 sm:$0xff]   ;;  %v7400_v46 = vld [vmem:[#allocation7 + $0x560] ss:$16 sps:$4 sm:$0xff]  }
 0x2ee   :  { %3734 = vmatprep.subr.bf16.mxu0 %v7336_v49  ;;  %3820 = vmatprep.subr.bf16.mxu1 %v7339_v12  ;;  %v7403_v49 = vld [vmem:[#allocation7 + $0x568] ss:$16 sps:$4 sm:$0xff]   ;;  %v7408_v12 = vld [vmem:[#allocation7 + $0x584] ss:$16 sps:$4 sm:$0xff]  }
 0x2f0   :  { %2978 = vmatmul.mubr.bf16.vlgmr.msra.gmra.mrb[8].mxu0 %v2260_v6  ;;  %3064 = vmatmul.mubr.bf16.vlgmr.msra.gmra.mrb[8].mxu1 %v2260_v6  ;;  %v7409_v6 = vld [vmem:[#allocation7 + $0x588] ss:$16 sps:$4 sm:$0xff]  }
 0x2f1   :  { %3735 = vmatpush1.bf16.msra.mxu0 %v7334_v2  ;;  %3821 = vmatpush1.bf16.msra.mxu1 %v7337_v13  ;;  %v7411_v2 = vld [vmem:[#allocation7 + $0x58c] ss:$16 sps:$4 sm:$0xff]   ;;  %v7406_v13 = vld [vmem:[#allocation7 + $0x580] ss:$16 sps:$4 sm:$0xff]  }
 0x2f2   :  { %3736 = vmatprep.subr.bf16.mxu0 %v7342_v52  ;;  %3822 = vmatprep.subr.bf16.mxu1 %v7345_v53  ;;  %v7414_v52 = vld [vmem:[#allocation7 + $0x5a4] ss:$16 sps:$4 sm:$0xff]   ;;  %v7417_v53 = vld [vmem:[#allocation7 + $0x5ac] ss:$16 sps:$4 sm:$0xff]  }
 0x2f5   :  { %3737 = vmatpush1.bf16.msra.mxu0 %v7340_v5  ;;  %3823 = vmatpush1.bf16.msra.mxu1 %v7343_v24  ;;  %v7412_v5 = vld [vmem:[#allocation7 + $0x5a0] ss:$16 sps:$4 sm:$0xff]   ;;  %v7415_v24 = vld [vmem:[#allocation7 + $0x5a8] ss:$16 sps:$4 sm:$0xff]  }
 0x2f6   :  { %3738 = vmatprep.subr.bf16.mxu0 %v7348_v59  ;;  %3824 = vmatprep.subr.bf16.mxu1 %v7351_v54  ;;  %v7420_v59 = vld [vmem:[#allocation7 + $0x5c4] ss:$16 sps:$4 sm:$0xff]   ;;  %v7423_v54 = vld [vmem:[#allocation7 + $0x5cc] ss:$16 sps:$4 sm:$0xff]  }
 0x2f9   :  { %3739 = vmatpush1.bf16.msra.mxu0 %v7346_v16  ;;  %3825 = vmatpush1.bf16.msra.mxu1 %v7349_v55  ;;  %v7418_v16 = vld [vmem:[#allocation7 + $0x5c0] ss:$16 sps:$4 sm:$0xff]   ;;  %v7421_v55 = vld [vmem:[#allocation7 + $0x5c8] ss:$16 sps:$4 sm:$0xff]  }
 0x2fa   :  { %3740 = vmatprep.subr.bf16.mxu0 %v7354_v56  ;;  %3826 = vmatprep.subr.bf16.mxu1 %v7357_v57  ;;  %v7426_v56 = vld [vmem:[#allocation7 + $0x5e4] ss:$16 sps:$4 sm:$0xff]   ;;  %v7429_v57 = vld [vmem:[#allocation7 + $0x5ec] ss:$16 sps:$4 sm:$0xff]  }
 0x2fd   :  { %3741 = vmatpush1.bf16.msra.mxu0 %v7352_v58  ;;  %3827 = vmatpush1.bf16.msra.mxu1 %v7355_v60  ;;  %v7424_v58 = vld [vmem:[#allocation7 + $0x5e0] ss:$16 sps:$4 sm:$0xff]   ;;  %v7427_v60 = vld [vmem:[#allocation7 + $0x5e8] ss:$16 sps:$4 sm:$0xff]  }
 0x2fe   :  { %3742 = vmatprep.subr.bf16.mxu0 %v7360_v61  ;;  %3828 = vmatprep.subr.bf16.mxu1 %v7363_v62  ;;  %v7432_v61 = vld [vmem:[#allocation7 + $0x604] ss:$16 sps:$4 sm:$0xff]   ;;  %v7435_v62 = vld [vmem:[#allocation7 + $0x60c] ss:$16 sps:$4 sm:$0xff]  }
 0x301   :  { %3743 = vmatpush1.bf16.msra.mxu0 %v7358_v63  ;;  %3829 = vmatpush1.bf16.msra.mxu1 %v7361_v0 }
 0x302   :  { %3744 = vmatprep.subr.bf16.mxu0 %v7366_v1  ;;  %3830 = vmatprep.subr.bf16.mxu1 %v7369_v3 }
 0x305   :  { %3745 = vmatpush1.bf16.msra.mxu0 %v7364_v4  ;;  %3831 = vmatpush1.bf16.msra.mxu1 %v7367_v7 }
 0x306   :  { %3746 = vmatprep.subr.bf16.mxu0 %v7372_v9  ;;  %3832 = vmatprep.subr.bf16.mxu1 %v7375_v10 }
 0x309   :  { %3747 = vmatpush1.bf16.msra.mxu0 %v7370_v18  ;;  %3833 = vmatpush1.bf16.msra.mxu1 %v7373_v19 }
 0x30a   :  { %3748 = vmatprep.subr.bf16.mxu0 %v7378_v20  ;;  %3834 = vmatprep.subr.bf16.mxu1 %v7381_v22 }
 0x30d   :  { %3749 = vmatpush1.bf16.msra.mxu0 %v7376_v23  ;;  %3835 = vmatpush1.bf16.msra.mxu1 %v7379_v25 }
 0x30e   :  { %3750 = vmatprep.subr.bf16.mxu0 %v7384_v27  ;;  %3836 = vmatprep.subr.bf16.mxu1 %v7387_v28 }
 0x311   :  { %3751 = vmatpush1.bf16.msra.mxu0 %v7382_v31  ;;  %3837 = vmatpush1.bf16.msra.mxu1 %v7385_v32 }
 0x312   :  { %3752 = vmatprep.subr.bf16.mxu0 %v7390_v35  ;;  %3838 = vmatprep.subr.bf16.mxu1 %v7393_v36 }
 0x315   :  { %3753 = vmatpush1.bf16.msra.mxu0 %v7388_v37  ;;  %3839 = vmatpush1.bf16.msra.mxu1 %v7391_v39  ;;  %v7430_v37 = vld [vmem:[#allocation7 + $0x600] ss:$16 sps:$4 sm:$0xff]   ;;  %v7433_v39 = vld [vmem:[#allocation7 + $0x608] ss:$16 sps:$4 sm:$0xff]  }
 0x316   :  { %3754 = vmatprep.subr.bf16.mxu0 %v7396_v40  ;;  %3840 = vmatprep.subr.bf16.mxu1 %v7399_v41  ;;  %v7441_v40 = vld [vmem:[#allocation7 + $0x62c] ss:$16 sps:$4 sm:$0xff]   ;;  %v7439_v41 = vld [vmem:[#allocation7 + $0x628] ss:$16 sps:$4 sm:$0xff]  }
 0x319   :  { %3755 = vmatpush1.bf16.msra.mxu0 %v7394_v42  ;;  %3841 = vmatpush1.bf16.msra.mxu1 %v7397_v43  ;;  %v7447_v42 = vld [vmem:[#allocation7 + $0x64c] ss:$16 sps:$4 sm:$0xff]   ;;  %v7442_v43 = vld [vmem:[#allocation7 + $0x640] ss:$16 sps:$4 sm:$0xff]  }
 0x31a   :  { %3756 = vmatprep.subr.bf16.mxu0 %v7402_v44  ;;  %3842 = vmatprep.subr.bf16.mxu1 %v7405_v45  ;;  %v7445_v44 = vld [vmem:[#allocation7 + $0x648] ss:$16 sps:$4 sm:$0xff]   ;;  %v7450_v45 = vld [vmem:[#allocation7 + $0x664] ss:$16 sps:$4 sm:$0xff]  }
 0x31d   :  { %3757 = vmatpush1.bf16.msra.mxu0 %v7400_v46  ;;  %3843 = vmatpush1.bf16.msra.mxu1 %v7403_v49  ;;  %v7453_v46 = vld [vmem:[#allocation7 + $0x66c] ss:$16 sps:$4 sm:$0xff]   ;;  %v7448_v49 = vld [vmem:[#allocation7 + $0x660] ss:$16 sps:$4 sm:$0xff]  }
 0x31e   :  { %3758 = vmatprep.subr.bf16.mxu0 %v7408_v12  ;;  %3844 = vmatprep.subr.bf16.mxu1 %v7411_v2  ;;  %v7451_v12 = vld [vmem:[#allocation7 + $0x668] ss:$16 sps:$4 sm:$0xff]   ;;  %v7456_v2 = vld [vmem:[#allocation7 + $0x684] ss:$16 sps:$4 sm:$0xff]  }
 0x321   :  { %3759 = vmatpush1.bf16.msra.mxu0 %v7406_v13  ;;  %3845 = vmatpush1.bf16.msra.mxu1 %v7409_v6  ;;  %v7459_v13 = vld [vmem:[#allocation7 + $0x68c] ss:$16 sps:$4 sm:$0xff]   ;;  %v7454_v6 = vld [vmem:[#allocation7 + $0x680] ss:$16 sps:$4 sm:$0xff]  }
 0x322   :  { %3760 = vmatprep.subr.bf16.mxu0 %v7414_v52  ;;  %3846 = vmatprep.subr.bf16.mxu1 %v7417_v53  ;;  %v7457_v52 = vld [vmem:[#allocation7 + $0x688] ss:$16 sps:$4 sm:$0xff]   ;;  %v7462_v53 = vld [vmem:[#allocation7 + $0x6a4] ss:$16 sps:$4 sm:$0xff]  }
 0x325   :  { %3761 = vmatpush1.bf16.msra.mxu0 %v7412_v5  ;;  %3847 = vmatpush1.bf16.msra.mxu1 %v7415_v24  ;;  %v7465_v5 = vld [vmem:[#allocation7 + $0x6ac] ss:$16 sps:$4 sm:$0xff]   ;;  %v7460_v24 = vld [vmem:[#allocation7 + $0x6a0] ss:$16 sps:$4 sm:$0xff]  }
 0x326   :  { %3762 = vmatprep.subr.bf16.mxu0 %v7420_v59  ;;  %3848 = vmatprep.subr.bf16.mxu1 %v7423_v54  ;;  %v7463_v59 = vld [vmem:[#allocation7 + $0x6a8] ss:$16 sps:$4 sm:$0xff]   ;;  %v7468_v54 = vld [vmem:[#allocation7 + $0x6c4] ss:$16 sps:$4 sm:$0xff]  }
 0x329   :  { %3763 = vmatpush1.bf16.msra.mxu0 %v7418_v16  ;;  %3849 = vmatpush1.bf16.msra.mxu1 %v7421_v55  ;;  %v7471_v16 = vld [vmem:[#allocation7 + $0x6cc] ss:$16 sps:$4 sm:$0xff]   ;;  %v7466_v55 = vld [vmem:[#allocation7 + $0x6c0] ss:$16 sps:$4 sm:$0xff]  }
 0x32a   :  { %3764 = vmatprep.subr.bf16.mxu0 %v7426_v56  ;;  %3850 = vmatprep.subr.bf16.mxu1 %v7429_v57  ;;  %v7469_v56 = vld [vmem:[#allocation7 + $0x6c8] ss:$16 sps:$4 sm:$0xff]   ;;  %v7474_v57 = vld [vmem:[#allocation7 + $0x6e4] ss:$16 sps:$4 sm:$0xff]  }
 0x32d   :  { %3765 = vmatpush1.bf16.msra.mxu0 %v7424_v58  ;;  %3851 = vmatpush1.bf16.msra.mxu1 %v7427_v60  ;;  %v7477_v58 = vld [vmem:[#allocation7 + $0x6ec] ss:$16 sps:$4 sm:$0xff]   ;;  %v7472_v60 = vld [vmem:[#allocation7 + $0x6e0] ss:$16 sps:$4 sm:$0xff]  }
 0x32e   :  { %3777 = vmatprep.subr.bf16.mxu0 %v7432_v61  ;;  %3863 = vmatprep.subr.bf16.mxu1 %v7435_v62  ;;  %v7475_v61 = vld [vmem:[#allocation7 + $0x6e8] ss:$16 sps:$4 sm:$0xff]   ;;  %v7480_v62 = vld [vmem:[#allocation7 + $0x704] ss:$16 sps:$4 sm:$0xff]  }
 0x3c3   :  { %v2979_v63 = vpop.f32.mrb[8].mxu0  ;;  %v8165_v0 = vpop.f32.mrb[8].mxu1 }
 0x3c4   :  { %v2981_v1 = vpop.f32.mrb[9].mxu0  ;;  %v3067_v3 = vpop.f32.mrb[9].mxu1  ;;  %v3074_v10 = vmax.f32 %v2979_v63, 0.0  ;;  %v7483_v63 = vld [vmem:[#allocation7 + $0x70c] ss:$16 sps:$4 sm:$0xff]  }
 0x3c5   :  { %v3075_v4 = vmax.f32 %v2981_v1, 0.0  ;;  %v2983_v7 = vpop.f32.mrb[10].mxu0  ;;  %v8167_v9 = vpop.f32.mrb[10].mxu1  ;;  %v3077_v25 = vmax.f32 %v3067_v3, 0.0  ;;  %v7478_v1 = vld [vmem:[#allocation7 + $0x700] ss:$16 sps:$4 sm:$0xff]  }
 0x3c6   :  { %v3078_v18 = vmax.f32 %v2983_v7, 0.0  ;;  %v2985_v19 = vpop.f32.mrb[11].mxu0  ;;  %v3071_v20 = vpop.f32.mrb[11].mxu1  ;;  %v8179_v32 = vadd.f32 %v3074_v10, %v8105_v33  ;;  %v7481_v3 = vld [vmem:[#allocation7 + $0x708] ss:$16 sps:$4 sm:$0xff]  }
 0x3c7   :  { %v3079_v22 = vmax.f32 %v2985_v19, 0.0  ;;  %v3081_v23 = vmax.f32 %v3071_v20, 0.0  ;;  %v8173_v28 = vadd.f32 %v3075_v4, %v8101_v29  ;;  %v7486_v4 = vld [vmem:[#allocation7 + $0x724] ss:$16 sps:$4 sm:$0xff]   ;;  %v7489_v7 = vld [vmem:[#allocation7 + $0x72c] ss:$16 sps:$4 sm:$0xff]  }
 0x3c8   :  { %v8170_v27 = vadd.f32 %v3078_v18, %v8099_v26  ;;  %v8187_v26 = vadd.f32 %v3077_v25, %v8111_v38  ;;  %v7444_v38 = vld [vmem:[#allocation7 + $0x644] ss:$16 sps:$4 sm:$0xff]   ;;  %v7484_v10 = vld [vmem:[#allocation7 + $0x720] ss:$16 sps:$4 sm:$0xff]   ;;  %v7487_v18 = vld [vmem:[#allocation7 + $0x728] ss:$16 sps:$4 sm:$0xff]  }
 0x3c9   :  { %v8176_v31 = vadd.f32 %v3079_v22, %v8103_v30  ;;  %v8182_v35 = vadd.f32 %v3081_v23, %v8107_v34  ;;  %v7438_v30 = vld [vmem:[#allocation7 + $0x624] ss:$16 sps:$4 sm:$0xff]   ;;  %v7436_v34 = vld [vmem:[#allocation7 + $0x620] ss:$16 sps:$4 sm:$0xff]   ;;  %v7495_v20 = vld [vmem:[#allocation7 + $0x74c] ss:$16 sps:$4 sm:$0xff]  }
 0x3ca   :  { %v3090_v29 = vpack.c.bf16 %v8170_v27, %v8179_v32  ;;  %v7492_v19 = vld [vmem:[#allocation7 + $0x744] ss:$16 sps:$4 sm:$0xff]   ;;  %v7490_v22 = vld [vmem:[#allocation7 + $0x740] ss:$16 sps:$4 sm:$0xff]   ;;  %v7493_v23 = vld [vmem:[#allocation7 + $0x748] ss:$16 sps:$4 sm:$0xff]  }
 0x3cb   :  { %v3091_v36 = vpack.c.bf16 %v8176_v31, %v8173_v28  ;;  %v3093_v33 = vpack.c.bf16 %v8182_v35, %v8187_v26  ;;  %v7498_v25 = vld [vmem:[#allocation7 + $0x764] ss:$16 sps:$4 sm:$0xff]  }
 0x3cd   :  { %3766 = vmatprep.mubr.bf16.mxu0 %v3091_v36  ;;  %3852 = vmatprep.mubr.bf16.mxu1 %v3091_v36  ;;  %v7501_v36 = vld [vmem:[#allocation7 + $0x76c] ss:$16 sps:$4 sm:$0xff]  }
 0x3ce   :  { %3767 = vmatmul.mubr.bf16.vlgmr.msra.gmra.mrb[12].mxu0 %v3090_v29  ;;  %3853 = vmatmul.mubr.bf16.vlgmr.msra.gmra.mrb[12].mxu1 %v3090_v29  ;;  %v7504_v29 = vld [vmem:[#allocation7 + $0x784] ss:$16 sps:$4 sm:$0xff]  }
 0x3cf   :  { %3778 = vmatpush1.bf16.msra.mxu0 %v7430_v37  ;;  %3864 = vmatpush1.bf16.msra.mxu1 %v7433_v39  ;;  %v7496_v37 = vld [vmem:[#allocation7 + $0x760] ss:$16 sps:$4 sm:$0xff]   ;;  %v7499_v39 = vld [vmem:[#allocation7 + $0x768] ss:$16 sps:$4 sm:$0xff]  }
 0x3d0   :  { %3809 = vmatprep.mubr.bf16.mxu0 %v3093_v33  ;;  %3895 = vmatprep.mubr.bf16.mxu1 %v3093_v33  ;;  %v7505_v33 = vld [vmem:[#allocation7 + $0x788] ss:$16 sps:$4 sm:$0xff]  }
 0x3d1   :  { %3779 = vmatprep.subr.bf16.mxu0 %v7438_v30  ;;  %3865 = vmatprep.subr.bf16.mxu1 %v7441_v40  ;;  %v7507_v30 = vld [vmem:[#allocation7 + $0x78c] ss:$16 sps:$4 sm:$0xff]   ;;  %v7502_v40 = vld [vmem:[#allocation7 + $0x780] ss:$16 sps:$4 sm:$0xff]  }
 0x3d3   :  { %3780 = vmatpush1.bf16.msra.mxu0 %v7436_v34  ;;  %3866 = vmatpush1.bf16.msra.mxu1 %v7439_v41  ;;  %v7510_v34 = vld [vmem:[#allocation7 + $0x7a4] ss:$16 sps:$4 sm:$0xff]   ;;  %v7513_v41 = vld [vmem:[#allocation7 + $0x7ac] ss:$16 sps:$4 sm:$0xff]  }
 0x3d4   :  { %3781 = vmatprep.subr.bf16.mxu0 %v7444_v38  ;;  %3867 = vmatprep.subr.bf16.mxu1 %v7447_v42  ;;  %v7508_v38 = vld [vmem:[#allocation7 + $0x7a0] ss:$16 sps:$4 sm:$0xff]   ;;  %v7511_v42 = vld [vmem:[#allocation7 + $0x7a8] ss:$16 sps:$4 sm:$0xff]  }
 0x3d7   :  { %3782 = vmatpush1.bf16.msra.mxu0 %v7442_v43  ;;  %3868 = vmatpush1.bf16.msra.mxu1 %v7445_v44  ;;  %v7516_v43 = vld [vmem:[#allocation7 + $0x7c4] ss:$16 sps:$4 sm:$0xff]   ;;  %v7519_v44 = vld [vmem:[#allocation7 + $0x7cc] ss:$16 sps:$4 sm:$0xff]  }
 0x3d8   :  { %3783 = vmatprep.subr.bf16.mxu0 %v7450_v45  ;;  %3869 = vmatprep.subr.bf16.mxu1 %v7453_v46  ;;  %v7514_v45 = vld [vmem:[#allocation7 + $0x7c0] ss:$16 sps:$4 sm:$0xff]   ;;  %v7517_v46 = vld [vmem:[#allocation7 + $0x7c8] ss:$16 sps:$4 sm:$0xff]  }
 0x3db   :  { %3784 = vmatpush1.bf16.msra.mxu0 %v7448_v49  ;;  %3870 = vmatpush1.bf16.msra.mxu1 %v7451_v12  ;;  %v3080_v49 = vmax.f32 %v8167_v9, 0.0  ;;  %v7522_v12 = vld [vmem:[#allocation7 + $0x7e4] ss:$16 sps:$4 sm:$0xff]   ;;  %v7526_v9 = vld [vmem:[#allocation5 + $0x800] ss:$16 sps:$4 sm:$0xff]  }
 0x3dc   :  { %3785 = vmatprep.subr.bf16.mxu0 %v7456_v2  ;;  %3871 = vmatprep.subr.bf16.mxu1 %v7459_v13  ;;  %v7525_v2 = vld [vmem:[#allocation7 + $0x7ec] ss:$16 sps:$4 sm:$0xff]   ;;  %v3076_v13 = vmax.f32 %v8165_v0, 0.0 }
 0x3df   :  { %3786 = vmatpush1.bf16.msra.mxu0 %v7454_v6  ;;  %3872 = vmatpush1.bf16.msra.mxu1 %v7457_v52  ;;  %v7520_v6 = vld [vmem:[#allocation7 + $0x7e0] ss:$16 sps:$4 sm:$0xff]   ;;  %v7523_v52 = vld [vmem:[#allocation7 + $0x7e8] ss:$16 sps:$4 sm:$0xff]  }
 0x3e0   :  { %3787 = vmatprep.subr.bf16.mxu0 %v7462_v53  ;;  %3873 = vmatprep.subr.bf16.mxu1 %v7465_v5  ;;  %v8196_v53 = vadd.f32 %v3080_v49, %v8120_v47  ;;  %v7528_v5 = vld [vmem:[#allocation5 + $0x804] ss:$16 sps:$4 sm:$0xff]   ;;  %v7532_v47 = vld [vmem:[#allocation5 + $0x820] ss:$16 sps:$4 sm:$0xff]   ;;  %v7591_v49 = vld [vmem:[#allocation5 + $0x94c] ss:$16 sps:$4 sm:$0xff]  }
 0x3e3   :  { %3788 = vmatpush1.bf16.msra.mxu0 %v7460_v24  ;;  %3874 = vmatpush1.bf16.msra.mxu1 %v7463_v59  ;;  %v7531_v24 = vld [vmem:[#allocation5 + $0x80c] ss:$16 sps:$4 sm:$0xff]   ;;  %v8199_v59 = vadd.f32 %v3076_v13, %v8123_v50  ;;  %v7540_v50 = vld [vmem:[#allocation5 + $0x844] ss:$16 sps:$4 sm:$0xff]  }
 0x3e4   :  { %3789 = vmatprep.subr.bf16.mxu0 %v7468_v54  ;;  %3875 = vmatprep.subr.bf16.mxu1 %v7471_v16  ;;  %v7529_v54 = vld [vmem:[#allocation5 + $0x808] ss:$16 sps:$4 sm:$0xff]   ;;  %v7534_v16 = vld [vmem:[#allocation5 + $0x824] ss:$16 sps:$4 sm:$0xff]  }
 0x3e5   :  { %v3092_v0 = vpack.c.bf16 %v8196_v53, %v8199_v59  ;;  %v7594_v13 = vld [vmem:[#allocation5 + $0x964] ss:$16 sps:$4 sm:$0xff]  }
 0x3e7   :  { %3790 = vmatpush1.bf16.msra.mxu0 %v7466_v55  ;;  %3876 = vmatpush1.bf16.msra.mxu1 %v7469_v56  ;;  %v7537_v55 = vld [vmem:[#allocation5 + $0x82c] ss:$16 sps:$4 sm:$0xff]   ;;  %v7535_v56 = vld [vmem:[#allocation5 + $0x828] ss:$16 sps:$4 sm:$0xff]  }
 0x3e8   :  { %3791 = vmatprep.subr.bf16.mxu0 %v7474_v57  ;;  %3877 = vmatprep.subr.bf16.mxu1 %v7477_v58  ;;  %v7543_v57 = vld [vmem:[#allocation5 + $0x84c] ss:$16 sps:$4 sm:$0xff]   ;;  %v7538_v58 = vld [vmem:[#allocation5 + $0x840] ss:$16 sps:$4 sm:$0xff]  }
 0x3eb   :  { %3792 = vmatpush1.bf16.msra.mxu0 %v7472_v60  ;;  %3878 = vmatpush1.bf16.msra.mxu1 %v7475_v61  ;;  %v7541_v60 = vld [vmem:[#allocation5 + $0x848] ss:$16 sps:$4 sm:$0xff]   ;;  %v7546_v61 = vld [vmem:[#allocation5 + $0x864] ss:$16 sps:$4 sm:$0xff]  }
 0x3ec   :  { %3793 = vmatprep.subr.bf16.mxu0 %v7480_v62  ;;  %3879 = vmatprep.subr.bf16.mxu1 %v7483_v63  ;;  %v7549_v62 = vld [vmem:[#allocation5 + $0x86c] ss:$16 sps:$4 sm:$0xff]   ;;  %v7544_v63 = vld [vmem:[#allocation5 + $0x860] ss:$16 sps:$4 sm:$0xff]  }
 0x3ef   :  { %3794 = vmatpush1.bf16.msra.mxu0 %v7478_v1  ;;  %3880 = vmatpush1.bf16.msra.mxu1 %v7481_v3  ;;  %v7547_v1 = vld [vmem:[#allocation5 + $0x868] ss:$16 sps:$4 sm:$0xff]   ;;  %v7552_v3 = vld [vmem:[#allocation5 + $0x884] ss:$16 sps:$4 sm:$0xff]  }
 0x3f0   :  { %3795 = vmatprep.subr.bf16.mxu0 %v7486_v4  ;;  %3881 = vmatprep.subr.bf16.mxu1 %v7489_v7  ;;  %v7555_v4 = vld [vmem:[#allocation5 + $0x88c] ss:$16 sps:$4 sm:$0xff]   ;;  %v7550_v7 = vld [vmem:[#allocation5 + $0x880] ss:$16 sps:$4 sm:$0xff]  }
 0x3f3   :  { %3796 = vmatpush1.bf16.msra.mxu0 %v7484_v10  ;;  %3882 = vmatpush1.bf16.msra.mxu1 %v7487_v18  ;;  %v7553_v10 = vld [vmem:[#allocation5 + $0x888] ss:$16 sps:$4 sm:$0xff]   ;;  %v7558_v18 = vld [vmem:[#allocation5 + $0x8a4] ss:$16 sps:$4 sm:$0xff]  }
 0x3f4   :  { %3797 = vmatprep.subr.bf16.mxu0 %v7492_v19  ;;  %3883 = vmatprep.subr.bf16.mxu1 %v7495_v20  ;;  %v7561_v19 = vld [vmem:[#allocation5 + $0x8ac] ss:$16 sps:$4 sm:$0xff]   ;;  %v7556_v20 = vld [vmem:[#allocation5 + $0x8a0] ss:$16 sps:$4 sm:$0xff]  }
 0x3f7   :  { %3798 = vmatpush1.bf16.msra.mxu0 %v7490_v22  ;;  %3884 = vmatpush1.bf16.msra.mxu1 %v7493_v23  ;;  %v7559_v22 = vld [vmem:[#allocation5 + $0x8a8] ss:$16 sps:$4 sm:$0xff]   ;;  %v7564_v23 = vld [vmem:[#allocation5 + $0x8c4] ss:$16 sps:$4 sm:$0xff]  }
 0x3f8   :  { %3799 = vmatprep.subr.bf16.mxu0 %v7498_v25  ;;  %3885 = vmatprep.subr.bf16.mxu1 %v7501_v36  ;;  %v7567_v25 = vld [vmem:[#allocation5 + $0x8cc] ss:$16 sps:$4 sm:$0xff]   ;;  %v7562_v36 = vld [vmem:[#allocation5 + $0x8c0] ss:$16 sps:$4 sm:$0xff]  }
 0x3fb   :  { %3800 = vmatpush1.bf16.msra.mxu0 %v7496_v37  ;;  %3886 = vmatpush1.bf16.msra.mxu1 %v7499_v39  ;;  %v7565_v37 = vld [vmem:[#allocation5 + $0x8c8] ss:$16 sps:$4 sm:$0xff]   ;;  %v7570_v39 = vld [vmem:[#allocation5 + $0x8e4] ss:$16 sps:$4 sm:$0xff]  }
 0x3fc   :  { %3801 = vmatprep.subr.bf16.mxu0 %v7504_v29  ;;  %3887 = vmatprep.subr.bf16.mxu1 %v7507_v30  ;;  %v7573_v29 = vld [vmem:[#allocation5 + $0x8ec] ss:$16 sps:$4 sm:$0xff]   ;;  %v7568_v30 = vld [vmem:[#allocation5 + $0x8e0] ss:$16 sps:$4 sm:$0xff]  }
 0x3ff   :  { %3802 = vmatpush1.bf16.msra.mxu0 %v7502_v40  ;;  %3888 = vmatpush1.bf16.msra.mxu1 %v7505_v33  ;;  %v7571_v40 = vld [vmem:[#allocation5 + $0x8e8] ss:$16 sps:$4 sm:$0xff]   ;;  %v7576_v33 = vld [vmem:[#allocation5 + $0x904] ss:$16 sps:$4 sm:$0xff]  }
 0x400   :  { %3803 = vmatprep.subr.bf16.mxu0 %v7510_v34  ;;  %3889 = vmatprep.subr.bf16.mxu1 %v7513_v41  ;;  %v7579_v34 = vld [vmem:[#allocation5 + $0x90c] ss:$16 sps:$4 sm:$0xff]   ;;  %v7574_v41 = vld [vmem:[#allocation5 + $0x900] ss:$16 sps:$4 sm:$0xff]  }
 0x403   :  { %3804 = vmatpush1.bf16.msra.mxu0 %v7508_v38  ;;  %3890 = vmatpush1.bf16.msra.mxu1 %v7511_v42  ;;  %v7577_v38 = vld [vmem:[#allocation5 + $0x908] ss:$16 sps:$4 sm:$0xff]   ;;  %v7582_v42 = vld [vmem:[#allocation5 + $0x924] ss:$16 sps:$4 sm:$0xff]  }
 0x404   :  { %3805 = vmatprep.subr.bf16.mxu0 %v7516_v43  ;;  %3891 = vmatprep.subr.bf16.mxu1 %v7519_v44  ;;  %v7585_v43 = vld [vmem:[#allocation5 + $0x92c] ss:$16 sps:$4 sm:$0xff]   ;;  %v7580_v44 = vld [vmem:[#allocation5 + $0x920] ss:$16 sps:$4 sm:$0xff]  }
 0x407   :  { %3806 = vmatpush1.bf16.msra.mxu0 %v7514_v45  ;;  %3892 = vmatpush1.bf16.msra.mxu1 %v7517_v46  ;;  %v7583_v45 = vld [vmem:[#allocation5 + $0x928] ss:$16 sps:$4 sm:$0xff]   ;;  %v7588_v46 = vld [vmem:[#allocation5 + $0x944] ss:$16 sps:$4 sm:$0xff]  }
 0x408   :  { %3807 = vmatprep.subr.bf16.mxu0 %v7522_v12  ;;  %3893 = vmatprep.subr.bf16.mxu1 %v7525_v2  ;;  %v7586_v12 = vld [vmem:[#allocation5 + $0x940] ss:$16 sps:$4 sm:$0xff]   ;;  %v7589_v2 = vld [vmem:[#allocation5 + $0x948] ss:$16 sps:$4 sm:$0xff]  }
 0x40b   :  { %3808 = vmatpush1.bf16.msra.mxu0 %v7520_v6  ;;  %3894 = vmatpush1.bf16.msra.mxu1 %v7523_v52  ;;  %v7597_v6 = vld [vmem:[#allocation5 + $0x96c] ss:$16 sps:$4 sm:$0xff]   ;;  %v7592_v52 = vld [vmem:[#allocation5 + $0x960] ss:$16 sps:$4 sm:$0xff]  }
 0x40c   :  { %4824 = vmatprep.subr.bf16.mxu0 %v7528_v5  ;;  %4910 = vmatprep.subr.bf16.mxu1 %v7531_v24  ;;  %v7595_v5 = vld [vmem:[#allocation5 + $0x968] ss:$16 sps:$4 sm:$0xff]   ;;  %v7600_v24 = vld [vmem:[#allocation5 + $0x984] ss:$16 sps:$4 sm:$0xff]  }
 0x40e   :  { %3810 = vmatmul.mubr.bf16.vlgmr.msra.gmra.mrb[12].mxu0 %v3092_v0  ;;  %3896 = vmatmul.mubr.bf16.vlgmr.msra.gmra.mrb[12].mxu1 %v3092_v0  ;;  %v7601_v0 = vld [vmem:[#allocation5 + $0x988] ss:$16 sps:$4 sm:$0xff]  }
 0x40f   :  { %4825 = vmatpush1.bf16.msra.mxu0 %v7526_v9  ;;  %4911 = vmatpush1.bf16.msra.mxu1 %v7529_v54  ;;  %v7603_v9 = vld [vmem:[#allocation5 + $0x98c] ss:$16 sps:$4 sm:$0xff]   ;;  %v7598_v54 = vld [vmem:[#allocation5 + $0x980] ss:$16 sps:$4 sm:$0xff]  }
 0x410   :  { %4826 = vmatprep.subr.bf16.mxu0 %v7534_v16  ;;  %4912 = vmatprep.subr.bf16.mxu1 %v7537_v55  ;;  %v7606_v16 = vld [vmem:[#allocation5 + $0x9a4] ss:$16 sps:$4 sm:$0xff]   ;;  %v7609_v55 = vld [vmem:[#allocation5 + $0x9ac] ss:$16 sps:$4 sm:$0xff]  }
 0x413   :  { %4827 = vmatpush1.bf16.msra.mxu0 %v7532_v47  ;;  %4913 = vmatpush1.bf16.msra.mxu1 %v7535_v56  ;;  %v7604_v47 = vld [vmem:[#allocation5 + $0x9a0] ss:$16 sps:$4 sm:$0xff]   ;;  %v7607_v56 = vld [vmem:[#allocation5 + $0x9a8] ss:$16 sps:$4 sm:$0xff]  }
 0x414   :  { %4828 = vmatprep.subr.bf16.mxu0 %v7540_v50  ;;  %4914 = vmatprep.subr.bf16.mxu1 %v7543_v57  ;;  %v7612_v50 = vld [vmem:[#allocation5 + $0x9c4] ss:$16 sps:$4 sm:$0xff]   ;;  %v7615_v57 = vld [vmem:[#allocation5 + $0x9cc] ss:$16 sps:$4 sm:$0xff]  }
 0x417   :  { %4829 = vmatpush1.bf16.msra.mxu0 %v7538_v58  ;;  %4915 = vmatpush1.bf16.msra.mxu1 %v7541_v60  ;;  %v7610_v58 = vld [vmem:[#allocation5 + $0x9c0] ss:$16 sps:$4 sm:$0xff]   ;;  %v7613_v60 = vld [vmem:[#allocation5 + $0x9c8] ss:$16 sps:$4 sm:$0xff]  }
 0x418   :  { %4830 = vmatprep.subr.bf16.mxu0 %v7546_v61  ;;  %4916 = vmatprep.subr.bf16.mxu1 %v7549_v62  ;;  %v7618_v61 = vld [vmem:[#allocation5 + $0x9e4] ss:$16 sps:$4 sm:$0xff]   ;;  %v7621_v62 = vld [vmem:[#allocation5 + $0x9ec] ss:$16 sps:$4 sm:$0xff]  }
 0x41b   :  { %4831 = vmatpush1.bf16.msra.mxu0 %v7544_v63  ;;  %4917 = vmatpush1.bf16.msra.mxu1 %v7547_v1  ;;  %v7616_v63 = vld [vmem:[#allocation5 + $0x9e0] ss:$16 sps:$4 sm:$0xff]   ;;  %v7619_v1 = vld [vmem:[#allocation5 + $0x9e8] ss:$16 sps:$4 sm:$0xff]  }
 0x41c   :  { %4832 = vmatprep.subr.bf16.mxu0 %v7552_v3  ;;  %4918 = vmatprep.subr.bf16.mxu1 %v7555_v4  ;;  %v7624_v3 = vld [vmem:[#allocation5 + $0xa04] ss:$16 sps:$4 sm:$0xff]   ;;  %v7627_v4 = vld [vmem:[#allocation5 + $0xa0c] ss:$16 sps:$4 sm:$0xff]  }
 0x41f   :  { %4833 = vmatpush1.bf16.msra.mxu0 %v7550_v7  ;;  %4919 = vmatpush1.bf16.msra.mxu1 %v7553_v10 }
 0x420   :  { %4834 = vmatprep.subr.bf16.mxu0 %v7558_v18  ;;  %4920 = vmatprep.subr.bf16.mxu1 %v7561_v19 }
 0x423   :  { %4835 = vmatpush1.bf16.msra.mxu0 %v7556_v20  ;;  %4921 = vmatpush1.bf16.msra.mxu1 %v7559_v22 }
 0x424   :  { %4836 = vmatprep.subr.bf16.mxu0 %v7564_v23  ;;  %4922 = vmatprep.subr.bf16.mxu1 %v7567_v25 }
 0x427   :  { %4837 = vmatpush1.bf16.msra.mxu0 %v7562_v36  ;;  %4923 = vmatpush1.bf16.msra.mxu1 %v7565_v37 }
 0x428   :  { %4838 = vmatprep.subr.bf16.mxu0 %v7570_v39  ;;  %4924 = vmatprep.subr.bf16.mxu1 %v7573_v29 }
 0x42b   :  { %4839 = vmatpush1.bf16.msra.mxu0 %v7568_v30  ;;  %4925 = vmatpush1.bf16.msra.mxu1 %v7571_v40 }
 0x42c   :  { %4840 = vmatprep.subr.bf16.mxu0 %v7576_v33  ;;  %4926 = vmatprep.subr.bf16.mxu1 %v7579_v34 }
 0x42f   :  { %4841 = vmatpush1.bf16.msra.mxu0 %v7574_v41  ;;  %4927 = vmatpush1.bf16.msra.mxu1 %v7577_v38 }
 0x430   :  { %4842 = vmatprep.subr.bf16.mxu0 %v7582_v42  ;;  %4928 = vmatprep.subr.bf16.mxu1 %v7585_v43 }
 0x433   :  { %4843 = vmatpush1.bf16.msra.mxu0 %v7580_v44  ;;  %4929 = vmatpush1.bf16.msra.mxu1 %v7583_v45  ;;  %v7622_v44 = vld [vmem:[#allocation5 + $0xa00] ss:$16 sps:$4 sm:$0xff]   ;;  %v7625_v45 = vld [vmem:[#allocation5 + $0xa08] ss:$16 sps:$4 sm:$0xff]  }
 0x434   :  { %4844 = vmatprep.subr.bf16.mxu0 %v7588_v46  ;;  %4930 = vmatprep.subr.bf16.mxu1 %v7591_v49  ;;  %v7633_v46 = vld [vmem:[#allocation5 + $0xa2c] ss:$16 sps:$4 sm:$0xff]   ;;  %v7631_v49 = vld [vmem:[#allocation5 + $0xa28] ss:$16 sps:$4 sm:$0xff]  }
 0x437   :  { %4845 = vmatpush1.bf16.msra.mxu0 %v7586_v12  ;;  %4931 = vmatpush1.bf16.msra.mxu1 %v7589_v2  ;;  %v7639_v12 = vld [vmem:[#allocation5 + $0xa4c] ss:$16 sps:$4 sm:$0xff]   ;;  %v7634_v2 = vld [vmem:[#allocation5 + $0xa40] ss:$16 sps:$4 sm:$0xff]  }
 0x438   :  { %4846 = vmatprep.subr.bf16.mxu0 %v7594_v13  ;;  %4932 = vmatprep.subr.bf16.mxu1 %v7597_v6  ;;  %v7637_v13 = vld [vmem:[#allocation5 + $0xa48] ss:$16 sps:$4 sm:$0xff]   ;;  %v7642_v6 = vld [vmem:[#allocation5 + $0xa64] ss:$16 sps:$4 sm:$0xff]  }
 0x43b   :  { %4847 = vmatpush1.bf16.msra.mxu0 %v7592_v52  ;;  %4933 = vmatpush1.bf16.msra.mxu1 %v7595_v5  ;;  %v7645_v52 = vld [vmem:[#allocation5 + $0xa6c] ss:$16 sps:$4 sm:$0xff]   ;;  %v7640_v5 = vld [vmem:[#allocation5 + $0xa60] ss:$16 sps:$4 sm:$0xff]  }
 0x43c   :  { %4848 = vmatprep.subr.bf16.mxu0 %v7600_v24  ;;  %4934 = vmatprep.subr.bf16.mxu1 %v7603_v9  ;;  %v7643_v24 = vld [vmem:[#allocation5 + $0xa68] ss:$16 sps:$4 sm:$0xff]   ;;  %v7648_v9 = vld [vmem:[#allocation5 + $0xa84] ss:$16 sps:$4 sm:$0xff]  }
 0x43f   :  { %4849 = vmatpush1.bf16.msra.mxu0 %v7598_v54  ;;  %4935 = vmatpush1.bf16.msra.mxu1 %v7601_v0  ;;  %v7651_v54 = vld [vmem:[#allocation5 + $0xa8c] ss:$16 sps:$4 sm:$0xff]   ;;  %v7646_v0 = vld [vmem:[#allocation5 + $0xa80] ss:$16 sps:$4 sm:$0xff]  }
 0x440   :  { %4850 = vmatprep.subr.bf16.mxu0 %v7606_v16  ;;  %4936 = vmatprep.subr.bf16.mxu1 %v7609_v55  ;;  %v7649_v16 = vld [vmem:[#allocation5 + $0xa88] ss:$16 sps:$4 sm:$0xff]   ;;  %v7654_v55 = vld [vmem:[#allocation5 + $0xaa4] ss:$16 sps:$4 sm:$0xff]  }
 0x443   :  { %4851 = vmatpush1.bf16.msra.mxu0 %v7604_v47  ;;  %4937 = vmatpush1.bf16.msra.mxu1 %v7607_v56  ;;  %v7657_v47 = vld [vmem:[#allocation5 + $0xaac] ss:$16 sps:$4 sm:$0xff]   ;;  %v7652_v56 = vld [vmem:[#allocation5 + $0xaa0] ss:$16 sps:$4 sm:$0xff]  }
 0x444   :  { %4852 = vmatprep.subr.bf16.mxu0 %v7612_v50  ;;  %4938 = vmatprep.subr.bf16.mxu1 %v7615_v57  ;;  %v7655_v50 = vld [vmem:[#allocation5 + $0xaa8] ss:$16 sps:$4 sm:$0xff]   ;;  %v7660_v57 = vld [vmem:[#allocation5 + $0xac4] ss:$16 sps:$4 sm:$0xff]  }
 0x447   :  { %4853 = vmatpush1.bf16.msra.mxu0 %v7610_v58  ;;  %4939 = vmatpush1.bf16.msra.mxu1 %v7613_v60  ;;  %v7663_v58 = vld [vmem:[#allocation5 + $0xacc] ss:$16 sps:$4 sm:$0xff]   ;;  %v7658_v60 = vld [vmem:[#allocation5 + $0xac0] ss:$16 sps:$4 sm:$0xff]  }
 0x448   :  { %4854 = vmatprep.subr.bf16.mxu0 %v7618_v61  ;;  %4940 = vmatprep.subr.bf16.mxu1 %v7621_v62  ;;  %v7661_v61 = vld [vmem:[#allocation5 + $0xac8] ss:$16 sps:$4 sm:$0xff]   ;;  %v7666_v62 = vld [vmem:[#allocation5 + $0xae4] ss:$16 sps:$4 sm:$0xff]  }
 0x44b   :  { %4855 = vmatpush1.bf16.msra.mxu0 %v7616_v63  ;;  %4941 = vmatpush1.bf16.msra.mxu1 %v7619_v1  ;;  %v7669_v63 = vld [vmem:[#allocation5 + $0xaec] ss:$16 sps:$4 sm:$0xff]   ;;  %v7664_v1 = vld [vmem:[#allocation5 + $0xae0] ss:$16 sps:$4 sm:$0xff]  }
 0x44c   :  { %4867 = vmatprep.subr.bf16.mxu0 %v7624_v3  ;;  %4953 = vmatprep.subr.bf16.mxu1 %v7627_v4  ;;  %v7667_v3 = vld [vmem:[#allocation5 + $0xae8] ss:$16 sps:$4 sm:$0xff]   ;;  %v7672_v4 = vld [vmem:[#allocation5 + $0xb04] ss:$16 sps:$4 sm:$0xff]  }
 0x4e1   :  { %v3811_v7 = vpop.f32.mrb[12].mxu0  ;;  %v8203_v10 = vpop.f32.mrb[12].mxu1 }
 0x4e2   :  { %v3813_v18 = vpop.f32.mrb[13].mxu0  ;;  %v3899_v19 = vpop.f32.mrb[13].mxu1  ;;  %v3906_v25 = vmax.f32 %v3811_v7, 0.0  ;;  %v7675_v7 = vld [vmem:[#allocation5 + $0xb0c] ss:$16 sps:$4 sm:$0xff]  }
 0x4e3   :  { %v3907_v20 = vmax.f32 %v3813_v18, 0.0  ;;  %v3815_v22 = vpop.f32.mrb[14].mxu0  ;;  %v8205_v23 = vpop.f32.mrb[14].mxu1  ;;  %v3909_v40 = vmax.f32 %v3899_v19, 0.0  ;;  %v7670_v18 = vld [vmem:[#allocation5 + $0xb00] ss:$16 sps:$4 sm:$0xff]  }
 0x4e4   :  { %v3910_v36 = vmax.f32 %v3815_v22, 0.0  ;;  %v3817_v37 = vpop.f32.mrb[15].mxu0  ;;  %v3903_v39 = vpop.f32.mrb[15].mxu1  ;;  %v8217_v38 = vadd.f32 %v3906_v25, %v8143_v15  ;;  %v7673_v19 = vld [vmem:[#allocation5 + $0xb08] ss:$16 sps:$4 sm:$0xff]  }
 0x4e5   :  { %v3911_v29 = vmax.f32 %v3817_v37, 0.0  ;;  %v3913_v30 = vmax.f32 %v3903_v39, 0.0  ;;  %v8211_v34 = vadd.f32 %v3907_v20, %v8139_v11  ;;  %v7678_v20 = vld [vmem:[#allocation5 + $0xb24] ss:$16 sps:$4 sm:$0xff]   ;;  %v7681_v22 = vld [vmem:[#allocation5 + $0xb2c] ss:$16 sps:$4 sm:$0xff]  }
 0x4e6   :  { %v8208_v33 = vadd.f32 %v3910_v36, %v8137_v8  ;;  %v8225_v8 = vadd.f32 %v3909_v40, %v8149_v21  ;;  %v7636_v21 = vld [vmem:[#allocation5 + $0xa44] ss:$16 sps:$4 sm:$0xff]   ;;  %v7676_v25 = vld [vmem:[#allocation5 + $0xb20] ss:$16 sps:$4 sm:$0xff]   ;;  %v7679_v36 = vld [vmem:[#allocation5 + $0xb28] ss:$16 sps:$4 sm:$0xff]  }
 0x4e7   :  { %v8214_v41 = vadd.f32 %v3911_v29, %v8141_v14  ;;  %v8220_v42 = vadd.f32 %v3913_v30, %v8145_v17  ;;  %v7630_v14 = vld [vmem:[#allocation5 + $0xa24] ss:$16 sps:$4 sm:$0xff]   ;;  %v7628_v17 = vld [vmem:[#allocation5 + $0xa20] ss:$16 sps:$4 sm:$0xff]   ;;  %v7687_v39 = vld [vmem:[#allocation5 + $0xb4c] ss:$16 sps:$4 sm:$0xff]  }
 0x4e8   :  { %v4180_v11 = vpack.c.bf16 %v8208_v33, %v8217_v38  ;;  %v7684_v37 = vld [vmem:[#allocation5 + $0xb44] ss:$16 sps:$4 sm:$0xff]   ;;  %v7682_v29 = vld [vmem:[#allocation5 + $0xb40] ss:$16 sps:$4 sm:$0xff]   ;;  %v7685_v30 = vld [vmem:[#allocation5 + $0xb48] ss:$16 sps:$4 sm:$0xff]  }
 0x4e9   :  { %v4181_v43 = vpack.c.bf16 %v8214_v41, %v8211_v34  ;;  %v4183_v15 = vpack.c.bf16 %v8220_v42, %v8225_v8  ;;  %v7690_v40 = vld [vmem:[#allocation5 + $0xb64] ss:$16 sps:$4 sm:$0xff]  }
 0x4eb   :  { %4856 = vmatprep.mubr.bf16.mxu0 %v4181_v43  ;;  %4942 = vmatprep.mubr.bf16.mxu1 %v4181_v43  ;;  %v7693_v43 = vld [vmem:[#allocation5 + $0xb6c] ss:$16 sps:$4 sm:$0xff]  }
 0x4ec   :  { %4857 = vmatmul.mubr.bf16.vlgmr.msra.gmra.mrb[16].mxu0 %v4180_v11  ;;  %4943 = vmatmul.mubr.bf16.vlgmr.msra.gmra.mrb[16].mxu1 %v4180_v11  ;;  %v7696_v11 = vld [vmem:[#allocation5 + $0xb84] ss:$16 sps:$4 sm:$0xff]  }
 0x4ed   :  { %4868 = vmatpush1.bf16.msra.mxu0 %v7622_v44  ;;  %4954 = vmatpush1.bf16.msra.mxu1 %v7625_v45  ;;  %v7688_v44 = vld [vmem:[#allocation5 + $0xb60] ss:$16 sps:$4 sm:$0xff]   ;;  %v7691_v45 = vld [vmem:[#allocation5 + $0xb68] ss:$16 sps:$4 sm:$0xff]  }
 0x4ee   :  { %4899 = vmatprep.mubr.bf16.mxu0 %v4183_v15  ;;  %4985 = vmatprep.mubr.bf16.mxu1 %v4183_v15  ;;  %v7697_v15 = vld [vmem:[#allocation5 + $0xb88] ss:$16 sps:$4 sm:$0xff]  }
 0x4ef   :  { %4869 = vmatprep.subr.bf16.mxu0 %v7630_v14  ;;  %4955 = vmatprep.subr.bf16.mxu1 %v7633_v46  ;;  %v7699_v14 = vld [vmem:[#allocation5 + $0xb8c] ss:$16 sps:$4 sm:$0xff]   ;;  %v7694_v46 = vld [vmem:[#allocation5 + $0xb80] ss:$16 sps:$4 sm:$0xff]  }
 0x4f1   :  { %4870 = vmatpush1.bf16.msra.mxu0 %v7628_v17  ;;  %4956 = vmatpush1.bf16.msra.mxu1 %v7631_v49  ;;  %v7702_v17 = vld [vmem:[#allocation5 + $0xba4] ss:$16 sps:$4 sm:$0xff]   ;;  %v7705_v49 = vld [vmem:[#allocation5 + $0xbac] ss:$16 sps:$4 sm:$0xff]  }
 0x4f2   :  { %4871 = vmatprep.subr.bf16.mxu0 %v7636_v21  ;;  %4957 = vmatprep.subr.bf16.mxu1 %v7639_v12  ;;  %v7700_v21 = vld [vmem:[#allocation5 + $0xba0] ss:$16 sps:$4 sm:$0xff]   ;;  %v7703_v12 = vld [vmem:[#allocation5 + $0xba8] ss:$16 sps:$4 sm:$0xff]  }
 0x4f5   :  { %4872 = vmatpush1.bf16.msra.mxu0 %v7634_v2  ;;  %4958 = vmatpush1.bf16.msra.mxu1 %v7637_v13  ;;  %v7708_v2 = vld [vmem:[#allocation5 + $0xbc4] ss:$16 sps:$4 sm:$0xff]   ;;  %v7711_v13 = vld [vmem:[#allocation5 + $0xbcc] ss:$16 sps:$4 sm:$0xff]  }
 0x4f6   :  { %4873 = vmatprep.subr.bf16.mxu0 %v7642_v6  ;;  %4959 = vmatprep.subr.bf16.mxu1 %v7645_v52  ;;  %v7706_v6 = vld [vmem:[#allocation5 + $0xbc0] ss:$16 sps:$4 sm:$0xff]   ;;  %v7709_v52 = vld [vmem:[#allocation5 + $0xbc8] ss:$16 sps:$4 sm:$0xff]  }
 0x4f9   :  { %4874 = vmatpush1.bf16.msra.mxu0 %v7640_v5  ;;  %4960 = vmatpush1.bf16.msra.mxu1 %v7643_v24  ;;  %v3912_v5 = vmax.f32 %v8205_v23, 0.0  ;;  %v7714_v24 = vld [vmem:[#allocation5 + $0xbe4] ss:$16 sps:$4 sm:$0xff]   ;;  %v7718_v23 = vld [vmem:[#allocation7 + $0x800] ss:$16 sps:$4 sm:$0xff]  }
 0x4fa   :  { %4875 = vmatprep.subr.bf16.mxu0 %v7648_v9  ;;  %4961 = vmatprep.subr.bf16.mxu1 %v7651_v54  ;;  %v7717_v9 = vld [vmem:[#allocation5 + $0xbec] ss:$16 sps:$4 sm:$0xff]   ;;  %v3908_v54 = vmax.f32 %v8203_v10, 0.0 }
 0x4fd   :  { %4876 = vmatpush1.bf16.msra.mxu0 %v7646_v0  ;;  %4962 = vmatpush1.bf16.msra.mxu1 %v7649_v16  ;;  %v7712_v0 = vld [vmem:[#allocation5 + $0xbe0] ss:$16 sps:$4 sm:$0xff]   ;;  %v7715_v16 = vld [vmem:[#allocation5 + $0xbe8] ss:$16 sps:$4 sm:$0xff]  }
 0x4fe   :  { %4877 = vmatprep.subr.bf16.mxu0 %v7654_v55  ;;  %4963 = vmatprep.subr.bf16.mxu1 %v7657_v47  ;;  %v8234_v55 = vadd.f32 %v3912_v5, %v8158_v48  ;;  %v7720_v47 = vld [vmem:[#allocation7 + $0x804] ss:$16 sps:$4 sm:$0xff]   ;;  %v7724_v48 = vld [vmem:[#allocation7 + $0x820] ss:$16 sps:$4 sm:$0xff]   ;;  %v7783_v5 = vld [vmem:[#allocation7 + $0x94c] ss:$16 sps:$4 sm:$0xff]  }
 0x501   :  { %4878 = vmatpush1.bf16.msra.mxu0 %v7652_v56  ;;  %4964 = vmatpush1.bf16.msra.mxu1 %v7655_v50  ;;  %v7723_v56 = vld [vmem:[#allocation7 + $0x80c] ss:$16 sps:$4 sm:$0xff]   ;;  %v8237_v50 = vadd.f32 %v3908_v54, %v8161_v51  ;;  %v7732_v51 = vld [vmem:[#allocation7 + $0x844] ss:$16 sps:$4 sm:$0xff]  }
 0x502   :  { %4879 = vmatprep.subr.bf16.mxu0 %v7660_v57  ;;  %4965 = vmatprep.subr.bf16.mxu1 %v7663_v58  ;;  %v7721_v57 = vld [vmem:[#allocation7 + $0x808] ss:$16 sps:$4 sm:$0xff]   ;;  %v7726_v58 = vld [vmem:[#allocation7 + $0x824] ss:$16 sps:$4 sm:$0xff]  }
 0x503   :  { %v4182_v10 = vpack.c.bf16 %v8234_v55, %v8237_v50  ;;  %v7786_v54 = vld [vmem:[#allocation7 + $0x964] ss:$16 sps:$4 sm:$0xff]  }
 0x505   :  { %4880 = vmatpush1.bf16.msra.mxu0 %v7658_v60  ;;  %4966 = vmatpush1.bf16.msra.mxu1 %v7661_v61  ;;  %v7729_v60 = vld [vmem:[#allocation7 + $0x82c] ss:$16 sps:$4 sm:$0xff]   ;;  %v7727_v61 = vld [vmem:[#allocation7 + $0x828] ss:$16 sps:$4 sm:$0xff]  }
 0x506   :  { %4881 = vmatprep.subr.bf16.mxu0 %v7666_v62  ;;  %4967 = vmatprep.subr.bf16.mxu1 %v7669_v63  ;;  %v7735_v62 = vld [vmem:[#allocation7 + $0x84c] ss:$16 sps:$4 sm:$0xff]   ;;  %v7730_v63 = vld [vmem:[#allocation7 + $0x840] ss:$16 sps:$4 sm:$0xff]  }
 0x509   :  { %4882 = vmatpush1.bf16.msra.mxu0 %v7664_v1  ;;  %4968 = vmatpush1.bf16.msra.mxu1 %v7667_v3  ;;  %v7733_v1 = vld [vmem:[#allocation7 + $0x848] ss:$16 sps:$4 sm:$0xff]   ;;  %v7738_v3 = vld [vmem:[#allocation7 + $0x864] ss:$16 sps:$4 sm:$0xff]  }
 0x50a   :  { %4883 = vmatprep.subr.bf16.mxu0 %v7672_v4  ;;  %4969 = vmatprep.subr.bf16.mxu1 %v7675_v7  ;;  %v7741_v4 = vld [vmem:[#allocation7 + $0x86c] ss:$16 sps:$4 sm:$0xff]   ;;  %v7736_v7 = vld [vmem:[#allocation7 + $0x860] ss:$16 sps:$4 sm:$0xff]  }
 0x50d   :  { %4884 = vmatpush1.bf16.msra.mxu0 %v7670_v18  ;;  %4970 = vmatpush1.bf16.msra.mxu1 %v7673_v19  ;;  %v7739_v18 = vld [vmem:[#allocation7 + $0x868] ss:$16 sps:$4 sm:$0xff]   ;;  %v7744_v19 = vld [vmem:[#allocation7 + $0x884] ss:$16 sps:$4 sm:$0xff]  }
 0x50e   :  { %4885 = vmatprep.subr.bf16.mxu0 %v7678_v20  ;;  %4971 = vmatprep.subr.bf16.mxu1 %v7681_v22  ;;  %v7747_v20 = vld [vmem:[#allocation7 + $0x88c] ss:$16 sps:$4 sm:$0xff]   ;;  %v7742_v22 = vld [vmem:[#allocation7 + $0x880] ss:$16 sps:$4 sm:$0xff]  }
 0x511   :  { %4886 = vmatpush1.bf16.msra.mxu0 %v7676_v25  ;;  %4972 = vmatpush1.bf16.msra.mxu1 %v7679_v36  ;;  %v7745_v25 = vld [vmem:[#allocation7 + $0x888] ss:$16 sps:$4 sm:$0xff]   ;;  %v7750_v36 = vld [vmem:[#allocation7 + $0x8a4] ss:$16 sps:$4 sm:$0xff]  }
 0x512   :  { %4887 = vmatprep.subr.bf16.mxu0 %v7684_v37  ;;  %4973 = vmatprep.subr.bf16.mxu1 %v7687_v39  ;;  %v7753_v37 = vld [vmem:[#allocation7 + $0x8ac] ss:$16 sps:$4 sm:$0xff]   ;;  %v7748_v39 = vld [vmem:[#allocation7 + $0x8a0] ss:$16 sps:$4 sm:$0xff]  }
 0x515   :  { %4888 = vmatpush1.bf16.msra.mxu0 %v7682_v29  ;;  %4974 = vmatpush1.bf16.msra.mxu1 %v7685_v30  ;;  %v7751_v29 = vld [vmem:[#allocation7 + $0x8a8] ss:$16 sps:$4 sm:$0xff]   ;;  %v7756_v30 = vld [vmem:[#allocation7 + $0x8c4] ss:$16 sps:$4 sm:$0xff]  }
 0x516   :  { %4889 = vmatprep.subr.bf16.mxu0 %v7690_v40  ;;  %4975 = vmatprep.subr.bf16.mxu1 %v7693_v43  ;;  %v7759_v40 = vld [vmem:[#allocation7 + $0x8cc] ss:$16 sps:$4 sm:$0xff]   ;;  %v7754_v43 = vld [vmem:[#allocation7 + $0x8c0] ss:$16 sps:$4 sm:$0xff]  }
 0x519   :  { %4890 = vmatpush1.bf16.msra.mxu0 %v7688_v44  ;;  %4976 = vmatpush1.bf16.msra.mxu1 %v7691_v45  ;;  %v7757_v44 = vld [vmem:[#allocation7 + $0x8c8] ss:$16 sps:$4 sm:$0xff]   ;;  %v7762_v45 = vld [vmem:[#allocation7 + $0x8e4] ss:$16 sps:$4 sm:$0xff]  }
 0x51a   :  { %4891 = vmatprep.subr.bf16.mxu0 %v7696_v11  ;;  %4977 = vmatprep.subr.bf16.mxu1 %v7699_v14  ;;  %v7765_v11 = vld [vmem:[#allocation7 + $0x8ec] ss:$16 sps:$4 sm:$0xff]   ;;  %v7760_v14 = vld [vmem:[#allocation7 + $0x8e0] ss:$16 sps:$4 sm:$0xff]  }
 0x51d   :  { %4892 = vmatpush1.bf16.msra.mxu0 %v7694_v46  ;;  %4978 = vmatpush1.bf16.msra.mxu1 %v7697_v15  ;;  %v7763_v46 = vld [vmem:[#allocation7 + $0x8e8] ss:$16 sps:$4 sm:$0xff]   ;;  %v7768_v15 = vld [vmem:[#allocation7 + $0x904] ss:$16 sps:$4 sm:$0xff]  }
 0x51e   :  { %4893 = vmatprep.subr.bf16.mxu0 %v7702_v17  ;;  %4979 = vmatprep.subr.bf16.mxu1 %v7705_v49  ;;  %v7771_v17 = vld [vmem:[#allocation7 + $0x90c] ss:$16 sps:$4 sm:$0xff]   ;;  %v7766_v49 = vld [vmem:[#allocation7 + $0x900] ss:$16 sps:$4 sm:$0xff]  }
 0x521   :  { %4894 = vmatpush1.bf16.msra.mxu0 %v7700_v21  ;;  %4980 = vmatpush1.bf16.msra.mxu1 %v7703_v12  ;;  %v7769_v21 = vld [vmem:[#allocation7 + $0x908] ss:$16 sps:$4 sm:$0xff]   ;;  %v7774_v12 = vld [vmem:[#allocation7 + $0x924] ss:$16 sps:$4 sm:$0xff]  }
 0x522   :  { %4895 = vmatprep.subr.bf16.mxu0 %v7708_v2  ;;  %4981 = vmatprep.subr.bf16.mxu1 %v7711_v13  ;;  %v7777_v2 = vld [vmem:[#allocation7 + $0x92c] ss:$16 sps:$4 sm:$0xff]   ;;  %v7772_v13 = vld [vmem:[#allocation7 + $0x920] ss:$16 sps:$4 sm:$0xff]  }
 0x525   :  { %4896 = vmatpush1.bf16.msra.mxu0 %v7706_v6  ;;  %4982 = vmatpush1.bf16.msra.mxu1 %v7709_v52  ;;  %v7775_v6 = vld [vmem:[#allocation7 + $0x928] ss:$16 sps:$4 sm:$0xff]   ;;  %v7780_v52 = vld [vmem:[#allocation7 + $0x944] ss:$16 sps:$4 sm:$0xff]  }
 0x526   :  { %4897 = vmatprep.subr.bf16.mxu0 %v7714_v24  ;;  %4983 = vmatprep.subr.bf16.mxu1 %v7717_v9  ;;  %v7778_v24 = vld [vmem:[#allocation7 + $0x940] ss:$16 sps:$4 sm:$0xff]   ;;  %v7781_v9 = vld [vmem:[#allocation7 + $0x948] ss:$16 sps:$4 sm:$0xff]  }
 0x529   :  { %4898 = vmatpush1.bf16.msra.mxu0 %v7712_v0  ;;  %4984 = vmatpush1.bf16.msra.mxu1 %v7715_v16  ;;  %v7789_v0 = vld [vmem:[#allocation7 + $0x96c] ss:$16 sps:$4 sm:$0xff]   ;;  %v7784_v16 = vld [vmem:[#allocation7 + $0x960] ss:$16 sps:$4 sm:$0xff]  }
 0x52a   :  { %5656 = vmatprep.subr.bf16.mxu0 %v7720_v47  ;;  %5742 = vmatprep.subr.bf16.mxu1 %v7723_v56  ;;  %v7787_v47 = vld [vmem:[#allocation7 + $0x968] ss:$16 sps:$4 sm:$0xff]   ;;  %v7792_v56 = vld [vmem:[#allocation7 + $0x984] ss:$16 sps:$4 sm:$0xff]  }
 0x52c   :  { %4900 = vmatmul.mubr.bf16.vlgmr.msra.gmra.mrb[16].mxu0 %v4182_v10  ;;  %4986 = vmatmul.mubr.bf16.vlgmr.msra.gmra.mrb[16].mxu1 %v4182_v10  ;;  %v7793_v10 = vld [vmem:[#allocation7 + $0x988] ss:$16 sps:$4 sm:$0xff]  }
 0x52d   :  { %5657 = vmatpush1.bf16.msra.mxu0 %v7718_v23  ;;  %5743 = vmatpush1.bf16.msra.mxu1 %v7721_v57  ;;  %v7795_v23 = vld [vmem:[#allocation7 + $0x98c] ss:$16 sps:$4 sm:$0xff]   ;;  %v7790_v57 = vld [vmem:[#allocation7 + $0x980] ss:$16 sps:$4 sm:$0xff]  }
 0x52e   :  { %5658 = vmatprep.subr.bf16.mxu0 %v7726_v58  ;;  %5744 = vmatprep.subr.bf16.mxu1 %v7729_v60  ;;  %v7798_v58 = vld [vmem:[#allocation7 + $0x9a4] ss:$16 sps:$4 sm:$0xff]   ;;  %v7801_v60 = vld [vmem:[#allocation7 + $0x9ac] ss:$16 sps:$4 sm:$0xff]  }
 0x531   :  { %5659 = vmatpush1.bf16.msra.mxu0 %v7724_v48  ;;  %5745 = vmatpush1.bf16.msra.mxu1 %v7727_v61  ;;  %v7796_v48 = vld [vmem:[#allocation7 + $0x9a0] ss:$16 sps:$4 sm:$0xff]   ;;  %v7799_v61 = vld [vmem:[#allocation7 + $0x9a8] ss:$16 sps:$4 sm:$0xff]  }
 0x532   :  { %5660 = vmatprep.subr.bf16.mxu0 %v7732_v51  ;;  %5746 = vmatprep.subr.bf16.mxu1 %v7735_v62  ;;  %v7804_v51 = vld [vmem:[#allocation7 + $0x9c4] ss:$16 sps:$4 sm:$0xff]   ;;  %v7807_v62 = vld [vmem:[#allocation7 + $0x9cc] ss:$16 sps:$4 sm:$0xff]  }
 0x535   :  { %5661 = vmatpush1.bf16.msra.mxu0 %v7730_v63  ;;  %5747 = vmatpush1.bf16.msra.mxu1 %v7733_v1  ;;  %v7802_v63 = vld [vmem:[#allocation7 + $0x9c0] ss:$16 sps:$4 sm:$0xff]   ;;  %v7805_v1 = vld [vmem:[#allocation7 + $0x9c8] ss:$16 sps:$4 sm:$0xff]  }
 0x536   :  { %5662 = vmatprep.subr.bf16.mxu0 %v7738_v3  ;;  %5748 = vmatprep.subr.bf16.mxu1 %v7741_v4  ;;  %v7810_v3 = vld [vmem:[#allocation7 + $0x9e4] ss:$16 sps:$4 sm:$0xff]   ;;  %v7813_v4 = vld [vmem:[#allocation7 + $0x9ec] ss:$16 sps:$4 sm:$0xff]  }
 0x539   :  { %5663 = vmatpush1.bf16.msra.mxu0 %v7736_v7  ;;  %5749 = vmatpush1.bf16.msra.mxu1 %v7739_v18  ;;  %v7808_v7 = vld [vmem:[#allocation7 + $0x9e0] ss:$16 sps:$4 sm:$0xff]   ;;  %v7811_v18 = vld [vmem:[#allocation7 + $0x9e8] ss:$16 sps:$4 sm:$0xff]  }
 0x53a   :  { %5664 = vmatprep.subr.bf16.mxu0 %v7744_v19  ;;  %5750 = vmatprep.subr.bf16.mxu1 %v7747_v20  ;;  %v7816_v19 = vld [vmem:[#allocation7 + $0xa04] ss:$16 sps:$4 sm:$0xff]   ;;  %v7819_v20 = vld [vmem:[#allocation7 + $0xa0c] ss:$16 sps:$4 sm:$0xff]  }
 0x53d   :  { %5665 = vmatpush1.bf16.msra.mxu0 %v7742_v22  ;;  %5751 = vmatpush1.bf16.msra.mxu1 %v7745_v25 }
 0x53e   :  { %5666 = vmatprep.subr.bf16.mxu0 %v7750_v36  ;;  %5752 = vmatprep.subr.bf16.mxu1 %v7753_v37 }
 0x541   :  { %5667 = vmatpush1.bf16.msra.mxu0 %v7748_v39  ;;  %5753 = vmatpush1.bf16.msra.mxu1 %v7751_v29 }
 0x542   :  { %5668 = vmatprep.subr.bf16.mxu0 %v7756_v30  ;;  %5754 = vmatprep.subr.bf16.mxu1 %v7759_v40 }
 0x545   :  { %5669 = vmatpush1.bf16.msra.mxu0 %v7754_v43  ;;  %5755 = vmatpush1.bf16.msra.mxu1 %v7757_v44 }
 0x546   :  { %5670 = vmatprep.subr.bf16.mxu0 %v7762_v45  ;;  %5756 = vmatprep.subr.bf16.mxu1 %v7765_v11 }
 0x549   :  { %5671 = vmatpush1.bf16.msra.mxu0 %v7760_v14  ;;  %5757 = vmatpush1.bf16.msra.mxu1 %v7763_v46 }
 0x54a   :  { %5672 = vmatprep.subr.bf16.mxu0 %v7768_v15  ;;  %5758 = vmatprep.subr.bf16.mxu1 %v7771_v17 }
 0x54d   :  { %5673 = vmatpush1.bf16.msra.mxu0 %v7766_v49  ;;  %5759 = vmatpush1.bf16.msra.mxu1 %v7769_v21 }
 0x54e   :  { %5674 = vmatprep.subr.bf16.mxu0 %v7774_v12  ;;  %5760 = vmatprep.subr.bf16.mxu1 %v7777_v2 }
 0x551   :  { %5675 = vmatpush1.bf16.msra.mxu0 %v7772_v13  ;;  %5761 = vmatpush1.bf16.msra.mxu1 %v7775_v6 }
 0x552   :  { %5676 = vmatprep.subr.bf16.mxu0 %v7780_v52  ;;  %5762 = vmatprep.subr.bf16.mxu1 %v7783_v5 }
 0x555   :  { %5677 = vmatpush1.bf16.msra.mxu0 %v7778_v24  ;;  %5763 = vmatpush1.bf16.msra.mxu1 %v7781_v9 }
 0x556   :  { %5678 = vmatprep.subr.bf16.mxu0 %v7786_v54  ;;  %5764 = vmatprep.subr.bf16.mxu1 %v7789_v0  ;;  %v7814_v0 = vld [vmem:[#allocation7 + $0xa00] ss:$16 sps:$4 sm:$0xff]  }
 0x559   :  { %5679 = vmatpush1.bf16.msra.mxu0 %v7784_v16  ;;  %5765 = vmatpush1.bf16.msra.mxu1 %v7787_v47  ;;  %v7817_v16 = vld [vmem:[#allocation7 + $0xa08] ss:$16 sps:$4 sm:$0xff]  }
 0x55a   :  { %5680 = vmatprep.subr.bf16.mxu0 %v7792_v56  ;;  %5766 = vmatprep.subr.bf16.mxu1 %v7795_v23  ;;  %v7828_v56 = vld [vmem:[#allocation7 + $0xa44] ss:$16 sps:$4 sm:$0xff]   ;;  %v7831_v23 = vld [vmem:[#allocation7 + $0xa4c] ss:$16 sps:$4 sm:$0xff]  }
 0x55d   :  { %5681 = vmatpush1.bf16.msra.mxu0 %v7790_v57  ;;  %5767 = vmatpush1.bf16.msra.mxu1 %v7793_v10  ;;  %v7826_v57 = vld [vmem:[#allocation7 + $0xa40] ss:$16 sps:$4 sm:$0xff]   ;;  %v7829_v10 = vld [vmem:[#allocation7 + $0xa48] ss:$16 sps:$4 sm:$0xff]  }
 0x55e   :  { %5682 = vmatprep.subr.bf16.mxu0 %v7798_v58  ;;  %5768 = vmatprep.subr.bf16.mxu1 %v7801_v60  ;;  %v7834_v58 = vld [vmem:[#allocation7 + $0xa64] ss:$16 sps:$4 sm:$0xff]   ;;  %v7837_v60 = vld [vmem:[#allocation7 + $0xa6c] ss:$16 sps:$4 sm:$0xff]  }
 0x561   :  { %5683 = vmatpush1.bf16.msra.mxu0 %v7796_v48  ;;  %5769 = vmatpush1.bf16.msra.mxu1 %v7799_v61  ;;  %v7832_v48 = vld [vmem:[#allocation7 + $0xa60] ss:$16 sps:$4 sm:$0xff]   ;;  %v7835_v61 = vld [vmem:[#allocation7 + $0xa68] ss:$16 sps:$4 sm:$0xff]  }
 0x562   :  { %5684 = vmatprep.subr.bf16.mxu0 %v7804_v51  ;;  %5770 = vmatprep.subr.bf16.mxu1 %v7807_v62  ;;  %v7840_v51 = vld [vmem:[#allocation7 + $0xa84] ss:$16 sps:$4 sm:$0xff]   ;;  %v7843_v62 = vld [vmem:[#allocation7 + $0xa8c] ss:$16 sps:$4 sm:$0xff]  }
 0x565   :  { %5685 = vmatpush1.bf16.msra.mxu0 %v7802_v63  ;;  %5771 = vmatpush1.bf16.msra.mxu1 %v7805_v1  ;;  %v7838_v63 = vld [vmem:[#allocation7 + $0xa80] ss:$16 sps:$4 sm:$0xff]   ;;  %v7841_v1 = vld [vmem:[#allocation7 + $0xa88] ss:$16 sps:$4 sm:$0xff]  }
 0x566   :  { %5686 = vmatprep.subr.bf16.mxu0 %v7810_v3  ;;  %5772 = vmatprep.subr.bf16.mxu1 %v7813_v4  ;;  %v7846_v3 = vld [vmem:[#allocation7 + $0xaa4] ss:$16 sps:$4 sm:$0xff]   ;;  %v7849_v4 = vld [vmem:[#allocation7 + $0xaac] ss:$16 sps:$4 sm:$0xff]  }
 0x569   :  { %5687 = vmatpush1.bf16.msra.mxu0 %v7808_v7  ;;  %5773 = vmatpush1.bf16.msra.mxu1 %v7811_v18  ;;  %v7844_v7 = vld [vmem:[#allocation7 + $0xaa0] ss:$16 sps:$4 sm:$0xff]   ;;  %v7847_v18 = vld [vmem:[#allocation7 + $0xaa8] ss:$16 sps:$4 sm:$0xff]  }
 0x56a   :  { %5699 = vmatprep.subr.bf16.mxu0 %v7816_v19  ;;  %5785 = vmatprep.subr.bf16.mxu1 %v7819_v20  ;;  %v7852_v19 = vld [vmem:[#allocation7 + $0xac4] ss:$16 sps:$4 sm:$0xff]   ;;  %v7855_v20 = vld [vmem:[#allocation7 + $0xacc] ss:$16 sps:$4 sm:$0xff]  }
 0x5ff   :  { %v4901_v22 = vpop.f32.mrb[16].mxu0  ;;  %v4987_v25 = vpop.f32.mrb[16].mxu1 }
 0x600   :  { %v4996_v36 = vmax.f32 %v4901_v22, 0.0  ;;  %v4998_v37 = vmax.f32 %v4987_v25, 0.0  ;;  %v4903_v39 = vpop.f32.mrb[17].mxu0  ;;  %v4989_v29 = vpop.f32.mrb[17].mxu1  ;;  %v7850_v22 = vld [vmem:[#allocation7 + $0xac0] ss:$16 sps:$4 sm:$0xff]  }
 0x601   :  { %v4997_v30 = vmax.f32 %v4903_v39, 0.0  ;;  %v4999_v40 = vmax.f32 %v4989_v29, 0.0  ;;  %v4905_v43 = vpop.f32.mrb[18].mxu0  ;;  %v4991_v44 = vpop.f32.mrb[18].mxu1  ;;  %v7853_v25 = vld [vmem:[#allocation7 + $0xac8] ss:$16 sps:$4 sm:$0xff]  }
 0x602   :  { %v5004_v45 = vadd.f32 %v4996_v36, %v8179_v32  ;;  %v5006_v11 = vadd.f32 %v4998_v37, %v8199_v59  ;;  %v5000_v14 = vmax.f32 %v4905_v43, 0.0  ;;  %v5002_v46 = vmax.f32 %v4991_v44, 0.0  ;;  %v4907_v15 = vpop.f32.mrb[19].mxu0  ;;  %v4993_v17 = vpop.f32.mrb[19].mxu1  ;;  %v7858_v36 = vld [vmem:[#allocation7 + $0xae4] ss:$16 sps:$4 sm:$0xff]  }
 0x603   :  { %v5005_v49 = vadd.f32 %v4997_v30, %v8173_v28  ;;  %v5007_v21 = vadd.f32 %v4999_v40, %v8187_v26  ;;  %v5001_v12 = vmax.f32 %v4907_v15, 0.0  ;;  %v5003_v2 = vmax.f32 %v4993_v17, 0.0  ;;  %v7861_v37 = vld [vmem:[#allocation7 + $0xaec] ss:$16 sps:$4 sm:$0xff]   ;;  %v7856_v39 = vld [vmem:[#allocation7 + $0xae0] ss:$16 sps:$4 sm:$0xff]  }
 0x604   :  { %v5008_v13 = vadd.f32 %v5000_v14, %v8170_v27  ;;  %v5010_v6 = vadd.f32 %v5002_v46, %v8196_v53  ;;  %v7822_v27 = vld [vmem:[#allocation7 + $0xa24] ss:$16 sps:$4 sm:$0xff]   ;;  %v7825_v53 = vld [vmem:[#allocation7 + $0xa2c] ss:$16 sps:$4 sm:$0xff]   ;;  %v7859_v29 = vld [vmem:[#allocation7 + $0xae8] ss:$16 sps:$4 sm:$0xff]  }
 0x605   :  { %v6694_v52 = vpack.c.bf16 %v5005_v49, %v5004_v45  ;;  %v6695_v5 = vpack.c.bf16 %v5007_v21, %v5006_v11  ;;  %v5009_v32 = vadd.f32 %v5001_v12, %v8176_v31  ;;  %v5011_v59 = vadd.f32 %v5003_v2, %v8182_v35  ;;  %v7820_v31 = vld [vmem:[#allocation7 + $0xa20] ss:$16 sps:$4 sm:$0xff]   ;;  %v7823_v35 = vld [vmem:[#allocation7 + $0xa28] ss:$16 sps:$4 sm:$0xff]   ;;  %v7864_v30 = vld [vmem:[#allocation7 + $0xb04] ss:$16 sps:$4 sm:$0xff]  }
 0x606   :  { %v5012_v24 = vpack.c.bf16 %v5008_v13, %v5004_v45  ;;  %v8249_v9 = vpack.c.bf16 %v5010_v6, %v5006_v11  ;;  %v7867_v40 = vld [vmem:[#allocation7 + $0xb0c] ss:$16 sps:$4 sm:$0xff]   ;;  %v7862_v43 = vld [vmem:[#allocation7 + $0xb00] ss:$16 sps:$4 sm:$0xff]   ;;  %v7865_v44 = vld [vmem:[#allocation7 + $0xb08] ss:$16 sps:$4 sm:$0xff]  }
 0x607   :  { %5864 = vst [vmem:[#allocation8] sm:$0xff] %v6694_v52  ;;  %5865 = vst [vmem:[#allocation8 + $0x8] sm:$0xff] %v6695_v5  ;;  %v6696_v28 = vpack.c.bf16 %v5009_v32, %v5008_v13  ;;  %v6697_v54 = vpack.c.bf16 %v5011_v59, %v5010_v6  ;;  %v5013_v26 = vpack.c.bf16 %v5009_v32, %v5005_v49  ;;  %v7870_v45 = vld [vmem:[#allocation7 + $0xb24] ss:$16 sps:$4 sm:$0xff]   ;;  %v7873_v11 = vld [vmem:[#allocation7 + $0xb2c] ss:$16 sps:$4 sm:$0xff]  }
 0x608   :  { %v5015_v47 = vpack.c.bf16 %v5011_v59, %v5007_v21  ;;  %v7868_v14 = vld [vmem:[#allocation7 + $0xb20] ss:$16 sps:$4 sm:$0xff]   ;;  %v7871_v46 = vld [vmem:[#allocation7 + $0xb28] ss:$16 sps:$4 sm:$0xff]   ;;  %v7876_v15 = vld [vmem:[#allocation7 + $0xb44] ss:$16 sps:$4 sm:$0xff]  }
 0x609   :  { %5866 = vst [vmem:[#allocation8 + $0x20] sm:$0xff] %v6696_v28  ;;  %5867 = vst [vmem:[#allocation8 + $0x28] sm:$0xff] %v6697_v54  ;;  %5688 = vmatprep.mubr.bf16.mxu0 %v5013_v26  ;;  %5774 = vmatprep.mubr.bf16.mxu1 %v5013_v26  ;;  %v7879_v17 = vld [vmem:[#allocation7 + $0xb4c] ss:$16 sps:$4 sm:$0xff]   ;;  %v7874_v49 = vld [vmem:[#allocation7 + $0xb40] ss:$16 sps:$4 sm:$0xff]  }
 0x60a   :  { %5689 = vmatmul.mubr.bf16.vlgmr.msra.gmra.mrb[20].mxu0 %v5012_v24  ;;  %5775 = vmatmul.mubr.bf16.vlgmr.msra.gmra.mrb[20].mxu1 %v5012_v24  ;;  %v7877_v21 = vld [vmem:[#allocation7 + $0xb48] ss:$16 sps:$4 sm:$0xff]   ;;  %v7882_v12 = vld [vmem:[#allocation7 + $0xb64] ss:$16 sps:$4 sm:$0xff]   ;;  %v7885_v2 = vld [vmem:[#allocation7 + $0xb6c] ss:$16 sps:$4 sm:$0xff]  }
 0x60b   :  { %5700 = vmatpush1.bf16.msra.mxu0 %v7814_v0  ;;  %5786 = vmatpush1.bf16.msra.mxu1 %v7817_v16  ;;  %v7880_v13 = vld [vmem:[#allocation7 + $0xb60] ss:$16 sps:$4 sm:$0xff]   ;;  %v7883_v6 = vld [vmem:[#allocation7 + $0xb68] ss:$16 sps:$4 sm:$0xff]   ;;  %v7888_v52 = vld [vmem:[#allocation7 + $0xb84] ss:$16 sps:$4 sm:$0xff]  }
 0x60c   :  { %5731 = vmatprep.mubr.bf16.mxu0 %v5015_v47  ;;  %5817 = vmatprep.mubr.bf16.mxu1 %v5015_v47  ;;  %v7891_v5 = vld [vmem:[#allocation7 + $0xb8c] ss:$16 sps:$4 sm:$0xff]   ;;  %v7886_v32 = vld [vmem:[#allocation7 + $0xb80] ss:$16 sps:$4 sm:$0xff]   ;;  %v7889_v59 = vld [vmem:[#allocation7 + $0xb88] ss:$16 sps:$4 sm:$0xff]  }
 0x60d   :  { %5701 = vmatprep.subr.bf16.mxu0 %v7822_v27  ;;  %5787 = vmatprep.subr.bf16.mxu1 %v7825_v53  ;;  %v7894_v24 = vld [vmem:[#allocation7 + $0xba4] ss:$16 sps:$4 sm:$0xff]   ;;  %v7897_v28 = vld [vmem:[#allocation7 + $0xbac] ss:$16 sps:$4 sm:$0xff]   ;;  %v7892_v54 = vld [vmem:[#allocation7 + $0xba0] ss:$16 sps:$4 sm:$0xff]  }
 0x60e   :  { %v7895_v26 = vld [vmem:[#allocation7 + $0xba8] ss:$16 sps:$4 sm:$0xff]   ;;  %v7900_v0 = vld [vmem:[#allocation7 + $0xbc4] ss:$16 sps:$4 sm:$0xff]   ;;  %v7903_v16 = vld [vmem:[#allocation7 + $0xbcc] ss:$16 sps:$4 sm:$0xff]  }
 0x60f   :  { %5702 = vmatpush1.bf16.msra.mxu0 %v7820_v31  ;;  %5788 = vmatpush1.bf16.msra.mxu1 %v7823_v35  ;;  %v7898_v47 = vld [vmem:[#allocation7 + $0xbc0] ss:$16 sps:$4 sm:$0xff]   ;;  %v7901_v27 = vld [vmem:[#allocation7 + $0xbc8] ss:$16 sps:$4 sm:$0xff]   ;;  %v7906_v53 = vld [vmem:[#allocation7 + $0xbe4] ss:$16 sps:$4 sm:$0xff]  }
 0x610   :  { %5703 = vmatprep.subr.bf16.mxu0 %v7828_v56  ;;  %5789 = vmatprep.subr.bf16.mxu1 %v7831_v23  ;;  %v7909_v31 = vld [vmem:[#allocation7 + $0xbec] ss:$16 sps:$4 sm:$0xff]   ;;  %v7904_v35 = vld [vmem:[#allocation7 + $0xbe0] ss:$16 sps:$4 sm:$0xff]   ;;  %v7907_v56 = vld [vmem:[#allocation7 + $0xbe8] ss:$16 sps:$4 sm:$0xff]  }
 0x613   :  { %5704 = vmatpush1.bf16.msra.mxu0 %v7826_v57  ;;  %5790 = vmatpush1.bf16.msra.mxu1 %v7829_v10 }
 0x614   :  { %5705 = vmatprep.subr.bf16.mxu0 %v7834_v58  ;;  %5791 = vmatprep.subr.bf16.mxu1 %v7837_v60 }
 0x617   :  { %5706 = vmatpush1.bf16.msra.mxu0 %v7832_v48  ;;  %5792 = vmatpush1.bf16.msra.mxu1 %v7835_v61 }
 0x618   :  { %5707 = vmatprep.subr.bf16.mxu0 %v7840_v51  ;;  %5793 = vmatprep.subr.bf16.mxu1 %v7843_v62 }
 0x61b   :  { %5708 = vmatpush1.bf16.msra.mxu0 %v7838_v63  ;;  %5794 = vmatpush1.bf16.msra.mxu1 %v7841_v1 }
 0x61c   :  { %5709 = vmatprep.subr.bf16.mxu0 %v7846_v3  ;;  %5795 = vmatprep.subr.bf16.mxu1 %v7849_v4 }
 0x61f   :  { %5710 = vmatpush1.bf16.msra.mxu0 %v7844_v7  ;;  %5796 = vmatpush1.bf16.msra.mxu1 %v7847_v18 }
 0x620   :  { %5711 = vmatprep.subr.bf16.mxu0 %v7852_v19  ;;  %5797 = vmatprep.subr.bf16.mxu1 %v7855_v20 }
 0x623   :  { %5712 = vmatpush1.bf16.msra.mxu0 %v7850_v22  ;;  %5798 = vmatpush1.bf16.msra.mxu1 %v7853_v25 }
 0x624   :  { %5713 = vmatprep.subr.bf16.mxu0 %v7858_v36  ;;  %5799 = vmatprep.subr.bf16.mxu1 %v7861_v37 }
 0x627   :  { %5714 = vmatpush1.bf16.msra.mxu0 %v7856_v39  ;;  %5800 = vmatpush1.bf16.msra.mxu1 %v7859_v29 }
 0x628   :  { %5715 = vmatprep.subr.bf16.mxu0 %v7864_v30  ;;  %5801 = vmatprep.subr.bf16.mxu1 %v7867_v40 }
 0x62b   :  { %5716 = vmatpush1.bf16.msra.mxu0 %v7862_v43  ;;  %5802 = vmatpush1.bf16.msra.mxu1 %v7865_v44 }
 0x62c   :  { %5717 = vmatprep.subr.bf16.mxu0 %v7870_v45  ;;  %5803 = vmatprep.subr.bf16.mxu1 %v7873_v11 }
 0x62f   :  { %5718 = vmatpush1.bf16.msra.mxu0 %v7868_v14  ;;  %5804 = vmatpush1.bf16.msra.mxu1 %v7871_v46 }
 0x630   :  { %5719 = vmatprep.subr.bf16.mxu0 %v7876_v15  ;;  %5805 = vmatprep.subr.bf16.mxu1 %v7879_v17 }
 0x633   :  { %5720 = vmatpush1.bf16.msra.mxu0 %v7874_v49  ;;  %5806 = vmatpush1.bf16.msra.mxu1 %v7877_v21 }
 0x634   :  { %5721 = vmatprep.subr.bf16.mxu0 %v7882_v12  ;;  %5807 = vmatprep.subr.bf16.mxu1 %v7885_v2 }
 0x637   :  { %5722 = vmatpush1.bf16.msra.mxu0 %v7880_v13  ;;  %5808 = vmatpush1.bf16.msra.mxu1 %v7883_v6 }
 0x638   :  { %5723 = vmatprep.subr.bf16.mxu0 %v7888_v52  ;;  %5809 = vmatprep.subr.bf16.mxu1 %v7891_v5 }
 0x63b   :  { %5724 = vmatpush1.bf16.msra.mxu0 %v7886_v32  ;;  %5810 = vmatpush1.bf16.msra.mxu1 %v7889_v59 }
 0x63c   :  { %5725 = vmatprep.subr.bf16.mxu0 %v7894_v24  ;;  %5811 = vmatprep.subr.bf16.mxu1 %v7897_v28 }
 0x63f   :  { %5726 = vmatpush1.bf16.msra.mxu0 %v7892_v54  ;;  %5812 = vmatpush1.bf16.msra.mxu1 %v7895_v26 }
 0x640   :  { %5727 = vmatprep.subr.bf16.mxu0 %v7900_v0  ;;  %5813 = vmatprep.subr.bf16.mxu1 %v7903_v16 }
 0x643   :  { %5728 = vmatpush1.bf16.msra.mxu0 %v7898_v47  ;;  %5814 = vmatpush1.bf16.msra.mxu1 %v7901_v27 }
 0x644   :  { %5729 = vmatprep.subr.bf16.mxu0 %v7906_v53  ;;  %5815 = vmatprep.subr.bf16.mxu1 %v7909_v31 }
 0x647   :  { %5730 = vmatpush1.bf16.msra.mxu0 %v7904_v35  ;;  %5816 = vmatpush1.bf16.msra.mxu1 %v7907_v56 }
 0x64a   :  { %5732 = vmatmul.mubr.bf16.vlgmr.msra.gmra.mrb[20].mxu0 %v8249_v9  ;;  %5818 = vmatmul.mubr.bf16.vlgmr.msra.gmra.mrb[20].mxu1 %v8249_v9 }
 0x71d   :  { %v5733_v23 = vpop.f32.mrb[20].mxu0  ;;  %v5819_v57 = vpop.f32.mrb[20].mxu1 }
 0x71e   :  { %v5828_v10 = vmax.f32 %v5733_v23, 0.0  ;;  %v5830_v58 = vmax.f32 %v5819_v57, 0.0  ;;  %v5735_v60 = vpop.f32.mrb[21].mxu0  ;;  %v5821_v48 = vpop.f32.mrb[21].mxu1 }
 0x71f   :  { %v5829_v61 = vmax.f32 %v5735_v60, 0.0  ;;  %v5831_v51 = vmax.f32 %v5821_v48, 0.0  ;;  %v5737_v62 = vpop.f32.mrb[22].mxu0  ;;  %v5823_v63 = vpop.f32.mrb[22].mxu1 }
 0x720   :  { %v5836_v1 = vadd.f32 %v5828_v10, %v8217_v38  ;;  %v5838_v3 = vadd.f32 %v5830_v58, %v8237_v50  ;;  %v5832_v4 = vmax.f32 %v5737_v62, 0.0  ;;  %v5834_v7 = vmax.f32 %v5823_v63, 0.0  ;;  %v5739_v18 = vpop.f32.mrb[23].mxu0  ;;  %v5825_v19 = vpop.f32.mrb[23].mxu1 }
 0x721   :  { %v5837_v9 = vadd.f32 %v5829_v61, %v8211_v34  ;;  %v5839_v20 = vadd.f32 %v5831_v51, %v8225_v8  ;;  %v5833_v22 = vmax.f32 %v5739_v18, 0.0  ;;  %v5835_v25 = vmax.f32 %v5825_v19, 0.0 }
 0x722   :  { %v5840_v36 = vadd.f32 %v5832_v4, %v8208_v33  ;;  %v5842_v37 = vadd.f32 %v5834_v7, %v8234_v55 }
 0x723   :  { %v6698_v39 = vpack.c.bf16 %v5837_v9, %v5836_v1  ;;  %v6699_v38 = vpack.c.bf16 %v5839_v20, %v5838_v3  ;;  %v5841_v50 = vadd.f32 %v5833_v22, %v8214_v41  ;;  %v5843_v29 = vadd.f32 %v5835_v25, %v8220_v42 }
 0x725   :  { %5892 = vst [vmem:[#allocation8 + $0x10] sm:$0xff] %v6698_v39  ;;  %5893 = vst [vmem:[#allocation8 + $0x18] sm:$0xff] %v6699_v38  ;;  %v6700_v30 = vpack.c.bf16 %v5841_v50, %v5840_v36  ;;  %v6701_v34 = vpack.c.bf16 %v5843_v29, %v5842_v37 }
 0x727   :  { %5894 = vst [vmem:[#allocation8 + $0x30] sm:$0xff] %v6700_v30  ;;  %5895 = vst [vmem:[#allocation8 + $0x38] sm:$0xff] %v6701_v34 }
 0x728   :  { %7991 = shalt.err (!%p7988_p0)
}
 0x729   :  { %s7992_s27 = scalar_lea.hbm %s8279_s3, 1024 }
 0x72a   :  { %p7993_p1 = scmp.ne.s32.totalorder %s8279_s3, %s7992_s27  ;;  %p7996_p2 = scmp.lt.u32.totalorder %s7992_s27, %s8279_s3 }
 0x72c   :  { %p7998_p3 = pnand %p7996_p2, %p7993_p1 }
 0x72e   :  { %8001 = shalt.err (!%p7998_p3)
}
 0x72f   :  { %5907 = dma.vmem_to_hbm [thread:$0]  %s5902_s22, 1024, %s8279_s3, [#allocation4], %s8012_s1, %s8012_s1, %s8013_s9  }
 0x730   :  { %8006 = dma.done.wait [#allocation4], 1024  }
 0x731   :  { %8007 = vsyncadd [#allocation4], 4294966272 }
 0x732   :  { %5911 = vsyncpa [#allocation3], 1 }
 0x733   :  { %5912 = vsyncpa [#allocation6], 1 }
 0x734   :  { %5913 = vsyncpa [#allocation4], 1 }

// kernel: tpu_custom_call.1
= control target key start
LH: loop header
LB: loop body
LE: loop exit
PB: predicated region body
PF: predicated region fallthrough
CT: control target
= control target key end

     0   :  { %8 = vsyncpa [#allocation3], 0  ;;  %s8276_s0 = inlined_call_operand.hbm [shape: bf16[16,1024], index: 0, kind: input, shape index: {}]   ;;  %s8277_s1 = inlined_call_operand.hbm [shape: bf16[3,512,512], index: 1, kind: input, shape index: {}]   ;;  %s8278_s2 = inlined_call_operand.hbm [shape: bf16[3,512,512], index: 2, kind: input, shape index: {}]   ;;  %s8279_s3 = inlined_call_operand.hbm [shape: bf16[16,1024], index: 3, kind: output, shape index: {}]  }
   0x1   :  { %9 = vsyncpa [#allocation6], 0 }
   0x2   :  { %10 = vsyncpa [#allocation4], 0  ;;  %s8008_s12 = smov [#allocation5]   ;;  %s7914_s16 = scalar_lea.hbm %s8277_s1, 49152 }
   0x3   :  { %s28_s13 = sshll.u32 %s8008_s12, 4  ;;  %p7915_p0 = scmp.ne.s32.totalorder %s8277_s1, %s7914_s16  ;;  %s29_s13 = int_to_ptr.vmem [resolvable:$true] %s28_s13 }
   0x4   :  { %p7918_p1 = scmp.lt.u32.totalorder %s7914_s16, %s8277_s1 }
   0x6   :  { %p7920_p2 = pnand %p7918_p1, %p7915_p0 }
   0x8   :  { %7923 = shalt.err (!%p7920_p2)
}
   0x9   :  { %s7924_s21 = scalar_lea.vmem %s29_s13, 49152  ;;  %p7929_p4 = scmp.lt.s32.totalorder %s29_s13, %s29_s13 }
   0xa   :  { %p7925_p3 = scmp.ne.s32.totalorder %s29_s13, %s7924_s21  ;;  %p7930_p5 = scmp.lt.s32.totalorder %s7924_s21, %s7924_s21 }
   0xc   :  { %p7931_p6 = por %p7930_p5, %p7929_p4 }
   0xe   :  { %p7932_p7 = pnand %p7931_p6, %p7925_p3 }
  0x10   :  { %7935 = shalt.err (!%p7932_p7)
}
  0x11   :  { %s8009_s22 = smov 256   ;;  %s8010_s23 = smov 16  }
  0x12   :  { %34 = dma.hbm_to_vmem [thread:$0]  %s8277_s1, 49152, %s29_s13, [#allocation6], %s8009_s22, %s8009_s22, %s8010_s23  }
  0x13   :  { %s8011_s26 = smov [#allocation2]   ;;  %s7936_s30 = scalar_lea.hbm %s8276_s0, 1024 }
  0x14   :  { %s16_s27 = sshll.u32 %s8011_s26, 4  ;;  %p7937_p8 = scmp.ne.s32.totalorder %s8276_s0, %s7936_s30  ;;  %s17_s27 = int_to_ptr.vmem [resolvable:$true] %s16_s27 }
  0x15   :  { %p7940_p9 = scmp.lt.u32.totalorder %s7936_s30, %s8276_s0 }
  0x17   :  { %p7942_p10 = pnand %p7940_p9, %p7937_p8 }
  0x19   :  { %7945 = shalt.err (!%p7942_p10)
}
  0x1a   :  { %s7946_s8 = scalar_lea.vmem %s17_s27, 1024  ;;  %p7951_p12 = scmp.lt.s32.totalorder %s17_s27, %s17_s27 }
  0x1b   :  { %p7947_p11 = scmp.ne.s32.totalorder %s17_s27, %s7946_s8  ;;  %p7952_p13 = scmp.lt.s32.totalorder %s7946_s8, %s7946_s8 }
  0x1d   :  { %p7953_p0 = por %p7952_p13, %p7951_p12 }
  0x1f   :  { %p7954_p1 = pnand %p7953_p0, %p7947_p11 }
  0x21   :  { %7957 = shalt.err (!%p7954_p1)
}
  0x22   :  { %s8012_s1 = smov 512   ;;  %s8013_s9 = smov 32  }
  0x23   :  { %22 = dma.hbm_to_vmem [thread:$0]  %s8276_s0, 1024, %s17_s27, [#allocation3], %s8012_s1, %s8012_s1, %s8013_s9  }
  0x24   :  { %s8014_s12 = smov [#allocation7]   ;;  %s7958_s16 = scalar_lea.hbm %s8278_s2, 49152 }
  0x25   :  { %s40_s13 = sshll.u32 %s8014_s12, 4  ;;  %p7959_p2 = scmp.ne.s32.totalorder %s8278_s2, %s7958_s16  ;;  %s41_s13 = int_to_ptr.vmem [resolvable:$true] %s40_s13 }
  0x26   :  { %p7962_p3 = scmp.lt.u32.totalorder %s7958_s16, %s8278_s2 }
  0x28   :  { %p7964_p4 = pnand %p7962_p3, %p7959_p2 }
  0x2a   :  { %7967 = shalt.err (!%p7964_p4)
}
  0x2b   :  { %s7968_s21 = scalar_lea.vmem %s41_s13, 49152  ;;  %p7973_p6 = scmp.lt.s32.totalorder %s41_s13, %s41_s13 }
  0x2c   :  { %p7969_p5 = scmp.ne.s32.totalorder %s41_s13, %s7968_s21  ;;  %p7974_p7 = scmp.lt.s32.totalorder %s7968_s21, %s7968_s21 }
  0x2e   :  { %p7975_p8 = por %p7974_p7, %p7973_p6 }
  0x30   :  { %p7976_p9 = pnand %p7975_p8, %p7969_p5 }
  0x32   :  { %7979 = shalt.err (!%p7976_p9)
}
  0x33   :  { %46 = dma.hbm_to_vmem [thread:$0]  %s8278_s2, 49152, %s41_s13, [#allocation6], %s8009_s22, %s8009_s22, %s8010_s23  }
  0x34   :  { %8002 = dma.done.wait [#allocation3], 1024  }
  0x35   :  { %8003 = vsyncadd [#allocation3], 4294966272 }
  0x36   :  { %8004 = dma.done.wait [#allocation6], 98304  }
  0x37   :  { %8005 = vsyncadd [#allocation6], 4294868992  ;;  %v6758_v0 = vld [vmem:[#allocation5 + $0x4] ss:$16 sps:$4 sm:$0xff]   ;;  %v6760_v1 = vld [vmem:[#allocation5 + $0xc] ss:$16 sps:$4 sm:$0xff]  }
  0x38   :  { %996 = vmatprep.subr.bf16.mxu0 %v6758_v0  ;;  %v6762_v2 = vld [vmem:[#allocation5] ss:$16 sps:$4 sm:$0xff]   ;;  %v6763_v3 = vld [vmem:[#allocation5 + $0x8] ss:$16 sps:$4 sm:$0xff]   ;;  %1082 = vmatprep.subr.bf16.mxu1 %v6760_v1  ;;  %v6764_v4 = vld [vmem:[#allocation5 + $0x24] ss:$16 sps:$4 sm:$0xff]  }
  0x39   :  { %997 = vmatpush1.bf16.msra.mxu0 %v6762_v2  ;;  %1083 = vmatpush1.bf16.msra.mxu1 %v6763_v3  ;;  %v6766_v5 = vld [vmem:[#allocation5 + $0x2c] ss:$16 sps:$4 sm:$0xff]   ;;  %v6768_v6 = vld [vmem:[#allocation5 + $0x20] ss:$16 sps:$4 sm:$0xff]   ;;  %v6769_v7 = vld [vmem:[#allocation5 + $0x28] ss:$16 sps:$4 sm:$0xff]  }
  0x3a   :  { %998 = vmatprep.subr.bf16.mxu0 %v6764_v4  ;;  %1084 = vmatprep.subr.bf16.mxu1 %v6766_v5  ;;  %v6770_v8 = vld [vmem:[#allocation5 + $0x44] ss:$16 sps:$4 sm:$0xff]   ;;  %v6772_v9 = vld [vmem:[#allocation5 + $0x4c] ss:$16 sps:$4 sm:$0xff]   ;;  %v6774_v10 = vld [vmem:[#allocation5 + $0x40] ss:$16 sps:$4 sm:$0xff]  }
  0x3b   :  { %v6775_v11 = vld [vmem:[#allocation5 + $0x48] ss:$16 sps:$4 sm:$0xff]   ;;  %v6776_v12 = vld [vmem:[#allocation5 + $0x64] ss:$16 sps:$4 sm:$0xff]   ;;  %v6778_v13 = vld [vmem:[#allocation5 + $0x6c] ss:$16 sps:$4 sm:$0xff]  }
  0x3c   :  { %v6780_v14 = vld [vmem:[#allocation5 + $0x60] ss:$16 sps:$4 sm:$0xff]   ;;  %v6781_v15 = vld [vmem:[#allocation5 + $0x68] ss:$16 sps:$4 sm:$0xff]   ;;  %v6782_v16 = vld [vmem:[#allocation5 + $0x84] ss:$16 sps:$4 sm:$0xff]  }
  0x3d   :  { %999 = vmatpush1.bf16.msra.mxu0 %v6768_v6  ;;  %1085 = vmatpush1.bf16.msra.mxu1 %v6769_v7  ;;  %v6784_v17 = vld [vmem:[#allocation5 + $0x8c] ss:$16 sps:$4 sm:$0xff]   ;;  %v6786_v18 = vld [vmem:[#allocation5 + $0x80] ss:$16 sps:$4 sm:$0xff]   ;;  %v6787_v19 = vld [vmem:[#allocation5 + $0x88] ss:$16 sps:$4 sm:$0xff]  }
  0x3e   :  { %1000 = vmatprep.subr.bf16.mxu0 %v6770_v8  ;;  %1086 = vmatprep.subr.bf16.mxu1 %v6772_v9  ;;  %v6788_v20 = vld [vmem:[#allocation5 + $0xa4] ss:$16 sps:$4 sm:$0xff]   ;;  %v6790_v21 = vld [vmem:[#allocation5 + $0xac] ss:$16 sps:$4 sm:$0xff]   ;;  %v6792_v22 = vld [vmem:[#allocation5 + $0xa0] ss:$16 sps:$4 sm:$0xff]  }
  0x3f   :  { %v6793_v23 = vld [vmem:[#allocation5 + $0xa8] ss:$16 sps:$4 sm:$0xff]   ;;  %v6794_v24 = vld [vmem:[#allocation5 + $0xc4] ss:$16 sps:$4 sm:$0xff]   ;;  %v6796_v25 = vld [vmem:[#allocation5 + $0xcc] ss:$16 sps:$4 sm:$0xff]  }
  0x40   :  { %v6798_v26 = vld [vmem:[#allocation5 + $0xc0] ss:$16 sps:$4 sm:$0xff]   ;;  %v6799_v27 = vld [vmem:[#allocation5 + $0xc8] ss:$16 sps:$4 sm:$0xff]   ;;  %v6800_v28 = vld [vmem:[#allocation5 + $0xe4] ss:$16 sps:$4 sm:$0xff]  }
  0x41   :  { %1001 = vmatpush1.bf16.msra.mxu0 %v6774_v10  ;;  %1087 = vmatpush1.bf16.msra.mxu1 %v6775_v11  ;;  %v6802_v29 = vld [vmem:[#allocation5 + $0xec] ss:$16 sps:$4 sm:$0xff]   ;;  %v6804_v30 = vld [vmem:[#allocation5 + $0xe0] ss:$16 sps:$4 sm:$0xff]   ;;  %v6805_v31 = vld [vmem:[#allocation5 + $0xe8] ss:$16 sps:$4 sm:$0xff]  }
  0x42   :  { %1002 = vmatprep.subr.bf16.mxu0 %v6776_v12  ;;  %1088 = vmatprep.subr.bf16.mxu1 %v6778_v13  ;;  %v6806_v32 = vld [vmem:[#allocation5 + $0x104] ss:$16 sps:$4 sm:$0xff]   ;;  %v6808_v33 = vld [vmem:[#allocation5 + $0x10c] ss:$16 sps:$4 sm:$0xff]   ;;  %v6810_v34 = vld [vmem:[#allocation5 + $0x100] ss:$16 sps:$4 sm:$0xff]  }
  0x43   :  { %v6811_v35 = vld [vmem:[#allocation5 + $0x108] ss:$16 sps:$4 sm:$0xff]   ;;  %v6812_v36 = vld [vmem:[#allocation5 + $0x124] ss:$16 sps:$4 sm:$0xff]   ;;  %v6814_v37 = vld [vmem:[#allocation5 + $0x12c] ss:$16 sps:$4 sm:$0xff]  }
  0x44   :  { %v6816_v38 = vld [vmem:[#allocation5 + $0x120] ss:$16 sps:$4 sm:$0xff]   ;;  %v6817_v39 = vld [vmem:[#allocation5 + $0x128] ss:$16 sps:$4 sm:$0xff]   ;;  %v6818_v40 = vld [vmem:[#allocation5 + $0x144] ss:$16 sps:$4 sm:$0xff]  }
  0x45   :  { %1003 = vmatpush1.bf16.msra.mxu0 %v6780_v14  ;;  %1089 = vmatpush1.bf16.msra.mxu1 %v6781_v15  ;;  %v6820_v41 = vld [vmem:[#allocation5 + $0x14c] ss:$16 sps:$4 sm:$0xff]   ;;  %v6822_v42 = vld [vmem:[#allocation5 + $0x140] ss:$16 sps:$4 sm:$0xff]   ;;  %v6823_v43 = vld [vmem:[#allocation5 + $0x148] ss:$16 sps:$4 sm:$0xff]  }
  0x46   :  { %1004 = vmatprep.subr.bf16.mxu0 %v6782_v16  ;;  %1090 = vmatprep.subr.bf16.mxu1 %v6784_v17  ;;  %v6824_v44 = vld [vmem:[#allocation5 + $0x164] ss:$16 sps:$4 sm:$0xff]   ;;  %v6826_v45 = vld [vmem:[#allocation5 + $0x16c] ss:$16 sps:$4 sm:$0xff]   ;;  %v6828_v48 = vld [vmem:[#allocation5 + $0x160] ss:$16 sps:$4 sm:$0xff]  }
  0x47   :  { %v68_v46 = vld [vmem:[#allocation2 + $0x10] sm:$0xff]  ;;  %v6829_v49 = vld [vmem:[#allocation5 + $0x168] ss:$16 sps:$4 sm:$0xff]   ;;  %v6832_v52 = vld [vmem:[#allocation5 + $0x18c] ss:$16 sps:$4 sm:$0xff]   ;;  %s8015_s2 = smov [#allocation8]  }
  0x48   :  { %v70_v47 = vld [vmem:[#allocation2 + $0x30] sm:$0xff]  ;;  %v6835_v54 = vld [vmem:[#allocation5 + $0x188] ss:$16 sps:$4 sm:$0xff]   ;;  %v6838_v56 = vld [vmem:[#allocation5 + $0x1ac] ss:$16 sps:$4 sm:$0xff]   ;;  %s5901_s22 = sshll.u32 %s8015_s2, 4  ;;  %s5902_s22 = int_to_ptr.vmem [resolvable:$true] %s5901_s22 }
  0x49   :  { %1005 = vmatpush1.bf16.msra.mxu0 %v6786_v18  ;;  %1091 = vmatpush1.bf16.msra.mxu1 %v6787_v19  ;;  %v5915_v50 = vcombine.high %v68_v46, %v70_v47  ;;  %v6830_v51 = vld [vmem:[#allocation5 + $0x184] ss:$16 sps:$4 sm:$0xff]   ;;  %v6834_v53 = vld [vmem:[#allocation5 + $0x180] ss:$16 sps:$4 sm:$0xff]   ;;  %v6841_v58 = vld [vmem:[#allocation5 + $0x1a8] ss:$16 sps:$4 sm:$0xff]   ;;  %v5914_v5 = vcombine.low %v68_v46, %v70_v47  ;;  %p7985_p11 = scmp.lt.s32.totalorder %s5902_s22, %s5902_s22 }
  0x4a   :  { %1006 = vmatprep.subr.bf16.mxu0 %v6788_v20  ;;  %1092 = vmatprep.subr.bf16.mxu1 %v6790_v21  ;;  %v6836_v55 = vld [vmem:[#allocation5 + $0x1a4] ss:$16 sps:$4 sm:$0xff]   ;;  %v6840_v57 = vld [vmem:[#allocation5 + $0x1a0] ss:$16 sps:$4 sm:$0xff]   ;;  %v6844_v60 = vld [vmem:[#allocation5 + $0x1cc] ss:$16 sps:$4 sm:$0xff]  }
  0x4b   :  { %1028 = vmatprep.mubr.bf16.mxu0 %v5915_v50  ;;  %1114 = vmatprep.mubr.bf16.mxu1 %v5915_v50  ;;  %v6842_v59 = vld [vmem:[#allocation5 + $0x1c4] ss:$16 sps:$4 sm:$0xff]   ;;  %v6846_v61 = vld [vmem:[#allocation5 + $0x1c0] ss:$16 sps:$4 sm:$0xff]   ;;  %v6847_v62 = vld [vmem:[#allocation5 + $0x1c8] ss:$16 sps:$4 sm:$0xff]  }
  0x4c   :  { %v6848_v63 = vld [vmem:[#allocation5 + $0x1e4] ss:$16 sps:$4 sm:$0xff]   ;;  %v6850_v0 = vld [vmem:[#allocation5 + $0x1ec] ss:$16 sps:$4 sm:$0xff]   ;;  %v6852_v1 = vld [vmem:[#allocation5 + $0x1e0] ss:$16 sps:$4 sm:$0xff]  }
  0x4d   :  { %1007 = vmatpush1.bf16.msra.mxu0 %v6792_v22  ;;  %1093 = vmatpush1.bf16.msra.mxu1 %v6793_v23  ;;  %v6853_v2 = vld [vmem:[#allocation5 + $0x1e8] ss:$16 sps:$4 sm:$0xff]   ;;  %v6856_v3 = vld [vmem:[#allocation5 + $0x204] ss:$16 sps:$4 sm:$0xff]   ;;  %v6859_v4 = vld [vmem:[#allocation5 + $0x20c] ss:$16 sps:$4 sm:$0xff]  }
  0x4e   :  { %1008 = vmatprep.subr.bf16.mxu0 %v6794_v24  ;;  %1094 = vmatprep.subr.bf16.mxu1 %v6796_v25  ;;  %v6854_v6 = vld [vmem:[#allocation5 + $0x200] ss:$16 sps:$4 sm:$0xff]   ;;  %v6857_v7 = vld [vmem:[#allocation5 + $0x208] ss:$16 sps:$4 sm:$0xff]   ;;  %v6862_v8 = vld [vmem:[#allocation5 + $0x224] ss:$16 sps:$4 sm:$0xff]  }
  0x4f   :  { %v6865_v9 = vld [vmem:[#allocation5 + $0x22c] ss:$16 sps:$4 sm:$0xff]   ;;  %v6860_v10 = vld [vmem:[#allocation5 + $0x220] ss:$16 sps:$4 sm:$0xff]   ;;  %v6863_v11 = vld [vmem:[#allocation5 + $0x228] ss:$16 sps:$4 sm:$0xff]  }
  0x50   :  { %v6868_v12 = vld [vmem:[#allocation5 + $0x244] ss:$16 sps:$4 sm:$0xff]   ;;  %v6871_v13 = vld [vmem:[#allocation5 + $0x24c] ss:$16 sps:$4 sm:$0xff]   ;;  %v6866_v14 = vld [vmem:[#allocation5 + $0x240] ss:$16 sps:$4 sm:$0xff]  }
  0x51   :  { %1009 = vmatpush1.bf16.msra.mxu0 %v6798_v26  ;;  %1095 = vmatpush1.bf16.msra.mxu1 %v6799_v27  ;;  %v6869_v15 = vld [vmem:[#allocation5 + $0x248] ss:$16 sps:$4 sm:$0xff]   ;;  %v6874_v16 = vld [vmem:[#allocation5 + $0x264] ss:$16 sps:$4 sm:$0xff]   ;;  %v6877_v17 = vld [vmem:[#allocation5 + $0x26c] ss:$16 sps:$4 sm:$0xff]  }
  0x52   :  { %1010 = vmatprep.subr.bf16.mxu0 %v6800_v28  ;;  %1096 = vmatprep.subr.bf16.mxu1 %v6802_v29  ;;  %v6872_v18 = vld [vmem:[#allocation5 + $0x260] ss:$16 sps:$4 sm:$0xff]   ;;  %v6875_v19 = vld [vmem:[#allocation5 + $0x268] ss:$16 sps:$4 sm:$0xff]   ;;  %v6880_v20 = vld [vmem:[#allocation5 + $0x284] ss:$16 sps:$4 sm:$0xff]  }
  0x53   :  { %v6883_v21 = vld [vmem:[#allocation5 + $0x28c] ss:$16 sps:$4 sm:$0xff]   ;;  %v6878_v22 = vld [vmem:[#allocation5 + $0x280] ss:$16 sps:$4 sm:$0xff]   ;;  %v6881_v23 = vld [vmem:[#allocation5 + $0x288] ss:$16 sps:$4 sm:$0xff]  }
  0x54   :  { %v6886_v24 = vld [vmem:[#allocation5 + $0x2a4] ss:$16 sps:$4 sm:$0xff]   ;;  %v6889_v25 = vld [vmem:[#allocation5 + $0x2ac] ss:$16 sps:$4 sm:$0xff]   ;;  %v6884_v26 = vld [vmem:[#allocation5 + $0x2a0] ss:$16 sps:$4 sm:$0xff]  }
  0x55   :  { %1011 = vmatpush1.bf16.msra.mxu0 %v6804_v30  ;;  %1097 = vmatpush1.bf16.msra.mxu1 %v6805_v31  ;;  %v6887_v27 = vld [vmem:[#allocation5 + $0x2a8] ss:$16 sps:$4 sm:$0xff]   ;;  %v6892_v28 = vld [vmem:[#allocation5 + $0x2c4] ss:$16 sps:$4 sm:$0xff]   ;;  %v6895_v29 = vld [vmem:[#allocation5 + $0x2cc] ss:$16 sps:$4 sm:$0xff]  }
  0x56   :  { %1012 = vmatprep.subr.bf16.mxu0 %v6806_v32  ;;  %1098 = vmatprep.subr.bf16.mxu1 %v6808_v33  ;;  %v8081_v30 = vld [vmem:[#allocation2 + $0x18] sm:$0xff]  ;;  %v6890_v32 = vld [vmem:[#allocation5 + $0x2c0] ss:$16 sps:$4 sm:$0xff]   ;;  %v6916_v47 = vld [vmem:[#allocation5 + $0x344] ss:$16 sps:$4 sm:$0xff]   ;;  %s7980_s23 = scalar_lea.vmem %s5902_s22, 1024 }
  0x57   :  { %v8083_v31 = vld [vmem:[#allocation2 + $0x38] sm:$0xff]  ;;  %p7981_p10 = scmp.ne.s32.totalorder %s5902_s22, %s7980_s23  ;;  %p7986_p12 = scmp.lt.s32.totalorder %s7980_s23, %s7980_s23 }
  0x58   :  { %v6893_v33 = vld [vmem:[#allocation5 + $0x2c8] ss:$16 sps:$4 sm:$0xff]  }
  0x59   :  { %1013 = vmatpush1.bf16.msra.mxu0 %v6810_v34  ;;  %1099 = vmatpush1.bf16.msra.mxu1 %v6811_v35  ;;  %v5917_v34 = vcombine.high %v8081_v30, %v8083_v31  ;;  %v6898_v35 = vld [vmem:[#allocation5 + $0x2e4] ss:$16 sps:$4 sm:$0xff]   ;;  %v6911_v46 = vld [vmem:[#allocation5 + $0x328] ss:$16 sps:$4 sm:$0xff]   ;;  %p7987_p13 = por %p7986_p12, %p7985_p11 }
  0x5a   :  { %1014 = vmatprep.subr.bf16.mxu0 %v6812_v36  ;;  %1100 = vmatprep.subr.bf16.mxu1 %v6814_v37  ;;  %v6901_v36 = vld [vmem:[#allocation5 + $0x2ec] ss:$16 sps:$4 sm:$0xff]   ;;  %v6896_v37 = vld [vmem:[#allocation5 + $0x2e0] ss:$16 sps:$4 sm:$0xff]   ;;  %v6917_v50 = vld [vmem:[#allocation5 + $0x348] ss:$16 sps:$4 sm:$0xff]  }
  0x5b   :  { %p7988_p0 = pnand %p7987_p13, %p7981_p10 }
  0x5d   :  { %1015 = vmatpush1.bf16.msra.mxu0 %v6816_v38  ;;  %1101 = vmatpush1.bf16.msra.mxu1 %v6817_v39  ;;  %v6899_v38 = vld [vmem:[#allocation5 + $0x2e8] ss:$16 sps:$4 sm:$0xff]   ;;  %v6904_v39 = vld [vmem:[#allocation5 + $0x304] ss:$16 sps:$4 sm:$0xff]  }
  0x5e   :  { %1016 = vmatprep.subr.bf16.mxu0 %v6818_v40  ;;  %1102 = vmatprep.subr.bf16.mxu1 %v6820_v41  ;;  %v6907_v40 = vld [vmem:[#allocation5 + $0x30c] ss:$16 sps:$4 sm:$0xff]   ;;  %v6902_v41 = vld [vmem:[#allocation5 + $0x300] ss:$16 sps:$4 sm:$0xff]  }
  0x61   :  { %1017 = vmatpush1.bf16.msra.mxu0 %v6822_v42  ;;  %1103 = vmatpush1.bf16.msra.mxu1 %v6823_v43  ;;  %v6905_v42 = vld [vmem:[#allocation5 + $0x308] ss:$16 sps:$4 sm:$0xff]   ;;  %v6910_v43 = vld [vmem:[#allocation5 + $0x324] ss:$16 sps:$4 sm:$0xff]  }
  0x62   :  { %1018 = vmatprep.subr.bf16.mxu0 %v6824_v44  ;;  %1104 = vmatprep.subr.bf16.mxu1 %v6826_v45  ;;  %v6913_v44 = vld [vmem:[#allocation5 + $0x32c] ss:$16 sps:$4 sm:$0xff]   ;;  %v6908_v45 = vld [vmem:[#allocation5 + $0x320] ss:$16 sps:$4 sm:$0xff]  }
  0x65   :  { %1019 = vmatpush1.bf16.msra.mxu0 %v6828_v48  ;;  %1105 = vmatpush1.bf16.msra.mxu1 %v6829_v49  ;;  %v6919_v48 = vld [vmem:[#allocation5 + $0x34c] ss:$16 sps:$4 sm:$0xff]   ;;  %v6914_v49 = vld [vmem:[#allocation5 + $0x340] ss:$16 sps:$4 sm:$0xff]  }
  0x66   :  { %1020 = vmatprep.subr.bf16.mxu0 %v6830_v51  ;;  %1106 = vmatprep.subr.bf16.mxu1 %v6832_v52  ;;  %v6922_v51 = vld [vmem:[#allocation5 + $0x364] ss:$16 sps:$4 sm:$0xff]   ;;  %v6925_v52 = vld [vmem:[#allocation5 + $0x36c] ss:$16 sps:$4 sm:$0xff]  }
  0x69   :  { %1021 = vmatpush1.bf16.msra.mxu0 %v6834_v53  ;;  %1107 = vmatpush1.bf16.msra.mxu1 %v6835_v54  ;;  %v6920_v53 = vld [vmem:[#allocation5 + $0x360] ss:$16 sps:$4 sm:$0xff]   ;;  %v6923_v54 = vld [vmem:[#allocation5 + $0x368] ss:$16 sps:$4 sm:$0xff]  }
  0x6a   :  { %1022 = vmatprep.subr.bf16.mxu0 %v6836_v55  ;;  %1108 = vmatprep.subr.bf16.mxu1 %v6838_v56  ;;  %v6928_v55 = vld [vmem:[#allocation5 + $0x384] ss:$16 sps:$4 sm:$0xff]   ;;  %v6931_v56 = vld [vmem:[#allocation5 + $0x38c] ss:$16 sps:$4 sm:$0xff]  }
  0x6d   :  { %1023 = vmatpush1.bf16.msra.mxu0 %v6840_v57  ;;  %1109 = vmatpush1.bf16.msra.mxu1 %v6841_v58  ;;  %v6926_v57 = vld [vmem:[#allocation5 + $0x380] ss:$16 sps:$4 sm:$0xff]   ;;  %v6929_v58 = vld [vmem:[#allocation5 + $0x388] ss:$16 sps:$4 sm:$0xff]  }
  0x6e   :  { %1024 = vmatprep.subr.bf16.mxu0 %v6842_v59  ;;  %1110 = vmatprep.subr.bf16.mxu1 %v6844_v60  ;;  %v6934_v59 = vld [vmem:[#allocation5 + $0x3a4] ss:$16 sps:$4 sm:$0xff]   ;;  %v6937_v60 = vld [vmem:[#allocation5 + $0x3ac] ss:$16 sps:$4 sm:$0xff]  }
  0x71   :  { %1025 = vmatpush1.bf16.msra.mxu0 %v6846_v61  ;;  %1111 = vmatpush1.bf16.msra.mxu1 %v6847_v62  ;;  %v6932_v61 = vld [vmem:[#allocation5 + $0x3a0] ss:$16 sps:$4 sm:$0xff]   ;;  %v6935_v62 = vld [vmem:[#allocation5 + $0x3a8] ss:$16 sps:$4 sm:$0xff]  }
  0x72   :  { %1026 = vmatprep.subr.bf16.mxu0 %v6848_v63  ;;  %1112 = vmatprep.subr.bf16.mxu1 %v6850_v0  ;;  %v6940_v63 = vld [vmem:[#allocation5 + $0x3c4] ss:$16 sps:$4 sm:$0xff]   ;;  %v6943_v0 = vld [vmem:[#allocation5 + $0x3cc] ss:$16 sps:$4 sm:$0xff]  }
  0x75   :  { %1027 = vmatpush1.bf16.msra.mxu0 %v6852_v1  ;;  %1113 = vmatpush1.bf16.msra.mxu1 %v6853_v2  ;;  %v6938_v1 = vld [vmem:[#allocation5 + $0x3c0] ss:$16 sps:$4 sm:$0xff]   ;;  %v6941_v2 = vld [vmem:[#allocation5 + $0x3c8] ss:$16 sps:$4 sm:$0xff]  }
  0x76   :  { %1039 = vmatprep.subr.bf16.mxu0 %v6856_v3  ;;  %1125 = vmatprep.subr.bf16.mxu1 %v6859_v4  ;;  %v6946_v3 = vld [vmem:[#allocation5 + $0x3e4] ss:$16 sps:$4 sm:$0xff]   ;;  %v6949_v4 = vld [vmem:[#allocation5 + $0x3ec] ss:$16 sps:$4 sm:$0xff]  }
  0x78   :  { %1029 = vmatmul.mubr.bf16.vlgmr.msra.gmra.mrb[0].mxu0 %v5914_v5  ;;  %1115 = vmatmul.mubr.bf16.vlgmr.msra.gmra.mrb[0].mxu1 %v5914_v5  ;;  %v6944_v5 = vld [vmem:[#allocation5 + $0x3e0] ss:$16 sps:$4 sm:$0xff]  }
  0x79   :  { %1040 = vmatpush1.bf16.msra.mxu0 %v6854_v6  ;;  %1126 = vmatpush1.bf16.msra.mxu1 %v6857_v7  ;;  %v6947_v6 = vld [vmem:[#allocation5 + $0x3e8] ss:$16 sps:$4 sm:$0xff]   ;;  %v6952_v7 = vld [vmem:[#allocation7 + $0x4] ss:$16 sps:$4 sm:$0xff]  }
  0x7a   :  { %1041 = vmatprep.subr.bf16.mxu0 %v6862_v8  ;;  %1127 = vmatprep.subr.bf16.mxu1 %v6865_v9  ;;  %v6955_v8 = vld [vmem:[#allocation7 + $0xc] ss:$16 sps:$4 sm:$0xff]   ;;  %v6950_v9 = vld [vmem:[#allocation7] ss:$16 sps:$4 sm:$0xff]  }
  0x7b   :  { %1071 = vmatprep.mubr.bf16.mxu0 %v5917_v34  ;;  %1157 = vmatprep.mubr.bf16.mxu1 %v5917_v34  ;;  %v6986_v34 = vld [vmem:[#allocation7 + $0xc0] ss:$16 sps:$4 sm:$0xff]  }
  0x7d   :  { %1042 = vmatpush1.bf16.msra.mxu0 %v6860_v10  ;;  %1128 = vmatpush1.bf16.msra.mxu1 %v6863_v11  ;;  %v6953_v10 = vld [vmem:[#allocation7 + $0x8] ss:$16 sps:$4 sm:$0xff]   ;;  %v5916_v11 = vcombine.low %v8081_v30, %v8083_v31  ;;  %v6980_v30 = vld [vmem:[#allocation7 + $0xa0] ss:$16 sps:$4 sm:$0xff]  }
  0x7e   :  { %1043 = vmatprep.subr.bf16.mxu0 %v6868_v12  ;;  %1129 = vmatprep.subr.bf16.mxu1 %v6871_v13  ;;  %v6958_v12 = vld [vmem:[#allocation7 + $0x24] ss:$16 sps:$4 sm:$0xff]   ;;  %v6961_v13 = vld [vmem:[#allocation7 + $0x2c] ss:$16 sps:$4 sm:$0xff]   ;;  %v6983_v31 = vld [vmem:[#allocation7 + $0xa8] ss:$16 sps:$4 sm:$0xff]  }
  0x81   :  { %1044 = vmatpush1.bf16.msra.mxu0 %v6866_v14  ;;  %1130 = vmatpush1.bf16.msra.mxu1 %v6869_v15  ;;  %v6956_v14 = vld [vmem:[#allocation7 + $0x20] ss:$16 sps:$4 sm:$0xff]   ;;  %v6959_v15 = vld [vmem:[#allocation7 + $0x28] ss:$16 sps:$4 sm:$0xff]  }
  0x82   :  { %1045 = vmatprep.subr.bf16.mxu0 %v6874_v16  ;;  %1131 = vmatprep.subr.bf16.mxu1 %v6877_v17  ;;  %v6964_v16 = vld [vmem:[#allocation7 + $0x44] ss:$16 sps:$4 sm:$0xff]   ;;  %v6967_v17 = vld [vmem:[#allocation7 + $0x4c] ss:$16 sps:$4 sm:$0xff]  }
  0x85   :  { %1046 = vmatpush1.bf16.msra.mxu0 %v6872_v18  ;;  %1132 = vmatpush1.bf16.msra.mxu1 %v6875_v19  ;;  %v6962_v18 = vld [vmem:[#allocation7 + $0x40] ss:$16 sps:$4 sm:$0xff]   ;;  %v6965_v19 = vld [vmem:[#allocation7 + $0x48] ss:$16 sps:$4 sm:$0xff]  }
  0x86   :  { %1047 = vmatprep.subr.bf16.mxu0 %v6880_v20  ;;  %1133 = vmatprep.subr.bf16.mxu1 %v6883_v21  ;;  %v6970_v20 = vld [vmem:[#allocation7 + $0x64] ss:$16 sps:$4 sm:$0xff]   ;;  %v6973_v21 = vld [vmem:[#allocation7 + $0x6c] ss:$16 sps:$4 sm:$0xff]  }
  0x89   :  { %1048 = vmatpush1.bf16.msra.mxu0 %v6878_v22  ;;  %1134 = vmatpush1.bf16.msra.mxu1 %v6881_v23  ;;  %v6968_v22 = vld [vmem:[#allocation7 + $0x60] ss:$16 sps:$4 sm:$0xff]   ;;  %v6971_v23 = vld [vmem:[#allocation7 + $0x68] ss:$16 sps:$4 sm:$0xff]  }
  0x8a   :  { %1049 = vmatprep.subr.bf16.mxu0 %v6886_v24  ;;  %1135 = vmatprep.subr.bf16.mxu1 %v6889_v25  ;;  %v6976_v24 = vld [vmem:[#allocation7 + $0x84] ss:$16 sps:$4 sm:$0xff]   ;;  %v6979_v25 = vld [vmem:[#allocation7 + $0x8c] ss:$16 sps:$4 sm:$0xff]  }
  0x8d   :  { %1050 = vmatpush1.bf16.msra.mxu0 %v6884_v26  ;;  %1136 = vmatpush1.bf16.msra.mxu1 %v6887_v27  ;;  %v6974_v26 = vld [vmem:[#allocation7 + $0x80] ss:$16 sps:$4 sm:$0xff]   ;;  %v6977_v27 = vld [vmem:[#allocation7 + $0x88] ss:$16 sps:$4 sm:$0xff]  }
  0x8e   :  { %1051 = vmatprep.subr.bf16.mxu0 %v6892_v28  ;;  %1137 = vmatprep.subr.bf16.mxu1 %v6895_v29  ;;  %v6982_v28 = vld [vmem:[#allocation7 + $0xa4] ss:$16 sps:$4 sm:$0xff]   ;;  %v6985_v29 = vld [vmem:[#allocation7 + $0xac] ss:$16 sps:$4 sm:$0xff]  }
  0x91   :  { %1052 = vmatpush1.bf16.msra.mxu0 %v6890_v32  ;;  %1138 = vmatpush1.bf16.msra.mxu1 %v6893_v33  ;;  %v6988_v32 = vld [vmem:[#allocation7 + $0xc4] ss:$16 sps:$4 sm:$0xff]   ;;  %v6991_v33 = vld [vmem:[#allocation7 + $0xcc] ss:$16 sps:$4 sm:$0xff]  }
  0x92   :  { %1053 = vmatprep.subr.bf16.mxu0 %v6898_v35  ;;  %1139 = vmatprep.subr.bf16.mxu1 %v6901_v36  ;;  %v6989_v35 = vld [vmem:[#allocation7 + $0xc8] ss:$16 sps:$4 sm:$0xff]   ;;  %v6994_v36 = vld [vmem:[#allocation7 + $0xe4] ss:$16 sps:$4 sm:$0xff]  }
  0x95   :  { %1054 = vmatpush1.bf16.msra.mxu0 %v6896_v37  ;;  %1140 = vmatpush1.bf16.msra.mxu1 %v6899_v38  ;;  %v6997_v37 = vld [vmem:[#allocation7 + $0xec] ss:$16 sps:$4 sm:$0xff]   ;;  %v6992_v38 = vld [vmem:[#allocation7 + $0xe0] ss:$16 sps:$4 sm:$0xff]  }
  0x96   :  { %1055 = vmatprep.subr.bf16.mxu0 %v6904_v39  ;;  %1141 = vmatprep.subr.bf16.mxu1 %v6907_v40  ;;  %v6995_v39 = vld [vmem:[#allocation7 + $0xe8] ss:$16 sps:$4 sm:$0xff]   ;;  %v7000_v40 = vld [vmem:[#allocation7 + $0x104] ss:$16 sps:$4 sm:$0xff]  }
  0x99   :  { %1056 = vmatpush1.bf16.msra.mxu0 %v6902_v41  ;;  %1142 = vmatpush1.bf16.msra.mxu1 %v6905_v42  ;;  %v7003_v41 = vld [vmem:[#allocation7 + $0x10c] ss:$16 sps:$4 sm:$0xff]   ;;  %v6998_v42 = vld [vmem:[#allocation7 + $0x100] ss:$16 sps:$4 sm:$0xff]  }
  0x9a   :  { %1057 = vmatprep.subr.bf16.mxu0 %v6910_v43  ;;  %1143 = vmatprep.subr.bf16.mxu1 %v6913_v44  ;;  %v7001_v43 = vld [vmem:[#allocation7 + $0x108] ss:$16 sps:$4 sm:$0xff]   ;;  %v7006_v44 = vld [vmem:[#allocation7 + $0x124] ss:$16 sps:$4 sm:$0xff]  }
  0x9d   :  { %1058 = vmatpush1.bf16.msra.mxu0 %v6908_v45  ;;  %1144 = vmatpush1.bf16.msra.mxu1 %v6911_v46  ;;  %v7009_v45 = vld [vmem:[#allocation7 + $0x12c] ss:$16 sps:$4 sm:$0xff]   ;;  %v7004_v46 = vld [vmem:[#allocation7 + $0x120] ss:$16 sps:$4 sm:$0xff]  }
  0x9e   :  { %1059 = vmatprep.subr.bf16.mxu0 %v6916_v47  ;;  %1145 = vmatprep.subr.bf16.mxu1 %v6919_v48  ;;  %v7007_v47 = vld [vmem:[#allocation7 + $0x128] ss:$16 sps:$4 sm:$0xff]   ;;  %v7012_v48 = vld [vmem:[#allocation7 + $0x144] ss:$16 sps:$4 sm:$0xff]  }
  0xa1   :  { %1060 = vmatpush1.bf16.msra.mxu0 %v6914_v49  ;;  %1146 = vmatpush1.bf16.msra.mxu1 %v6917_v50  ;;  %v7015_v49 = vld [vmem:[#allocation7 + $0x14c] ss:$16 sps:$4 sm:$0xff]   ;;  %v7010_v50 = vld [vmem:[#allocation7 + $0x140] ss:$16 sps:$4 sm:$0xff]  }
  0xa2   :  { %1061 = vmatprep.subr.bf16.mxu0 %v6922_v51  ;;  %1147 = vmatprep.subr.bf16.mxu1 %v6925_v52  ;;  %v7013_v51 = vld [vmem:[#allocation7 + $0x148] ss:$16 sps:$4 sm:$0xff]   ;;  %v7018_v52 = vld [vmem:[#allocation7 + $0x164] ss:$16 sps:$4 sm:$0xff]  }
  0xa5   :  { %1062 = vmatpush1.bf16.msra.mxu0 %v6920_v53  ;;  %1148 = vmatpush1.bf16.msra.mxu1 %v6923_v54  ;;  %v7021_v53 = vld [vmem:[#allocation7 + $0x16c] ss:$16 sps:$4 sm:$0xff]   ;;  %v7016_v54 = vld [vmem:[#allocation7 + $0x160] ss:$16 sps:$4 sm:$0xff]  }
  0xa6   :  { %1063 = vmatprep.subr.bf16.mxu0 %v6928_v55  ;;  %1149 = vmatprep.subr.bf16.mxu1 %v6931_v56  ;;  %v7019_v55 = vld [vmem:[#allocation7 + $0x168] ss:$16 sps:$4 sm:$0xff]   ;;  %v7024_v56 = vld [vmem:[#allocation7 + $0x184] ss:$16 sps:$4 sm:$0xff]  }
  0xa9   :  { %1064 = vmatpush1.bf16.msra.mxu0 %v6926_v57  ;;  %1150 = vmatpush1.bf16.msra.mxu1 %v6929_v58  ;;  %v7027_v57 = vld [vmem:[#allocation7 + $0x18c] ss:$16 sps:$4 sm:$0xff]   ;;  %v7022_v58 = vld [vmem:[#allocation7 + $0x180] ss:$16 sps:$4 sm:$0xff]  }
  0xaa   :  { %1065 = vmatprep.subr.bf16.mxu0 %v6934_v59  ;;  %1151 = vmatprep.subr.bf16.mxu1 %v6937_v60  ;;  %v7025_v59 = vld [vmem:[#allocation7 + $0x188] ss:$16 sps:$4 sm:$0xff]   ;;  %v7030_v60 = vld [vmem:[#allocation7 + $0x1a4] ss:$16 sps:$4 sm:$0xff]  }
  0xad   :  { %1066 = vmatpush1.bf16.msra.mxu0 %v6932_v61  ;;  %1152 = vmatpush1.bf16.msra.mxu1 %v6935_v62  ;;  %v7033_v61 = vld [vmem:[#allocation7 + $0x1ac] ss:$16 sps:$4 sm:$0xff]   ;;  %v7028_v62 = vld [vmem:[#allocation7 + $0x1a0] ss:$16 sps:$4 sm:$0xff]  }
  0xae   :  { %1067 = vmatprep.subr.bf16.mxu0 %v6940_v63  ;;  %1153 = vmatprep.subr.bf16.mxu1 %v6943_v0  ;;  %v7031_v63 = vld [vmem:[#allocation7 + $0x1a8] ss:$16 sps:$4 sm:$0xff]   ;;  %v7036_v0 = vld [vmem:[#allocation7 + $0x1c4] ss:$16 sps:$4 sm:$0xff]  }
  0xb1   :  { %1068 = vmatpush1.bf16.msra.mxu0 %v6938_v1  ;;  %1154 = vmatpush1.bf16.msra.mxu1 %v6941_v2  ;;  %v7039_v1 = vld [vmem:[#allocation7 + $0x1cc] ss:$16 sps:$4 sm:$0xff]   ;;  %v7034_v2 = vld [vmem:[#allocation7 + $0x1c0] ss:$16 sps:$4 sm:$0xff]  }
  0xb2   :  { %1069 = vmatprep.subr.bf16.mxu0 %v6946_v3  ;;  %1155 = vmatprep.subr.bf16.mxu1 %v6949_v4  ;;  %v7037_v3 = vld [vmem:[#allocation7 + $0x1c8] ss:$16 sps:$4 sm:$0xff]   ;;  %v7042_v4 = vld [vmem:[#allocation7 + $0x1e4] ss:$16 sps:$4 sm:$0xff]  }
  0xb5   :  { %1070 = vmatpush1.bf16.msra.mxu0 %v6944_v5  ;;  %1156 = vmatpush1.bf16.msra.mxu1 %v6947_v6  ;;  %v7045_v5 = vld [vmem:[#allocation7 + $0x1ec] ss:$16 sps:$4 sm:$0xff]   ;;  %v7040_v6 = vld [vmem:[#allocation7 + $0x1e0] ss:$16 sps:$4 sm:$0xff]  }
  0xb6   :  { %1820 = vmatprep.subr.bf16.mxu0 %v6952_v7  ;;  %1906 = vmatprep.subr.bf16.mxu1 %v6955_v8  ;;  %v7043_v7 = vld [vmem:[#allocation7 + $0x1e8] ss:$16 sps:$4 sm:$0xff]   ;;  %v7048_v8 = vld [vmem:[#allocation7 + $0x204] ss:$16 sps:$4 sm:$0xff]  }
  0xb8   :  { %1072 = vmatmul.mubr.bf16.vlgmr.msra.gmra.mrb[0].mxu0 %v5916_v11  ;;  %1158 = vmatmul.mubr.bf16.vlgmr.msra.gmra.mrb[0].mxu1 %v5916_v11  ;;  %v58_v11 = vld [vmem:[#allocation2 + $0x20] sm:$0xff] }
  0xb9   :  { %1821 = vmatpush1.bf16.msra.mxu0 %v6950_v9  ;;  %1907 = vmatpush1.bf16.msra.mxu1 %v6953_v10  ;;  %v7051_v9 = vld [vmem:[#allocation7 + $0x20c] ss:$16 sps:$4 sm:$0xff]   ;;  %v56_v10 = vld [vmem:[#allocation2] sm:$0xff] }
  0xba   :  { %1822 = vmatprep.subr.bf16.mxu0 %v6958_v12  ;;  %1908 = vmatprep.subr.bf16.mxu1 %v6961_v13  ;;  %v8089_v12 = vld [vmem:[#allocation2 + $0x28] sm:$0xff] }
  0xbb   :  { %v8091_v13 = vld [vmem:[#allocation2 + $0x8] sm:$0xff] }
  0xbd   :  { %1823 = vmatpush1.bf16.msra.mxu0 %v6956_v14  ;;  %1909 = vmatpush1.bf16.msra.mxu1 %v6959_v15  ;;  %v64_v14 = vunpack.c.l.bf16 %v58_v11 }
  0xbe   :  { %1824 = vmatprep.subr.bf16.mxu0 %v6964_v16  ;;  %1910 = vmatprep.subr.bf16.mxu1 %v6967_v17  ;;  %v61_v17 = vunpack.c.h.bf16 %v56_v10 }
  0xc1   :  { %1825 = vmatpush1.bf16.msra.mxu0 %v6962_v18  ;;  %1911 = vmatpush1.bf16.msra.mxu1 %v6965_v19  ;;  %v65_v18 = vunpack.c.h.bf16 %v58_v11  ;;  %v60_v19 = vunpack.c.l.bf16 %v56_v10  ;;  %v7103_v10 = vld [vmem:[#allocation7 + $0x328] ss:$16 sps:$4 sm:$0xff]   ;;  %v7108_v11 = vld [vmem:[#allocation7 + $0x344] ss:$16 sps:$4 sm:$0xff]  }
  0xc2   :  { %1826 = vmatprep.subr.bf16.mxu0 %v6970_v20  ;;  %1912 = vmatprep.subr.bf16.mxu1 %v6973_v21 }
  0xc5   :  { %1827 = vmatpush1.bf16.msra.mxu0 %v6968_v22  ;;  %1913 = vmatpush1.bf16.msra.mxu1 %v6971_v23  ;;  %v67_v22 = vunpack.c.h.bf16 %v8089_v12 }
  0xc6   :  { %1828 = vmatprep.subr.bf16.mxu0 %v6976_v24  ;;  %1914 = vmatprep.subr.bf16.mxu1 %v6979_v25  ;;  %v63_v25 = vunpack.c.h.bf16 %v8091_v13 }
  0xc9   :  { %1829 = vmatpush1.bf16.msra.mxu0 %v6974_v26  ;;  %1915 = vmatpush1.bf16.msra.mxu1 %v6977_v27 }
  0xca   :  { %1830 = vmatprep.subr.bf16.mxu0 %v6982_v28  ;;  %1916 = vmatprep.subr.bf16.mxu1 %v6985_v29 }
  0xcd   :  { %1831 = vmatpush1.bf16.msra.mxu0 %v6980_v30  ;;  %1917 = vmatpush1.bf16.msra.mxu1 %v6983_v31  ;;  %v7046_v31 = vld [vmem:[#allocation7 + $0x200] ss:$16 sps:$4 sm:$0xff]  }
  0xce   :  { %1832 = vmatprep.subr.bf16.mxu0 %v6988_v32  ;;  %1918 = vmatprep.subr.bf16.mxu1 %v6991_v33  ;;  %v7049_v32 = vld [vmem:[#allocation7 + $0x208] ss:$16 sps:$4 sm:$0xff]  }
  0xd1   :  { %1833 = vmatpush1.bf16.msra.mxu0 %v6986_v34  ;;  %1919 = vmatpush1.bf16.msra.mxu1 %v6989_v35 }
  0xd2   :  { %1834 = vmatprep.subr.bf16.mxu0 %v6994_v36  ;;  %1920 = vmatprep.subr.bf16.mxu1 %v6997_v37  ;;  %v7054_v36 = vld [vmem:[#allocation7 + $0x224] ss:$16 sps:$4 sm:$0xff]   ;;  %v7057_v37 = vld [vmem:[#allocation7 + $0x22c] ss:$16 sps:$4 sm:$0xff]  }
  0xd5   :  { %1835 = vmatpush1.bf16.msra.mxu0 %v6992_v38  ;;  %1921 = vmatpush1.bf16.msra.mxu1 %v6995_v39 }
  0xd6   :  { %1836 = vmatprep.subr.bf16.mxu0 %v7000_v40  ;;  %1922 = vmatprep.subr.bf16.mxu1 %v7003_v41  ;;  %v7052_v40 = vld [vmem:[#allocation7 + $0x220] ss:$16 sps:$4 sm:$0xff]   ;;  %v7055_v41 = vld [vmem:[#allocation7 + $0x228] ss:$16 sps:$4 sm:$0xff]  }
  0xd9   :  { %1837 = vmatpush1.bf16.msra.mxu0 %v6998_v42  ;;  %1923 = vmatpush1.bf16.msra.mxu1 %v7001_v43  ;;  %v7060_v43 = vld [vmem:[#allocation7 + $0x244] ss:$16 sps:$4 sm:$0xff]  }
  0xda   :  { %1838 = vmatprep.subr.bf16.mxu0 %v7006_v44  ;;  %1924 = vmatprep.subr.bf16.mxu1 %v7009_v45  ;;  %v7063_v44 = vld [vmem:[#allocation7 + $0x24c] ss:$16 sps:$4 sm:$0xff]   ;;  %v7058_v45 = vld [vmem:[#allocation7 + $0x240] ss:$16 sps:$4 sm:$0xff]  }
  0xdd   :  { %1839 = vmatpush1.bf16.msra.mxu0 %v7004_v46  ;;  %1925 = vmatpush1.bf16.msra.mxu1 %v7007_v47  ;;  %v7061_v46 = vld [vmem:[#allocation7 + $0x248] ss:$16 sps:$4 sm:$0xff]   ;;  %v7066_v47 = vld [vmem:[#allocation7 + $0x264] ss:$16 sps:$4 sm:$0xff]  }
  0xde   :  { %1840 = vmatprep.subr.bf16.mxu0 %v7012_v48  ;;  %1926 = vmatprep.subr.bf16.mxu1 %v7015_v49  ;;  %v7069_v48 = vld [vmem:[#allocation7 + $0x26c] ss:$16 sps:$4 sm:$0xff]   ;;  %v7064_v49 = vld [vmem:[#allocation7 + $0x260] ss:$16 sps:$4 sm:$0xff]  }
  0xe1   :  { %1841 = vmatpush1.bf16.msra.mxu0 %v7010_v50  ;;  %1927 = vmatpush1.bf16.msra.mxu1 %v7013_v51  ;;  %v7067_v50 = vld [vmem:[#allocation7 + $0x268] ss:$16 sps:$4 sm:$0xff]   ;;  %v7072_v51 = vld [vmem:[#allocation7 + $0x284] ss:$16 sps:$4 sm:$0xff]  }
  0xe2   :  { %1842 = vmatprep.subr.bf16.mxu0 %v7018_v52  ;;  %1928 = vmatprep.subr.bf16.mxu1 %v7021_v53  ;;  %v7075_v52 = vld [vmem:[#allocation7 + $0x28c] ss:$16 sps:$4 sm:$0xff]   ;;  %v7070_v53 = vld [vmem:[#allocation7 + $0x280] ss:$16 sps:$4 sm:$0xff]  }
  0xe5   :  { %1843 = vmatpush1.bf16.msra.mxu0 %v7016_v54  ;;  %1929 = vmatpush1.bf16.msra.mxu1 %v7019_v55  ;;  %v7073_v54 = vld [vmem:[#allocation7 + $0x288] ss:$16 sps:$4 sm:$0xff]   ;;  %v7078_v55 = vld [vmem:[#allocation7 + $0x2a4] ss:$16 sps:$4 sm:$0xff]  }
  0xe6   :  { %1844 = vmatprep.subr.bf16.mxu0 %v7024_v56  ;;  %1930 = vmatprep.subr.bf16.mxu1 %v7027_v57  ;;  %v7081_v56 = vld [vmem:[#allocation7 + $0x2ac] ss:$16 sps:$4 sm:$0xff]   ;;  %v7076_v57 = vld [vmem:[#allocation7 + $0x2a0] ss:$16 sps:$4 sm:$0xff]  }
  0xe9   :  { %1845 = vmatpush1.bf16.msra.mxu0 %v7022_v58  ;;  %1931 = vmatpush1.bf16.msra.mxu1 %v7025_v59  ;;  %v7079_v58 = vld [vmem:[#allocation7 + $0x2a8] ss:$16 sps:$4 sm:$0xff]   ;;  %v7084_v59 = vld [vmem:[#allocation7 + $0x2c4] ss:$16 sps:$4 sm:$0xff]  }
  0xea   :  { %1846 = vmatprep.subr.bf16.mxu0 %v7030_v60  ;;  %1932 = vmatprep.subr.bf16.mxu1 %v7033_v61  ;;  %v7087_v60 = vld [vmem:[#allocation7 + $0x2cc] ss:$16 sps:$4 sm:$0xff]   ;;  %v7082_v61 = vld [vmem:[#allocation7 + $0x2c0] ss:$16 sps:$4 sm:$0xff]  }
  0xed   :  { %1847 = vmatpush1.bf16.msra.mxu0 %v7028_v62  ;;  %1933 = vmatpush1.bf16.msra.mxu1 %v7031_v63  ;;  %v7085_v62 = vld [vmem:[#allocation7 + $0x2c8] ss:$16 sps:$4 sm:$0xff]   ;;  %v7090_v63 = vld [vmem:[#allocation7 + $0x2e4] ss:$16 sps:$4 sm:$0xff]  }
  0xee   :  { %1848 = vmatprep.subr.bf16.mxu0 %v7036_v0  ;;  %1934 = vmatprep.subr.bf16.mxu1 %v7039_v1  ;;  %v7093_v0 = vld [vmem:[#allocation7 + $0x2ec] ss:$16 sps:$4 sm:$0xff]   ;;  %v7088_v1 = vld [vmem:[#allocation7 + $0x2e0] ss:$16 sps:$4 sm:$0xff]  }
  0xf1   :  { %1849 = vmatpush1.bf16.msra.mxu0 %v7034_v2  ;;  %1935 = vmatpush1.bf16.msra.mxu1 %v7037_v3  ;;  %v7091_v2 = vld [vmem:[#allocation7 + $0x2e8] ss:$16 sps:$4 sm:$0xff]   ;;  %v7096_v3 = vld [vmem:[#allocation7 + $0x304] ss:$16 sps:$4 sm:$0xff]  }
  0xf2   :  { %1850 = vmatprep.subr.bf16.mxu0 %v7042_v4  ;;  %1936 = vmatprep.subr.bf16.mxu1 %v7045_v5  ;;  %v7099_v4 = vld [vmem:[#allocation7 + $0x30c] ss:$16 sps:$4 sm:$0xff]   ;;  %v7094_v5 = vld [vmem:[#allocation7 + $0x300] ss:$16 sps:$4 sm:$0xff]  }
  0xf5   :  { %1851 = vmatpush1.bf16.msra.mxu0 %v7040_v6  ;;  %1937 = vmatpush1.bf16.msra.mxu1 %v7043_v7  ;;  %v7097_v6 = vld [vmem:[#allocation7 + $0x308] ss:$16 sps:$4 sm:$0xff]   ;;  %v7102_v7 = vld [vmem:[#allocation7 + $0x324] ss:$16 sps:$4 sm:$0xff]  }
  0xf6   :  { %1863 = vmatprep.subr.bf16.mxu0 %v7048_v8  ;;  %1949 = vmatprep.subr.bf16.mxu1 %v7051_v9  ;;  %v7105_v8 = vld [vmem:[#allocation7 + $0x32c] ss:$16 sps:$4 sm:$0xff]   ;;  %v7100_v9 = vld [vmem:[#allocation7 + $0x320] ss:$16 sps:$4 sm:$0xff]  }
 0x18b   :  { %v1073_v15 = vpop.f32.mrb[0].mxu0  ;;  %v8093_v16 = vpop.f32.mrb[0].mxu1 }
 0x18c   :  { %v1075_v20 = vpop.f32.mrb[1].mxu0  ;;  %v1161_v21 = vpop.f32.mrb[1].mxu1  ;;  %v8105_v33 = vadd.f32 %v1073_v15, %v60_v19  ;;  %v7106_v15 = vld [vmem:[#allocation7 + $0x340] ss:$16 sps:$4 sm:$0xff]   ;;  %v7117_v19 = vld [vmem:[#allocation7 + $0x36c] ss:$16 sps:$4 sm:$0xff]  }
 0x18d   :  { %v1077_v23 = vpop.f32.mrb[2].mxu0  ;;  %v8096_v24 = vpop.f32.mrb[2].mxu1  ;;  %v8101_v29 = vadd.f32 %v1075_v20, %v61_v17  ;;  %v8111_v38 = vadd.f32 %v1161_v21, %v63_v25  ;;  %v7109_v17 = vld [vmem:[#allocation7 + $0x348] ss:$16 sps:$4 sm:$0xff]   ;;  %v7112_v20 = vld [vmem:[#allocation7 + $0x360] ss:$16 sps:$4 sm:$0xff]  }
 0x18e   :  { %v8099_v26 = vadd.f32 %v1077_v23, %v64_v14  ;;  %v1079_v27 = vpop.f32.mrb[3].mxu0  ;;  %v1165_v28 = vpop.f32.mrb[3].mxu1  ;;  %v7111_v14 = vld [vmem:[#allocation7 + $0x34c] ss:$16 sps:$4 sm:$0xff]   ;;  %v7115_v21 = vld [vmem:[#allocation7 + $0x368] ss:$16 sps:$4 sm:$0xff]  }
 0x18f   :  { %v8103_v30 = vadd.f32 %v1079_v27, %v65_v18  ;;  %v8107_v34 = vadd.f32 %v1165_v28, %v67_v22  ;;  %v7114_v18 = vld [vmem:[#allocation7 + $0x364] ss:$16 sps:$4 sm:$0xff]   ;;  %v7123_v23 = vld [vmem:[#allocation7 + $0x38c] ss:$16 sps:$4 sm:$0xff]   ;;  %v7118_v25 = vld [vmem:[#allocation7 + $0x380] ss:$16 sps:$4 sm:$0xff]  }
 0x190   :  { %v1176_v39 = vpack.c.bf16 %v8099_v26, %v8105_v33  ;;  %v7120_v22 = vld [vmem:[#allocation7 + $0x384] ss:$16 sps:$4 sm:$0xff]   ;;  %v7121_v27 = vld [vmem:[#allocation7 + $0x388] ss:$16 sps:$4 sm:$0xff]  }
 0x191   :  { %v1177_v35 = vpack.c.bf16 %v8103_v30, %v8101_v29  ;;  %v1179_v42 = vpack.c.bf16 %v8107_v34, %v8111_v38  ;;  %v7126_v28 = vld [vmem:[#allocation7 + $0x3a4] ss:$16 sps:$4 sm:$0xff]  }
 0x193   :  { %1852 = vmatprep.mubr.bf16.mxu0 %v1177_v35  ;;  %1938 = vmatprep.mubr.bf16.mxu1 %v1177_v35  ;;  %v7127_v35 = vld [vmem:[#allocation7 + $0x3a8] ss:$16 sps:$4 sm:$0xff]  }
 0x194   :  { %1853 = vmatmul.mubr.bf16.vlgmr.msra.gmra.mrb[4].mxu0 %v1176_v39  ;;  %1939 = vmatmul.mubr.bf16.vlgmr.msra.gmra.mrb[4].mxu1 %v1176_v39  ;;  %v7130_v39 = vld [vmem:[#allocation7 + $0x3c0] ss:$16 sps:$4 sm:$0xff]  }
 0x195   :  { %1864 = vmatpush1.bf16.msra.mxu0 %v7046_v31  ;;  %1950 = vmatpush1.bf16.msra.mxu1 %v7049_v32  ;;  %v7129_v31 = vld [vmem:[#allocation7 + $0x3ac] ss:$16 sps:$4 sm:$0xff]   ;;  %v7124_v32 = vld [vmem:[#allocation7 + $0x3a0] ss:$16 sps:$4 sm:$0xff]  }
 0x196   :  { %1895 = vmatprep.mubr.bf16.mxu0 %v1179_v42  ;;  %1981 = vmatprep.mubr.bf16.mxu1 %v1179_v42  ;;  %v7138_v42 = vld [vmem:[#allocation7 + $0x3e4] ss:$16 sps:$4 sm:$0xff]  }
 0x197   :  { %1865 = vmatprep.subr.bf16.mxu0 %v7054_v36  ;;  %1951 = vmatprep.subr.bf16.mxu1 %v7057_v37  ;;  %v7132_v36 = vld [vmem:[#allocation7 + $0x3c4] ss:$16 sps:$4 sm:$0xff]   ;;  %v7135_v37 = vld [vmem:[#allocation7 + $0x3cc] ss:$16 sps:$4 sm:$0xff]  }
 0x199   :  { %1866 = vmatpush1.bf16.msra.mxu0 %v7052_v40  ;;  %1952 = vmatpush1.bf16.msra.mxu1 %v7055_v41  ;;  %v7133_v40 = vld [vmem:[#allocation7 + $0x3c8] ss:$16 sps:$4 sm:$0xff]   ;;  %v66_v41 = vunpack.c.l.bf16 %v8089_v12  ;;  %v7142_v12 = vld [vmem:[#allocation5 + $0x400] ss:$16 sps:$4 sm:$0xff]  }
 0x19a   :  { %1867 = vmatprep.subr.bf16.mxu0 %v7060_v43  ;;  %1953 = vmatprep.subr.bf16.mxu1 %v7063_v44  ;;  %v7141_v43 = vld [vmem:[#allocation7 + $0x3ec] ss:$16 sps:$4 sm:$0xff]   ;;  %v62_v44 = vunpack.c.l.bf16 %v8091_v13 }
 0x19d   :  { %1868 = vmatpush1.bf16.msra.mxu0 %v7058_v45  ;;  %1954 = vmatpush1.bf16.msra.mxu1 %v7061_v46  ;;  %v7136_v45 = vld [vmem:[#allocation7 + $0x3e0] ss:$16 sps:$4 sm:$0xff]   ;;  %v7139_v46 = vld [vmem:[#allocation7 + $0x3e8] ss:$16 sps:$4 sm:$0xff]  }
 0x19e   :  { %1869 = vmatprep.subr.bf16.mxu0 %v7066_v47  ;;  %1955 = vmatprep.subr.bf16.mxu1 %v7069_v48  ;;  %v8120_v47 = vadd.f32 %v8096_v24, %v66_v41  ;;  %v7144_v48 = vld [vmem:[#allocation5 + $0x404] ss:$16 sps:$4 sm:$0xff]   ;;  %v7148_v24 = vld [vmem:[#allocation5 + $0x420] ss:$16 sps:$4 sm:$0xff]   ;;  %v7219_v41 = vld [vmem:[#allocation5 + $0x58c] ss:$16 sps:$4 sm:$0xff]  }
 0x1a1   :  { %1870 = vmatpush1.bf16.msra.mxu0 %v7064_v49  ;;  %1956 = vmatpush1.bf16.msra.mxu1 %v7067_v50  ;;  %v7147_v49 = vld [vmem:[#allocation5 + $0x40c] ss:$16 sps:$4 sm:$0xff]   ;;  %v8123_v50 = vadd.f32 %v8093_v16, %v62_v44  ;;  %v7156_v16 = vld [vmem:[#allocation5 + $0x444] ss:$16 sps:$4 sm:$0xff]  }
 0x1a2   :  { %1871 = vmatprep.subr.bf16.mxu0 %v7072_v51  ;;  %1957 = vmatprep.subr.bf16.mxu1 %v7075_v52  ;;  %v7145_v51 = vld [vmem:[#allocation5 + $0x408] ss:$16 sps:$4 sm:$0xff]   ;;  %v7150_v52 = vld [vmem:[#allocation5 + $0x424] ss:$16 sps:$4 sm:$0xff]  }
 0x1a3   :  { %v1178_v13 = vpack.c.bf16 %v8120_v47, %v8123_v50  ;;  %v7222_v44 = vld [vmem:[#allocation5 + $0x5a4] ss:$16 sps:$4 sm:$0xff]  }
 0x1a5   :  { %1872 = vmatpush1.bf16.msra.mxu0 %v7070_v53  ;;  %1958 = vmatpush1.bf16.msra.mxu1 %v7073_v54  ;;  %v7153_v53 = vld [vmem:[#allocation5 + $0x42c] ss:$16 sps:$4 sm:$0xff]   ;;  %v7151_v54 = vld [vmem:[#allocation5 + $0x428] ss:$16 sps:$4 sm:$0xff]  }
 0x1a6   :  { %1873 = vmatprep.subr.bf16.mxu0 %v7078_v55  ;;  %1959 = vmatprep.subr.bf16.mxu1 %v7081_v56  ;;  %v7159_v55 = vld [vmem:[#allocation5 + $0x44c] ss:$16 sps:$4 sm:$0xff]   ;;  %v7154_v56 = vld [vmem:[#allocation5 + $0x440] ss:$16 sps:$4 sm:$0xff]  }
 0x1a9   :  { %1874 = vmatpush1.bf16.msra.mxu0 %v7076_v57  ;;  %1960 = vmatpush1.bf16.msra.mxu1 %v7079_v58  ;;  %v7157_v57 = vld [vmem:[#allocation5 + $0x448] ss:$16 sps:$4 sm:$0xff]   ;;  %v7162_v58 = vld [vmem:[#allocation5 + $0x464] ss:$16 sps:$4 sm:$0xff]  }
 0x1aa   :  { %1875 = vmatprep.subr.bf16.mxu0 %v7084_v59  ;;  %1961 = vmatprep.subr.bf16.mxu1 %v7087_v60  ;;  %v7165_v59 = vld [vmem:[#allocation5 + $0x46c] ss:$16 sps:$4 sm:$0xff]   ;;  %v7160_v60 = vld [vmem:[#allocation5 + $0x460] ss:$16 sps:$4 sm:$0xff]  }
 0x1ad   :  { %1876 = vmatpush1.bf16.msra.mxu0 %v7082_v61  ;;  %1962 = vmatpush1.bf16.msra.mxu1 %v7085_v62  ;;  %v7163_v61 = vld [vmem:[#allocation5 + $0x468] ss:$16 sps:$4 sm:$0xff]   ;;  %v7168_v62 = vld [vmem:[#allocation5 + $0x484] ss:$16 sps:$4 sm:$0xff]  }
 0x1ae   :  { %1877 = vmatprep.subr.bf16.mxu0 %v7090_v63  ;;  %1963 = vmatprep.subr.bf16.mxu1 %v7093_v0  ;;  %v7171_v63 = vld [vmem:[#allocation5 + $0x48c] ss:$16 sps:$4 sm:$0xff]   ;;  %v7166_v0 = vld [vmem:[#allocation5 + $0x480] ss:$16 sps:$4 sm:$0xff]  }
 0x1b1   :  { %1878 = vmatpush1.bf16.msra.mxu0 %v7088_v1  ;;  %1964 = vmatpush1.bf16.msra.mxu1 %v7091_v2  ;;  %v7169_v1 = vld [vmem:[#allocation5 + $0x488] ss:$16 sps:$4 sm:$0xff]   ;;  %v7174_v2 = vld [vmem:[#allocation5 + $0x4a4] ss:$16 sps:$4 sm:$0xff]  }
 0x1b2   :  { %1879 = vmatprep.subr.bf16.mxu0 %v7096_v3  ;;  %1965 = vmatprep.subr.bf16.mxu1 %v7099_v4  ;;  %v7177_v3 = vld [vmem:[#allocation5 + $0x4ac] ss:$16 sps:$4 sm:$0xff]   ;;  %v7172_v4 = vld [vmem:[#allocation5 + $0x4a0] ss:$16 sps:$4 sm:$0xff]  }
 0x1b5   :  { %1880 = vmatpush1.bf16.msra.mxu0 %v7094_v5  ;;  %1966 = vmatpush1.bf16.msra.mxu1 %v7097_v6  ;;  %v7175_v5 = vld [vmem:[#allocation5 + $0x4a8] ss:$16 sps:$4 sm:$0xff]   ;;  %v7180_v6 = vld [vmem:[#allocation5 + $0x4c4] ss:$16 sps:$4 sm:$0xff]  }
 0x1b6   :  { %1881 = vmatprep.subr.bf16.mxu0 %v7102_v7  ;;  %1967 = vmatprep.subr.bf16.mxu1 %v7105_v8  ;;  %v7183_v7 = vld [vmem:[#allocation5 + $0x4cc] ss:$16 sps:$4 sm:$0xff]   ;;  %v7178_v8 = vld [vmem:[#allocation5 + $0x4c0] ss:$16 sps:$4 sm:$0xff]  }
 0x1b9   :  { %1882 = vmatpush1.bf16.msra.mxu0 %v7100_v9  ;;  %1968 = vmatpush1.bf16.msra.mxu1 %v7103_v10  ;;  %v7181_v9 = vld [vmem:[#allocation5 + $0x4c8] ss:$16 sps:$4 sm:$0xff]   ;;  %v7186_v10 = vld [vmem:[#allocation5 + $0x4e4] ss:$16 sps:$4 sm:$0xff]  }
 0x1ba   :  { %1883 = vmatprep.subr.bf16.mxu0 %v7108_v11  ;;  %1969 = vmatprep.subr.bf16.mxu1 %v7111_v14  ;;  %v7189_v11 = vld [vmem:[#allocation5 + $0x4ec] ss:$16 sps:$4 sm:$0xff]   ;;  %v7184_v14 = vld [vmem:[#allocation5 + $0x4e0] ss:$16 sps:$4 sm:$0xff]  }
 0x1bd   :  { %1884 = vmatpush1.bf16.msra.mxu0 %v7106_v15  ;;  %1970 = vmatpush1.bf16.msra.mxu1 %v7109_v17  ;;  %v7187_v15 = vld [vmem:[#allocation5 + $0x4e8] ss:$16 sps:$4 sm:$0xff]   ;;  %v7192_v17 = vld [vmem:[#allocation5 + $0x504] ss:$16 sps:$4 sm:$0xff]  }
 0x1be   :  { %1885 = vmatprep.subr.bf16.mxu0 %v7114_v18  ;;  %1971 = vmatprep.subr.bf16.mxu1 %v7117_v19  ;;  %v7195_v18 = vld [vmem:[#allocation5 + $0x50c] ss:$16 sps:$4 sm:$0xff]   ;;  %v7190_v19 = vld [vmem:[#allocation5 + $0x500] ss:$16 sps:$4 sm:$0xff]  }
 0x1c1   :  { %1886 = vmatpush1.bf16.msra.mxu0 %v7112_v20  ;;  %1972 = vmatpush1.bf16.msra.mxu1 %v7115_v21  ;;  %v7193_v20 = vld [vmem:[#allocation5 + $0x508] ss:$16 sps:$4 sm:$0xff]   ;;  %v7198_v21 = vld [vmem:[#allocation5 + $0x524] ss:$16 sps:$4 sm:$0xff]  }
 0x1c2   :  { %1887 = vmatprep.subr.bf16.mxu0 %v7120_v22  ;;  %1973 = vmatprep.subr.bf16.mxu1 %v7123_v23  ;;  %v7201_v22 = vld [vmem:[#allocation5 + $0x52c] ss:$16 sps:$4 sm:$0xff]   ;;  %v7196_v23 = vld [vmem:[#allocation5 + $0x520] ss:$16 sps:$4 sm:$0xff]  }
 0x1c5   :  { %1888 = vmatpush1.bf16.msra.mxu0 %v7118_v25  ;;  %1974 = vmatpush1.bf16.msra.mxu1 %v7121_v27  ;;  %v7199_v25 = vld [vmem:[#allocation5 + $0x528] ss:$16 sps:$4 sm:$0xff]   ;;  %v7204_v27 = vld [vmem:[#allocation5 + $0x544] ss:$16 sps:$4 sm:$0xff]  }
 0x1c6   :  { %1889 = vmatprep.subr.bf16.mxu0 %v7126_v28  ;;  %1975 = vmatprep.subr.bf16.mxu1 %v7129_v31  ;;  %v7207_v28 = vld [vmem:[#allocation5 + $0x54c] ss:$16 sps:$4 sm:$0xff]   ;;  %v7202_v31 = vld [vmem:[#allocation5 + $0x540] ss:$16 sps:$4 sm:$0xff]  }
 0x1c9   :  { %1890 = vmatpush1.bf16.msra.mxu0 %v7124_v32  ;;  %1976 = vmatpush1.bf16.msra.mxu1 %v7127_v35  ;;  %v7205_v32 = vld [vmem:[#allocation5 + $0x548] ss:$16 sps:$4 sm:$0xff]   ;;  %v7210_v35 = vld [vmem:[#allocation5 + $0x564] ss:$16 sps:$4 sm:$0xff]  }
 0x1ca   :  { %1891 = vmatprep.subr.bf16.mxu0 %v7132_v36  ;;  %1977 = vmatprep.subr.bf16.mxu1 %v7135_v37  ;;  %v7213_v36 = vld [vmem:[#allocation5 + $0x56c] ss:$16 sps:$4 sm:$0xff]   ;;  %v7208_v37 = vld [vmem:[#allocation5 + $0x560] ss:$16 sps:$4 sm:$0xff]  }
 0x1cd   :  { %1892 = vmatpush1.bf16.msra.mxu0 %v7130_v39  ;;  %1978 = vmatpush1.bf16.msra.mxu1 %v7133_v40  ;;  %v7211_v39 = vld [vmem:[#allocation5 + $0x568] ss:$16 sps:$4 sm:$0xff]   ;;  %v7216_v40 = vld [vmem:[#allocation5 + $0x584] ss:$16 sps:$4 sm:$0xff]  }
 0x1ce   :  { %1893 = vmatprep.subr.bf16.mxu0 %v7138_v42  ;;  %1979 = vmatprep.subr.bf16.mxu1 %v7141_v43  ;;  %v7214_v42 = vld [vmem:[#allocation5 + $0x580] ss:$16 sps:$4 sm:$0xff]   ;;  %v7217_v43 = vld [vmem:[#allocation5 + $0x588] ss:$16 sps:$4 sm:$0xff]  }
 0x1d1   :  { %1894 = vmatpush1.bf16.msra.mxu0 %v7136_v45  ;;  %1980 = vmatpush1.bf16.msra.mxu1 %v7139_v46  ;;  %v7225_v45 = vld [vmem:[#allocation5 + $0x5ac] ss:$16 sps:$4 sm:$0xff]   ;;  %v7220_v46 = vld [vmem:[#allocation5 + $0x5a0] ss:$16 sps:$4 sm:$0xff]  }
 0x1d2   :  { %2902 = vmatprep.subr.bf16.mxu0 %v7144_v48  ;;  %2988 = vmatprep.subr.bf16.mxu1 %v7147_v49  ;;  %v7223_v48 = vld [vmem:[#allocation5 + $0x5a8] ss:$16 sps:$4 sm:$0xff]   ;;  %v7228_v49 = vld [vmem:[#allocation5 + $0x5c4] ss:$16 sps:$4 sm:$0xff]  }
 0x1d4   :  { %1896 = vmatmul.mubr.bf16.vlgmr.msra.gmra.mrb[4].mxu0 %v1178_v13  ;;  %1982 = vmatmul.mubr.bf16.vlgmr.msra.gmra.mrb[4].mxu1 %v1178_v13  ;;  %v7229_v13 = vld [vmem:[#allocation5 + $0x5c8] ss:$16 sps:$4 sm:$0xff]  }
 0x1d5   :  { %2903 = vmatpush1.bf16.msra.mxu0 %v7142_v12  ;;  %2989 = vmatpush1.bf16.msra.mxu1 %v7145_v51  ;;  %v7231_v12 = vld [vmem:[#allocation5 + $0x5cc] ss:$16 sps:$4 sm:$0xff]   ;;  %v7226_v51 = vld [vmem:[#allocation5 + $0x5c0] ss:$16 sps:$4 sm:$0xff]  }
 0x1d6   :  { %2904 = vmatprep.subr.bf16.mxu0 %v7150_v52  ;;  %2990 = vmatprep.subr.bf16.mxu1 %v7153_v53  ;;  %v7234_v52 = vld [vmem:[#allocation5 + $0x5e4] ss:$16 sps:$4 sm:$0xff]   ;;  %v7237_v53 = vld [vmem:[#allocation5 + $0x5ec] ss:$16 sps:$4 sm:$0xff]  }
 0x1d9   :  { %2905 = vmatpush1.bf16.msra.mxu0 %v7148_v24  ;;  %2991 = vmatpush1.bf16.msra.mxu1 %v7151_v54  ;;  %v7232_v24 = vld [vmem:[#allocation5 + $0x5e0] ss:$16 sps:$4 sm:$0xff]   ;;  %v7235_v54 = vld [vmem:[#allocation5 + $0x5e8] ss:$16 sps:$4 sm:$0xff]  }
 0x1da   :  { %2906 = vmatprep.subr.bf16.mxu0 %v7156_v16  ;;  %2992 = vmatprep.subr.bf16.mxu1 %v7159_v55  ;;  %v7240_v16 = vld [vmem:[#allocation5 + $0x604] ss:$16 sps:$4 sm:$0xff]   ;;  %v7243_v55 = vld [vmem:[#allocation5 + $0x60c] ss:$16 sps:$4 sm:$0xff]  }
 0x1dd   :  { %2907 = vmatpush1.bf16.msra.mxu0 %v7154_v56  ;;  %2993 = vmatpush1.bf16.msra.mxu1 %v7157_v57  ;;  %v7910_v56 = vld [vmem:[#allocation2 + $0x30] sm:$0xff] }
 0x1de   :  { %2908 = vmatprep.subr.bf16.mxu0 %v7162_v58  ;;  %2994 = vmatprep.subr.bf16.mxu1 %v7165_v59  ;;  %v76_v57 = vunpack.c.l.bf16 %v7910_v56 }
 0x1e1   :  { %2909 = vmatpush1.bf16.msra.mxu0 %v7160_v60  ;;  %2995 = vmatpush1.bf16.msra.mxu1 %v7163_v61  ;;  %v7911_v60 = vld [vmem:[#allocation2 + $0x10] sm:$0xff] }
 0x1e2   :  { %2910 = vmatprep.subr.bf16.mxu0 %v7168_v62  ;;  %2996 = vmatprep.subr.bf16.mxu1 %v7171_v63  ;;  %v73_v61 = vunpack.c.h.bf16 %v7911_v60  ;;  %v77_v62 = vunpack.c.h.bf16 %v7910_v56  ;;  %v72_v63 = vunpack.c.l.bf16 %v7911_v60  ;;  %v7283_v56 = vld [vmem:[#allocation5 + $0x6e8] ss:$16 sps:$4 sm:$0xff]   ;;  %v7286_v60 = vld [vmem:[#allocation5 + $0x700] ss:$16 sps:$4 sm:$0xff]  }
 0x1e5   :  { %2911 = vmatpush1.bf16.msra.mxu0 %v7166_v0  ;;  %2997 = vmatpush1.bf16.msra.mxu1 %v7169_v1 }
 0x1e6   :  { %2912 = vmatprep.subr.bf16.mxu0 %v7174_v2  ;;  %2998 = vmatprep.subr.bf16.mxu1 %v7177_v3  ;;  %v8129_v2 = vld [vmem:[#allocation2 + $0x38] sm:$0xff] }
 0x1e7   :  { %v79_v3 = vunpack.c.h.bf16 %v8129_v2 }
 0x1e9   :  { %2913 = vmatpush1.bf16.msra.mxu0 %v7172_v4  ;;  %2999 = vmatpush1.bf16.msra.mxu1 %v7175_v5 }
 0x1ea   :  { %2914 = vmatprep.subr.bf16.mxu0 %v7180_v6  ;;  %3000 = vmatprep.subr.bf16.mxu1 %v7183_v7  ;;  %v8134_v6 = vld [vmem:[#allocation2 + $0x18] sm:$0xff] }
 0x1eb   :  { %v75_v7 = vunpack.c.h.bf16 %v8134_v6 }
 0x1ed   :  { %2915 = vmatpush1.bf16.msra.mxu0 %v7178_v8  ;;  %3001 = vmatpush1.bf16.msra.mxu1 %v7181_v9 }
 0x1ee   :  { %2916 = vmatprep.subr.bf16.mxu0 %v7186_v10  ;;  %3002 = vmatprep.subr.bf16.mxu1 %v7189_v11 }
 0x1f1   :  { %2917 = vmatpush1.bf16.msra.mxu0 %v7184_v14  ;;  %3003 = vmatpush1.bf16.msra.mxu1 %v7187_v15 }
 0x1f2   :  { %2918 = vmatprep.subr.bf16.mxu0 %v7192_v17  ;;  %3004 = vmatprep.subr.bf16.mxu1 %v7195_v18 }
 0x1f5   :  { %2919 = vmatpush1.bf16.msra.mxu0 %v7190_v19  ;;  %3005 = vmatpush1.bf16.msra.mxu1 %v7193_v20  ;;  %v7238_v19 = vld [vmem:[#allocation5 + $0x600] ss:$16 sps:$4 sm:$0xff]   ;;  %v7241_v20 = vld [vmem:[#allocation5 + $0x608] ss:$16 sps:$4 sm:$0xff]  }
 0x1f6   :  { %2920 = vmatprep.subr.bf16.mxu0 %v7198_v21  ;;  %3006 = vmatprep.subr.bf16.mxu1 %v7201_v22 }
 0x1f9   :  { %2921 = vmatpush1.bf16.msra.mxu0 %v7196_v23  ;;  %3007 = vmatpush1.bf16.msra.mxu1 %v7199_v25  ;;  %v7246_v23 = vld [vmem:[#allocation5 + $0x624] ss:$16 sps:$4 sm:$0xff]   ;;  %v7249_v25 = vld [vmem:[#allocation5 + $0x62c] ss:$16 sps:$4 sm:$0xff]  }
 0x1fa   :  { %2922 = vmatprep.subr.bf16.mxu0 %v7204_v27  ;;  %3008 = vmatprep.subr.bf16.mxu1 %v7207_v28  ;;  %v7244_v28 = vld [vmem:[#allocation5 + $0x620] ss:$16 sps:$4 sm:$0xff]  }
 0x1fd   :  { %2923 = vmatpush1.bf16.msra.mxu0 %v7202_v31  ;;  %3009 = vmatpush1.bf16.msra.mxu1 %v7205_v32  ;;  %v7247_v31 = vld [vmem:[#allocation5 + $0x628] ss:$16 sps:$4 sm:$0xff]   ;;  %v7252_v32 = vld [vmem:[#allocation5 + $0x644] ss:$16 sps:$4 sm:$0xff]  }
 0x1fe   :  { %2924 = vmatprep.subr.bf16.mxu0 %v7210_v35  ;;  %3010 = vmatprep.subr.bf16.mxu1 %v7213_v36  ;;  %v7255_v35 = vld [vmem:[#allocation5 + $0x64c] ss:$16 sps:$4 sm:$0xff]   ;;  %v7250_v36 = vld [vmem:[#allocation5 + $0x640] ss:$16 sps:$4 sm:$0xff]  }
 0x201   :  { %2925 = vmatpush1.bf16.msra.mxu0 %v7208_v37  ;;  %3011 = vmatpush1.bf16.msra.mxu1 %v7211_v39  ;;  %v7253_v37 = vld [vmem:[#allocation5 + $0x648] ss:$16 sps:$4 sm:$0xff]   ;;  %v7258_v39 = vld [vmem:[#allocation5 + $0x664] ss:$16 sps:$4 sm:$0xff]  }
 0x202   :  { %2926 = vmatprep.subr.bf16.mxu0 %v7216_v40  ;;  %3012 = vmatprep.subr.bf16.mxu1 %v7219_v41  ;;  %v7261_v40 = vld [vmem:[#allocation5 + $0x66c] ss:$16 sps:$4 sm:$0xff]   ;;  %v7256_v41 = vld [vmem:[#allocation5 + $0x660] ss:$16 sps:$4 sm:$0xff]  }
 0x205   :  { %2927 = vmatpush1.bf16.msra.mxu0 %v7214_v42  ;;  %3013 = vmatpush1.bf16.msra.mxu1 %v7217_v43  ;;  %v7259_v42 = vld [vmem:[#allocation5 + $0x668] ss:$16 sps:$4 sm:$0xff]   ;;  %v7264_v43 = vld [vmem:[#allocation5 + $0x684] ss:$16 sps:$4 sm:$0xff]  }
 0x206   :  { %2928 = vmatprep.subr.bf16.mxu0 %v7222_v44  ;;  %3014 = vmatprep.subr.bf16.mxu1 %v7225_v45  ;;  %v7267_v44 = vld [vmem:[#allocation5 + $0x68c] ss:$16 sps:$4 sm:$0xff]   ;;  %v7262_v45 = vld [vmem:[#allocation5 + $0x680] ss:$16 sps:$4 sm:$0xff]  }
 0x209   :  { %2929 = vmatpush1.bf16.msra.mxu0 %v7220_v46  ;;  %3015 = vmatpush1.bf16.msra.mxu1 %v7223_v48  ;;  %v7265_v46 = vld [vmem:[#allocation5 + $0x688] ss:$16 sps:$4 sm:$0xff]   ;;  %v7270_v48 = vld [vmem:[#allocation5 + $0x6a4] ss:$16 sps:$4 sm:$0xff]  }
 0x20a   :  { %2930 = vmatprep.subr.bf16.mxu0 %v7228_v49  ;;  %3016 = vmatprep.subr.bf16.mxu1 %v7231_v12  ;;  %v7273_v49 = vld [vmem:[#allocation5 + $0x6ac] ss:$16 sps:$4 sm:$0xff]   ;;  %v7268_v12 = vld [vmem:[#allocation5 + $0x6a0] ss:$16 sps:$4 sm:$0xff]  }
 0x20d   :  { %2931 = vmatpush1.bf16.msra.mxu0 %v7226_v51  ;;  %3017 = vmatpush1.bf16.msra.mxu1 %v7229_v13  ;;  %v7271_v51 = vld [vmem:[#allocation5 + $0x6a8] ss:$16 sps:$4 sm:$0xff]   ;;  %v7276_v13 = vld [vmem:[#allocation5 + $0x6c4] ss:$16 sps:$4 sm:$0xff]  }
 0x20e   :  { %2932 = vmatprep.subr.bf16.mxu0 %v7234_v52  ;;  %3018 = vmatprep.subr.bf16.mxu1 %v7237_v53  ;;  %v7279_v52 = vld [vmem:[#allocation5 + $0x6cc] ss:$16 sps:$4 sm:$0xff]   ;;  %v7274_v53 = vld [vmem:[#allocation5 + $0x6c0] ss:$16 sps:$4 sm:$0xff]  }
 0x211   :  { %2933 = vmatpush1.bf16.msra.mxu0 %v7232_v24  ;;  %3019 = vmatpush1.bf16.msra.mxu1 %v7235_v54  ;;  %v7277_v24 = vld [vmem:[#allocation5 + $0x6c8] ss:$16 sps:$4 sm:$0xff]   ;;  %v7282_v54 = vld [vmem:[#allocation5 + $0x6e4] ss:$16 sps:$4 sm:$0xff]  }
 0x212   :  { %2945 = vmatprep.subr.bf16.mxu0 %v7240_v16  ;;  %3031 = vmatprep.subr.bf16.mxu1 %v7243_v55  ;;  %v7285_v16 = vld [vmem:[#allocation5 + $0x6ec] ss:$16 sps:$4 sm:$0xff]   ;;  %v7280_v55 = vld [vmem:[#allocation5 + $0x6e0] ss:$16 sps:$4 sm:$0xff]  }
 0x2a7   :  { %v1897_v58 = vpop.f32.mrb[4].mxu0  ;;  %v8127_v59 = vpop.f32.mrb[4].mxu1 }
 0x2a8   :  { %v1899_v0 = vpop.f32.mrb[5].mxu0  ;;  %v1985_v1 = vpop.f32.mrb[5].mxu1  ;;  %v8143_v15 = vadd.f32 %v1897_v58, %v72_v63  ;;  %v7291_v58 = vld [vmem:[#allocation5 + $0x70c] ss:$16 sps:$4 sm:$0xff]  }
 0x2a9   :  { %v1901_v4 = vpop.f32.mrb[6].mxu0  ;;  %v8132_v5 = vpop.f32.mrb[6].mxu1  ;;  %v8139_v11 = vadd.f32 %v1899_v0, %v73_v61  ;;  %v8149_v21 = vadd.f32 %v1985_v1, %v75_v7  ;;  %v7289_v61 = vld [vmem:[#allocation5 + $0x708] ss:$16 sps:$4 sm:$0xff]   ;;  %v7297_v63 = vld [vmem:[#allocation5 + $0x72c] ss:$16 sps:$4 sm:$0xff]  }
 0x2aa   :  { %v8137_v8 = vadd.f32 %v1901_v4, %v76_v57  ;;  %v1903_v9 = vpop.f32.mrb[7].mxu0  ;;  %v1989_v10 = vpop.f32.mrb[7].mxu1  ;;  %v7288_v57 = vld [vmem:[#allocation5 + $0x704] ss:$16 sps:$4 sm:$0xff]   ;;  %v7292_v0 = vld [vmem:[#allocation5 + $0x720] ss:$16 sps:$4 sm:$0xff]  }
 0x2ab   :  { %v8141_v14 = vadd.f32 %v1903_v9, %v77_v62  ;;  %v8145_v17 = vadd.f32 %v1989_v10, %v79_v3  ;;  %v7294_v62 = vld [vmem:[#allocation5 + $0x724] ss:$16 sps:$4 sm:$0xff]   ;;  %v7295_v1 = vld [vmem:[#allocation5 + $0x728] ss:$16 sps:$4 sm:$0xff]   ;;  %v7303_v4 = vld [vmem:[#allocation5 + $0x74c] ss:$16 sps:$4 sm:$0xff]  }
 0x2ac   :  { %v2258_v22 = vpack.c.bf16 %v8137_v8, %v8143_v15  ;;  %v7300_v3 = vld [vmem:[#allocation5 + $0x744] ss:$16 sps:$4 sm:$0xff]   ;;  %v7298_v7 = vld [vmem:[#allocation5 + $0x740] ss:$16 sps:$4 sm:$0xff]   ;;  %v7301_v9 = vld [vmem:[#allocation5 + $0x748] ss:$16 sps:$4 sm:$0xff]  }
 0x2ad   :  { %v2259_v18 = vpack.c.bf16 %v8141_v14, %v8139_v11  ;;  %v2261_v27 = vpack.c.bf16 %v8145_v17, %v8149_v21  ;;  %v7306_v10 = vld [vmem:[#allocation5 + $0x764] ss:$16 sps:$4 sm:$0xff]  }
 0x2af   :  { %2934 = vmatprep.mubr.bf16.mxu0 %v2259_v18  ;;  %3020 = vmatprep.mubr.bf16.mxu1 %v2259_v18  ;;  %v7309_v18 = vld [vmem:[#allocation5 + $0x76c] ss:$16 sps:$4 sm:$0xff]  }
 0x2b0   :  { %2935 = vmatmul.mubr.bf16.vlgmr.msra.gmra.mrb[8].mxu0 %v2258_v22  ;;  %3021 = vmatmul.mubr.bf16.vlgmr.msra.gmra.mrb[8].mxu1 %v2258_v22  ;;  %v7312_v22 = vld [vmem:[#allocation5 + $0x784] ss:$16 sps:$4 sm:$0xff]  }
 0x2b1   :  { %2946 = vmatpush1.bf16.msra.mxu0 %v7238_v19  ;;  %3032 = vmatpush1.bf16.msra.mxu1 %v7241_v20  ;;  %v7304_v19 = vld [vmem:[#allocation5 + $0x760] ss:$16 sps:$4 sm:$0xff]   ;;  %v7307_v20 = vld [vmem:[#allocation5 + $0x768] ss:$16 sps:$4 sm:$0xff]  }
 0x2b2   :  { %2977 = vmatprep.mubr.bf16.mxu0 %v2261_v27  ;;  %3063 = vmatprep.mubr.bf16.mxu1 %v2261_v27  ;;  %v7313_v27 = vld [vmem:[#allocation5 + $0x788] ss:$16 sps:$4 sm:$0xff]  }
 0x2b3   :  { %2947 = vmatprep.subr.bf16.mxu0 %v7246_v23  ;;  %3033 = vmatprep.subr.bf16.mxu1 %v7249_v25  ;;  %v7315_v23 = vld [vmem:[#allocation5 + $0x78c] ss:$16 sps:$4 sm:$0xff]   ;;  %v7310_v25 = vld [vmem:[#allocation5 + $0x780] ss:$16 sps:$4 sm:$0xff]  }
 0x2b5   :  { %2948 = vmatpush1.bf16.msra.mxu0 %v7244_v28  ;;  %3034 = vmatpush1.bf16.msra.mxu1 %v7247_v31  ;;  %v7318_v28 = vld [vmem:[#allocation5 + $0x7a4] ss:$16 sps:$4 sm:$0xff]   ;;  %v7321_v31 = vld [vmem:[#allocation5 + $0x7ac] ss:$16 sps:$4 sm:$0xff]  }
 0x2b6   :  { %2949 = vmatprep.subr.bf16.mxu0 %v7252_v32  ;;  %3035 = vmatprep.subr.bf16.mxu1 %v7255_v35  ;;  %v7316_v32 = vld [vmem:[#allocation5 + $0x7a0] ss:$16 sps:$4 sm:$0xff]   ;;  %v7319_v35 = vld [vmem:[#allocation5 + $0x7a8] ss:$16 sps:$4 sm:$0xff]  }
 0x2b9   :  { %2950 = vmatpush1.bf16.msra.mxu0 %v7250_v36  ;;  %3036 = vmatpush1.bf16.msra.mxu1 %v7253_v37  ;;  %v7324_v36 = vld [vmem:[#allocation5 + $0x7c4] ss:$16 sps:$4 sm:$0xff]   ;;  %v7327_v37 = vld [vmem:[#allocation5 + $0x7cc] ss:$16 sps:$4 sm:$0xff]  }
 0x2ba   :  { %2951 = vmatprep.subr.bf16.mxu0 %v7258_v39  ;;  %3037 = vmatprep.subr.bf16.mxu1 %v7261_v40  ;;  %v7322_v39 = vld [vmem:[#allocation5 + $0x7c0] ss:$16 sps:$4 sm:$0xff]   ;;  %v7325_v40 = vld [vmem:[#allocation5 + $0x7c8] ss:$16 sps:$4 sm:$0xff]  }
 0x2bd   :  { %2952 = vmatpush1.bf16.msra.mxu0 %v7256_v41  ;;  %3038 = vmatpush1.bf16.msra.mxu1 %v7259_v42  ;;  %v78_v41 = vunpack.c.l.bf16 %v8129_v2  ;;  %v7330_v42 = vld [vmem:[#allocation5 + $0x7e4] ss:$16 sps:$4 sm:$0xff]   ;;  %v7334_v2 = vld [vmem:[#allocation7 + $0x400] ss:$16 sps:$4 sm:$0xff]  }
 0x2be   :  { %2953 = vmatprep.subr.bf16.mxu0 %v7264_v43  ;;  %3039 = vmatprep.subr.bf16.mxu1 %v7267_v44  ;;  %v7333_v43 = vld [vmem:[#allocation5 + $0x7ec] ss:$16 sps:$4 sm:$0xff]   ;;  %v74_v44 = vunpack.c.l.bf16 %v8134_v6 }
 0x2c1   :  { %2954 = vmatpush1.bf16.msra.mxu0 %v7262_v45  ;;  %3040 = vmatpush1.bf16.msra.mxu1 %v7265_v46  ;;  %v7328_v45 = vld [vmem:[#allocation5 + $0x7e0] ss:$16 sps:$4 sm:$0xff]   ;;  %v7331_v46 = vld [vmem:[#allocation5 + $0x7e8] ss:$16 sps:$4 sm:$0xff]  }
 0x2c2   :  { %2955 = vmatprep.subr.bf16.mxu0 %v7270_v48  ;;  %3041 = vmatprep.subr.bf16.mxu1 %v7273_v49  ;;  %v8158_v48 = vadd.f32 %v8132_v5, %v78_v41  ;;  %v7336_v49 = vld [vmem:[#allocation7 + $0x404] ss:$16 sps:$4 sm:$0xff]   ;;  %v7340_v5 = vld [vmem:[#allocation7 + $0x420] ss:$16 sps:$4 sm:$0xff]   ;;  %v7399_v41 = vld [vmem:[#allocation7 + $0x54c] ss:$16 sps:$4 sm:$0xff]  }
 0x2c5   :  { %2956 = vmatpush1.bf16.msra.mxu0 %v7268_v12  ;;  %3042 = vmatpush1.bf16.msra.mxu1 %v7271_v51  ;;  %v7339_v12 = vld [vmem:[#allocation7 + $0x40c] ss:$16 sps:$4 sm:$0xff]   ;;  %v8161_v51 = vadd.f32 %v8127_v59, %v74_v44  ;;  %v7348_v59 = vld [vmem:[#allocation7 + $0x444] ss:$16 sps:$4 sm:$0xff]  }
 0x2c6   :  { %2957 = vmatprep.subr.bf16.mxu0 %v7276_v13  ;;  %3043 = vmatprep.subr.bf16.mxu1 %v7279_v52  ;;  %v7337_v13 = vld [vmem:[#allocation7 + $0x408] ss:$16 sps:$4 sm:$0xff]   ;;  %v7342_v52 = vld [vmem:[#allocation7 + $0x424] ss:$16 sps:$4 sm:$0xff]  }
 0x2c7   :  { %v2260_v6 = vpack.c.bf16 %v8158_v48, %v8161_v51  ;;  %v7402_v44 = vld [vmem:[#allocation7 + $0x564] ss:$16 sps:$4 sm:$0xff]  }
 0x2c9   :  { %2958 = vmatpush1.bf16.msra.mxu0 %v7274_v53  ;;  %3044 = vmatpush1.bf16.msra.mxu1 %v7277_v24  ;;  %v7345_v53 = vld [vmem:[#allocation7 + $0x42c] ss:$16 sps:$4 sm:$0xff]   ;;  %v7343_v24 = vld [vmem:[#allocation7 + $0x428] ss:$16 sps:$4 sm:$0xff]  }
 0x2ca   :  { %2959 = vmatprep.subr.bf16.mxu0 %v7282_v54  ;;  %3045 = vmatprep.subr.bf16.mxu1 %v7285_v16  ;;  %v7351_v54 = vld [vmem:[#allocation7 + $0x44c] ss:$16 sps:$4 sm:$0xff]   ;;  %v7346_v16 = vld [vmem:[#allocation7 + $0x440] ss:$16 sps:$4 sm:$0xff]  }
 0x2cd   :  { %2960 = vmatpush1.bf16.msra.mxu0 %v7280_v55  ;;  %3046 = vmatpush1.bf16.msra.mxu1 %v7283_v56  ;;  %v7349_v55 = vld [vmem:[#allocation7 + $0x448] ss:$16 sps:$4 sm:$0xff]   ;;  %v7354_v56 = vld [vmem:[#allocation7 + $0x464] ss:$16 sps:$4 sm:$0xff]  }
 0x2ce   :  { %2961 = vmatprep.subr.bf16.mxu0 %v7288_v57  ;;  %3047 = vmatprep.subr.bf16.mxu1 %v7291_v58  ;;  %v7357_v57 = vld [vmem:[#allocation7 + $0x46c] ss:$16 sps:$4 sm:$0xff]   ;;  %v7352_v58 = vld [vmem:[#allocation7 + $0x460] ss:$16 sps:$4 sm:$0xff]  }
 0x2d1   :  { %2962 = vmatpush1.bf16.msra.mxu0 %v7286_v60  ;;  %3048 = vmatpush1.bf16.msra.mxu1 %v7289_v61  ;;  %v7355_v60 = vld [vmem:[#allocation7 + $0x468] ss:$16 sps:$4 sm:$0xff]   ;;  %v7360_v61 = vld [vmem:[#allocation7 + $0x484] ss:$16 sps:$4 sm:$0xff]  }
 0x2d2   :  { %2963 = vmatprep.subr.bf16.mxu0 %v7294_v62  ;;  %3049 = vmatprep.subr.bf16.mxu1 %v7297_v63  ;;  %v7363_v62 = vld [vmem:[#allocation7 + $0x48c] ss:$16 sps:$4 sm:$0xff]   ;;  %v7358_v63 = vld [vmem:[#allocation7 + $0x480] ss:$16 sps:$4 sm:$0xff]  }
 0x2d5   :  { %2964 = vmatpush1.bf16.msra.mxu0 %v7292_v0  ;;  %3050 = vmatpush1.bf16.msra.mxu1 %v7295_v1  ;;  %v7361_v0 = vld [vmem:[#allocation7 + $0x488] ss:$16 sps:$4 sm:$0xff]   ;;  %v7366_v1 = vld [vmem:[#allocation7 + $0x4a4] ss:$16 sps:$4 sm:$0xff]  }
 0x2d6   :  { %2965 = vmatprep.subr.bf16.mxu0 %v7300_v3  ;;  %3051 = vmatprep.subr.bf16.mxu1 %v7303_v4  ;;  %v7369_v3 = vld [vmem:[#allocation7 + $0x4ac] ss:$16 sps:$4 sm:$0xff]   ;;  %v7364_v4 = vld [vmem:[#allocation7 + $0x4a0] ss:$16 sps:$4 sm:$0xff]  }
 0x2d9   :  { %2966 = vmatpush1.bf16.msra.mxu0 %v7298_v7  ;;  %3052 = vmatpush1.bf16.msra.mxu1 %v7301_v9  ;;  %v7367_v7 = vld [vmem:[#allocation7 + $0x4a8] ss:$16 sps:$4 sm:$0xff]   ;;  %v7372_v9 = vld [vmem:[#allocation7 + $0x4c4] ss:$16 sps:$4 sm:$0xff]  }
 0x2da   :  { %2967 = vmatprep.subr.bf16.mxu0 %v7306_v10  ;;  %3053 = vmatprep.subr.bf16.mxu1 %v7309_v18  ;;  %v7375_v10 = vld [vmem:[#allocation7 + $0x4cc] ss:$16 sps:$4 sm:$0xff]   ;;  %v7370_v18 = vld [vmem:[#allocation7 + $0x4c0] ss:$16 sps:$4 sm:$0xff]  }
 0x2dd   :  { %2968 = vmatpush1.bf16.msra.mxu0 %v7304_v19  ;;  %3054 = vmatpush1.bf16.msra.mxu1 %v7307_v20  ;;  %v7373_v19 = vld [vmem:[#allocation7 + $0x4c8] ss:$16 sps:$4 sm:$0xff]   ;;  %v7378_v20 = vld [vmem:[#allocation7 + $0x4e4] ss:$16 sps:$4 sm:$0xff]  }
 0x2de   :  { %2969 = vmatprep.subr.bf16.mxu0 %v7312_v22  ;;  %3055 = vmatprep.subr.bf16.mxu1 %v7315_v23  ;;  %v7381_v22 = vld [vmem:[#allocation7 + $0x4ec] ss:$16 sps:$4 sm:$0xff]   ;;  %v7376_v23 = vld [vmem:[#allocation7 + $0x4e0] ss:$16 sps:$4 sm:$0xff]  }
 0x2e1   :  { %2970 = vmatpush1.bf16.msra.mxu0 %v7310_v25  ;;  %3056 = vmatpush1.bf16.msra.mxu1 %v7313_v27  ;;  %v7379_v25 = vld [vmem:[#allocation7 + $0x4e8] ss:$16 sps:$4 sm:$0xff]   ;;  %v7384_v27 = vld [vmem:[#allocation7 + $0x504] ss:$16 sps:$4 sm:$0xff]  }
 0x2e2   :  { %2971 = vmatprep.subr.bf16.mxu0 %v7318_v28  ;;  %3057 = vmatprep.subr.bf16.mxu1 %v7321_v31  ;;  %v7387_v28 = vld [vmem:[#allocation7 + $0x50c] ss:$16 sps:$4 sm:$0xff]   ;;  %v7382_v31 = vld [vmem:[#allocation7 + $0x500] ss:$16 sps:$4 sm:$0xff]  }
 0x2e5   :  { %2972 = vmatpush1.bf16.msra.mxu0 %v7316_v32  ;;  %3058 = vmatpush1.bf16.msra.mxu1 %v7319_v35  ;;  %v7385_v32 = vld [vmem:[#allocation7 + $0x508] ss:$16 sps:$4 sm:$0xff]   ;;  %v7390_v35 = vld [vmem:[#allocation7 + $0x524] ss:$16 sps:$4 sm:$0xff]  }
 0x2e6   :  { %2973 = vmatprep.subr.bf16.mxu0 %v7324_v36  ;;  %3059 = vmatprep.subr.bf16.mxu1 %v7327_v37  ;;  %v7393_v36 = vld [vmem:[#allocation7 + $0x52c] ss:$16 sps:$4 sm:$0xff]   ;;  %v7388_v37 = vld [vmem:[#allocation7 + $0x520] ss:$16 sps:$4 sm:$0xff]  }
 0x2e9   :  { %2974 = vmatpush1.bf16.msra.mxu0 %v7322_v39  ;;  %3060 = vmatpush1.bf16.msra.mxu1 %v7325_v40  ;;  %v7391_v39 = vld [vmem:[#allocation7 + $0x528] ss:$16 sps:$4 sm:$0xff]   ;;  %v7396_v40 = vld [vmem:[#allocation7 + $0x544] ss:$16 sps:$4 sm:$0xff]  }
 0x2ea   :  { %2975 = vmatprep.subr.bf16.mxu0 %v7330_v42  ;;  %3061 = vmatprep.subr.bf16.mxu1 %v7333_v43  ;;  %v7394_v42 = vld [vmem:[#allocation7 + $0x540] ss:$16 sps:$4 sm:$0xff]   ;;  %v7397_v43 = vld [vmem:[#allocation7 + $0x548] ss:$16 sps:$4 sm:$0xff]  }
 0x2ed   :  { %2976 = vmatpush1.bf16.msra.mxu0 %v7328_v45  ;;  %3062 = vmatpush1.bf16.msra.mxu1 %v7331_v46  ;;  %v7405_v45 = vld [vmem:[#allocation7 + $0x56c] ss:$16 sps:$4 sm:$0xff]   ;;  %v7400_v46 = vld [vmem:[#allocation7 + $0x560] ss:$16 sps:$4 sm:$0xff]  }
 0x2ee   :  { %3734 = vmatprep.subr.bf16.mxu0 %v7336_v49  ;;  %3820 = vmatprep.subr.bf16.mxu1 %v7339_v12  ;;  %v7403_v49 = vld [vmem:[#allocation7 + $0x568] ss:$16 sps:$4 sm:$0xff]   ;;  %v7408_v12 = vld [vmem:[#allocation7 + $0x584] ss:$16 sps:$4 sm:$0xff]  }
 0x2f0   :  { %2978 = vmatmul.mubr.bf16.vlgmr.msra.gmra.mrb[8].mxu0 %v2260_v6  ;;  %3064 = vmatmul.mubr.bf16.vlgmr.msra.gmra.mrb[8].mxu1 %v2260_v6  ;;  %v7409_v6 = vld [vmem:[#allocation7 + $0x588] ss:$16 sps:$4 sm:$0xff]  }
 0x2f1   :  { %3735 = vmatpush1.bf16.msra.mxu0 %v7334_v2  ;;  %3821 = vmatpush1.bf16.msra.mxu1 %v7337_v13  ;;  %v7411_v2 = vld [vmem:[#allocation7 + $0x58c] ss:$16 sps:$4 sm:$0xff]   ;;  %v7406_v13 = vld [vmem:[#allocation7 + $0x580] ss:$16 sps:$4 sm:$0xff]  }
 0x2f2   :  { %3736 = vmatprep.subr.bf16.mxu0 %v7342_v52  ;;  %3822 = vmatprep.subr.bf16.mxu1 %v7345_v53  ;;  %v7414_v52 = vld [vmem:[#allocation7 + $0x5a4] ss:$16 sps:$4 sm:$0xff]   ;;  %v7417_v53 = vld [vmem:[#allocation7 + $0x5ac] ss:$16 sps:$4 sm:$0xff]  }
 0x2f5   :  { %3737 = vmatpush1.bf16.msra.mxu0 %v7340_v5  ;;  %3823 = vmatpush1.bf16.msra.mxu1 %v7343_v24  ;;  %v7412_v5 = vld [vmem:[#allocation7 + $0x5a0] ss:$16 sps:$4 sm:$0xff]   ;;  %v7415_v24 = vld [vmem:[#allocation7 + $0x5a8] ss:$16 sps:$4 sm:$0xff]  }
 0x2f6   :  { %3738 = vmatprep.subr.bf16.mxu0 %v7348_v59  ;;  %3824 = vmatprep.subr.bf16.mxu1 %v7351_v54  ;;  %v7420_v59 = vld [vmem:[#allocation7 + $0x5c4] ss:$16 sps:$4 sm:$0xff]   ;;  %v7423_v54 = vld [vmem:[#allocation7 + $0x5cc] ss:$16 sps:$4 sm:$0xff]  }
 0x2f9   :  { %3739 = vmatpush1.bf16.msra.mxu0 %v7346_v16  ;;  %3825 = vmatpush1.bf16.msra.mxu1 %v7349_v55  ;;  %v7418_v16 = vld [vmem:[#allocation7 + $0x5c0] ss:$16 sps:$4 sm:$0xff]   ;;  %v7421_v55 = vld [vmem:[#allocation7 + $0x5c8] ss:$16 sps:$4 sm:$0xff]  }
 0x2fa   :  { %3740 = vmatprep.subr.bf16.mxu0 %v7354_v56  ;;  %3826 = vmatprep.subr.bf16.mxu1 %v7357_v57  ;;  %v7426_v56 = vld [vmem:[#allocation7 + $0x5e4] ss:$16 sps:$4 sm:$0xff]   ;;  %v7429_v57 = vld [vmem:[#allocation7 + $0x5ec] ss:$16 sps:$4 sm:$0xff]  }
 0x2fd   :  { %3741 = vmatpush1.bf16.msra.mxu0 %v7352_v58  ;;  %3827 = vmatpush1.bf16.msra.mxu1 %v7355_v60  ;;  %v7424_v58 = vld [vmem:[#allocation7 + $0x5e0] ss:$16 sps:$4 sm:$0xff]   ;;  %v7427_v60 = vld [vmem:[#allocation7 + $0x5e8] ss:$16 sps:$4 sm:$0xff]  }
 0x2fe   :  { %3742 = vmatprep.subr.bf16.mxu0 %v7360_v61  ;;  %3828 = vmatprep.subr.bf16.mxu1 %v7363_v62  ;;  %v7432_v61 = vld [vmem:[#allocation7 + $0x604] ss:$16 sps:$4 sm:$0xff]   ;;  %v7435_v62 = vld [vmem:[#allocation7 + $0x60c] ss:$16 sps:$4 sm:$0xff]  }
 0x301   :  { %3743 = vmatpush1.bf16.msra.mxu0 %v7358_v63  ;;  %3829 = vmatpush1.bf16.msra.mxu1 %v7361_v0 }
 0x302   :  { %3744 = vmatprep.subr.bf16.mxu0 %v7366_v1  ;;  %3830 = vmatprep.subr.bf16.mxu1 %v7369_v3 }
 0x305   :  { %3745 = vmatpush1.bf16.msra.mxu0 %v7364_v4  ;;  %3831 = vmatpush1.bf16.msra.mxu1 %v7367_v7 }
 0x306   :  { %3746 = vmatprep.subr.bf16.mxu0 %v7372_v9  ;;  %3832 = vmatprep.subr.bf16.mxu1 %v7375_v10 }
 0x309   :  { %3747 = vmatpush1.bf16.msra.mxu0 %v7370_v18  ;;  %3833 = vmatpush1.bf16.msra.mxu1 %v7373_v19 }
 0x30a   :  { %3748 = vmatprep.subr.bf16.mxu0 %v7378_v20  ;;  %3834 = vmatprep.subr.bf16.mxu1 %v7381_v22 }
 0x30d   :  { %3749 = vmatpush1.bf16.msra.mxu0 %v7376_v23  ;;  %3835 = vmatpush1.bf16.msra.mxu1 %v7379_v25 }
 0x30e   :  { %3750 = vmatprep.subr.bf16.mxu0 %v7384_v27  ;;  %3836 = vmatprep.subr.bf16.mxu1 %v7387_v28 }
 0x311   :  { %3751 = vmatpush1.bf16.msra.mxu0 %v7382_v31  ;;  %3837 = vmatpush1.bf16.msra.mxu1 %v7385_v32 }
 0x312   :  { %3752 = vmatprep.subr.bf16.mxu0 %v7390_v35  ;;  %3838 = vmatprep.subr.bf16.mxu1 %v7393_v36 }
 0x315   :  { %3753 = vmatpush1.bf16.msra.mxu0 %v7388_v37  ;;  %3839 = vmatpush1.bf16.msra.mxu1 %v7391_v39  ;;  %v7430_v37 = vld [vmem:[#allocation7 + $0x600] ss:$16 sps:$4 sm:$0xff]   ;;  %v7433_v39 = vld [vmem:[#allocation7 + $0x608] ss:$16 sps:$4 sm:$0xff]  }
 0x316   :  { %3754 = vmatprep.subr.bf16.mxu0 %v7396_v40  ;;  %3840 = vmatprep.subr.bf16.mxu1 %v7399_v41  ;;  %v7441_v40 = vld [vmem:[#allocation7 + $0x62c] ss:$16 sps:$4 sm:$0xff]   ;;  %v7439_v41 = vld [vmem:[#allocation7 + $0x628] ss:$16 sps:$4 sm:$0xff]  }
 0x319   :  { %3755 = vmatpush1.bf16.msra.mxu0 %v7394_v42  ;;  %3841 = vmatpush1.bf16.msra.mxu1 %v7397_v43  ;;  %v7447_v42 = vld [vmem:[#allocation7 + $0x64c] ss:$16 sps:$4 sm:$0xff]   ;;  %v7442_v43 = vld [vmem:[#allocation7 + $0x640] ss:$16 sps:$4 sm:$0xff]  }
 0x31a   :  { %3756 = vmatprep.subr.bf16.mxu0 %v7402_v44  ;;  %3842 = vmatprep.subr.bf16.mxu1 %v7405_v45  ;;  %v7445_v44 = vld [vmem:[#allocation7 + $0x648] ss:$16 sps:$4 sm:$0xff]   ;;  %v7450_v45 = vld [vmem:[#allocation7 + $0x664] ss:$16 sps:$4 sm:$0xff]  }
 0x31d   :  { %3757 = vmatpush1.bf16.msra.mxu0 %v7400_v46  ;;  %3843 = vmatpush1.bf16.msra.mxu1 %v7403_v49  ;;  %v7453_v46 = vld [vmem:[#allocation7 + $0x66c] ss:$16 sps:$4 sm:$0xff]   ;;  %v7448_v49 = vld [vmem:[#allocation7 + $0x660] ss:$16 sps:$4 sm:$0xff]  }
 0x31e   :  { %3758 = vmatprep.subr.bf16.mxu0 %v7408_v12  ;;  %3844 = vmatprep.subr.bf16.mxu1 %v7411_v2  ;;  %v7451_v12 = vld [vmem:[#allocation7 + $0x668] ss:$16 sps:$4 sm:$0xff]   ;;  %v7456_v2 = vld [vmem:[#allocation7 + $0x684] ss:$16 sps:$4 sm:$0xff]  }
 0x321   :  { %3759 = vmatpush1.bf16.msra.mxu0 %v7406_v13  ;;  %3845 = vmatpush1.bf16.msra.mxu1 %v7409_v6  ;;  %v7459_v13 = vld [vmem:[#allocation7 + $0x68c] ss:$16 sps:$4 sm:$0xff]   ;;  %v7454_v6 = vld [vmem:[#allocation7 + $0x680] ss:$16 sps:$4 sm:$0xff]  }
 0x322   :  { %3760 = vmatprep.subr.bf16.mxu0 %v7414_v52  ;;  %3846 = vmatprep.subr.bf16.mxu1 %v7417_v53  ;;  %v7457_v52 = vld [vmem:[#allocation7 + $0x688] ss:$16 sps:$4 sm:$0xff]   ;;  %v7462_v53 = vld [vmem:[#allocation7 + $0x6a4] ss:$16 sps:$4 sm:$0xff]  }
 0x325   :  { %3761 = vmatpush1.bf16.msra.mxu0 %v7412_v5  ;;  %3847 = vmatpush1.bf16.msra.mxu1 %v7415_v24  ;;  %v7465_v5 = vld [vmem:[#allocation7 + $0x6ac] ss:$16 sps:$4 sm:$0xff]   ;;  %v7460_v24 = vld [vmem:[#allocation7 + $0x6a0] ss:$16 sps:$4 sm:$0xff]  }
 0x326   :  { %3762 = vmatprep.subr.bf16.mxu0 %v7420_v59  ;;  %3848 = vmatprep.subr.bf16.mxu1 %v7423_v54  ;;  %v7463_v59 = vld [vmem:[#allocation7 + $0x6a8] ss:$16 sps:$4 sm:$0xff]   ;;  %v7468_v54 = vld [vmem:[#allocation7 + $0x6c4] ss:$16 sps:$4 sm:$0xff]  }
 0x329   :  { %3763 = vmatpush1.bf16.msra.mxu0 %v7418_v16  ;;  %3849 = vmatpush1.bf16.msra.mxu1 %v7421_v55  ;;  %v7471_v16 = vld [vmem:[#allocation7 + $0x6cc] ss:$16 sps:$4 sm:$0xff]   ;;  %v7466_v55 = vld [vmem:[#allocation7 + $0x6c0] ss:$16 sps:$4 sm:$0xff]  }
 0x32a   :  { %3764 = vmatprep.subr.bf16.mxu0 %v7426_v56  ;;  %3850 = vmatprep.subr.bf16.mxu1 %v7429_v57  ;;  %v7469_v56 = vld [vmem:[#allocation7 + $0x6c8] ss:$16 sps:$4 sm:$0xff]   ;;  %v7474_v57 = vld [vmem:[#allocation7 + $0x6e4] ss:$16 sps:$4 sm:$0xff]  }
 0x32d   :  { %3765 = vmatpush1.bf16.msra.mxu0 %v7424_v58  ;;  %3851 = vmatpush1.bf16.msra.mxu1 %v7427_v60  ;;  %v7477_v58 = vld [vmem:[#allocation7 + $0x6ec] ss:$16 sps:$4 sm:$0xff]   ;;  %v7472_v60 = vld [vmem:[#allocation7 + $0x6e0] ss:$16 sps:$4 sm:$0xff]  }
 0x32e   :  { %3777 = vmatprep.subr.bf16.mxu0 %v7432_v61  ;;  %3863 = vmatprep.subr.bf16.mxu1 %v7435_v62  ;;  %v7475_v61 = vld [vmem:[#allocation7 + $0x6e8] ss:$16 sps:$4 sm:$0xff]   ;;  %v7480_v62 = vld [vmem:[#allocation7 + $0x704] ss:$16 sps:$4 sm:$0xff]  }
 0x3c3   :  { %v2979_v63 = vpop.f32.mrb[8].mxu0  ;;  %v8165_v0 = vpop.f32.mrb[8].mxu1 }
 0x3c4   :  { %v2981_v1 = vpop.f32.mrb[9].mxu0  ;;  %v3067_v3 = vpop.f32.mrb[9].mxu1  ;;  %v3074_v10 = vmax.f32 %v2979_v63, 0.0  ;;  %v7483_v63 = vld [vmem:[#allocation7 + $0x70c] ss:$16 sps:$4 sm:$0xff]  }
 0x3c5   :  { %v3075_v4 = vmax.f32 %v2981_v1, 0.0  ;;  %v2983_v7 = vpop.f32.mrb[10].mxu0  ;;  %v8167_v9 = vpop.f32.mrb[10].mxu1  ;;  %v3077_v25 = vmax.f32 %v3067_v3, 0.0  ;;  %v7478_v1 = vld [vmem:[#allocation7 + $0x700] ss:$16 sps:$4 sm:$0xff]  }
 0x3c6   :  { %v3078_v18 = vmax.f32 %v2983_v7, 0.0  ;;  %v2985_v19 = vpop.f32.mrb[11].mxu0  ;;  %v3071_v20 = vpop.f32.mrb[11].mxu1  ;;  %v8179_v32 = vadd.f32 %v3074_v10, %v8105_v33  ;;  %v7481_v3 = vld [vmem:[#allocation7 + $0x708] ss:$16 sps:$4 sm:$0xff]  }
 0x3c7   :  { %v3079_v22 = vmax.f32 %v2985_v19, 0.0  ;;  %v3081_v23 = vmax.f32 %v3071_v20, 0.0  ;;  %v8173_v28 = vadd.f32 %v3075_v4, %v8101_v29  ;;  %v7486_v4 = vld [vmem:[#allocation7 + $0x724] ss:$16 sps:$4 sm:$0xff]   ;;  %v7489_v7 = vld [vmem:[#allocation7 + $0x72c] ss:$16 sps:$4 sm:$0xff]  }
 0x3c8   :  { %v8170_v27 = vadd.f32 %v3078_v18, %v8099_v26  ;;  %v8187_v26 = vadd.f32 %v3077_v25, %v8111_v38  ;;  %v7444_v38 = vld [vmem:[#allocation7 + $0x644] ss:$16 sps:$4 sm:$0xff]   ;;  %v7484_v10 = vld [vmem:[#allocation7 + $0x720] ss:$16 sps:$4 sm:$0xff]   ;;  %v7487_v18 = vld [vmem:[#allocation7 + $0x728] ss:$16 sps:$4 sm:$0xff]  }
 0x3c9   :  { %v8176_v31 = vadd.f32 %v3079_v22, %v8103_v30  ;;  %v8182_v35 = vadd.f32 %v3081_v23, %v8107_v34  ;;  %v7438_v30 = vld [vmem:[#allocation7 + $0x624] ss:$16 sps:$4 sm:$0xff]   ;;  %v7436_v34 = vld [vmem:[#allocation7 + $0x620] ss:$16 sps:$4 sm:$0xff]   ;;  %v7495_v20 = vld [vmem:[#allocation7 + $0x74c] ss:$16 sps:$4 sm:$0xff]  }
 0x3ca   :  { %v3090_v29 = vpack.c.bf16 %v8170_v27, %v8179_v32  ;;  %v7492_v19 = vld [vmem:[#allocation7 + $0x744] ss:$16 sps:$4 sm:$0xff]   ;;  %v7490_v22 = vld [vmem:[#allocation7 + $0x740] ss:$16 sps:$4 sm:$0xff]   ;;  %v7493_v23 = vld [vmem:[#allocation7 + $0x748] ss:$16 sps:$4 sm:$0xff]  }
 0x3cb   :  { %v3091_v36 = vpack.c.bf16 %v8176_v31, %v8173_v28  ;;  %v3093_v33 = vpack.c.bf16 %v8182_v35, %v8187_v26  ;;  %v7498_v25 = vld [vmem:[#allocation7 + $0x764] ss:$16 sps:$4 sm:$0xff]  }
 0x3cd   :  { %3766 = vmatprep.mubr.bf16.mxu0 %v3091_v36  ;;  %3852 = vmatprep.mubr.bf16.mxu1 %v3091_v36  ;;  %v7501_v36 = vld [vmem:[#allocation7 + $0x76c] ss:$16 sps:$4 sm:$0xff]  }
 0x3ce   :  { %3767 = vmatmul.mubr.bf16.vlgmr.msra.gmra.mrb[12].mxu0 %v3090_v29  ;;  %3853 = vmatmul.mubr.bf16.vlgmr.msra.gmra.mrb[12].mxu1 %v3090_v29  ;;  %v7504_v29 = vld [vmem:[#allocation7 + $0x784] ss:$16 sps:$4 sm:$0xff]  }
 0x3cf   :  { %3778 = vmatpush1.bf16.msra.mxu0 %v7430_v37  ;;  %3864 = vmatpush1.bf16.msra.mxu1 %v7433_v39  ;;  %v7496_v37 = vld [vmem:[#allocation7 + $0x760] ss:$16 sps:$4 sm:$0xff]   ;;  %v7499_v39 = vld [vmem:[#allocation7 + $0x768] ss:$16 sps:$4 sm:$0xff]  }
 0x3d0   :  { %3809 = vmatprep.mubr.bf16.mxu0 %v3093_v33  ;;  %3895 = vmatprep.mubr.bf16.mxu1 %v3093_v33  ;;  %v7505_v33 = vld [vmem:[#allocation7 + $0x788] ss:$16 sps:$4 sm:$0xff]  }
 0x3d1   :  { %3779 = vmatprep.subr.bf16.mxu0 %v7438_v30  ;;  %3865 = vmatprep.subr.bf16.mxu1 %v7441_v40  ;;  %v7507_v30 = vld [vmem:[#allocation7 + $0x78c] ss:$16 sps:$4 sm:$0xff]   ;;  %v7502_v40 = vld [vmem:[#allocation7 + $0x780] ss:$16 sps:$4 sm:$0xff]  }
 0x3d3   :  { %3780 = vmatpush1.bf16.msra.mxu0 %v7436_v34  ;;  %3866 = vmatpush1.bf16.msra.mxu1 %v7439_v41  ;;  %v7510_v34 = vld [vmem:[#allocation7 + $0x7a4] ss:$16 sps:$4 sm:$0xff]   ;;  %v7513_v41 = vld [vmem:[#allocation7 + $0x7ac] ss:$16 sps:$4 sm:$0xff]  }
 0x3d4   :  { %3781 = vmatprep.subr.bf16.mxu0 %v7444_v38  ;;  %3867 = vmatprep.subr.bf16.mxu1 %v7447_v42  ;;  %v7508_v38 = vld [vmem:[#allocation7 + $0x7a0] ss:$16 sps:$4 sm:$0xff]   ;;  %v7511_v42 = vld [vmem:[#allocation7 + $0x7a8] ss:$16 sps:$4 sm:$0xff]  }
 0x3d7   :  { %3782 = vmatpush1.bf16.msra.mxu0 %v7442_v43  ;;  %3868 = vmatpush1.bf16.msra.mxu1 %v7445_v44  ;;  %v7516_v43 = vld [vmem:[#allocation7 + $0x7c4] ss:$16 sps:$4 sm:$0xff]   ;;  %v7519_v44 = vld [vmem:[#allocation7 + $0x7cc] ss:$16 sps:$4 sm:$0xff]  }
 0x3d8   :  { %3783 = vmatprep.subr.bf16.mxu0 %v7450_v45  ;;  %3869 = vmatprep.subr.bf16.mxu1 %v7453_v46  ;;  %v7514_v45 = vld [vmem:[#allocation7 + $0x7c0] ss:$16 sps:$4 sm:$0xff]   ;;  %v7517_v46 = vld [vmem:[#allocation7 + $0x7c8] ss:$16 sps:$4 sm:$0xff]  }
 0x3db   :  { %3784 = vmatpush1.bf16.msra.mxu0 %v7448_v49  ;;  %3870 = vmatpush1.bf16.msra.mxu1 %v7451_v12  ;;  %v3080_v49 = vmax.f32 %v8167_v9, 0.0  ;;  %v7522_v12 = vld [vmem:[#allocation7 + $0x7e4] ss:$16 sps:$4 sm:$0xff]   ;;  %v7526_v9 = vld [vmem:[#allocation5 + $0x800] ss:$16 sps:$4 sm:$0xff]  }
 0x3dc   :  { %3785 = vmatprep.subr.bf16.mxu0 %v7456_v2  ;;  %3871 = vmatprep.subr.bf16.mxu1 %v7459_v13  ;;  %v7525_v2 = vld [vmem:[#allocation7 + $0x7ec] ss:$16 sps:$4 sm:$0xff]   ;;  %v3076_v13 = vmax.f32 %v8165_v0, 0.0 }
 0x3df   :  { %3786 = vmatpush1.bf16.msra.mxu0 %v7454_v6  ;;  %3872 = vmatpush1.bf16.msra.mxu1 %v7457_v52  ;;  %v7520_v6 = vld [vmem:[#allocation7 + $0x7e0] ss:$16 sps:$4 sm:$0xff]   ;;  %v7523_v52 = vld [vmem:[#allocation7 + $0x7e8] ss:$16 sps:$4 sm:$0xff]  }
 0x3e0   :  { %3787 = vmatprep.subr.bf16.mxu0 %v7462_v53  ;;  %3873 = vmatprep.subr.bf16.mxu1 %v7465_v5  ;;  %v8196_v53 = vadd.f32 %v3080_v49, %v8120_v47  ;;  %v7528_v5 = vld [vmem:[#allocation5 + $0x804] ss:$16 sps:$4 sm:$0xff]   ;;  %v7532_v47 = vld [vmem:[#allocation5 + $0x820] ss:$16 sps:$4 sm:$0xff]   ;;  %v7591_v49 = vld [vmem:[#allocation5 + $0x94c] ss:$16 sps:$4 sm:$0xff]  }
 0x3e3   :  { %3788 = vmatpush1.bf16.msra.mxu0 %v7460_v24  ;;  %3874 = vmatpush1.bf16.msra.mxu1 %v7463_v59  ;;  %v7531_v24 = vld [vmem:[#allocation5 + $0x80c] ss:$16 sps:$4 sm:$0xff]   ;;  %v8199_v59 = vadd.f32 %v3076_v13, %v8123_v50  ;;  %v7540_v50 = vld [vmem:[#allocation5 + $0x844] ss:$16 sps:$4 sm:$0xff]  }
 0x3e4   :  { %3789 = vmatprep.subr.bf16.mxu0 %v7468_v54  ;;  %3875 = vmatprep.subr.bf16.mxu1 %v7471_v16  ;;  %v7529_v54 = vld [vmem:[#allocation5 + $0x808] ss:$16 sps:$4 sm:$0xff]   ;;  %v7534_v16 = vld [vmem:[#allocation5 + $0x824] ss:$16 sps:$4 sm:$0xff]  }
 0x3e5   :  { %v3092_v0 = vpack.c.bf16 %v8196_v53, %v8199_v59  ;;  %v7594_v13 = vld [vmem:[#allocation5 + $0x964] ss:$16 sps:$4 sm:$0xff]  }
 0x3e7   :  { %3790 = vmatpush1.bf16.msra.mxu0 %v7466_v55  ;;  %3876 = vmatpush1.bf16.msra.mxu1 %v7469_v56  ;;  %v7537_v55 = vld [vmem:[#allocation5 + $0x82c] ss:$16 sps:$4 sm:$0xff]   ;;  %v7535_v56 = vld [vmem:[#allocation5 + $0x828] ss:$16 sps:$4 sm:$0xff]  }
 0x3e8   :  { %3791 = vmatprep.subr.bf16.mxu0 %v7474_v57  ;;  %3877 = vmatprep.subr.bf16.mxu1 %v7477_v58  ;;  %v7543_v57 = vld [vmem:[#allocation5 + $0x84c] ss:$16 sps:$4 sm:$0xff]   ;;  %v7538_v58 = vld [vmem:[#allocation5 + $0x840] ss:$16 sps:$4 sm:$0xff]  }
 0x3eb   :  { %3792 = vmatpush1.bf16.msra.mxu0 %v7472_v60  ;;  %3878 = vmatpush1.bf16.msra.mxu1 %v7475_v61  ;;  %v7541_v60 = vld [vmem:[#allocation5 + $0x848] ss:$16 sps:$4 sm:$0xff]   ;;  %v7546_v61 = vld [vmem:[#allocation5 + $0x864] ss:$16 sps:$4 sm:$0xff]  }
 0x3ec   :  { %3793 = vmatprep.subr.bf16.mxu0 %v7480_v62  ;;  %3879 = vmatprep.subr.bf16.mxu1 %v7483_v63  ;;  %v7549_v62 = vld [vmem:[#allocation5 + $0x86c] ss:$16 sps:$4 sm:$0xff]   ;;  %v7544_v63 = vld [vmem:[#allocation5 + $0x860] ss:$16 sps:$4 sm:$0xff]  }
 0x3ef   :  { %3794 = vmatpush1.bf16.msra.mxu0 %v7478_v1  ;;  %3880 = vmatpush1.bf16.msra.mxu1 %v7481_v3  ;;  %v7547_v1 = vld [vmem:[#allocation5 + $0x868] ss:$16 sps:$4 sm:$0xff]   ;;  %v7552_v3 = vld [vmem:[#allocation5 + $0x884] ss:$16 sps:$4 sm:$0xff]  }
 0x3f0   :  { %3795 = vmatprep.subr.bf16.mxu0 %v7486_v4  ;;  %3881 = vmatprep.subr.bf16.mxu1 %v7489_v7  ;;  %v7555_v4 = vld [vmem:[#allocation5 + $0x88c] ss:$16 sps:$4 sm:$0xff]   ;;  %v7550_v7 = vld [vmem:[#allocation5 + $0x880] ss:$16 sps:$4 sm:$0xff]  }
 0x3f3   :  { %3796 = vmatpush1.bf16.msra.mxu0 %v7484_v10  ;;  %3882 = vmatpush1.bf16.msra.mxu1 %v7487_v18  ;;  %v7553_v10 = vld [vmem:[#allocation5 + $0x888] ss:$16 sps:$4 sm:$0xff]   ;;  %v7558_v18 = vld [vmem:[#allocation5 + $0x8a4] ss:$16 sps:$4 sm:$0xff]  }
 0x3f4   :  { %3797 = vmatprep.subr.bf16.mxu0 %v7492_v19  ;;  %3883 = vmatprep.subr.bf16.mxu1 %v7495_v20  ;;  %v7561_v19 = vld [vmem:[#allocation5 + $0x8ac] ss:$16 sps:$4 sm:$0xff]   ;;  %v7556_v20 = vld [vmem:[#allocation5 + $0x8a0] ss:$16 sps:$4 sm:$0xff]  }
 0x3f7   :  { %3798 = vmatpush1.bf16.msra.mxu0 %v7490_v22  ;;  %3884 = vmatpush1.bf16.msra.mxu1 %v7493_v23  ;;  %v7559_v22 = vld [vmem:[#allocation5 + $0x8a8] ss:$16 sps:$4 sm:$0xff]   ;;  %v7564_v23 = vld [vmem:[#allocation5 + $0x8c4] ss:$16 sps:$4 sm:$0xff]  }
 0x3f8   :  { %3799 = vmatprep.subr.bf16.mxu0 %v7498_v25  ;;  %3885 = vmatprep.subr.bf16.mxu1 %v7501_v36  ;;  %v7567_v25 = vld [vmem:[#allocation5 + $0x8cc] ss:$16 sps:$4 sm:$0xff]   ;;  %v7562_v36 = vld [vmem:[#allocation5 + $0x8c0] ss:$16 sps:$4 sm:$0xff]  }
 0x3fb   :  { %3800 = vmatpush1.bf16.msra.mxu0 %v7496_v37  ;;  %3886 = vmatpush1.bf16.msra.mxu1 %v7499_v39  ;;  %v7565_v37 = vld [vmem:[#allocation5 + $0x8c8] ss:$16 sps:$4 sm:$0xff]   ;;  %v7570_v39 = vld [vmem:[#allocation5 + $0x8e4] ss:$16 sps:$4 sm:$0xff]  }
 0x3fc   :  { %3801 = vmatprep.subr.bf16.mxu0 %v7504_v29  ;;  %3887 = vmatprep.subr.bf16.mxu1 %v7507_v30  ;;  %v7573_v29 = vld [vmem:[#allocation5 + $0x8ec] ss:$16 sps:$4 sm:$0xff]   ;;  %v7568_v30 = vld [vmem:[#allocation5 + $0x8e0] ss:$16 sps:$4 sm:$0xff]  }
 0x3ff   :  { %3802 = vmatpush1.bf16.msra.mxu0 %v7502_v40  ;;  %3888 = vmatpush1.bf16.msra.mxu1 %v7505_v33  ;;  %v7571_v40 = vld [vmem:[#allocation5 + $0x8e8] ss:$16 sps:$4 sm:$0xff]   ;;  %v7576_v33 = vld [vmem:[#allocation5 + $0x904] ss:$16 sps:$4 sm:$0xff]  }
 0x400   :  { %3803 = vmatprep.subr.bf16.mxu0 %v7510_v34  ;;  %3889 = vmatprep.subr.bf16.mxu1 %v7513_v41  ;;  %v7579_v34 = vld [vmem:[#allocation5 + $0x90c] ss:$16 sps:$4 sm:$0xff]   ;;  %v7574_v41 = vld [vmem:[#allocation5 + $0x900] ss:$16 sps:$4 sm:$0xff]  }
 0x403   :  { %3804 = vmatpush1.bf16.msra.mxu0 %v7508_v38  ;;  %3890 = vmatpush1.bf16.msra.mxu1 %v7511_v42  ;;  %v7577_v38 = vld [vmem:[#allocation5 + $0x908] ss:$16 sps:$4 sm:$0xff]   ;;  %v7582_v42 = vld [vmem:[#allocation5 + $0x924] ss:$16 sps:$4 sm:$0xff]  }
 0x404   :  { %3805 = vmatprep.subr.bf16.mxu0 %v7516_v43  ;;  %3891 = vmatprep.subr.bf16.mxu1 %v7519_v44  ;;  %v7585_v43 = vld [vmem:[#allocation5 + $0x92c] ss:$16 sps:$4 sm:$0xff]   ;;  %v7580_v44 = vld [vmem:[#allocation5 + $0x920] ss:$16 sps:$4 sm:$0xff]  }
 0x407   :  { %3806 = vmatpush1.bf16.msra.mxu0 %v7514_v45  ;;  %3892 = vmatpush1.bf16.msra.mxu1 %v7517_v46  ;;  %v7583_v45 = vld [vmem:[#allocation5 + $0x928] ss:$16 sps:$4 sm:$0xff]   ;;  %v7588_v46 = vld [vmem:[#allocation5 + $0x944] ss:$16 sps:$4 sm:$0xff]  }
 0x408   :  { %3807 = vmatprep.subr.bf16.mxu0 %v7522_v12  ;;  %3893 = vmatprep.subr.bf16.mxu1 %v7525_v2  ;;  %v7586_v12 = vld [vmem:[#allocation5 + $0x940] ss:$16 sps:$4 sm:$0xff]   ;;  %v7589_v2 = vld [vmem:[#allocation5 + $0x948] ss:$16 sps:$4 sm:$0xff]  }
 0x40b   :  { %3808 = vmatpush1.bf16.msra.mxu0 %v7520_v6  ;;  %3894 = vmatpush1.bf16.msra.mxu1 %v7523_v52  ;;  %v7597_v6 = vld [vmem:[#allocation5 + $0x96c] ss:$16 sps:$4 sm:$0xff]   ;;  %v7592_v52 = vld [vmem:[#allocation5 + $0x960] ss:$16 sps:$4 sm:$0xff]  }
 0x40c   :  { %4824 = vmatprep.subr.bf16.mxu0 %v7528_v5  ;;  %4910 = vmatprep.subr.bf16.mxu1 %v7531_v24  ;;  %v7595_v5 = vld [vmem:[#allocation5 + $0x968] ss:$16 sps:$4 sm:$0xff]   ;;  %v7600_v24 = vld [vmem:[#allocation5 + $0x984] ss:$16 sps:$4 sm:$0xff]  }
 0x40e   :  { %3810 = vmatmul.mubr.bf16.vlgmr.msra.gmra.mrb[12].mxu0 %v3092_v0  ;;  %3896 = vmatmul.mubr.bf16.vlgmr.msra.gmra.mrb[12].mxu1 %v3092_v0  ;;  %v7601_v0 = vld [vmem:[#allocation5 + $0x988] ss:$16 sps:$4 sm:$0xff]  }
 0x40f   :  { %4825 = vmatpush1.bf16.msra.mxu0 %v7526_v9  ;;  %4911 = vmatpush1.bf16.msra.mxu1 %v7529_v54  ;;  %v7603_v9 = vld [vmem:[#allocation5 + $0x98c] ss:$16 sps:$4 sm:$0xff]   ;;  %v7598_v54 = vld [vmem:[#allocation5 + $0x980] ss:$16 sps:$4 sm:$0xff]  }
 0x410   :  { %4826 = vmatprep.subr.bf16.mxu0 %v7534_v16  ;;  %4912 = vmatprep.subr.bf16.mxu1 %v7537_v55  ;;  %v7606_v16 = vld [vmem:[#allocation5 + $0x9a4] ss:$16 sps:$4 sm:$0xff]   ;;  %v7609_v55 = vld [vmem:[#allocation5 + $0x9ac] ss:$16 sps:$4 sm:$0xff]  }
 0x413   :  { %4827 = vmatpush1.bf16.msra.mxu0 %v7532_v47  ;;  %4913 = vmatpush1.bf16.msra.mxu1 %v7535_v56  ;;  %v7604_v47 = vld [vmem:[#allocation5 + $0x9a0] ss:$16 sps:$4 sm:$0xff]   ;;  %v7607_v56 = vld [vmem:[#allocation5 + $0x9a8] ss:$16 sps:$4 sm:$0xff]  }
 0x414   :  { %4828 = vmatprep.subr.bf16.mxu0 %v7540_v50  ;;  %4914 = vmatprep.subr.bf16.mxu1 %v7543_v57  ;;  %v7612_v50 = vld [vmem:[#allocation5 + $0x9c4] ss:$16 sps:$4 sm:$0xff]   ;;  %v7615_v57 = vld [vmem:[#allocation5 + $0x9cc] ss:$16 sps:$4 sm:$0xff]  }
 0x417   :  { %4829 = vmatpush1.bf16.msra.mxu0 %v7538_v58  ;;  %4915 = vmatpush1.bf16.msra.mxu1 %v7541_v60  ;;  %v7610_v58 = vld [vmem:[#allocation5 + $0x9c0] ss:$16 sps:$4 sm:$0xff]   ;;  %v7613_v60 = vld [vmem:[#allocation5 + $0x9c8] ss:$16 sps:$4 sm:$0xff]  }
 0x418   :  { %4830 = vmatprep.subr.bf16.mxu0 %v7546_v61  ;;  %4916 = vmatprep.subr.bf16.mxu1 %v7549_v62  ;;  %v7618_v61 = vld [vmem:[#allocation5 + $0x9e4] ss:$16 sps:$4 sm:$0xff]   ;;  %v7621_v62 = vld [vmem:[#allocation5 + $0x9ec] ss:$16 sps:$4 sm:$0xff]  }
 0x41b   :  { %4831 = vmatpush1.bf16.msra.mxu0 %v7544_v63  ;;  %4917 = vmatpush1.bf16.msra.mxu1 %v7547_v1  ;;  %v7616_v63 = vld [vmem:[#allocation5 + $0x9e0] ss:$16 sps:$4 sm:$0xff]   ;;  %v7619_v1 = vld [vmem:[#allocation5 + $0x9e8] ss:$16 sps:$4 sm:$0xff]  }
 0x41c   :  { %4832 = vmatprep.subr.bf16.mxu0 %v7552_v3  ;;  %4918 = vmatprep.subr.bf16.mxu1 %v7555_v4  ;;  %v7624_v3 = vld [vmem:[#allocation5 + $0xa04] ss:$16 sps:$4 sm:$0xff]   ;;  %v7627_v4 = vld [vmem:[#allocation5 + $0xa0c] ss:$16 sps:$4 sm:$0xff]  }
 0x41f   :  { %4833 = vmatpush1.bf16.msra.mxu0 %v7550_v7  ;;  %4919 = vmatpush1.bf16.msra.mxu1 %v7553_v10 }
 0x420   :  { %4834 = vmatprep.subr.bf16.mxu0 %v7558_v18  ;;  %4920 = vmatprep.subr.bf16.mxu1 %v7561_v19 }
 0x423   :  { %4835 = vmatpush1.bf16.msra.mxu0 %v7556_v20  ;;  %4921 = vmatpush1.bf16.msra.mxu1 %v7559_v22 }
 0x424   :  { %4836 = vmatprep.subr.bf16.mxu0 %v7564_v23  ;;  %4922 = vmatprep.subr.bf16.mxu1 %v7567_v25 }
 0x427   :  { %4837 = vmatpush1.bf16.msra.mxu0 %v7562_v36  ;;  %4923 = vmatpush1.bf16.msra.mxu1 %v7565_v37 }
 0x428   :  { %4838 = vmatprep.subr.bf16.mxu0 %v7570_v39  ;;  %4924 = vmatprep.subr.bf16.mxu1 %v7573_v29 }
 0x42b   :  { %4839 = vmatpush1.bf16.msra.mxu0 %v7568_v30  ;;  %4925 = vmatpush1.bf16.msra.mxu1 %v7571_v40 }
 0x42c   :  { %4840 = vmatprep.subr.bf16.mxu0 %v7576_v33  ;;  %4926 = vmatprep.subr.bf16.mxu1 %v7579_v34 }
 0x42f   :  { %4841 = vmatpush1.bf16.msra.mxu0 %v7574_v41  ;;  %4927 = vmatpush1.bf16.msra.mxu1 %v7577_v38 }
 0x430   :  { %4842 = vmatprep.subr.bf16.mxu0 %v7582_v42  ;;  %4928 = vmatprep.subr.bf16.mxu1 %v7585_v43 }
 0x433   :  { %4843 = vmatpush1.bf16.msra.mxu0 %v7580_v44  ;;  %4929 = vmatpush1.bf16.msra.mxu1 %v7583_v45  ;;  %v7622_v44 = vld [vmem:[#allocation5 + $0xa00] ss:$16 sps:$4 sm:$0xff]   ;;  %v7625_v45 = vld [vmem:[#allocation5 + $0xa08] ss:$16 sps:$4 sm:$0xff]  }
 0x434   :  { %4844 = vmatprep.subr.bf16.mxu0 %v7588_v46  ;;  %4930 = vmatprep.subr.bf16.mxu1 %v7591_v49  ;;  %v7633_v46 = vld [vmem:[#allocation5 + $0xa2c] ss:$16 sps:$4 sm:$0xff]   ;;  %v7631_v49 = vld [vmem:[#allocation5 + $0xa28] ss:$16 sps:$4 sm:$0xff]  }
 0x437   :  { %4845 = vmatpush1.bf16.msra.mxu0 %v7586_v12  ;;  %4931 = vmatpush1.bf16.msra.mxu1 %v7589_v2  ;;  %v7639_v12 = vld [vmem:[#allocation5 + $0xa4c] ss:$16 sps:$4 sm:$0xff]   ;;  %v7634_v2 = vld [vmem:[#allocation5 + $0xa40] ss:$16 sps:$4 sm:$0xff]  }
 0x438   :  { %4846 = vmatprep.subr.bf16.mxu0 %v7594_v13  ;;  %4932 = vmatprep.subr.bf16.mxu1 %v7597_v6  ;;  %v7637_v13 = vld [vmem:[#allocation5 + $0xa48] ss:$16 sps:$4 sm:$0xff]   ;;  %v7642_v6 = vld [vmem:[#allocation5 + $0xa64] ss:$16 sps:$4 sm:$0xff]  }
 0x43b   :  { %4847 = vmatpush1.bf16.msra.mxu0 %v7592_v52  ;;  %4933 = vmatpush1.bf16.msra.mxu1 %v7595_v5  ;;  %v7645_v52 = vld [vmem:[#allocation5 + $0xa6c] ss:$16 sps:$4 sm:$0xff]   ;;  %v7640_v5 = vld [vmem:[#allocation5 + $0xa60] ss:$16 sps:$4 sm:$0xff]  }
 0x43c   :  { %4848 = vmatprep.subr.bf16.mxu0 %v7600_v24  ;;  %4934 = vmatprep.subr.bf16.mxu1 %v7603_v9  ;;  %v7643_v24 = vld [vmem:[#allocation5 + $0xa68] ss:$16 sps:$4 sm:$0xff]   ;;  %v7648_v9 = vld [vmem:[#allocation5 + $0xa84] ss:$16 sps:$4 sm:$0xff]  }
 0x43f   :  { %4849 = vmatpush1.bf16.msra.mxu0 %v7598_v54  ;;  %4935 = vmatpush1.bf16.msra.mxu1 %v7601_v0  ;;  %v7651_v54 = vld [vmem:[#allocation5 + $0xa8c] ss:$16 sps:$4 sm:$0xff]   ;;  %v7646_v0 = vld [vmem:[#allocation5 + $0xa80] ss:$16 sps:$4 sm:$0xff]  }
 0x440   :  { %4850 = vmatprep.subr.bf16.mxu0 %v7606_v16  ;;  %4936 = vmatprep.subr.bf16.mxu1 %v7609_v55  ;;  %v7649_v16 = vld [vmem:[#allocation5 + $0xa88] ss:$16 sps:$4 sm:$0xff]   ;;  %v7654_v55 = vld [vmem:[#allocation5 + $0xaa4] ss:$16 sps:$4 sm:$0xff]  }
 0x443   :  { %4851 = vmatpush1.bf16.msra.mxu0 %v7604_v47  ;;  %4937 = vmatpush1.bf16.msra.mxu1 %v7607_v56  ;;  %v7657_v47 = vld [vmem:[#allocation5 + $0xaac] ss:$16 sps:$4 sm:$0xff]   ;;  %v7652_v56 = vld [vmem:[#allocation5 + $0xaa0] ss:$16 sps:$4 sm:$0xff]  }
 0x444   :  { %4852 = vmatprep.subr.bf16.mxu0 %v7612_v50  ;;  %4938 = vmatprep.subr.bf16.mxu1 %v7615_v57  ;;  %v7655_v50 = vld [vmem:[#allocation5 + $0xaa8] ss:$16 sps:$4 sm:$0xff]   ;;  %v7660_v57 = vld [vmem:[#allocation5 + $0xac4] ss:$16 sps:$4 sm:$0xff]  }
 0x447   :  { %4853 = vmatpush1.bf16.msra.mxu0 %v7610_v58  ;;  %4939 = vmatpush1.bf16.msra.mxu1 %v7613_v60  ;;  %v7663_v58 = vld [vmem:[#allocation5 + $0xacc] ss:$16 sps:$4 sm:$0xff]   ;;  %v7658_v60 = vld [vmem:[#allocation5 + $0xac0] ss:$16 sps:$4 sm:$0xff]  }
 0x448   :  { %4854 = vmatprep.subr.bf16.mxu0 %v7618_v61  ;;  %4940 = vmatprep.subr.bf16.mxu1 %v7621_v62  ;;  %v7661_v61 = vld [vmem:[#allocation5 + $0xac8] ss:$16 sps:$4 sm:$0xff]   ;;  %v7666_v62 = vld [vmem:[#allocation5 + $0xae4] ss:$16 sps:$4 sm:$0xff]  }
 0x44b   :  { %4855 = vmatpush1.bf16.msra.mxu0 %v7616_v63  ;;  %4941 = vmatpush1.bf16.msra.mxu1 %v7619_v1  ;;  %v7669_v63 = vld [vmem:[#allocation5 + $0xaec] ss:$16 sps:$4 sm:$0xff]   ;;  %v7664_v1 = vld [vmem:[#allocation5 + $0xae0] ss:$16 sps:$4 sm:$0xff]  }
 0x44c   :  { %4867 = vmatprep.subr.bf16.mxu0 %v7624_v3  ;;  %4953 = vmatprep.subr.bf16.mxu1 %v7627_v4  ;;  %v7667_v3 = vld [vmem:[#allocation5 + $0xae8] ss:$16 sps:$4 sm:$0xff]   ;;  %v7672_v4 = vld [vmem:[#allocation5 + $0xb04] ss:$16 sps:$4 sm:$0xff]  }
 0x4e1   :  { %v3811_v7 = vpop.f32.mrb[12].mxu0  ;;  %v8203_v10 = vpop.f32.mrb[12].mxu1 }
 0x4e2   :  { %v3813_v18 = vpop.f32.mrb[13].mxu0  ;;  %v3899_v19 = vpop.f32.mrb[13].mxu1  ;;  %v3906_v25 = vmax.f32 %v3811_v7, 0.0  ;;  %v7675_v7 = vld [vmem:[#allocation5 + $0xb0c] ss:$16 sps:$4 sm:$0xff]  }
 0x4e3   :  { %v3907_v20 = vmax.f32 %v3813_v18, 0.0  ;;  %v3815_v22 = vpop.f32.mrb[14].mxu0  ;;  %v8205_v23 = vpop.f32.mrb[14].mxu1  ;;  %v3909_v40 = vmax.f32 %v3899_v19, 0.0  ;;  %v7670_v18 = vld [vmem:[#allocation5 + $0xb00] ss:$16 sps:$4 sm:$0xff]  }
 0x4e4   :  { %v3910_v36 = vmax.f32 %v3815_v22, 0.0  ;;  %v3817_v37 = vpop.f32.mrb[15].mxu0  ;;  %v3903_v39 = vpop.f32.mrb[15].mxu1  ;;  %v8217_v38 = vadd.f32 %v3906_v25, %v8143_v15  ;;  %v7673_v19 = vld [vmem:[#allocation5 + $0xb08] ss:$16 sps:$4 sm:$0xff]  }
 0x4e5   :  { %v3911_v29 = vmax.f32 %v3817_v37, 0.0  ;;  %v3913_v30 = vmax.f32 %v3903_v39, 0.0  ;;  %v8211_v34 = vadd.f32 %v3907_v20, %v8139_v11  ;;  %v7678_v20 = vld [vmem:[#allocation5 + $0xb24] ss:$16 sps:$4 sm:$0xff]   ;;  %v7681_v22 = vld [vmem:[#allocation5 + $0xb2c] ss:$16 sps:$4 sm:$0xff]  }
 0x4e6   :  { %v8208_v33 = vadd.f32 %v3910_v36, %v8137_v8  ;;  %v8225_v8 = vadd.f32 %v3909_v40, %v8149_v21  ;;  %v7636_v21 = vld [vmem:[#allocation5 + $0xa44] ss:$16 sps:$4 sm:$0xff]   ;;  %v7676_v25 = vld [vmem:[#allocation5 + $0xb20] ss:$16 sps:$4 sm:$0xff]   ;;  %v7679_v36 = vld [vmem:[#allocation5 + $0xb28] ss:$16 sps:$4 sm:$0xff]  }
 0x4e7   :  { %v8214_v41 = vadd.f32 %v3911_v29, %v8141_v14  ;;  %v8220_v42 = vadd.f32 %v3913_v30, %v8145_v17  ;;  %v7630_v14 = vld [vmem:[#allocation5 + $0xa24] ss:$16 sps:$4 sm:$0xff]   ;;  %v7628_v17 = vld [vmem:[#allocation5 + $0xa20] ss:$16 sps:$4 sm:$0xff]   ;;  %v7687_v39 = vld [vmem:[#allocation5 + $0xb4c] ss:$16 sps:$4 sm:$0xff]  }
 0x4e8   :  { %v4180_v11 = vpack.c.bf16 %v8208_v33, %v8217_v38  ;;  %v7684_v37 = vld [vmem:[#allocation5 + $0xb44] ss:$16 sps:$4 sm:$0xff]   ;;  %v7682_v29 = vld [vmem:[#allocation5 + $0xb40] ss:$16 sps:$4 sm:$0xff]   ;;  %v7685_v30 = vld [vmem:[#allocation5 + $0xb48] ss:$16 sps:$4 sm:$0xff]  }
 0x4e9   :  { %v4181_v43 = vpack.c.bf16 %v8214_v41, %v8211_v34  ;;  %v4183_v15 = vpack.c.bf16 %v8220_v42, %v8225_v8  ;;  %v7690_v40 = vld [vmem:[#allocation5 + $0xb64] ss:$16 sps:$4 sm:$0xff]  }
 0x4eb   :  { %4856 = vmatprep.mubr.bf16.mxu0 %v4181_v43  ;;  %4942 = vmatprep.mubr.bf16.mxu1 %v4181_v43  ;;  %v7693_v43 = vld [vmem:[#allocation5 + $0xb6c] ss:$16 sps:$4 sm:$0xff]  }
 0x4ec   :  { %4857 = vmatmul.mubr.bf16.vlgmr.msra.gmra.mrb[16].mxu0 %v4180_v11  ;;  %4943 = vmatmul.mubr.bf16.vlgmr.msra.gmra.mrb[16].mxu1 %v4180_v11  ;;  %v7696_v11 = vld [vmem:[#allocation5 + $0xb84] ss:$16 sps:$4 sm:$0xff]  }
 0x4ed   :  { %4868 = vmatpush1.bf16.msra.mxu0 %v7622_v44  ;;  %4954 = vmatpush1.bf16.msra.mxu1 %v7625_v45  ;;  %v7688_v44 = vld [vmem:[#allocation5 + $0xb60] ss:$16 sps:$4 sm:$0xff]   ;;  %v7691_v45 = vld [vmem:[#allocation5 + $0xb68] ss:$16 sps:$4 sm:$0xff]  }
 0x4ee   :  { %4899 = vmatprep.mubr.bf16.mxu0 %v4183_v15  ;;  %4985 = vmatprep.mubr.bf16.mxu1 %v4183_v15  ;;  %v7697_v15 = vld [vmem:[#allocation5 + $0xb88] ss:$16 sps:$4 sm:$0xff]  }
 0x4ef   :  { %4869 = vmatprep.subr.bf16.mxu0 %v7630_v14  ;;  %4955 = vmatprep.subr.bf16.mxu1 %v7633_v46  ;;  %v7699_v14 = vld [vmem:[#allocation5 + $0xb8c] ss:$16 sps:$4 sm:$0xff]   ;;  %v7694_v46 = vld [vmem:[#allocation5 + $0xb80] ss:$16 sps:$4 sm:$0xff]  }
 0x4f1   :  { %4870 = vmatpush1.bf16.msra.mxu0 %v7628_v17  ;;  %4956 = vmatpush1.bf16.msra.mxu1 %v7631_v49  ;;  %v7702_v17 = vld [vmem:[#allocation5 + $0xba4] ss:$16 sps:$4 sm:$0xff]   ;;  %v7705_v49 = vld [vmem:[#allocation5 + $0xbac] ss:$16 sps:$4 sm:$0xff]  }
 0x4f2   :  { %4871 = vmatprep.subr.bf16.mxu0 %v7636_v21  ;;  %4957 = vmatprep.subr.bf16.mxu1 %v7639_v12  ;;  %v7700_v21 = vld [vmem:[#allocation5 + $0xba0] ss:$16 sps:$4 sm:$0xff]   ;;  %v7703_v12 = vld [vmem:[#allocation5 + $0xba8] ss:$16 sps:$4 sm:$0xff]  }
 0x4f5   :  { %4872 = vmatpush1.bf16.msra.mxu0 %v7634_v2  ;;  %4958 = vmatpush1.bf16.msra.mxu1 %v7637_v13  ;;  %v7708_v2 = vld [vmem:[#allocation5 + $0xbc4] ss:$16 sps:$4 sm:$0xff]   ;;  %v7711_v13 = vld [vmem:[#allocation5 + $0xbcc] ss:$16 sps:$4 sm:$0xff]  }
 0x4f6   :  { %4873 = vmatprep.subr.bf16.mxu0 %v7642_v6  ;;  %4959 = vmatprep.subr.bf16.mxu1 %v7645_v52  ;;  %v7706_v6 = vld [vmem:[#allocation5 + $0xbc0] ss:$16 sps:$4 sm:$0xff]   ;;  %v7709_v52 = vld [vmem:[#allocation5 + $0xbc8] ss:$16 sps:$4 sm:$0xff]  }
 0x4f9   :  { %4874 = vmatpush1.bf16.msra.mxu0 %v7640_v5  ;;  %4960 = vmatpush1.bf16.msra.mxu1 %v7643_v24  ;;  %v3912_v5 = vmax.f32 %v8205_v23, 0.0  ;;  %v7714_v24 = vld [vmem:[#allocation5 + $0xbe4] ss:$16 sps:$4 sm:$0xff]   ;;  %v7718_v23 = vld [vmem:[#allocation7 + $0x800] ss:$16 sps:$4 sm:$0xff]  }
 0x4fa   :  { %4875 = vmatprep.subr.bf16.mxu0 %v7648_v9  ;;  %4961 = vmatprep.subr.bf16.mxu1 %v7651_v54  ;;  %v7717_v9 = vld [vmem:[#allocation5 + $0xbec] ss:$16 sps:$4 sm:$0xff]   ;;  %v3908_v54 = vmax.f32 %v8203_v10, 0.0 }
 0x4fd   :  { %4876 = vmatpush1.bf16.msra.mxu0 %v7646_v0  ;;  %4962 = vmatpush1.bf16.msra.mxu1 %v7649_v16  ;;  %v7712_v0 = vld [vmem:[#allocation5 + $0xbe0] ss:$16 sps:$4 sm:$0xff]   ;;  %v7715_v16 = vld [vmem:[#allocation5 + $0xbe8] ss:$16 sps:$4 sm:$0xff]  }
 0x4fe   :  { %4877 = vmatprep.subr.bf16.mxu0 %v7654_v55  ;;  %4963 = vmatprep.subr.bf16.mxu1 %v7657_v47  ;;  %v8234_v55 = vadd.f32 %v3912_v5, %v8158_v48  ;;  %v7720_v47 = vld [vmem:[#allocation7 + $0x804] ss:$16 sps:$4 sm:$0xff]   ;;  %v7724_v48 = vld [vmem:[#allocation7 + $0x820] ss:$16 sps:$4 sm:$0xff]   ;;  %v7783_v5 = vld [vmem:[#allocation7 + $0x94c] ss:$16 sps:$4 sm:$0xff]  }
 0x501   :  { %4878 = vmatpush1.bf16.msra.mxu0 %v7652_v56  ;;  %4964 = vmatpush1.bf16.msra.mxu1 %v7655_v50  ;;  %v7723_v56 = vld [vmem:[#allocation7 + $0x80c] ss:$16 sps:$4 sm:$0xff]   ;;  %v8237_v50 = vadd.f32 %v3908_v54, %v8161_v51  ;;  %v7732_v51 = vld [vmem:[#allocation7 + $0x844] ss:$16 sps:$4 sm:$0xff]  }
 0x502   :  { %4879 = vmatprep.subr.bf16.mxu0 %v7660_v57  ;;  %4965 = vmatprep.subr.bf16.mxu1 %v7663_v58  ;;  %v7721_v57 = vld [vmem:[#allocation7 + $0x808] ss:$16 sps:$4 sm:$0xff]   ;;  %v7726_v58 = vld [vmem:[#allocation7 + $0x824] ss:$16 sps:$4 sm:$0xff]  }
 0x503   :  { %v4182_v10 = vpack.c.bf16 %v8234_v55, %v8237_v50  ;;  %v7786_v54 = vld [vmem:[#allocation7 + $0x964] ss:$16 sps:$4 sm:$0xff]  }
 0x505   :  { %4880 = vmatpush1.bf16.msra.mxu0 %v7658_v60  ;;  %4966 = vmatpush1.bf16.msra.mxu1 %v7661_v61  ;;  %v7729_v60 = vld [vmem:[#allocation7 + $0x82c] ss:$16 sps:$4 sm:$0xff]   ;;  %v7727_v61 = vld [vmem:[#allocation7 + $0x828] ss:$16 sps:$4 sm:$0xff]  }
 0x506   :  { %4881 = vmatprep.subr.bf16.mxu0 %v7666_v62  ;;  %4967 = vmatprep.subr.bf16.mxu1 %v7669_v63  ;;  %v7735_v62 = vld [vmem:[#allocation7 + $0x84c] ss:$16 sps:$4 sm:$0xff]   ;;  %v7730_v63 = vld [vmem:[#allocation7 + $0x840] ss:$16 sps:$4 sm:$0xff]  }
 0x509   :  { %4882 = vmatpush1.bf16.msra.mxu0 %v7664_v1  ;;  %4968 = vmatpush1.bf16.msra.mxu1 %v7667_v3  ;;  %v7733_v1 = vld [vmem:[#allocation7 + $0x848] ss:$16 sps:$4 sm:$0xff]   ;;  %v7738_v3 = vld [vmem:[#allocation7 + $0x864] ss:$16 sps:$4 sm:$0xff]  }
 0x50a   :  { %4883 = vmatprep.subr.bf16.mxu0 %v7672_v4  ;;  %4969 = vmatprep.subr.bf16.mxu1 %v7675_v7  ;;  %v7741_v4 = vld [vmem:[#allocation7 + $0x86c] ss:$16 sps:$4 sm:$0xff]   ;;  %v7736_v7 = vld [vmem:[#allocation7 + $0x860] ss:$16 sps:$4 sm:$0xff]  }
 0x50d   :  { %4884 = vmatpush1.bf16.msra.mxu0 %v7670_v18  ;;  %4970 = vmatpush1.bf16.msra.mxu1 %v7673_v19  ;;  %v7739_v18 = vld [vmem:[#allocation7 + $0x868] ss:$16 sps:$4 sm:$0xff]   ;;  %v7744_v19 = vld [vmem:[#allocation7 + $0x884] ss:$16 sps:$4 sm:$0xff]  }
 0x50e   :  { %4885 = vmatprep.subr.bf16.mxu0 %v7678_v20  ;;  %4971 = vmatprep.subr.bf16.mxu1 %v7681_v22  ;;  %v7747_v20 = vld [vmem:[#allocation7 + $0x88c] ss:$16 sps:$4 sm:$0xff]   ;;  %v7742_v22 = vld [vmem:[#allocation7 + $0x880] ss:$16 sps:$4 sm:$0xff]  }
 0x511   :  { %4886 = vmatpush1.bf16.msra.mxu0 %v7676_v25  ;;  %4972 = vmatpush1.bf16.msra.mxu1 %v7679_v36  ;;  %v7745_v25 = vld [vmem:[#allocation7 + $0x888] ss:$16 sps:$4 sm:$0xff]   ;;  %v7750_v36 = vld [vmem:[#allocation7 + $0x8a4] ss:$16 sps:$4 sm:$0xff]  }
 0x512   :  { %4887 = vmatprep.subr.bf16.mxu0 %v7684_v37  ;;  %4973 = vmatprep.subr.bf16.mxu1 %v7687_v39  ;;  %v7753_v37 = vld [vmem:[#allocation7 + $0x8ac] ss:$16 sps:$4 sm:$0xff]   ;;  %v7748_v39 = vld [vmem:[#allocation7 + $0x8a0] ss:$16 sps:$4 sm:$0xff]  }
 0x515   :  { %4888 = vmatpush1.bf16.msra.mxu0 %v7682_v29  ;;  %4974 = vmatpush1.bf16.msra.mxu1 %v7685_v30  ;;  %v7751_v29 = vld [vmem:[#allocation7 + $0x8a8] ss:$16 sps:$4 sm:$0xff]   ;;  %v7756_v30 = vld [vmem:[#allocation7 + $0x8c4] ss:$16 sps:$4 sm:$0xff]  }
 0x516   :  { %4889 = vmatprep.subr.bf16.mxu0 %v7690_v40  ;;  %4975 = vmatprep.subr.bf16.mxu1 %v7693_v43  ;;  %v7759_v40 = vld [vmem:[#allocation7 + $0x8cc] ss:$16 sps:$4 sm:$0xff]   ;;  %v7754_v43 = vld [vmem:[#allocation7 + $0x8c0] ss:$16 sps:$4 sm:$0xff]  }
 0x519   :  { %4890 = vmatpush1.bf16.msra.mxu0 %v7688_v44  ;;  %4976 = vmatpush1.bf16.msra.mxu1 %v7691_v45  ;;  %v7757_v44 = vld [vmem:[#allocation7 + $0x8c8] ss:$16 sps:$4 sm:$0xff]   ;;  %v7762_v45 = vld [vmem:[#allocation7 + $0x8e4] ss:$16 sps:$4 sm:$0xff]  }
 0x51a   :  { %4891 = vmatprep.subr.bf16.mxu0 %v7696_v11  ;;  %4977 = vmatprep.subr.bf16.mxu1 %v7699_v14  ;;  %v7765_v11 = vld [vmem:[#allocation7 + $0x8ec] ss:$16 sps:$4 sm:$0xff]   ;;  %v7760_v14 = vld [vmem:[#allocation7 + $0x8e0] ss:$16 sps:$4 sm:$0xff]  }
 0x51d   :  { %4892 = vmatpush1.bf16.msra.mxu0 %v7694_v46  ;;  %4978 = vmatpush1.bf16.msra.mxu1 %v7697_v15  ;;  %v7763_v46 = vld [vmem:[#allocation7 + $0x8e8] ss:$16 sps:$4 sm:$0xff]   ;;  %v7768_v15 = vld [vmem:[#allocation7 + $0x904] ss:$16 sps:$4 sm:$0xff]  }
 0x51e   :  { %4893 = vmatprep.subr.bf16.mxu0 %v7702_v17  ;;  %4979 = vmatprep.subr.bf16.mxu1 %v7705_v49  ;;  %v7771_v17 = vld [vmem:[#allocation7 + $0x90c] ss:$16 sps:$4 sm:$0xff]   ;;  %v7766_v49 = vld [vmem:[#allocation7 + $0x900] ss:$16 sps:$4 sm:$0xff]  }
 0x521   :  { %4894 = vmatpush1.bf16.msra.mxu0 %v7700_v21  ;;  %4980 = vmatpush1.bf16.msra.mxu1 %v7703_v12  ;;  %v7769_v21 = vld [vmem:[#allocation7 + $0x908] ss:$16 sps:$4 sm:$0xff]   ;;  %v7774_v12 = vld [vmem:[#allocation7 + $0x924] ss:$16 sps:$4 sm:$0xff]  }
 0x522   :  { %4895 = vmatprep.subr.bf16.mxu0 %v7708_v2  ;;  %4981 = vmatprep.subr.bf16.mxu1 %v7711_v13  ;;  %v7777_v2 = vld [vmem:[#allocation7 + $0x92c] ss:$16 sps:$4 sm:$0xff]   ;;  %v7772_v13 = vld [vmem:[#allocation7 + $0x920] ss:$16 sps:$4 sm:$0xff]  }
 0x525   :  { %4896 = vmatpush1.bf16.msra.mxu0 %v7706_v6  ;;  %4982 = vmatpush1.bf16.msra.mxu1 %v7709_v52  ;;  %v7775_v6 = vld [vmem:[#allocation7 + $0x928] ss:$16 sps:$4 sm:$0xff]   ;;  %v7780_v52 = vld [vmem:[#allocation7 + $0x944] ss:$16 sps:$4 sm:$0xff]  }
 0x526   :  { %4897 = vmatprep.subr.bf16.mxu0 %v7714_v24  ;;  %4983 = vmatprep.subr.bf16.mxu1 %v7717_v9  ;;  %v7778_v24 = vld [vmem:[#allocation7 + $0x940] ss:$16 sps:$4 sm:$0xff]   ;;  %v7781_v9 = vld [vmem:[#allocation7 + $0x948] ss:$16 sps:$4 sm:$0xff]  }
 0x529   :  { %4898 = vmatpush1.bf16.msra.mxu0 %v7712_v0  ;;  %4984 = vmatpush1.bf16.msra.mxu1 %v7715_v16  ;;  %v7789_v0 = vld [vmem:[#allocation7 + $0x96c] ss:$16 sps:$4 sm:$0xff]   ;;  %v7784_v16 = vld [vmem:[#allocation7 + $0x960] ss:$16 sps:$4 sm:$0xff]  }
 0x52a   :  { %5656 = vmatprep.subr.bf16.mxu0 %v7720_v47  ;;  %5742 = vmatprep.subr.bf16.mxu1 %v7723_v56  ;;  %v7787_v47 = vld [vmem:[#allocation7 + $0x968] ss:$16 sps:$4 sm:$0xff]   ;;  %v7792_v56 = vld [vmem:[#allocation7 + $0x984] ss:$16 sps:$4 sm:$0xff]  }
 0x52c   :  { %4900 = vmatmul.mubr.bf16.vlgmr.msra.gmra.mrb[16].mxu0 %v4182_v10  ;;  %4986 = vmatmul.mubr.bf16.vlgmr.msra.gmra.mrb[16].mxu1 %v4182_v10  ;;  %v7793_v10 = vld [vmem:[#allocation7 + $0x988] ss:$16 sps:$4 sm:$0xff]  }
 0x52d   :  { %5657 = vmatpush1.bf16.msra.mxu0 %v7718_v23  ;;  %5743 = vmatpush1.bf16.msra.mxu1 %v7721_v57  ;;  %v7795_v23 = vld [vmem:[#allocation7 + $0x98c] ss:$16 sps:$4 sm:$0xff]   ;;  %v7790_v57 = vld [vmem:[#allocation7 + $0x980] ss:$16 sps:$4 sm:$0xff]  }
 0x52e   :  { %5658 = vmatprep.subr.bf16.mxu0 %v7726_v58  ;;  %5744 = vmatprep.subr.bf16.mxu1 %v7729_v60  ;;  %v7798_v58 = vld [vmem:[#allocation7 + $0x9a4] ss:$16 sps:$4 sm:$0xff]   ;;  %v7801_v60 = vld [vmem:[#allocation7 + $0x9ac] ss:$16 sps:$4 sm:$0xff]  }
 0x531   :  { %5659 = vmatpush1.bf16.msra.mxu0 %v7724_v48  ;;  %5745 = vmatpush1.bf16.msra.mxu1 %v7727_v61  ;;  %v7796_v48 = vld [vmem:[#allocation7 + $0x9a0] ss:$16 sps:$4 sm:$0xff]   ;;  %v7799_v61 = vld [vmem:[#allocation7 + $0x9a8] ss:$16 sps:$4 sm:$0xff]  }
 0x532   :  { %5660 = vmatprep.subr.bf16.mxu0 %v7732_v51  ;;  %5746 = vmatprep.subr.bf16.mxu1 %v7735_v62  ;;  %v7804_v51 = vld [vmem:[#allocation7 + $0x9c4] ss:$16 sps:$4 sm:$0xff]   ;;  %v7807_v62 = vld [vmem:[#allocation7 + $0x9cc] ss:$16 sps:$4 sm:$0xff]  }
 0x535   :  { %5661 = vmatpush1.bf16.msra.mxu0 %v7730_v63  ;;  %5747 = vmatpush1.bf16.msra.mxu1 %v7733_v1  ;;  %v7802_v63 = vld [vmem:[#allocation7 + $0x9c0] ss:$16 sps:$4 sm:$0xff]   ;;  %v7805_v1 = vld [vmem:[#allocation7 + $0x9c8] ss:$16 sps:$4 sm:$0xff]  }
 0x536   :  { %5662 = vmatprep.subr.bf16.mxu0 %v7738_v3  ;;  %5748 = vmatprep.subr.bf16.mxu1 %v7741_v4  ;;  %v7810_v3 = vld [vmem:[#allocation7 + $0x9e4] ss:$16 sps:$4 sm:$0xff]   ;;  %v7813_v4 = vld [vmem:[#allocation7 + $0x9ec] ss:$16 sps:$4 sm:$0xff]  }
 0x539   :  { %5663 = vmatpush1.bf16.msra.mxu0 %v7736_v7  ;;  %5749 = vmatpush1.bf16.msra.mxu1 %v7739_v18  ;;  %v7808_v7 = vld [vmem:[#allocation7 + $0x9e0] ss:$16 sps:$4 sm:$0xff]   ;;  %v7811_v18 = vld [vmem:[#allocation7 + $0x9e8] ss:$16 sps:$4 sm:$0xff]  }
 0x53a   :  { %5664 = vmatprep.subr.bf16.mxu0 %v7744_v19  ;;  %5750 = vmatprep.subr.bf16.mxu1 %v7747_v20  ;;  %v7816_v19 = vld [vmem:[#allocation7 + $0xa04] ss:$16 sps:$4 sm:$0xff]   ;;  %v7819_v20 = vld [vmem:[#allocation7 + $0xa0c] ss:$16 sps:$4 sm:$0xff]  }
 0x53d   :  { %5665 = vmatpush1.bf16.msra.mxu0 %v7742_v22  ;;  %5751 = vmatpush1.bf16.msra.mxu1 %v7745_v25 }
 0x53e   :  { %5666 = vmatprep.subr.bf16.mxu0 %v7750_v36  ;;  %5752 = vmatprep.subr.bf16.mxu1 %v7753_v37 }
 0x541   :  { %5667 = vmatpush1.bf16.msra.mxu0 %v7748_v39  ;;  %5753 = vmatpush1.bf16.msra.mxu1 %v7751_v29 }
 0x542   :  { %5668 = vmatprep.subr.bf16.mxu0 %v7756_v30  ;;  %5754 = vmatprep.subr.bf16.mxu1 %v7759_v40 }
 0x545   :  { %5669 = vmatpush1.bf16.msra.mxu0 %v7754_v43  ;;  %5755 = vmatpush1.bf16.msra.mxu1 %v7757_v44 }
 0x546   :  { %5670 = vmatprep.subr.bf16.mxu0 %v7762_v45  ;;  %5756 = vmatprep.subr.bf16.mxu1 %v7765_v11 }
 0x549   :  { %5671 = vmatpush1.bf16.msra.mxu0 %v7760_v14  ;;  %5757 = vmatpush1.bf16.msra.mxu1 %v7763_v46 }
 0x54a   :  { %5672 = vmatprep.subr.bf16.mxu0 %v7768_v15  ;;  %5758 = vmatprep.subr.bf16.mxu1 %v7771_v17 }
 0x54d   :  { %5673 = vmatpush1.bf16.msra.mxu0 %v7766_v49  ;;  %5759 = vmatpush1.bf16.msra.mxu1 %v7769_v21 }
 0x54e   :  { %5674 = vmatprep.subr.bf16.mxu0 %v7774_v12  ;;  %5760 = vmatprep.subr.bf16.mxu1 %v7777_v2 }
 0x551   :  { %5675 = vmatpush1.bf16.msra.mxu0 %v7772_v13  ;;  %5761 = vmatpush1.bf16.msra.mxu1 %v7775_v6 }
 0x552   :  { %5676 = vmatprep.subr.bf16.mxu0 %v7780_v52  ;;  %5762 = vmatprep.subr.bf16.mxu1 %v7783_v5 }
 0x555   :  { %5677 = vmatpush1.bf16.msra.mxu0 %v7778_v24  ;;  %5763 = vmatpush1.bf16.msra.mxu1 %v7781_v9 }
 0x556   :  { %5678 = vmatprep.subr.bf16.mxu0 %v7786_v54  ;;  %5764 = vmatprep.subr.bf16.mxu1 %v7789_v0  ;;  %v7814_v0 = vld [vmem:[#allocation7 + $0xa00] ss:$16 sps:$4 sm:$0xff]  }
 0x559   :  { %5679 = vmatpush1.bf16.msra.mxu0 %v7784_v16  ;;  %5765 = vmatpush1.bf16.msra.mxu1 %v7787_v47  ;;  %v7817_v16 = vld [vmem:[#allocation7 + $0xa08] ss:$16 sps:$4 sm:$0xff]  }
 0x55a   :  { %5680 = vmatprep.subr.bf16.mxu0 %v7792_v56  ;;  %5766 = vmatprep.subr.bf16.mxu1 %v7795_v23  ;;  %v7828_v56 = vld [vmem:[#allocation7 + $0xa44] ss:$16 sps:$4 sm:$0xff]   ;;  %v7831_v23 = vld [vmem:[#allocation7 + $0xa4c] ss:$16 sps:$4 sm:$0xff]  }
 0x55d   :  { %5681 = vmatpush1.bf16.msra.mxu0 %v7790_v57  ;;  %5767 = vmatpush1.bf16.msra.mxu1 %v7793_v10  ;;  %v7826_v57 = vld [vmem:[#allocation7 + $0xa40] ss:$16 sps:$4 sm:$0xff]   ;;  %v7829_v10 = vld [vmem:[#allocation7 + $0xa48] ss:$16 sps:$4 sm:$0xff]  }
 0x55e   :  { %5682 = vmatprep.subr.bf16.mxu0 %v7798_v58  ;;  %5768 = vmatprep.subr.bf16.mxu1 %v7801_v60  ;;  %v7834_v58 = vld [vmem:[#allocation7 + $0xa64] ss:$16 sps:$4 sm:$0xff]   ;;  %v7837_v60 = vld [vmem:[#allocation7 + $0xa6c] ss:$16 sps:$4 sm:$0xff]  }
 0x561   :  { %5683 = vmatpush1.bf16.msra.mxu0 %v7796_v48  ;;  %5769 = vmatpush1.bf16.msra.mxu1 %v7799_v61  ;;  %v7832_v48 = vld [vmem:[#allocation7 + $0xa60] ss:$16 sps:$4 sm:$0xff]   ;;  %v7835_v61 = vld [vmem:[#allocation7 + $0xa68] ss:$16 sps:$4 sm:$0xff]  }
 0x562   :  { %5684 = vmatprep.subr.bf16.mxu0 %v7804_v51  ;;  %5770 = vmatprep.subr.bf16.mxu1 %v7807_v62  ;;  %v7840_v51 = vld [vmem:[#allocation7 + $0xa84] ss:$16 sps:$4 sm:$0xff]   ;;  %v7843_v62 = vld [vmem:[#allocation7 + $0xa8c] ss:$16 sps:$4 sm:$0xff]  }
 0x565   :  { %5685 = vmatpush1.bf16.msra.mxu0 %v7802_v63  ;;  %5771 = vmatpush1.bf16.msra.mxu1 %v7805_v1  ;;  %v7838_v63 = vld [vmem:[#allocation7 + $0xa80] ss:$16 sps:$4 sm:$0xff]   ;;  %v7841_v1 = vld [vmem:[#allocation7 + $0xa88] ss:$16 sps:$4 sm:$0xff]  }
 0x566   :  { %5686 = vmatprep.subr.bf16.mxu0 %v7810_v3  ;;  %5772 = vmatprep.subr.bf16.mxu1 %v7813_v4  ;;  %v7846_v3 = vld [vmem:[#allocation7 + $0xaa4] ss:$16 sps:$4 sm:$0xff]   ;;  %v7849_v4 = vld [vmem:[#allocation7 + $0xaac] ss:$16 sps:$4 sm:$0xff]  }
 0x569   :  { %5687 = vmatpush1.bf16.msra.mxu0 %v7808_v7  ;;  %5773 = vmatpush1.bf16.msra.mxu1 %v7811_v18  ;;  %v7844_v7 = vld [vmem:[#allocation7 + $0xaa0] ss:$16 sps:$4 sm:$0xff]   ;;  %v7847_v18 = vld [vmem:[#allocation7 + $0xaa8] ss:$16 sps:$4 sm:$0xff]  }
 0x56a   :  { %5699 = vmatprep.subr.bf16.mxu0 %v7816_v19  ;;  %5785 = vmatprep.subr.bf16.mxu1 %v7819_v20  ;;  %v7852_v19 = vld [vmem:[#allocation7 + $0xac4] ss:$16 sps:$4 sm:$0xff]   ;;  %v7855_v20 = vld [vmem:[#allocation7 + $0xacc] ss:$16 sps:$4 sm:$0xff]  }
 0x5ff   :  { %v4901_v22 = vpop.f32.mrb[16].mxu0  ;;  %v4987_v25 = vpop.f32.mrb[16].mxu1 }
 0x600   :  { %v4996_v36 = vmax.f32 %v4901_v22, 0.0  ;;  %v4998_v37 = vmax.f32 %v4987_v25, 0.0  ;;  %v4903_v39 = vpop.f32.mrb[17].mxu0  ;;  %v4989_v29 = vpop.f32.mrb[17].mxu1  ;;  %v7850_v22 = vld [vmem:[#allocation7 + $0xac0] ss:$16 sps:$4 sm:$0xff]  }
 0x601   :  { %v4997_v30 = vmax.f32 %v4903_v39, 0.0  ;;  %v4999_v40 = vmax.f32 %v4989_v29, 0.0  ;;  %v4905_v43 = vpop.f32.mrb[18].mxu0  ;;  %v4991_v44 = vpop.f32.mrb[18].mxu1  ;;  %v7853_v25 = vld [vmem:[#allocation7 + $0xac8] ss:$16 sps:$4 sm:$0xff]  }
 0x602   :  { %v5004_v45 = vadd.f32 %v4996_v36, %v8179_v32  ;;  %v5006_v11 = vadd.f32 %v4998_v37, %v8199_v59  ;;  %v5000_v14 = vmax.f32 %v4905_v43, 0.0  ;;  %v5002_v46 = vmax.f32 %v4991_v44, 0.0  ;;  %v4907_v15 = vpop.f32.mrb[19].mxu0  ;;  %v4993_v17 = vpop.f32.mrb[19].mxu1  ;;  %v7858_v36 = vld [vmem:[#allocation7 + $0xae4] ss:$16 sps:$4 sm:$0xff]  }
 0x603   :  { %v5005_v49 = vadd.f32 %v4997_v30, %v8173_v28  ;;  %v5007_v21 = vadd.f32 %v4999_v40, %v8187_v26  ;;  %v5001_v12 = vmax.f32 %v4907_v15, 0.0  ;;  %v5003_v2 = vmax.f32 %v4993_v17, 0.0  ;;  %v7861_v37 = vld [vmem:[#allocation7 + $0xaec] ss:$16 sps:$4 sm:$0xff]   ;;  %v7856_v39 = vld [vmem:[#allocation7 + $0xae0] ss:$16 sps:$4 sm:$0xff]  }
 0x604   :  { %v5008_v13 = vadd.f32 %v5000_v14, %v8170_v27  ;;  %v5010_v6 = vadd.f32 %v5002_v46, %v8196_v53  ;;  %v7822_v27 = vld [vmem:[#allocation7 + $0xa24] ss:$16 sps:$4 sm:$0xff]   ;;  %v7825_v53 = vld [vmem:[#allocation7 + $0xa2c] ss:$16 sps:$4 sm:$0xff]   ;;  %v7859_v29 = vld [vmem:[#allocation7 + $0xae8] ss:$16 sps:$4 sm:$0xff]  }
 0x605   :  { %v6694_v52 = vpack.c.bf16 %v5005_v49, %v5004_v45  ;;  %v6695_v5 = vpack.c.bf16 %v5007_v21, %v5006_v11  ;;  %v5009_v32 = vadd.f32 %v5001_v12, %v8176_v31  ;;  %v5011_v59 = vadd.f32 %v5003_v2, %v8182_v35  ;;  %v7820_v31 = vld [vmem:[#allocation7 + $0xa20] ss:$16 sps:$4 sm:$0xff]   ;;  %v7823_v35 = vld [vmem:[#allocation7 + $0xa28] ss:$16 sps:$4 sm:$0xff]   ;;  %v7864_v30 = vld [vmem:[#allocation7 + $0xb04] ss:$16 sps:$4 sm:$0xff]  }
 0x606   :  { %v5012_v24 = vpack.c.bf16 %v5008_v13, %v5004_v45  ;;  %v8249_v9 = vpack.c.bf16 %v5010_v6, %v5006_v11  ;;  %v7867_v40 = vld [vmem:[#allocation7 + $0xb0c] ss:$16 sps:$4 sm:$0xff]   ;;  %v7862_v43 = vld [vmem:[#allocation7 + $0xb00] ss:$16 sps:$4 sm:$0xff]   ;;  %v7865_v44 = vld [vmem:[#allocation7 + $0xb08] ss:$16 sps:$4 sm:$0xff]  }
 0x607   :  { %5864 = vst [vmem:[#allocation8] sm:$0xff] %v6694_v52  ;;  %5865 = vst [vmem:[#allocation8 + $0x8] sm:$0xff] %v6695_v5  ;;  %v6696_v28 = vpack.c.bf16 %v5009_v32, %v5008_v13  ;;  %v6697_v54 = vpack.c.bf16 %v5011_v59, %v5010_v6  ;;  %v5013_v26 = vpack.c.bf16 %v5009_v32, %v5005_v49  ;;  %v7870_v45 = vld [vmem:[#allocation7 + $0xb24] ss:$16 sps:$4 sm:$0xff]   ;;  %v7873_v11 = vld [vmem:[#allocation7 + $0xb2c] ss:$16 sps:$4 sm:$0xff]  }
 0x608   :  { %v5015_v47 = vpack.c.bf16 %v5011_v59, %v5007_v21  ;;  %v7868_v14 = vld [vmem:[#allocation7 + $0xb20] ss:$16 sps:$4 sm:$0xff]   ;;  %v7871_v46 = vld [vmem:[#allocation7 + $0xb28] ss:$16 sps:$4 sm:$0xff]   ;;  %v7876_v15 = vld [vmem:[#allocation7 + $0xb44] ss:$16 sps:$4 sm:$0xff]  }
 0x609   :  { %5866 = vst [vmem:[#allocation8 + $0x20] sm:$0xff] %v6696_v28  ;;  %5867 = vst [vmem:[#allocation8 + $0x28] sm:$0xff] %v6697_v54  ;;  %5688 = vmatprep.mubr.bf16.mxu0 %v5013_v26  ;;  %5774 = vmatprep.mubr.bf16.mxu1 %v5013_v26  ;;  %v7879_v17 = vld [vmem:[#allocation7 + $0xb4c] ss:$16 sps:$4 sm:$0xff]   ;;  %v7874_v49 = vld [vmem:[#allocation7 + $0xb40] ss:$16 sps:$4 sm:$0xff]  }
 0x60a   :  { %5689 = vmatmul.mubr.bf16.vlgmr.msra.gmra.mrb[20].mxu0 %v5012_v24  ;;  %5775 = vmatmul.mubr.bf16.vlgmr.msra.gmra.mrb[20].mxu1 %v5012_v24  ;;  %v7877_v21 = vld [vmem:[#allocation7 + $0xb48] ss:$16 sps:$4 sm:$0xff]   ;;  %v7882_v12 = vld [vmem:[#allocation7 + $0xb64] ss:$16 sps:$4 sm:$0xff]   ;;  %v7885_v2 = vld [vmem:[#allocation7 + $0xb6c] ss:$16 sps:$4 sm:$0xff]  }
 0x60b   :  { %5700 = vmatpush1.bf16.msra.mxu0 %v7814_v0  ;;  %5786 = vmatpush1.bf16.msra.mxu1 %v7817_v16  ;;  %v7880_v13 = vld [vmem:[#allocation7 + $0xb60] ss:$16 sps:$4 sm:$0xff]   ;;  %v7883_v6 = vld [vmem:[#allocation7 + $0xb68] ss:$16 sps:$4 sm:$0xff]   ;;  %v7888_v52 = vld [vmem:[#allocation7 + $0xb84] ss:$16 sps:$4 sm:$0xff]  }
 0x60c   :  { %5731 = vmatprep.mubr.bf16.mxu0 %v5015_v47  ;;  %5817 = vmatprep.mubr.bf16.mxu1 %v5015_v47  ;;  %v7891_v5 = vld [vmem:[#allocation7 + $0xb8c] ss:$16 sps:$4 sm:$0xff]   ;;  %v7886_v32 = vld [vmem:[#allocation7 + $0xb80] ss:$16 sps:$4 sm:$0xff]   ;;  %v7889_v59 = vld [vmem:[#allocation7 + $0xb88] ss:$16 sps:$4 sm:$0xff]  }
 0x60d   :  { %5701 = vmatprep.subr.bf16.mxu0 %v7822_v27  ;;  %5787 = vmatprep.subr.bf16.mxu1 %v7825_v53  ;;  %v7894_v24 = vld [vmem:[#allocation7 + $0xba4] ss:$16 sps:$4 sm:$0xff]   ;;  %v7897_v28 = vld [vmem:[#allocation7 + $0xbac] ss:$16 sps:$4 sm:$0xff]   ;;  %v7892_v54 = vld [vmem:[#allocation7 + $0xba0] ss:$16 sps:$4 sm:$0xff]  }
 0x60e   :  { %v7895_v26 = vld [vmem:[#allocation7 + $0xba8] ss:$16 sps:$4 sm:$0xff]   ;;  %v7900_v0 = vld [vmem:[#allocation7 + $0xbc4] ss:$16 sps:$4 sm:$0xff]   ;;  %v7903_v16 = vld [vmem:[#allocation7 + $0xbcc] ss:$16 sps:$4 sm:$0xff]  }
 0x60f   :  { %5702 = vmatpush1.bf16.msra.mxu0 %v7820_v31  ;;  %5788 = vmatpush1.bf16.msra.mxu1 %v7823_v35  ;;  %v7898_v47 = vld [vmem:[#allocation7 + $0xbc0] ss:$16 sps:$4 sm:$0xff]   ;;  %v7901_v27 = vld [vmem:[#allocation7 + $0xbc8] ss:$16 sps:$4 sm:$0xff]   ;;  %v7906_v53 = vld [vmem:[#allocation7 + $0xbe4] ss:$16 sps:$4 sm:$0xff]  }
 0x610   :  { %5703 = vmatprep.subr.bf16.mxu0 %v7828_v56  ;;  %5789 = vmatprep.subr.bf16.mxu1 %v7831_v23  ;;  %v7909_v31 = vld [vmem:[#allocation7 + $0xbec] ss:$16 sps:$4 sm:$0xff]   ;;  %v7904_v35 = vld [vmem:[#allocation7 + $0xbe0] ss:$16 sps:$4 sm:$0xff]   ;;  %v7907_v56 = vld [vmem:[#allocation7 + $0xbe8] ss:$16 sps:$4 sm:$0xff]  }
 0x613   :  { %5704 = vmatpush1.bf16.msra.mxu0 %v7826_v57  ;;  %5790 = vmatpush1.bf16.msra.mxu1 %v7829_v10 }
 0x614   :  { %5705 = vmatprep.subr.bf16.mxu0 %v7834_v58  ;;  %5791 = vmatprep.subr.bf16.mxu1 %v7837_v60 }
 0x617   :  { %5706 = vmatpush1.bf16.msra.mxu0 %v7832_v48  ;;  %5792 = vmatpush1.bf16.msra.mxu1 %v7835_v61 }
 0x618   :  { %5707 = vmatprep.subr.bf16.mxu0 %v7840_v51  ;;  %5793 = vmatprep.subr.bf16.mxu1 %v7843_v62 }
 0x61b   :  { %5708 = vmatpush1.bf16.msra.mxu0 %v7838_v63  ;;  %5794 = vmatpush1.bf16.msra.mxu1 %v7841_v1 }
 0x61c   :  { %5709 = vmatprep.subr.bf16.mxu0 %v7846_v3  ;;  %5795 = vmatprep.subr.bf16.mxu1 %v7849_v4 }
 0x61f   :  { %5710 = vmatpush1.bf16.msra.mxu0 %v7844_v7  ;;  %5796 = vmatpush1.bf16.msra.mxu1 %v7847_v18 }
 0x620   :  { %5711 = vmatprep.subr.bf16.mxu0 %v7852_v19  ;;  %5797 = vmatprep.subr.bf16.mxu1 %v7855_v20 }
 0x623   :  { %5712 = vmatpush1.bf16.msra.mxu0 %v7850_v22  ;;  %5798 = vmatpush1.bf16.msra.mxu1 %v7853_v25 }
 0x624   :  { %5713 = vmatprep.subr.bf16.mxu0 %v7858_v36  ;;  %5799 = vmatprep.subr.bf16.mxu1 %v7861_v37 }
 0x627   :  { %5714 = vmatpush1.bf16.msra.mxu0 %v7856_v39  ;;  %5800 = vmatpush1.bf16.msra.mxu1 %v7859_v29 }
 0x628   :  { %5715 = vmatprep.subr.bf16.mxu0 %v7864_v30  ;;  %5801 = vmatprep.subr.bf16.mxu1 %v7867_v40 }
 0x62b   :  { %5716 = vmatpush1.bf16.msra.mxu0 %v7862_v43  ;;  %5802 = vmatpush1.bf16.msra.mxu1 %v7865_v44 }
 0x62c   :  { %5717 = vmatprep.subr.bf16.mxu0 %v7870_v45  ;;  %5803 = vmatprep.subr.bf16.mxu1 %v7873_v11 }
 0x62f   :  { %5718 = vmatpush1.bf16.msra.mxu0 %v7868_v14  ;;  %5804 = vmatpush1.bf16.msra.mxu1 %v7871_v46 }
 0x630   :  { %5719 = vmatprep.subr.bf16.mxu0 %v7876_v15  ;;  %5805 = vmatprep.subr.bf16.mxu1 %v7879_v17 }
 0x633   :  { %5720 = vmatpush1.bf16.msra.mxu0 %v7874_v49  ;;  %5806 = vmatpush1.bf16.msra.mxu1 %v7877_v21 }
 0x634   :  { %5721 = vmatprep.subr.bf16.mxu0 %v7882_v12  ;;  %5807 = vmatprep.subr.bf16.mxu1 %v7885_v2 }
 0x637   :  { %5722 = vmatpush1.bf16.msra.mxu0 %v7880_v13  ;;  %5808 = vmatpush1.bf16.msra.mxu1 %v7883_v6 }
 0x638   :  { %5723 = vmatprep.subr.bf16.mxu0 %v7888_v52  ;;  %5809 = vmatprep.subr.bf16.mxu1 %v7891_v5 }
 0x63b   :  { %5724 = vmatpush1.bf16.msra.mxu0 %v7886_v32  ;;  %5810 = vmatpush1.bf16.msra.mxu1 %v7889_v59 }
 0x63c   :  { %5725 = vmatprep.subr.bf16.mxu0 %v7894_v24  ;;  %5811 = vmatprep.subr.bf16.mxu1 %v7897_v28 }
 0x63f   :  { %5726 = vmatpush1.bf16.msra.mxu0 %v7892_v54  ;;  %5812 = vmatpush1.bf16.msra.mxu1 %v7895_v26 }
 0x640   :  { %5727 = vmatprep.subr.bf16.mxu0 %v7900_v0  ;;  %5813 = vmatprep.subr.bf16.mxu1 %v7903_v16 }
 0x643   :  { %5728 = vmatpush1.bf16.msra.mxu0 %v7898_v47  ;;  %5814 = vmatpush1.bf16.msra.mxu1 %v7901_v27 }
 0x644   :  { %5729 = vmatprep.subr.bf16.mxu0 %v7906_v53  ;;  %5815 = vmatprep.subr.bf16.mxu1 %v7909_v31 }
 0x647   :  { %5730 = vmatpush1.bf16.msra.mxu0 %v7904_v35  ;;  %5816 = vmatpush1.bf16.msra.mxu1 %v7907_v56 }
 0x64a   :  { %5732 = vmatmul.mubr.bf16.vlgmr.msra.gmra.mrb[20].mxu0 %v8249_v9  ;;  %5818 = vmatmul.mubr.bf16.vlgmr.msra.gmra.mrb[20].mxu1 %v8249_v9 }
 0x71d   :  { %v5733_v23 = vpop.f32.mrb[20].mxu0  ;;  %v5819_v57 = vpop.f32.mrb[20].mxu1 }
 0x71e   :  { %v5828_v10 = vmax.f32 %v5733_v23, 0.0  ;;  %v5830_v58 = vmax.f32 %v5819_v57, 0.0  ;;  %v5735_v60 = vpop.f32.mrb[21].mxu0  ;;  %v5821_v48 = vpop.f32.mrb[21].mxu1 }
 0x71f   :  { %v5829_v61 = vmax.f32 %v5735_v60, 0.0  ;;  %v5831_v51 = vmax.f32 %v5821_v48, 0.0  ;;  %v5737_v62 = vpop.f32.mrb[22].mxu0  ;;  %v5823_v63 = vpop.f32.mrb[22].mxu1 }
 0x720   :  { %v5836_v1 = vadd.f32 %v5828_v10, %v8217_v38  ;;  %v5838_v3 = vadd.f32 %v5830_v58, %v8237_v50  ;;  %v5832_v4 = vmax.f32 %v5737_v62, 0.0  ;;  %v5834_v7 = vmax.f32 %v5823_v63, 0.0  ;;  %v5739_v18 = vpop.f32.mrb[23].mxu0  ;;  %v5825_v19 = vpop.f32.mrb[23].mxu1 }
 0x721   :  { %v5837_v9 = vadd.f32 %v5829_v61, %v8211_v34  ;;  %v5839_v20 = vadd.f32 %v5831_v51, %v8225_v8  ;;  %v5833_v22 = vmax.f32 %v5739_v18, 0.0  ;;  %v5835_v25 = vmax.f32 %v5825_v19, 0.0 }
 0x722   :  { %v5840_v36 = vadd.f32 %v5832_v4, %v8208_v33  ;;  %v5842_v37 = vadd.f32 %v5834_v7, %v8234_v55 }
 0x723   :  { %v6698_v39 = vpack.c.bf16 %v5837_v9, %v5836_v1  ;;  %v6699_v38 = vpack.c.bf16 %v5839_v20, %v5838_v3  ;;  %v5841_v50 = vadd.f32 %v5833_v22, %v8214_v41  ;;  %v5843_v29 = vadd.f32 %v5835_v25, %v8220_v42 }
 0x725   :  { %5892 = vst [vmem:[#allocation8 + $0x10] sm:$0xff] %v6698_v39  ;;  %5893 = vst [vmem:[#allocation8 + $0x18] sm:$0xff] %v6699_v38  ;;  %v6700_v30 = vpack.c.bf16 %v5841_v50, %v5840_v36  ;;  %v6701_v34 = vpack.c.bf16 %v5843_v29, %v5842_v37 }
 0x727   :  { %5894 = vst [vmem:[#allocation8 + $0x30] sm:$0xff] %v6700_v30  ;;  %5895 = vst [vmem:[#allocation8 + $0x38] sm:$0xff] %v6701_v34 }
 0x728   :  { %7991 = shalt.err (!%p7988_p0)
}
 0x729   :  { %s7992_s27 = scalar_lea.hbm %s8279_s3, 1024 }
 0x72a   :  { %p7993_p1 = scmp.ne.s32.totalorder %s8279_s3, %s7992_s27  ;;  %p7996_p2 = scmp.lt.u32.totalorder %s7992_s27, %s8279_s3 }
 0x72c   :  { %p7998_p3 = pnand %p7996_p2, %p7993_p1 }
 0x72e   :  { %8001 = shalt.err (!%p7998_p3)
}
 0x72f   :  { %5907 = dma.vmem_to_hbm [thread:$0]  %s5902_s22, 1024, %s8279_s3, [#allocation4], %s8012_s1, %s8012_s1, %s8013_s9  }
 0x730   :  { %8006 = dma.done.wait [#allocation4], 1024  }
 0x731   :  { %8007 = vsyncadd [#allocation4], 4294966272 }
 0x732   :  { %5911 = vsyncpa [#allocation3], 1 }
 0x733   :  { %5912 = vsyncpa [#allocation6], 1 }
 0x734   :  { %5913 = vsyncpa [#allocation4], 1 }

</bundles_post_ra>
